<compile_context>
chip_gen: v7x
topology: tpu7x:2x2x1
jax: 0.10.0
libtpu: 0.0.40
codegen_flags: <defaults>
</compile_context>

<pallas_src>
import functools

import numpy as np
import jax
import jax.numpy as jnp
from jax.experimental import pallas as pl
from jax.experimental.pallas import tpu as pltpu

_LANE = 128
_KMAP = ((3, 1), (2, 0))  # ConvTranspose2d(K=4,s=2,p=1): (phase, tap) -> kernel idx


def _rup(n, m=_LANE):
    return ((n + m - 1) // m) * m


# ----------------------------------------------------------------------------
# Per-generation VMEM sizing
# ----------------------------------------------------------------------------
def _chip_vmem_bytes():
    try:
        info = pltpu.get_tpu_info()
        cap = getattr(info, "vmem_capacity_bytes", None)
        if cap:
            return int(cap)
    except Exception:
        pass
    return 64 * 1024 * 1024              # unknown -> assume the small (v7x) VMEM


def _vmem_limits():
    cap = _chip_vmem_bytes()
    if cap <= 64 * 1024 * 1024:          # v7x: 64 MiB physical per TensorCore
        limit = 44 * 1024 * 1024
    else:                                # v5e / v6e: 128 MiB physical
        limit = 100 * 1024 * 1024
    return limit, (limit * 3) // 4       # (compiler limit, block-sizing budget)


# ----------------------------------------------------------------------------
# One-time weight prepacking (hoisted out of the jitted forward)
# ----------------------------------------------------------------------------
def _pack_proj_weight(w):
    """(nz, cout, 4, 4) ConvTranspose2d weight -> (cin_p, 16*cout_p) bf16."""
    cin, cout = w.shape[0], w.shape[1]
    cin_p, cout_p = _rup(cin), _rup(cout)
    wt = jnp.transpose(w, (0, 2, 3, 1))                       # (cin, ky, kx, cout)
    wt = jnp.pad(wt, ((0, cin_p - cin), (0, 0), (0, 0), (0, cout_p - cout)))
    return wt.reshape(cin_p, 16 * cout_p).astype(jnp.bfloat16)


def _pack_phase_weight(w):
    """(cin, cout, 4, 4) weight -> (4, 4*cin_p, cout_p) bf16, phase-major
    (py,px), K-concatenated over the 4 (ty,tx) taps."""
    cin, cout = w.shape[0], w.shape[1]
    cin_p, cout_p = _rup(cin), _rup(cout)
    wt = jnp.transpose(w, (2, 3, 0, 1))                       # (ky, kx, cin, cout)
    wt = jnp.pad(wt, ((0, 0), (0, 0), (0, cin_p - cin), (0, cout_p - cout)))
    phases = []
    for py in range(2):
        for px in range(2):
            taps = [wt[_KMAP[py][ty], _KMAP[px][tx]]
                    for ty in range(2) for tx in range(2)]
            phases.append(jnp.concatenate(taps, axis=0))      # (4*cin_p, cout_p)
    return jnp.stack(phases, axis=0).astype(jnp.bfloat16)


def prepack_weights(weights):
    w0, w1, w2, w3 = weights
    return {"w0": _pack_proj_weight(w0),
            "w1": _pack_phase_weight(w1),
            "w2": _pack_phase_weight(w2),
            "w3": _pack_phase_weight(w3)}


# ----------------------------------------------------------------------------
# BatchNorm stat combination (tiny O(C) math in XLA)
# ----------------------------------------------------------------------------
def _bn_scale_shift(s1, s2, count):
    # TODO(synk): running_mean/running_var momentum updates (training-mode side
    # effects, not part of the returned output) are not modeled.
    tot = jnp.sum(s1, axis=(0, 1))
    totsq = jnp.sum(s2, axis=(0, 1))
    mean = tot / count
    var = jnp.maximum(totsq / count - mean * mean, 0.0)       # clamp cancellation
    inv = jax.lax.rsqrt(var + 1e-5)
    c = mean.shape[0]
    return inv.reshape(1, 1, 1, c), (-mean * inv).reshape(1, 1, 1, c)


# ----------------------------------------------------------------------------
# Layer 1: ConvTranspose2d(nz, C, 4, 1, 0) on a 1x1 input == one matmul.
# Gridded over batch blocks; emits pre-BN bf16 output + per-block stats.
# ----------------------------------------------------------------------------
def input_projection(x2d, wpk, vmem_limit, budget):
    n, cin = x2d.shape
    cin_p = wpk.shape[0]
    cout16 = wpk.shape[1]
    cout_p = cout16 // 16

    xb = jnp.pad(x2d, ((0, 0), (0, cin_p - cin))).astype(jnp.bfloat16)
    xb = xb.reshape(n, 1, cin_p)

    cap = min(256, n // 2) if n >= 2 else 1
    cap = max(cap, 1)

    def est(nb):
        return (2 * nb * cin_p * 2 + 2 * cin_p * cout16 * 2
                + 3 * nb * 16 * cout_p * 4 + 2 * nb * 16 * cout_p * 2)

    nb = 1
    for cand in range(1, cap + 1):
        if n % cand == 0 and est(cand) <= budget:
            nb = cand
    n_blk = n // nb

    def kernel(x_ref, w_ref, y_ref, s1_ref, s2_ref):
        y = jnp.dot(x_ref[...].reshape(nb, cin_p), w_ref[...],
                    preferred_element_type=jnp.float32)       # (nb, 16*cout_p)
        yr = y.reshape(nb * 16, cout_p)                        # per-channel stats
        s1_ref[0] = jnp.sum(yr, axis=0, keepdims=True)
        s2_ref[0] = jnp.sum(yr * yr, axis=0, keepdims=True)
        y_ref[...] = y.reshape(nb, 16, cout_p).astype(y_ref.dtype)

    y, s1, s2 = pl.pallas_call(
        kernel,
        grid=(n_blk,),
        out_shape=(jax.ShapeDtypeStruct((n, 16, cout_p), jnp.bfloat16),
                   jax.ShapeDtypeStruct((n_blk, 1, cout_p), jnp.float32),
                   jax.ShapeDtypeStruct((n_blk, 1, cout_p), jnp.float32)),
        in_specs=[pl.BlockSpec((nb, 1, cin_p), lambda b: (b, 0, 0)),
                  pl.BlockSpec((cin_p, cout16), lambda b: (0, 0))],
        out_specs=(pl.BlockSpec((nb, 16, cout_p), lambda b: (b, 0, 0)),
                   pl.BlockSpec((1, 1, cout_p), lambda b: (b, 0, 0)),
                   pl.BlockSpec((1, 1, cout_p), lambda b: (b, 0, 0))),
        compiler_params=pltpu.CompilerParams(
            dimension_semantics=("parallel",),
            vmem_limit_bytes=vmem_limit),
    )(xb, wpk)
    return y.reshape(n, 4, 4, cout_p), s1, s2


# ----------------------------------------------------------------------------
# Stride-2 ConvTranspose2d(K=4, s=2, p=1) via sub-pixel (phase) decomposition,
# with the previous layer's BatchNorm scale/shift + ReLU fused onto the load.
# ----------------------------------------------------------------------------
def _make_deconv_kernel(nb, h, w, cin_p, cout_p, nc, use_bn_out):
    m = nb * h * w

    def kernel(x_ref, sc_ref, sh_ref, w_ref, y_ref, *rest):
        if use_bn_out:
            s1_ref, s2_ref, xh = rest
        else:
            (xh,) = rest

        # previous layer's BN (global scale/shift) + ReLU, fused on load;
        # 1-px halo built in VMEM scratch (border stays zero).
        xh[...] = jnp.zeros_like(xh)
        xn = jnp.maximum(
            x_ref[...].astype(jnp.float32) * sc_ref[...] + sh_ref[...], 0.0)
        xh[:, 1:1 + h, 1:1 + w, :] = xn.astype(xh.dtype)

        # 9 distinct shifted slabs, hoisted & reused by all 4 phases.
        slab = [[xh[:, dy:dy + h, dx:dx + w, :].reshape(m, cin_p)
                 for dx in range(3)] for dy in range(3)]

        if use_bn_out:
            s1 = jnp.zeros((1, cout_p), jnp.float32)
            s2 = jnp.zeros((1, cout_p), jnp.float32)

        for py in range(2):
            for px in range(2):
                # K-concat of the 4 taps -> one MXU matmul per phase
                xs = jnp.concatenate(
                    [slab[py + ty][px + tx] for ty in range(2) for tx in range(2)],
                    axis=1)                                   # (m, 4*cin_p)
                acc = jnp.dot(xs, w_ref[py * 2 + px],
                              preferred_element_type=jnp.float32)  # (m, cout_p)
                if use_bn_out:
                    s1 = s1 + jnp.sum(acc, axis=0, keepdims=True)
                    s2 = s2 + jnp.sum(acc * acc, axis=0, keepdims=True)
                    y_ref[:, py, :, px * cout_p:(px + 1) * cout_p] = (
                        acc.reshape(nb * h, w, cout_p).astype(y_ref.dtype))
                else:
                    t = jnp.tanh(acc[:, :nc])                 # only real channels
                    y_ref[py, px, :, :, :] = (
                        t.reshape(nb * h, w, nc).astype(y_ref.dtype))

        if use_bn_out:
            s1_ref[0] = s1
            s2_ref[0] = s2

    return kernel


def _pick_deconv_nb(n, h, w, cin_p, cout_p, out_ch, out_bytes, m_target, budget):
    """Largest batch block (a divisor of n, <= n//2 so the 'parallel' grid axis
    has >= 2 steps for v7x's two TensorCores) whose estimated VMEM live set fits
    the budget and whose matmul M dim stays near m_target."""
    def est(nb):
        m = nb * h * w
        return (2 * nb * h * w * cin_p * 2                 # x block, dbuf, bf16
                + nb * (h + 2) * (w + 2) * cin_p * 2       # halo scratch
                + 9 * m * cin_p * 2                        # hoisted slabs
                + m * 4 * cin_p * 2                        # per-phase K-concat
                + 2 * m * cout_p * 4                       # f32 acc (+headroom)
                + 2 * 16 * cin_p * cout_p * 2              # phase weights, dbuf
                + 2 * nb * h * 2 * w * 2 * out_ch * out_bytes)  # y block, dbuf

    cap = n // 2 if n >= 2 else 1
    m_cap = max(m_target, h * w)
    best = 1
    for nb in range(1, cap + 1):
        if n % nb == 0 and nb * h * w <= m_cap and est(nb) <= budget:
            best = nb
    return best


def _deconv_s2(x, scale, shift, wpk, nc, use_bn_out, m_target, vmem_limit, budget):
    """One ConvTranspose2d(K=4,s=2,p=1) layer.  The input x is the *pre-BN*
    output of the previous layer; (scale, shift) are that layer's global BN
    parameters, applied (with ReLU) inside this kernel right after the load.

    use_bn_out=True : emit pre-BN bf16 NHWC output + per-block (sum, sumsq).
    use_bn_out=False: emit tanh(output) for the nc real channels only (f32).
    """
    n, h, w, cin_p = x.shape
    cout_p = wpk.shape[2]
    assert wpk.shape[1] == 4 * cin_p

    out_ch = cout_p if use_bn_out else nc
    out_dtype = jnp.bfloat16 if use_bn_out else jnp.float32
    out_bytes = 2 if use_bn_out else 4

    nb = _pick_deconv_nb(n, h, w, cin_p, cout_p, out_ch, out_bytes,
                         m_target, budget)
    n_blk = n // nb

    kern = _make_deconv_kernel(nb, h, w, cin_p, cout_p, nc, use_bn_out)

    if use_bn_out:
        # (nb*h, 2, w, 2*cout_p) row-major-flattens exactly to NHWC (nb,2h,2w,C)
        out_shape = (jax.ShapeDtypeStruct((n * h, 2, w, 2 * cout_p), out_dtype),
                     jax.ShapeDtypeStruct((n_blk, 1, cout_p), jnp.float32),
                     jax.ShapeDtypeStruct((n_blk, 1, cout_p), jnp.float32))
        out_specs = (pl.BlockSpec((nb * h, 2, w, 2 * cout_p),
                                  lambda b: (b, 0, 0, 0)),
                     pl.BlockSpec((1, 1, cout_p), lambda b: (b, 0, 0)),
                     pl.BlockSpec((1, 1, cout_p), lambda b: (b, 0, 0)))
    else:
        # phase-separated layout, only nc real channels
        out_shape = (jax.ShapeDtypeStruct((2, 2, n * h, w, nc), out_dtype),)
        out_specs = (pl.BlockSpec((2, 2, nb * h, w, nc),
                                  lambda b: (0, 0, b, 0, 0)),)

    res = pl.pallas_call(
        kern,
        grid=(n_blk,),
        out_shape=out_shape,
        in_specs=[pl.BlockSpec((nb, h, w, cin_p), lambda b: (b, 0, 0, 0)),
                  pl.BlockSpec((1, 1, 1, cin_p), lambda b: (0, 0, 0, 0)),
                  pl.BlockSpec((1, 1, 1, cin_p), lambda b: (0, 0, 0, 0)),
                  pl.BlockSpec((4, 4 * cin_p, cout_p), lambda b: (0, 0, 0))],
        out_specs=out_specs,
        scratch_shapes=[pltpu.VMEM((nb, h + 2, w + 2, cin_p), jnp.bfloat16)],
        compiler_params=pltpu.CompilerParams(
            dimension_semantics=("parallel",),
            vmem_limit_bytes=vmem_limit),
    )(x, scale, shift, wpk)

    if use_bn_out:
        return res[0].reshape(n, 2 * h, 2 * w, cout_p), res[1], res[2]

    yr = res[0].reshape(2, 2, n, h, w, nc)                    # (py,px,n,j,i,c)
    y = jnp.transpose(yr, (2, 3, 0, 4, 1, 5)).reshape(n, 2 * h, 2 * w, nc)
    return y, None, None


# ----------------------------------------------------------------------------
# dcganGenerator forward
# ----------------------------------------------------------------------------
def init_params(key, nc=3, nz=128, ngf=64):
    chans = [nz, ngf * 8, ngf * 4, ngf * 2, nc]
    keys = jax.random.split(key, 4)
    return [0.05 * jax.random.normal(keys[i], (chans[i], chans[i + 1], 4, 4),
                                     jnp.float32)
            for i in range(4)]


@functools.partial(jax.jit, static_argnames=("nc", "m_target"))
def dcgan_generator_forward(x_nchw, packed, *, nc=3, m_target=1024):
    n = x_nchw.shape[0]
    vmem_limit, budget = _vmem_limits()

    # layer 1: 1x1-input deconv == one matmul; pre-BN bf16 output + stats
    y, s1, s2 = input_projection(x_nchw.reshape(n, -1), packed["w0"],
                                 vmem_limit, budget)
    sc, sh = _bn_scale_shift(s1, s2, float(n * 16))

    # layers 2-3: stride-2 deconv; previous BN+ReLU fused on load, own stats out
    y, s1, s2 = _deconv_s2(y, sc, sh, packed["w1"], nc, True,
                           m_target, vmem_limit, budget)
    sc, sh = _bn_scale_shift(s1, s2, float(n * 8 * 8))
    y, s1, s2 = _deconv_s2(y, sc, sh, packed["w2"], nc, True,
                           m_target, vmem_limit, budget)
    sc, sh = _bn_scale_shift(s1, s2, float(n * 16 * 16))

    # layer 4: stride-2 deconv + tanh, only nc real channels emitted
    y, _, _ = _deconv_s2(y, sc, sh, packed["w3"], nc, False,
                         m_target, vmem_limit, budget)        # (n, 32, 32, nc)
    return jnp.transpose(y, (0, 3, 1, 2))                     # NHWC -> NCHW


# ----------------------------------------------------------------------------
# numpy reference (direct scatter-add definition of ConvTranspose2d)
# ----------------------------------------------------------------------------
_LAYER_CFG = [  # (stride, padding, batchnorm, activation)
    (1, 0, True, "relu"),
    (2, 1, True, "relu"),
    (2, 1, True, "relu"),
    (2, 1, False, "tanh"),
]


def _conv_transpose_np(x, w, s, p):
    N, Cin, H, W = x.shape
    _, Cout, K, _ = w.shape
    Hf, Wf = (H - 1) * s + K, (W - 1) * s + K
    full = np.zeros((N, Cout, Hf, Wf), dtype=np.float64)
    for iy in range(H):
        for ix in range(W):
            full[:, :, iy * s:iy * s + K, ix * s:ix * s + K] += np.einsum(
                "nc,cokl->nokl", x[:, :, iy, ix], w)
    Hout, Wout = Hf - 2 * p, Wf - 2 * p
    return full[:, :, p:p + Hout, p:p + Wout]


def ref_forward(x_nchw, weights):
    y = np.asarray(x_nchw, dtype=np.float64)
    for w, (s, p, bn, act) in zip(weights, _LAYER_CFG):
        y = _conv_transpose_np(y, np.asarray(w, np.float64), s, p)
        if bn:
            mean = y.mean(axis=(0, 2, 3), keepdims=True)
            var = y.var(axis=(0, 2, 3), keepdims=True)        # biased, as PyTorch
            y = (y - mean) / np.sqrt(var + 1e-5)
        y = np.maximum(y, 0.0) if act == "relu" else np.tanh(y)
    return y


if __name__ == "__main__":
    # Small-but-consistent config: nc=3, nz=32, ngf=8 => 1x1 -> 4 -> 8 -> 16 -> 32
    nc, nz, ngf = 3, 32, 8
    key = jax.random.PRNGKey(0)
    k_x, k_w, k_x2 = jax.random.split(key, 3)

    weights = init_params(k_w, nc=nc, nz=nz, ngf=ngf)
    packed = prepack_weights(weights)                         # one-time prepack
    np_weights = [np.asarray(w) for w in weights]

    # config 1: batch=2 (every layer still runs >= 2 grid steps)
    x = jax.random.normal(k_x, (2, nz, 1, 1), jnp.float32)
    out = jax.block_until_ready(dcgan_generator_forward(x, packed, nc=nc))
    assert out.shape == (2, nc, 32, 32), out.shape
    ref = ref_forward(np.asarray(x), np_weights)
    np.testing.assert_allclose(np.asarray(out), ref, rtol=4e-2, atol=4e-2)

    # config 2: batch=4 with a tiny M target so every layer uses multiple
    # batch blocks -> exercises the multi-block BN partial-stat combination.
    x2 = jax.random.normal(k_x2, (4, nz, 1, 1), jnp.float32)
    out2 = jax.block_until_ready(
        dcgan_generator_forward(x2, packed, nc=nc, m_target=64))
    assert out2.shape == (4, nc, 32, 32), out2.shape
    ref2 = ref_forward(np.asarray(x2), np_weights)
    np.testing.assert_allclose(np.asarray(out2), ref2, rtol=4e-2, atol=4e-2)

    print("KERNEL_OK")
</pallas_src>

<mosaic_0001>
module attributes {stable_mosaic.version = 11 : i64} {
  func.func @kernel(%arg0: i32, %arg1: memref<1x4x4x128xbf16, #tpu.memory_space<vmem>>, %arg2: memref<1x1x1x128xf32, #tpu.memory_space<vmem>>, %arg3: memref<1x1x1x128xf32, #tpu.memory_space<vmem>>, %arg4: memref<4x512x128xbf16, #tpu.memory_space<vmem>>, %arg5: memref<4x2x4x256xbf16, #tpu.memory_space<vmem>>, %arg6: memref<1x1x128xf32, #tpu.memory_space<vmem>>, %arg7: memref<1x1x128xf32, #tpu.memory_space<vmem>>, %arg8: memref<1x6x6x128xbf16, #tpu.memory_space<vmem>>) attributes {dimension_semantics = [#tpu.dimension_semantics<parallel>], iteration_bounds = array<i64: 2>, scalar_prefetch = 0 : i64, scratch_operands = 1 : i64, tpu.core_type = #tpu.core_type<tc>, window_params = [{transform_indices = @transform_0, window_bounds = array<i64: 1, 4, 4, 128>}, {pipeline_mode = #tpu.pipeline_mode<synchronous>, transform_indices = @transform_1, window_bounds = array<i64: 1, 1, 1, 128>}, {pipeline_mode = #tpu.pipeline_mode<synchronous>, transform_indices = @transform_2, window_bounds = array<i64: 1, 1, 1, 128>}, {pipeline_mode = #tpu.pipeline_mode<synchronous>, transform_indices = @transform_3, window_bounds = array<i64: 4, 512, 128>}, {transform_indices = @transform_4, window_bounds = array<i64: 4, 2, 4, 256>}, {transform_indices = @transform_5, window_bounds = array<i64: 1, 1, 128>}, {transform_indices = @transform_6, window_bounds = array<i64: 1, 1, 128>}]} {
    %cst = arith.constant 0.000000e+00 : bf16
    %0 = vector.broadcast %cst : bf16 to vector<1x6x6x128xbf16>
    %c0 = arith.constant 0 : index
    %c0_0 = arith.constant 0 : index
    %c0_1 = arith.constant 0 : index
    %c0_2 = arith.constant 0 : index
    %1 = vector.load %arg8[%c0, %c0_0, %c0_1, %c0_2] : memref<1x6x6x128xbf16, #tpu.memory_space<vmem>>, vector<1x6x6x128xbf16>
    tpu.vector_store %arg8[%c0, %c0_0, %c0_1, %c0_2], %0 {strides = array<i32>} : memref<1x6x6x128xbf16, #tpu.memory_space<vmem>>, vector<1x6x6x128xbf16>,
    %c0_3 = arith.constant 0 : index
    %c0_4 = arith.constant 0 : index
    %c0_5 = arith.constant 0 : index
    %c0_6 = arith.constant 0 : index
    %2 = vector.load %arg1[%c0_3, %c0_4, %c0_5, %c0_6] : memref<1x4x4x128xbf16, #tpu.memory_space<vmem>>, vector<1x4x4x128xbf16>
    %3 = arith.extf %2 : vector<1x4x4x128xbf16> to vector<1x4x4x128xf32>
    %c0_7 = arith.constant 0 : index
    %c0_8 = arith.constant 0 : index
    %c0_9 = arith.constant 0 : index
    %c0_10 = arith.constant 0 : index
    %4 = vector.load %arg2[%c0_7, %c0_8, %c0_9, %c0_10] : memref<1x1x1x128xf32, #tpu.memory_space<vmem>>, vector<1x1x1x128xf32>
    %5 = vector.broadcast %4 : vector<1x1x1x128xf32> to vector<1x4x4x128xf32>
    %6 = arith.mulf %3, %5 : vector<1x4x4x128xf32>
    %c0_11 = arith.constant 0 : index
    %c0_12 = arith.constant 0 : index
    %c0_13 = arith.constant 0 : index
    %c0_14 = arith.constant 0 : index
    %7 = vector.load %arg3[%c0_11, %c0_12, %c0_13, %c0_14] : memref<1x1x1x128xf32, #tpu.memory_space<vmem>>, vector<1x1x1x128xf32>
    %8 = vector.broadcast %7 : vector<1x1x1x128xf32> to vector<1x4x4x128xf32>
    %9 = arith.addf %6, %8 : vector<1x4x4x128xf32>
    %cst_15 = arith.constant 0.000000e+00 : f32
    %10 = vector.broadcast %cst_15 : f32 to vector<1x4x4x128xf32>
    %11 = arith.maximumf %9, %10 : vector<1x4x4x128xf32>
    %12 = arith.truncf %11 : vector<1x4x4x128xf32> to vector<1x4x4x128xbf16>
    %c0_16 = arith.constant 0 : index
    %c1 = arith.constant 1 : index
    %c1_17 = arith.constant 1 : index
    %c0_18 = arith.constant 0 : index
    %13 = vector.load %arg8[%c0_16, %c1, %c1_17, %c0_18] : memref<1x6x6x128xbf16, #tpu.memory_space<vmem>>, vector<1x4x4x128xbf16>
    tpu.vector_store %arg8[%c0_16, %c1, %c1_17, %c0_18], %12 {strides = array<i32>} : memref<1x6x6x128xbf16, #tpu.memory_space<vmem>>, vector<1x4x4x128xbf16>,
    %c0_19 = arith.constant 0 : index
    %c0_20 = arith.constant 0 : index
    %c0_21 = arith.constant 0 : index
    %c0_22 = arith.constant 0 : index
    %14 = vector.load %arg8[%c0_19, %c0_20, %c0_21, %c0_22] : memref<1x6x6x128xbf16, #tpu.memory_space<vmem>>, vector<1x4x4x128xbf16>
    %15 = vector.shape_cast %14 : vector<1x4x4x128xbf16> to vector<16x128xbf16>
    %c0_23 = arith.constant 0 : index
    %c0_24 = arith.constant 0 : index
    %c1_25 = arith.constant 1 : index
    %c0_26 = arith.constant 0 : index
    %16 = vector.load %arg8[%c0_23, %c0_24, %c1_25, %c0_26] : memref<1x6x6x128xbf16, #tpu.memory_space<vmem>>, vector<1x4x4x128xbf16>
    %17 = vector.shape_cast %16 : vector<1x4x4x128xbf16> to vector<16x128xbf16>
    %c0_27 = arith.constant 0 : index
    %c0_28 = arith.constant 0 : index
    %c2 = arith.constant 2 : index
    %c0_29 = arith.constant 0 : index
    %18 = vector.load %arg8[%c0_27, %c0_28, %c2, %c0_29] : memref<1x6x6x128xbf16, #tpu.memory_space<vmem>>, vector<1x4x4x128xbf16>
    %19 = vector.shape_cast %18 : vector<1x4x4x128xbf16> to vector<16x128xbf16>
    %c0_30 = arith.constant 0 : index
    %c1_31 = arith.constant 1 : index
    %c0_32 = arith.constant 0 : index
    %c0_33 = arith.constant 0 : index
    %20 = vector.load %arg8[%c0_30, %c1_31, %c0_32, %c0_33] : memref<1x6x6x128xbf16, #tpu.memory_space<vmem>>, vector<1x4x4x128xbf16>
    %21 = vector.shape_cast %20 : vector<1x4x4x128xbf16> to vector<16x128xbf16>
    %c0_34 = arith.constant 0 : index
    %c1_35 = arith.constant 1 : index
    %c1_36 = arith.constant 1 : index
    %c0_37 = arith.constant 0 : index
    %22 = vector.load %arg8[%c0_34, %c1_35, %c1_36, %c0_37] : memref<1x6x6x128xbf16, #tpu.memory_space<vmem>>, vector<1x4x4x128xbf16>
    %23 = vector.shape_cast %22 : vector<1x4x4x128xbf16> to vector<16x128xbf16>
    %c0_38 = arith.constant 0 : index
    %c1_39 = arith.constant 1 : index
    %c2_40 = arith.constant 2 : index
    %c0_41 = arith.constant 0 : index
    %24 = vector.load %arg8[%c0_38, %c1_39, %c2_40, %c0_41] : memref<1x6x6x128xbf16, #tpu.memory_space<vmem>>, vector<1x4x4x128xbf16>
    %25 = vector.shape_cast %24 : vector<1x4x4x128xbf16> to vector<16x128xbf16>
    %c0_42 = arith.constant 0 : index
    %c2_43 = arith.constant 2 : index
    %c0_44 = arith.constant 0 : index
    %c0_45 = arith.constant 0 : index
    %26 = vector.load %arg8[%c0_42, %c2_43, %c0_44, %c0_45] : memref<1x6x6x128xbf16, #tpu.memory_space<vmem>>, vector<1x4x4x128xbf16>
    %27 = vector.shape_cast %26 : vector<1x4x4x128xbf16> to vector<16x128xbf16>
    %c0_46 = arith.constant 0 : index
    %c2_47 = arith.constant 2 : index
    %c1_48 = arith.constant 1 : index
    %c0_49 = arith.constant 0 : index
    %28 = vector.load %arg8[%c0_46, %c2_47, %c1_48, %c0_49] : memref<1x6x6x128xbf16, #tpu.memory_space<vmem>>, vector<1x4x4x128xbf16>
    %29 = vector.shape_cast %28 : vector<1x4x4x128xbf16> to vector<16x128xbf16>
    %c0_50 = arith.constant 0 : index
    %c2_51 = arith.constant 2 : index
    %c2_52 = arith.constant 2 : index
    %c0_53 = arith.constant 0 : index
    %30 = vector.load %arg8[%c0_50, %c2_51, %c2_52, %c0_53] : memref<1x6x6x128xbf16, #tpu.memory_space<vmem>>, vector<1x4x4x128xbf16>
    %31 = vector.shape_cast %30 : vector<1x4x4x128xbf16> to vector<16x128xbf16>
    %cst_54 = arith.constant 0.000000e+00 : f32
    %32 = vector.broadcast %cst_54 : f32 to vector<1x128xf32>
    %cst_55 = arith.constant 0.000000e+00 : f32
    %33 = vector.broadcast %cst_55 : f32 to vector<1x128xf32>
    %34 = tpu.concatenate %15, %17, %21, %23 in 1 : vector<16x128xbf16>, vector<16x128xbf16>, vector<16x128xbf16>, vector<16x128xbf16> -> vector<16x512xbf16>
    %c0_56 = arith.constant 0 : index
    %c0_57 = arith.constant 0 : index
    %c0_58 = arith.constant 0 : index
    %35 = vector.load %arg4[%c0_56, %c0_57, %c0_58] : memref<4x512x128xbf16, #tpu.memory_space<vmem>>, vector<1x512x128xbf16>
    %36 = vector.shape_cast %35 : vector<1x512x128xbf16> to vector<512x128xbf16>
    %cst_59 = arith.constant dense<0.000000e+00> : vector<16x128xf32>
    %37 = tpu.matmul %34, %36, %cst_59 {dimension_numbers = #tpu.dot_dimension_numbers<[1], [0], [0], [1], [0, 0, 1, 1], [], []>} : vector<16x512xbf16>, vector<512x128xbf16>, vector<16x128xf32> -> vector<16x128xf32>
    %cst_60 = arith.constant dense<0.000000e+00> : vector<128xf32>
    %38 = vector.multi_reduction <add>, %37, %cst_60 [0] : vector<16x128xf32> to vector<128xf32>
    %39 = vector.shape_cast %38 : vector<128xf32> to vector<1x128xf32>
    %40 = arith.addf %32, %39 : vector<1x128xf32>
    %41 = arith.mulf %37, %37 : vector<16x128xf32>
    %cst_61 = arith.constant dense<0.000000e+00> : vector<128xf32>
    %42 = vector.multi_reduction <add>, %41, %cst_61 [0] : vector<16x128xf32> to vector<128xf32>
    %43 = vector.shape_cast %42 : vector<128xf32> to vector<1x128xf32>
    %44 = arith.addf %33, %43 : vector<1x128xf32>
    %45 = vector.shape_cast %37 : vector<16x128xf32> to vector<4x4x128xf32>
    %46 = arith.truncf %45 : vector<4x4x128xf32> to vector<4x4x128xbf16>
    %c0_62 = arith.constant 0 : index
    %c0_63 = arith.constant 0 : index
    %c0_64 = arith.constant 0 : index
    %c0_65 = arith.constant 0 : index
    %47 = vector.load %arg5[%c0_62, %c0_63, %c0_64, %c0_65] : memref<4x2x4x256xbf16, #tpu.memory_space<vmem>>, vector<4x1x4x128xbf16>
    %48 = vector.shape_cast %47 : vector<4x1x4x128xbf16> to vector<4x4x128xbf16>
    %49 = vector.shape_cast %46 : vector<4x4x128xbf16> to vector<4x1x4x128xbf16>
    tpu.vector_store %arg5[%c0_62, %c0_63, %c0_64, %c0_65], %49 {strides = array<i32>} : memref<4x2x4x256xbf16, #tpu.memory_space<vmem>>, vector<4x1x4x128xbf16>,
    %50 = tpu.concatenate %17, %19, %23, %25 in 1 : vector<16x128xbf16>, vector<16x128xbf16>, vector<16x128xbf16>, vector<16x128xbf16> -> vector<16x512xbf16>
    %c1_66 = arith.constant 1 : index
    %c0_67 = arith.constant 0 : index
    %c0_68 = arith.constant 0 : index
    %51 = vector.load %arg4[%c1_66, %c0_67, %c0_68] : memref<4x512x128xbf16, #tpu.memory_space<vmem>>, vector<1x512x128xbf16>
    %52 = vector.shape_cast %51 : vector<1x512x128xbf16> to vector<512x128xbf16>
    %cst_69 = arith.constant dense<0.000000e+00> : vector<16x128xf32>
    %53 = tpu.matmul %50, %52, %cst_69 {dimension_numbers = #tpu.dot_dimension_numbers<[1], [0], [0], [1], [0, 0, 1, 1], [], []>} : vector<16x512xbf16>, vector<512x128xbf16>, vector<16x128xf32> -> vector<16x128xf32>
    %cst_70 = arith.constant dense<0.000000e+00> : vector<128xf32>
    %54 = vector.multi_reduction <add>, %53, %cst_70 [0] : vector<16x128xf32> to vector<128xf32>
    %55 = vector.shape_cast %54 : vector<128xf32> to vector<1x128xf32>
    %56 = arith.addf %40, %55 : vector<1x128xf32>
    %57 = arith.mulf %53, %53 : vector<16x128xf32>
    %cst_71 = arith.constant dense<0.000000e+00> : vector<128xf32>
    %58 = vector.multi_reduction <add>, %57, %cst_71 [0] : vector<16x128xf32> to vector<128xf32>
    %59 = vector.shape_cast %58 : vector<128xf32> to vector<1x128xf32>
    %60 = arith.addf %44, %59 : vector<1x128xf32>
    %61 = vector.shape_cast %53 : vector<16x128xf32> to vector<4x4x128xf32>
    %62 = arith.truncf %61 : vector<4x4x128xf32> to vector<4x4x128xbf16>
    %c0_72 = arith.constant 0 : index
    %c0_73 = arith.constant 0 : index
    %c0_74 = arith.constant 0 : index
    %c128 = arith.constant 128 : index
    %63 = vector.load %arg5[%c0_72, %c0_73, %c0_74, %c128] : memref<4x2x4x256xbf16, #tpu.memory_space<vmem>>, vector<4x1x4x128xbf16>
    %64 = vector.shape_cast %63 : vector<4x1x4x128xbf16> to vector<4x4x128xbf16>
    %65 = vector.shape_cast %62 : vector<4x4x128xbf16> to vector<4x1x4x128xbf16>
    tpu.vector_store %arg5[%c0_72, %c0_73, %c0_74, %c128], %65 {strides = array<i32>} : memref<4x2x4x256xbf16, #tpu.memory_space<vmem>>, vector<4x1x4x128xbf16>,
    %66 = tpu.concatenate %21, %23, %27, %29 in 1 : vector<16x128xbf16>, vector<16x128xbf16>, vector<16x128xbf16>, vector<16x128xbf16> -> vector<16x512xbf16>
    %c2_75 = arith.constant 2 : index
    %c0_76 = arith.constant 0 : index
    %c0_77 = arith.constant 0 : index
    %67 = vector.load %arg4[%c2_75, %c0_76, %c0_77] : memref<4x512x128xbf16, #tpu.memory_space<vmem>>, vector<1x512x128xbf16>
    %68 = vector.shape_cast %67 : vector<1x512x128xbf16> to vector<512x128xbf16>
    %cst_78 = arith.constant dense<0.000000e+00> : vector<16x128xf32>
    %69 = tpu.matmul %66, %68, %cst_78 {dimension_numbers = #tpu.dot_dimension_numbers<[1], [0], [0], [1], [0, 0, 1, 1], [], []>} : vector<16x512xbf16>, vector<512x128xbf16>, vector<16x128xf32> -> vector<16x128xf32>
    %cst_79 = arith.constant dense<0.000000e+00> : vector<128xf32>
    %70 = vector.multi_reduction <add>, %69, %cst_79 [0] : vector<16x128xf32> to vector<128xf32>
    %71 = vector.shape_cast %70 : vector<128xf32> to vector<1x128xf32>
    %72 = arith.addf %56, %71 : vector<1x128xf32>
    %73 = arith.mulf %69, %69 : vector<16x128xf32>
    %cst_80 = arith.constant dense<0.000000e+00> : vector<128xf32>
    %74 = vector.multi_reduction <add>, %73, %cst_80 [0] : vector<16x128xf32> to vector<128xf32>
    %75 = vector.shape_cast %74 : vector<128xf32> to vector<1x128xf32>
    %76 = arith.addf %60, %75 : vector<1x128xf32>
    %77 = vector.shape_cast %69 : vector<16x128xf32> to vector<4x4x128xf32>
    %78 = arith.truncf %77 : vector<4x4x128xf32> to vector<4x4x128xbf16>
    %c0_81 = arith.constant 0 : index
    %c1_82 = arith.constant 1 : index
    %c0_83 = arith.constant 0 : index
    %c0_84 = arith.constant 0 : index
    %79 = vector.load %arg5[%c0_81, %c1_82, %c0_83, %c0_84] : memref<4x2x4x256xbf16, #tpu.memory_space<vmem>>, vector<4x1x4x128xbf16>
    %80 = vector.shape_cast %79 : vector<4x1x4x128xbf16> to vector<4x4x128xbf16>
    %81 = vector.shape_cast %78 : vector<4x4x128xbf16> to vector<4x1x4x128xbf16>
    tpu.vector_store %arg5[%c0_81, %c1_82, %c0_83, %c0_84], %81 {strides = array<i32>} : memref<4x2x4x256xbf16, #tpu.memory_space<vmem>>, vector<4x1x4x128xbf16>,
    %82 = tpu.concatenate %23, %25, %29, %31 in 1 : vector<16x128xbf16>, vector<16x128xbf16>, vector<16x128xbf16>, vector<16x128xbf16> -> vector<16x512xbf16>
    %c3 = arith.constant 3 : index
    %c0_85 = arith.constant 0 : index
    %c0_86 = arith.constant 0 : index
    %83 = vector.load %arg4[%c3, %c0_85, %c0_86] : memref<4x512x128xbf16, #tpu.memory_space<vmem>>, vector<1x512x128xbf16>
    %84 = vector.shape_cast %83 : vector<1x512x128xbf16> to vector<512x128xbf16>
    %cst_87 = arith.constant dense<0.000000e+00> : vector<16x128xf32>
    %85 = tpu.matmul %82, %84, %cst_87 {dimension_numbers = #tpu.dot_dimension_numbers<[1], [0], [0], [1], [0, 0, 1, 1], [], []>} : vector<16x512xbf16>, vector<512x128xbf16>, vector<16x128xf32> -> vector<16x128xf32>
    %cst_88 = arith.constant dense<0.000000e+00> : vector<128xf32>
    %86 = vector.multi_reduction <add>, %85, %cst_88 [0] : vector<16x128xf32> to vector<128xf32>
    %87 = vector.shape_cast %86 : vector<128xf32> to vector<1x128xf32>
    %88 = arith.addf %72, %87 : vector<1x128xf32>
    %89 = arith.mulf %85, %85 : vector<16x128xf32>
    %cst_89 = arith.constant dense<0.000000e+00> : vector<128xf32>
    %90 = vector.multi_reduction <add>, %89, %cst_89 [0] : vector<16x128xf32> to vector<128xf32>
    %91 = vector.shape_cast %90 : vector<128xf32> to vector<1x128xf32>
    %92 = arith.addf %76, %91 : vector<1x128xf32>
    %93 = vector.shape_cast %85 : vector<16x128xf32> to vector<4x4x128xf32>
    %94 = arith.truncf %93 : vector<4x4x128xf32> to vector<4x4x128xbf16>
    %c0_90 = arith.constant 0 : index
    %c1_91 = arith.constant 1 : index
    %c0_92 = arith.constant 0 : index
    %c128_93 = arith.constant 128 : index
    %95 = vector.load %arg5[%c0_90, %c1_91, %c0_92, %c128_93] : memref<4x2x4x256xbf16, #tpu.memory_space<vmem>>, vector<4x1x4x128xbf16>
    %96 = vector.shape_cast %95 : vector<4x1x4x128xbf16> to vector<4x4x128xbf16>
    %97 = vector.shape_cast %94 : vector<4x4x128xbf16> to vector<4x1x4x128xbf16>
    tpu.vector_store %arg5[%c0_90, %c1_91, %c0_92, %c128_93], %97 {strides = array<i32>} : memref<4x2x4x256xbf16, #tpu.memory_space<vmem>>, vector<4x1x4x128xbf16>,
    %c0_94 = arith.constant 0 : index
    %c0_95 = arith.constant 0 : index
    %c0_96 = arith.constant 0 : index
    %98 = vector.load %arg6[%c0_94, %c0_95, %c0_96] : memref<1x1x128xf32, #tpu.memory_space<vmem>>, vector<1x1x128xf32>
    %99 = vector.shape_cast %98 : vector<1x1x128xf32> to vector<1x128xf32>
    %100 = vector.shape_cast %88 : vector<1x128xf32> to vector<1x1x128xf32>
    tpu.vector_store %arg6[%c0_94, %c0_95, %c0_96], %100 {strides = array<i32>} : memref<1x1x128xf32, #tpu.memory_space<vmem>>, vector<1x1x128xf32>,
    %c0_97 = arith.constant 0 : index
    %c0_98 = arith.constant 0 : index
    %c0_99 = arith.constant 0 : index
    %101 = vector.load %arg7[%c0_97, %c0_98, %c0_99] : memref<1x1x128xf32, #tpu.memory_space<vmem>>, vector<1x1x128xf32>
    %102 = vector.shape_cast %101 : vector<1x1x128xf32> to vector<1x128xf32>
    %103 = vector.shape_cast %92 : vector<1x128xf32> to vector<1x1x128xf32>
    tpu.vector_store %arg7[%c0_97, %c0_98, %c0_99], %103 {strides = array<i32>} : memref<1x1x128xf32, #tpu.memory_space<vmem>>, vector<1x1x128xf32>,
    return
  }
  func.func @transform_0(%arg0: i32) -> (i32, i32, i32, i32) {
    %c0_i32 = arith.constant 0 : i32
    %c0_i32_0 = arith.constant 0 : i32
    %c0_i32_1 = arith.constant 0 : i32
    %c0_i32_2 = arith.constant 0 : i32
    return %arg0, %c0_i32, %c0_i32_0, %c0_i32_1 : i32, i32, i32, i32
  }
  func.func @transform_1(%arg0: i32) -> (i32, i32, i32, i32) {
    %c0_i32 = arith.constant 0 : i32
    %c0_i32_0 = arith.constant 0 : i32
    %c0_i32_1 = arith.constant 0 : i32
    %c0_i32_2 = arith.constant 0 : i32
    %c0_i32_3 = arith.constant 0 : i32
    return %c0_i32, %c0_i32_0, %c0_i32_1, %c0_i32_2 : i32, i32, i32, i32
  }
  func.func @transform_2(%arg0: i32) -> (i32, i32, i32, i32) {
    %c0_i32 = arith.constant 0 : i32
    %c0_i32_0 = arith.constant 0 : i32
    %c0_i32_1 = arith.constant 0 : i32
    %c0_i32_2 = arith.constant 0 : i32
    %c0_i32_3 = arith.constant 0 : i32
    return %c0_i32, %c0_i32_0, %c0_i32_1, %c0_i32_2 : i32, i32, i32, i32
  }
  func.func @transform_3(%arg0: i32) -> (i32, i32, i32) {
    %c0_i32 = arith.constant 0 : i32
    %c0_i32_0 = arith.constant 0 : i32
    %c0_i32_1 = arith.constant 0 : i32
    %c0_i32_2 = arith.constant 0 : i32
    return %c0_i32, %c0_i32_0, %c0_i32_1 : i32, i32, i32
  }
  func.func @transform_4(%arg0: i32) -> (i32, i32, i32, i32) {
    %c0_i32 = arith.constant 0 : i32
    %c0_i32_0 = arith.constant 0 : i32
    %c0_i32_1 = arith.constant 0 : i32
    %c0_i32_2 = arith.constant 0 : i32
    return %arg0, %c0_i32, %c0_i32_0, %c0_i32_1 : i32, i32, i32, i32
  }
  func.func @transform_5(%arg0: i32) -> (i32, i32, i32) {
    %c0_i32 = arith.constant 0 : i32
    %c0_i32_0 = arith.constant 0 : i32
    %c0_i32_1 = arith.constant 0 : i32
    return %arg0, %c0_i32, %c0_i32_0 : i32, i32, i32
  }
  func.func @transform_6(%arg0: i32) -> (i32, i32, i32) {
    %c0_i32 = arith.constant 0 : i32
    %c0_i32_0 = arith.constant 0 : i32
    %c0_i32_1 = arith.constant 0 : i32
    return %arg0, %c0_i32, %c0_i32_0 : i32, i32, i32
  }
}

module attributes {stable_mosaic.version = 11 : i64} {
  func.func @kernel(%arg0: i32, %arg1: memref<1x1x128xbf16, #tpu.memory_space<vmem>>, %arg2: memref<128x2048xbf16, #tpu.memory_space<vmem>>, %arg3: memref<1x16x128xbf16, #tpu.memory_space<vmem>>, %arg4: memref<1x1x128xf32, #tpu.memory_space<vmem>>, %arg5: memref<1x1x128xf32, #tpu.memory_space<vmem>>) attributes {dimension_semantics = [#tpu.dimension_semantics<parallel>], iteration_bounds = array<i64: 2>, scalar_prefetch = 0 : i64, scratch_operands = 0 : i64, tpu.core_type = #tpu.core_type<tc>, window_params = [{transform_indices = @transform_0, window_bounds = array<i64: 1, 1, 128>}, {pipeline_mode = #tpu.pipeline_mode<synchronous>, transform_indices = @transform_1, window_bounds = array<i64: 128, 2048>}, {transform_indices = @transform_2, window_bounds = array<i64: 1, 16, 128>}, {transform_indices = @transform_3, window_bounds = array<i64: 1, 1, 128>}, {transform_indices = @transform_4, window_bounds = array<i64: 1, 1, 128>}]} {
    %c0 = arith.constant 0 : index
    %c0_0 = arith.constant 0 : index
    %c0_1 = arith.constant 0 : index
    %0 = vector.load %arg1[%c0, %c0_0, %c0_1] : memref<1x1x128xbf16, #tpu.memory_space<vmem>>, vector<1x1x128xbf16>
    %1 = vector.shape_cast %0 : vector<1x1x128xbf16> to vector<1x128xbf16>
    %c0_2 = arith.constant 0 : index
    %c0_3 = arith.constant 0 : index
    %2 = vector.load %arg2[%c0_2, %c0_3] : memref<128x2048xbf16, #tpu.memory_space<vmem>>, vector<128x2048xbf16>
    %cst = arith.constant dense<0.000000e+00> : vector<1x2048xf32>
    %3 = tpu.matmul %1, %2, %cst {dimension_numbers = #tpu.dot_dimension_numbers<[1], [0], [0], [1], [0, 0, 1, 1], [], []>} : vector<1x128xbf16>, vector<128x2048xbf16>, vector<1x2048xf32> -> vector<1x2048xf32>
    %4 = vector.shape_cast %3 : vector<1x2048xf32> to vector<16x128xf32>
    %cst_4 = arith.constant dense<0.000000e+00> : vector<128xf32>
    %5 = vector.multi_reduction <add>, %4, %cst_4 [0] : vector<16x128xf32> to vector<128xf32>
    %6 = vector.shape_cast %5 : vector<128xf32> to vector<1x128xf32>
    %c0_5 = arith.constant 0 : index
    %c0_6 = arith.constant 0 : index
    %c0_7 = arith.constant 0 : index
    %7 = vector.load %arg4[%c0_5, %c0_6, %c0_7] : memref<1x1x128xf32, #tpu.memory_space<vmem>>, vector<1x1x128xf32>
    %8 = vector.shape_cast %7 : vector<1x1x128xf32> to vector<1x128xf32>
    %9 = vector.shape_cast %6 : vector<1x128xf32> to vector<1x1x128xf32>
    tpu.vector_store %arg4[%c0_5, %c0_6, %c0_7], %9 {strides = array<i32>} : memref<1x1x128xf32, #tpu.memory_space<vmem>>, vector<1x1x128xf32>,
    %10 = arith.mulf %4, %4 : vector<16x128xf32>
    %cst_8 = arith.constant dense<0.000000e+00> : vector<128xf32>
    %11 = vector.multi_reduction <add>, %10, %cst_8 [0] : vector<16x128xf32> to vector<128xf32>
    %12 = vector.shape_cast %11 : vector<128xf32> to vector<1x128xf32>
    %c0_9 = arith.constant 0 : index
    %c0_10 = arith.constant 0 : index
    %c0_11 = arith.constant 0 : index
    %13 = vector.load %arg5[%c0_9, %c0_10, %c0_11] : memref<1x1x128xf32, #tpu.memory_space<vmem>>, vector<1x1x128xf32>
    %14 = vector.shape_cast %13 : vector<1x1x128xf32> to vector<1x128xf32>
    %15 = vector.shape_cast %12 : vector<1x128xf32> to vector<1x1x128xf32>
    tpu.vector_store %arg5[%c0_9, %c0_10, %c0_11], %15 {strides = array<i32>} : memref<1x1x128xf32, #tpu.memory_space<vmem>>, vector<1x1x128xf32>,
    %16 = vector.shape_cast %3 : vector<1x2048xf32> to vector<1x16x128xf32>
    %17 = arith.truncf %16 : vector<1x16x128xf32> to vector<1x16x128xbf16>
    %c0_12 = arith.constant 0 : index
    %c0_13 = arith.constant 0 : index
    %c0_14 = arith.constant 0 : index
    %18 = vector.load %arg3[%c0_12, %c0_13, %c0_14] : memref<1x16x128xbf16, #tpu.memory_space<vmem>>, vector<1x16x128xbf16>
    tpu.vector_store %arg3[%c0_12, %c0_13, %c0_14], %17 {strides = array<i32>} : memref<1x16x128xbf16, #tpu.memory_space<vmem>>, vector<1x16x128xbf16>,
    return
  }
  func.func @transform_0(%arg0: i32) -> (i32, i32, i32) {
    %c0_i32 = arith.constant 0 : i32
    %c0_i32_0 = arith.constant 0 : i32
    %c0_i32_1 = arith.constant 0 : i32
    return %arg0, %c0_i32, %c0_i32_0 : i32, i32, i32
  }
  func.func @transform_1(%arg0: i32) -> (i32, i32) {
    %c0_i32 = arith.constant 0 : i32
    %c0_i32_0 = arith.constant 0 : i32
    %c0_i32_1 = arith.constant 0 : i32
    return %c0_i32, %c0_i32_0 : i32, i32
  }
  func.func @transform_2(%arg0: i32) -> (i32, i32, i32) {
    %c0_i32 = arith.constant 0 : i32
    %c0_i32_0 = arith.constant 0 : i32
    %c0_i32_1 = arith.constant 0 : i32
    return %arg0, %c0_i32, %c0_i32_0 : i32, i32, i32
  }
  func.func @transform_3(%arg0: i32) -> (i32, i32, i32) {
    %c0_i32 = arith.constant 0 : i32
    %c0_i32_0 = arith.constant 0 : i32
    %c0_i32_1 = arith.constant 0 : i32
    return %arg0, %c0_i32, %c0_i32_0 : i32, i32, i32
  }
  func.func @transform_4(%arg0: i32) -> (i32, i32, i32) {
    %c0_i32 = arith.constant 0 : i32
    %c0_i32_0 = arith.constant 0 : i32
    %c0_i32_1 = arith.constant 0 : i32
    return %arg0, %c0_i32, %c0_i32_0 : i32, i32, i32
  }
}

module attributes {stable_mosaic.version = 11 : i64} {
  func.func @kernel(%arg0: i32, %arg1: memref<1x8x8x128xbf16, #tpu.memory_space<vmem>>, %arg2: memref<1x1x1x128xf32, #tpu.memory_space<vmem>>, %arg3: memref<1x1x1x128xf32, #tpu.memory_space<vmem>>, %arg4: memref<4x512x128xbf16, #tpu.memory_space<vmem>>, %arg5: memref<8x2x8x256xbf16, #tpu.memory_space<vmem>>, %arg6: memref<1x1x128xf32, #tpu.memory_space<vmem>>, %arg7: memref<1x1x128xf32, #tpu.memory_space<vmem>>, %arg8: memref<1x10x10x128xbf16, #tpu.memory_space<vmem>>) attributes {dimension_semantics = [#tpu.dimension_semantics<parallel>], iteration_bounds = array<i64: 2>, scalar_prefetch = 0 : i64, scratch_operands = 1 : i64, tpu.core_type = #tpu.core_type<tc>, window_params = [{transform_indices = @transform_0, window_bounds = array<i64: 1, 8, 8, 128>}, {pipeline_mode = #tpu.pipeline_mode<synchronous>, transform_indices = @transform_1, window_bounds = array<i64: 1, 1, 1, 128>}, {pipeline_mode = #tpu.pipeline_mode<synchronous>, transform_indices = @transform_2, window_bounds = array<i64: 1, 1, 1, 128>}, {pipeline_mode = #tpu.pipeline_mode<synchronous>, transform_indices = @transform_3, window_bounds = array<i64: 4, 512, 128>}, {transform_indices = @transform_4, window_bounds = array<i64: 8, 2, 8, 256>}, {transform_indices = @transform_5, window_bounds = array<i64: 1, 1, 128>}, {transform_indices = @transform_6, window_bounds = array<i64: 1, 1, 128>}]} {
    %cst = arith.constant 0.000000e+00 : bf16
    %0 = vector.broadcast %cst : bf16 to vector<1x10x10x128xbf16>
    %c0 = arith.constant 0 : index
    %c0_0 = arith.constant 0 : index
    %c0_1 = arith.constant 0 : index
    %c0_2 = arith.constant 0 : index
    %1 = vector.load %arg8[%c0, %c0_0, %c0_1, %c0_2] : memref<1x10x10x128xbf16, #tpu.memory_space<vmem>>, vector<1x10x10x128xbf16>
    tpu.vector_store %arg8[%c0, %c0_0, %c0_1, %c0_2], %0 {strides = array<i32>} : memref<1x10x10x128xbf16, #tpu.memory_space<vmem>>, vector<1x10x10x128xbf16>,
    %c0_3 = arith.constant 0 : index
    %c0_4 = arith.constant 0 : index
    %c0_5 = arith.constant 0 : index
    %c0_6 = arith.constant 0 : index
    %2 = vector.load %arg1[%c0_3, %c0_4, %c0_5, %c0_6] : memref<1x8x8x128xbf16, #tpu.memory_space<vmem>>, vector<1x8x8x128xbf16>
    %3 = arith.extf %2 : vector<1x8x8x128xbf16> to vector<1x8x8x128xf32>
    %c0_7 = arith.constant 0 : index
    %c0_8 = arith.constant 0 : index
    %c0_9 = arith.constant 0 : index
    %c0_10 = arith.constant 0 : index
    %4 = vector.load %arg2[%c0_7, %c0_8, %c0_9, %c0_10] : memref<1x1x1x128xf32, #tpu.memory_space<vmem>>, vector<1x1x1x128xf32>
    %5 = vector.broadcast %4 : vector<1x1x1x128xf32> to vector<1x8x8x128xf32>
    %6 = arith.mulf %3, %5 : vector<1x8x8x128xf32>
    %c0_11 = arith.constant 0 : index
    %c0_12 = arith.constant 0 : index
    %c0_13 = arith.constant 0 : index
    %c0_14 = arith.constant 0 : index
    %7 = vector.load %arg3[%c0_11, %c0_12, %c0_13, %c0_14] : memref<1x1x1x128xf32, #tpu.memory_space<vmem>>, vector<1x1x1x128xf32>
    %8 = vector.broadcast %7 : vector<1x1x1x128xf32> to vector<1x8x8x128xf32>
    %9 = arith.addf %6, %8 : vector<1x8x8x128xf32>
    %cst_15 = arith.constant 0.000000e+00 : f32
    %10 = vector.broadcast %cst_15 : f32 to vector<1x8x8x128xf32>
    %11 = arith.maximumf %9, %10 : vector<1x8x8x128xf32>
    %12 = arith.truncf %11 : vector<1x8x8x128xf32> to vector<1x8x8x128xbf16>
    %c0_16 = arith.constant 0 : index
    %c1 = arith.constant 1 : index
    %c1_17 = arith.constant 1 : index
    %c0_18 = arith.constant 0 : index
    %13 = vector.load %arg8[%c0_16, %c1, %c1_17, %c0_18] : memref<1x10x10x128xbf16, #tpu.memory_space<vmem>>, vector<1x8x8x128xbf16>
    tpu.vector_store %arg8[%c0_16, %c1, %c1_17, %c0_18], %12 {strides = array<i32>} : memref<1x10x10x128xbf16, #tpu.memory_space<vmem>>, vector<1x8x8x128xbf16>,
    %c0_19 = arith.constant 0 : index
    %c0_20 = arith.constant 0 : index
    %c0_21 = arith.constant 0 : index
    %c0_22 = arith.constant 0 : index
    %14 = vector.load %arg8[%c0_19, %c0_20, %c0_21, %c0_22] : memref<1x10x10x128xbf16, #tpu.memory_space<vmem>>, vector<1x8x8x128xbf16>
    %15 = vector.shape_cast %14 : vector<1x8x8x128xbf16> to vector<64x128xbf16>
    %c0_23 = arith.constant 0 : index
    %c0_24 = arith.constant 0 : index
    %c1_25 = arith.constant 1 : index
    %c0_26 = arith.constant 0 : index
    %16 = vector.load %arg8[%c0_23, %c0_24, %c1_25, %c0_26] : memref<1x10x10x128xbf16, #tpu.memory_space<vmem>>, vector<1x8x8x128xbf16>
    %17 = vector.shape_cast %16 : vector<1x8x8x128xbf16> to vector<64x128xbf16>
    %c0_27 = arith.constant 0 : index
    %c0_28 = arith.constant 0 : index
    %c2 = arith.constant 2 : index
    %c0_29 = arith.constant 0 : index
    %18 = vector.load %arg8[%c0_27, %c0_28, %c2, %c0_29] : memref<1x10x10x128xbf16, #tpu.memory_space<vmem>>, vector<1x8x8x128xbf16>
    %19 = vector.shape_cast %18 : vector<1x8x8x128xbf16> to vector<64x128xbf16>
    %c0_30 = arith.constant 0 : index
    %c1_31 = arith.constant 1 : index
    %c0_32 = arith.constant 0 : index
    %c0_33 = arith.constant 0 : index
    %20 = vector.load %arg8[%c0_30, %c1_31, %c0_32, %c0_33] : memref<1x10x10x128xbf16, #tpu.memory_space<vmem>>, vector<1x8x8x128xbf16>
    %21 = vector.shape_cast %20 : vector<1x8x8x128xbf16> to vector<64x128xbf16>
    %c0_34 = arith.constant 0 : index
    %c1_35 = arith.constant 1 : index
    %c1_36 = arith.constant 1 : index
    %c0_37 = arith.constant 0 : index
    %22 = vector.load %arg8[%c0_34, %c1_35, %c1_36, %c0_37] : memref<1x10x10x128xbf16, #tpu.memory_space<vmem>>, vector<1x8x8x128xbf16>
    %23 = vector.shape_cast %22 : vector<1x8x8x128xbf16> to vector<64x128xbf16>
    %c0_38 = arith.constant 0 : index
    %c1_39 = arith.constant 1 : index
    %c2_40 = arith.constant 2 : index
    %c0_41 = arith.constant 0 : index
    %24 = vector.load %arg8[%c0_38, %c1_39, %c2_40, %c0_41] : memref<1x10x10x128xbf16, #tpu.memory_space<vmem>>, vector<1x8x8x128xbf16>
    %25 = vector.shape_cast %24 : vector<1x8x8x128xbf16> to vector<64x128xbf16>
    %c0_42 = arith.constant 0 : index
    %c2_43 = arith.constant 2 : index
    %c0_44 = arith.constant 0 : index
    %c0_45 = arith.constant 0 : index
    %26 = vector.load %arg8[%c0_42, %c2_43, %c0_44, %c0_45] : memref<1x10x10x128xbf16, #tpu.memory_space<vmem>>, vector<1x8x8x128xbf16>
    %27 = vector.shape_cast %26 : vector<1x8x8x128xbf16> to vector<64x128xbf16>
    %c0_46 = arith.constant 0 : index
    %c2_47 = arith.constant 2 : index
    %c1_48 = arith.constant 1 : index
    %c0_49 = arith.constant 0 : index
    %28 = vector.load %arg8[%c0_46, %c2_47, %c1_48, %c0_49] : memref<1x10x10x128xbf16, #tpu.memory_space<vmem>>, vector<1x8x8x128xbf16>
    %29 = vector.shape_cast %28 : vector<1x8x8x128xbf16> to vector<64x128xbf16>
    %c0_50 = arith.constant 0 : index
    %c2_51 = arith.constant 2 : index
    %c2_52 = arith.constant 2 : index
    %c0_53 = arith.constant 0 : index
    %30 = vector.load %arg8[%c0_50, %c2_51, %c2_52, %c0_53] : memref<1x10x10x128xbf16, #tpu.memory_space<vmem>>, vector<1x8x8x128xbf16>
    %31 = vector.shape_cast %30 : vector<1x8x8x128xbf16> to vector<64x128xbf16>
    %cst_54 = arith.constant 0.000000e+00 : f32
    %32 = vector.broadcast %cst_54 : f32 to vector<1x128xf32>
    %cst_55 = arith.constant 0.000000e+00 : f32
    %33 = vector.broadcast %cst_55 : f32 to vector<1x128xf32>
    %34 = tpu.concatenate %15, %17, %21, %23 in 1 : vector<64x128xbf16>, vector<64x128xbf16>, vector<64x128xbf16>, vector<64x128xbf16> -> vector<64x512xbf16>
    %c0_56 = arith.constant 0 : index
    %c0_57 = arith.constant 0 : index
    %c0_58 = arith.constant 0 : index
    %35 = vector.load %arg4[%c0_56, %c0_57, %c0_58] : memref<4x512x128xbf16, #tpu.memory_space<vmem>>, vector<1x512x128xbf16>
    %36 = vector.shape_cast %35 : vector<1x512x128xbf16> to vector<512x128xbf16>
    %cst_59 = arith.constant dense<0.000000e+00> : vector<64x128xf32>
    %37 = tpu.matmul %34, %36, %cst_59 {dimension_numbers = #tpu.dot_dimension_numbers<[1], [0], [0], [1], [0, 0, 1, 1], [], []>} : vector<64x512xbf16>, vector<512x128xbf16>, vector<64x128xf32> -> vector<64x128xf32>
    %cst_60 = arith.constant dense<0.000000e+00> : vector<128xf32>
    %38 = vector.multi_reduction <add>, %37, %cst_60 [0] : vector<64x128xf32> to vector<128xf32>
    %39 = vector.shape_cast %38 : vector<128xf32> to vector<1x128xf32>
    %40 = arith.addf %32, %39 : vector<1x128xf32>
    %41 = arith.mulf %37, %37 : vector<64x128xf32>
    %cst_61 = arith.constant dense<0.000000e+00> : vector<128xf32>
    %42 = vector.multi_reduction <add>, %41, %cst_61 [0] : vector<64x128xf32> to vector<128xf32>
    %43 = vector.shape_cast %42 : vector<128xf32> to vector<1x128xf32>
    %44 = arith.addf %33, %43 : vector<1x128xf32>
    %45 = vector.shape_cast %37 : vector<64x128xf32> to vector<8x8x128xf32>
    %46 = arith.truncf %45 : vector<8x8x128xf32> to vector<8x8x128xbf16>
    %c0_62 = arith.constant 0 : index
    %c0_63 = arith.constant 0 : index
    %c0_64 = arith.constant 0 : index
    %c0_65 = arith.constant 0 : index
    %47 = vector.load %arg5[%c0_62, %c0_63, %c0_64, %c0_65] : memref<8x2x8x256xbf16, #tpu.memory_space<vmem>>, vector<8x1x8x128xbf16>
    %48 = vector.shape_cast %47 : vector<8x1x8x128xbf16> to vector<8x8x128xbf16>
    %49 = vector.shape_cast %46 : vector<8x8x128xbf16> to vector<8x1x8x128xbf16>
    tpu.vector_store %arg5[%c0_62, %c0_63, %c0_64, %c0_65], %49 {strides = array<i32>} : memref<8x2x8x256xbf16, #tpu.memory_space<vmem>>, vector<8x1x8x128xbf16>,
    %50 = tpu.concatenate %17, %19, %23, %25 in 1 : vector<64x128xbf16>, vector<64x128xbf16>, vector<64x128xbf16>, vector<64x128xbf16> -> vector<64x512xbf16>
    %c1_66 = arith.constant 1 : index
    %c0_67 = arith.constant 0 : index
    %c0_68 = arith.constant 0 : index
    %51 = vector.load %arg4[%c1_66, %c0_67, %c0_68] : memref<4x512x128xbf16, #tpu.memory_space<vmem>>, vector<1x512x128xbf16>
    %52 = vector.shape_cast %51 : vector<1x512x128xbf16> to vector<512x128xbf16>
    %cst_69 = arith.constant dense<0.000000e+00> : vector<64x128xf32>
    %53 = tpu.matmul %50, %52, %cst_69 {dimension_numbers = #tpu.dot_dimension_numbers<[1], [0], [0], [1], [0, 0, 1, 1], [], []>} : vector<64x512xbf16>, vector<512x128xbf16>, vector<64x128xf32> -> vector<64x128xf32>
    %cst_70 = arith.constant dense<0.000000e+00> : vector<128xf32>
    %54 = vector.multi_reduction <add>, %53, %cst_70 [0] : vector<64x128xf32> to vector<128xf32>
    %55 = vector.shape_cast %54 : vector<128xf32> to vector<1x128xf32>
    %56 = arith.addf %40, %55 : vector<1x128xf32>
    %57 = arith.mulf %53, %53 : vector<64x128xf32>
    %cst_71 = arith.constant dense<0.000000e+00> : vector<128xf32>
    %58 = vector.multi_reduction <add>, %57, %cst_71 [0] : vector<64x128xf32> to vector<128xf32>
    %59 = vector.shape_cast %58 : vector<128xf32> to vector<1x128xf32>
    %60 = arith.addf %44, %59 : vector<1x128xf32>
    %61 = vector.shape_cast %53 : vector<64x128xf32> to vector<8x8x128xf32>
    %62 = arith.truncf %61 : vector<8x8x128xf32> to vector<8x8x128xbf16>
    %c0_72 = arith.constant 0 : index
    %c0_73 = arith.constant 0 : index
    %c0_74 = arith.constant 0 : index
    %c128 = arith.constant 128 : index
    %63 = vector.load %arg5[%c0_72, %c0_73, %c0_74, %c128] : memref<8x2x8x256xbf16, #tpu.memory_space<vmem>>, vector<8x1x8x128xbf16>
    %64 = vector.shape_cast %63 : vector<8x1x8x128xbf16> to vector<8x8x128xbf16>
    %65 = vector.shape_cast %62 : vector<8x8x128xbf16> to vector<8x1x8x128xbf16>
    tpu.vector_store %arg5[%c0_72, %c0_73, %c0_74, %c128], %65 {strides = array<i32>} : memref<8x2x8x256xbf16, #tpu.memory_space<vmem>>, vector<8x1x8x128xbf16>,
    %66 = tpu.concatenate %21, %23, %27, %29 in 1 : vector<64x128xbf16>, vector<64x128xbf16>, vector<64x128xbf16>, vector<64x128xbf16> -> vector<64x512xbf16>
    %c2_75 = arith.constant 2 : index
    %c0_76 = arith.constant 0 : index
    %c0_77 = arith.constant 0 : index
    %67 = vector.load %arg4[%c2_75, %c0_76, %c0_77] : memref<4x512x128xbf16, #tpu.memory_space<vmem>>, vector<1x512x128xbf16>
    %68 = vector.shape_cast %67 : vector<1x512x128xbf16> to vector<512x128xbf16>
    %cst_78 = arith.constant dense<0.000000e+00> : vector<64x128xf32>
    %69 = tpu.matmul %66, %68, %cst_78 {dimension_numbers = #tpu.dot_dimension_numbers<[1], [0], [0], [1], [0, 0, 1, 1], [], []>} : vector<64x512xbf16>, vector<512x128xbf16>, vector<64x128xf32> -> vector<64x128xf32>
    %cst_79 = arith.constant dense<0.000000e+00> : vector<128xf32>
    %70 = vector.multi_reduction <add>, %69, %cst_79 [0] : vector<64x128xf32> to vector<128xf32>
    %71 = vector.shape_cast %70 : vector<128xf32> to vector<1x128xf32>
    %72 = arith.addf %56, %71 : vector<1x128xf32>
    %73 = arith.mulf %69, %69 : vector<64x128xf32>
    %cst_80 = arith.constant dense<0.000000e+00> : vector<128xf32>
    %74 = vector.multi_reduction <add>, %73, %cst_80 [0] : vector<64x128xf32> to vector<128xf32>
    %75 = vector.shape_cast %74 : vector<128xf32> to vector<1x128xf32>
    %76 = arith.addf %60, %75 : vector<1x128xf32>
    %77 = vector.shape_cast %69 : vector<64x128xf32> to vector<8x8x128xf32>
    %78 = arith.truncf %77 : vector<8x8x128xf32> to vector<8x8x128xbf16>
    %c0_81 = arith.constant 0 : index
    %c1_82 = arith.constant 1 : index
    %c0_83 = arith.constant 0 : index
    %c0_84 = arith.constant 0 : index
    %79 = vector.load %arg5[%c0_81, %c1_82, %c0_83, %c0_84] : memref<8x2x8x256xbf16, #tpu.memory_space<vmem>>, vector<8x1x8x128xbf16>
    %80 = vector.shape_cast %79 : vector<8x1x8x128xbf16> to vector<8x8x128xbf16>
    %81 = vector.shape_cast %78 : vector<8x8x128xbf16> to vector<8x1x8x128xbf16>
    tpu.vector_store %arg5[%c0_81, %c1_82, %c0_83, %c0_84], %81 {strides = array<i32>} : memref<8x2x8x256xbf16, #tpu.memory_space<vmem>>, vector<8x1x8x128xbf16>,
    %82 = tpu.concatenate %23, %25, %29, %31 in 1 : vector<64x128xbf16>, vector<64x128xbf16>, vector<64x128xbf16>, vector<64x128xbf16> -> vector<64x512xbf16>
    %c3 = arith.constant 3 : index
    %c0_85 = arith.constant 0 : index
    %c0_86 = arith.constant 0 : index
    %83 = vector.load %arg4[%c3, %c0_85, %c0_86] : memref<4x512x128xbf16, #tpu.memory_space<vmem>>, vector<1x512x128xbf16>
    %84 = vector.shape_cast %83 : vector<1x512x128xbf16> to vector<512x128xbf16>
    %cst_87 = arith.constant dense<0.000000e+00> : vector<64x128xf32>
    %85 = tpu.matmul %82, %84, %cst_87 {dimension_numbers = #tpu.dot_dimension_numbers<[1], [0], [0], [1], [0, 0, 1, 1], [], []>} : vector<64x512xbf16>, vector<512x128xbf16>, vector<64x128xf32> -> vector<64x128xf32>
    %cst_88 = arith.constant dense<0.000000e+00> : vector<128xf32>
    %86 = vector.multi_reduction <add>, %85, %cst_88 [0] : vector<64x128xf32> to vector<128xf32>
    %87 = vector.shape_cast %86 : vector<128xf32> to vector<1x128xf32>
    %88 = arith.addf %72, %87 : vector<1x128xf32>
    %89 = arith.mulf %85, %85 : vector<64x128xf32>
    %cst_89 = arith.constant dense<0.000000e+00> : vector<128xf32>
    %90 = vector.multi_reduction <add>, %89, %cst_89 [0] : vector<64x128xf32> to vector<128xf32>
    %91 = vector.shape_cast %90 : vector<128xf32> to vector<1x128xf32>
    %92 = arith.addf %76, %91 : vector<1x128xf32>
    %93 = vector.shape_cast %85 : vector<64x128xf32> to vector<8x8x128xf32>
    %94 = arith.truncf %93 : vector<8x8x128xf32> to vector<8x8x128xbf16>
    %c0_90 = arith.constant 0 : index
    %c1_91 = arith.constant 1 : index
    %c0_92 = arith.constant 0 : index
    %c128_93 = arith.constant 128 : index
    %95 = vector.load %arg5[%c0_90, %c1_91, %c0_92, %c128_93] : memref<8x2x8x256xbf16, #tpu.memory_space<vmem>>, vector<8x1x8x128xbf16>
    %96 = vector.shape_cast %95 : vector<8x1x8x128xbf16> to vector<8x8x128xbf16>
    %97 = vector.shape_cast %94 : vector<8x8x128xbf16> to vector<8x1x8x128xbf16>
    tpu.vector_store %arg5[%c0_90, %c1_91, %c0_92, %c128_93], %97 {strides = array<i32>} : memref<8x2x8x256xbf16, #tpu.memory_space<vmem>>, vector<8x1x8x128xbf16>,
    %c0_94 = arith.constant 0 : index
    %c0_95 = arith.constant 0 : index
    %c0_96 = arith.constant 0 : index
    %98 = vector.load %arg6[%c0_94, %c0_95, %c0_96] : memref<1x1x128xf32, #tpu.memory_space<vmem>>, vector<1x1x128xf32>
    %99 = vector.shape_cast %98 : vector<1x1x128xf32> to vector<1x128xf32>
    %100 = vector.shape_cast %88 : vector<1x128xf32> to vector<1x1x128xf32>
    tpu.vector_store %arg6[%c0_94, %c0_95, %c0_96], %100 {strides = array<i32>} : memref<1x1x128xf32, #tpu.memory_space<vmem>>, vector<1x1x128xf32>,
    %c0_97 = arith.constant 0 : index
    %c0_98 = arith.constant 0 : index
    %c0_99 = arith.constant 0 : index
    %101 = vector.load %arg7[%c0_97, %c0_98, %c0_99] : memref<1x1x128xf32, #tpu.memory_space<vmem>>, vector<1x1x128xf32>
    %102 = vector.shape_cast %101 : vector<1x1x128xf32> to vector<1x128xf32>
    %103 = vector.shape_cast %92 : vector<1x128xf32> to vector<1x1x128xf32>
    tpu.vector_store %arg7[%c0_97, %c0_98, %c0_99], %103 {strides = array<i32>} : memref<1x1x128xf32, #tpu.memory_space<vmem>>, vector<1x1x128xf32>,
    return
  }
  func.func @transform_0(%arg0: i32) -> (i32, i32, i32, i32) {
    %c0_i32 = arith.constant 0 : i32
    %c0_i32_0 = arith.constant 0 : i32
    %c0_i32_1 = arith.constant 0 : i32
    %c0_i32_2 = arith.constant 0 : i32
    return %arg0, %c0_i32, %c0_i32_0, %c0_i32_1 : i32, i32, i32, i32
  }
  func.func @transform_1(%arg0: i32) -> (i32, i32, i32, i32) {
    %c0_i32 = arith.constant 0 : i32
    %c0_i32_0 = arith.constant 0 : i32
    %c0_i32_1 = arith.constant 0 : i32
    %c0_i32_2 = arith.constant 0 : i32
    %c0_i32_3 = arith.constant 0 : i32
    return %c0_i32, %c0_i32_0, %c0_i32_1, %c0_i32_2 : i32, i32, i32, i32
  }
  func.func @transform_2(%arg0: i32) -> (i32, i32, i32, i32) {
    %c0_i32 = arith.constant 0 : i32
    %c0_i32_0 = arith.constant 0 : i32
    %c0_i32_1 = arith.constant 0 : i32
    %c0_i32_2 = arith.constant 0 : i32
    %c0_i32_3 = arith.constant 0 : i32
    return %c0_i32, %c0_i32_0, %c0_i32_1, %c0_i32_2 : i32, i32, i32, i32
  }
  func.func @transform_3(%arg0: i32) -> (i32, i32, i32) {
    %c0_i32 = arith.constant 0 : i32
    %c0_i32_0 = arith.constant 0 : i32
    %c0_i32_1 = arith.constant 0 : i32
    %c0_i32_2 = arith.constant 0 : i32
    return %c0_i32, %c0_i32_0, %c0_i32_1 : i32, i32, i32
  }
  func.func @transform_4(%arg0: i32) -> (i32, i32, i32, i32) {
    %c0_i32 = arith.constant 0 : i32
    %c0_i32_0 = arith.constant 0 : i32
    %c0_i32_1 = arith.constant 0 : i32
    %c0_i32_2 = arith.constant 0 : i32
    return %arg0, %c0_i32, %c0_i32_0, %c0_i32_1 : i32, i32, i32, i32
  }
  func.func @transform_5(%arg0: i32) -> (i32, i32, i32) {
    %c0_i32 = arith.constant 0 : i32
    %c0_i32_0 = arith.constant 0 : i32
    %c0_i32_1 = arith.constant 0 : i32
    return %arg0, %c0_i32, %c0_i32_0 : i32, i32, i32
  }
  func.func @transform_6(%arg0: i32) -> (i32, i32, i32) {
    %c0_i32 = arith.constant 0 : i32
    %c0_i32_0 = arith.constant 0 : i32
    %c0_i32_1 = arith.constant 0 : i32
    return %arg0, %c0_i32, %c0_i32_0 : i32, i32, i32
  }
}

module attributes {stable_mosaic.version = 11 : i64} {
  func.func @kernel(%arg0: i32, %arg1: memref<1x16x16x128xbf16, #tpu.memory_space<vmem>>, %arg2: memref<1x1x1x128xf32, #tpu.memory_space<vmem>>, %arg3: memref<1x1x1x128xf32, #tpu.memory_space<vmem>>, %arg4: memref<4x512x128xbf16, #tpu.memory_space<vmem>>, %arg5: memref<2x2x16x16x3xf32, #tpu.memory_space<vmem>>, %arg6: memref<1x18x18x128xbf16, #tpu.memory_space<vmem>>) attributes {dimension_semantics = [#tpu.dimension_semantics<parallel>], iteration_bounds = array<i64: 2>, scalar_prefetch = 0 : i64, scratch_operands = 1 : i64, tpu.core_type = #tpu.core_type<tc>, window_params = [{transform_indices = @transform_0, window_bounds = array<i64: 1, 16, 16, 128>}, {pipeline_mode = #tpu.pipeline_mode<synchronous>, transform_indices = @transform_1, window_bounds = array<i64: 1, 1, 1, 128>}, {pipeline_mode = #tpu.pipeline_mode<synchronous>, transform_indices = @transform_2, window_bounds = array<i64: 1, 1, 1, 128>}, {pipeline_mode = #tpu.pipeline_mode<synchronous>, transform_indices = @transform_3, window_bounds = array<i64: 4, 512, 128>}, {transform_indices = @transform_4, window_bounds = array<i64: 2, 2, 16, 16, 3>}]} {
    %cst = arith.constant 0.000000e+00 : bf16
    %0 = vector.broadcast %cst : bf16 to vector<1x18x18x128xbf16>
    %c0 = arith.constant 0 : index
    %c0_0 = arith.constant 0 : index
    %c0_1 = arith.constant 0 : index
    %c0_2 = arith.constant 0 : index
    %1 = vector.load %arg6[%c0, %c0_0, %c0_1, %c0_2] : memref<1x18x18x128xbf16, #tpu.memory_space<vmem>>, vector<1x18x18x128xbf16>
    tpu.vector_store %arg6[%c0, %c0_0, %c0_1, %c0_2], %0 {strides = array<i32>} : memref<1x18x18x128xbf16, #tpu.memory_space<vmem>>, vector<1x18x18x128xbf16>,
    %c0_3 = arith.constant 0 : index
    %c0_4 = arith.constant 0 : index
    %c0_5 = arith.constant 0 : index
    %c0_6 = arith.constant 0 : index
    %2 = vector.load %arg1[%c0_3, %c0_4, %c0_5, %c0_6] : memref<1x16x16x128xbf16, #tpu.memory_space<vmem>>, vector<1x16x16x128xbf16>
    %3 = arith.extf %2 : vector<1x16x16x128xbf16> to vector<1x16x16x128xf32>
    %c0_7 = arith.constant 0 : index
    %c0_8 = arith.constant 0 : index
    %c0_9 = arith.constant 0 : index
    %c0_10 = arith.constant 0 : index
    %4 = vector.load %arg2[%c0_7, %c0_8, %c0_9, %c0_10] : memref<1x1x1x128xf32, #tpu.memory_space<vmem>>, vector<1x1x1x128xf32>
    %5 = vector.broadcast %4 : vector<1x1x1x128xf32> to vector<1x16x16x128xf32>
    %6 = arith.mulf %3, %5 : vector<1x16x16x128xf32>
    %c0_11 = arith.constant 0 : index
    %c0_12 = arith.constant 0 : index
    %c0_13 = arith.constant 0 : index
    %c0_14 = arith.constant 0 : index
    %7 = vector.load %arg3[%c0_11, %c0_12, %c0_13, %c0_14] : memref<1x1x1x128xf32, #tpu.memory_space<vmem>>, vector<1x1x1x128xf32>
    %8 = vector.broadcast %7 : vector<1x1x1x128xf32> to vector<1x16x16x128xf32>
    %9 = arith.addf %6, %8 : vector<1x16x16x128xf32>
    %cst_15 = arith.constant 0.000000e+00 : f32
    %10 = vector.broadcast %cst_15 : f32 to vector<1x16x16x128xf32>
    %11 = arith.maximumf %9, %10 : vector<1x16x16x128xf32>
    %12 = arith.truncf %11 : vector<1x16x16x128xf32> to vector<1x16x16x128xbf16>
    %c0_16 = arith.constant 0 : index
    %c1 = arith.constant 1 : index
    %c1_17 = arith.constant 1 : index
    %c0_18 = arith.constant 0 : index
    %13 = vector.load %arg6[%c0_16, %c1, %c1_17, %c0_18] : memref<1x18x18x128xbf16, #tpu.memory_space<vmem>>, vector<1x16x16x128xbf16>
    tpu.vector_store %arg6[%c0_16, %c1, %c1_17, %c0_18], %12 {strides = array<i32>} : memref<1x18x18x128xbf16, #tpu.memory_space<vmem>>, vector<1x16x16x128xbf16>,
    %c0_19 = arith.constant 0 : index
    %c0_20 = arith.constant 0 : index
    %c0_21 = arith.constant 0 : index
    %c0_22 = arith.constant 0 : index
    %14 = vector.load %arg6[%c0_19, %c0_20, %c0_21, %c0_22] : memref<1x18x18x128xbf16, #tpu.memory_space<vmem>>, vector<1x16x16x128xbf16>
    %15 = vector.shape_cast %14 : vector<1x16x16x128xbf16> to vector<256x128xbf16>
    %c0_23 = arith.constant 0 : index
    %c0_24 = arith.constant 0 : index
    %c1_25 = arith.constant 1 : index
    %c0_26 = arith.constant 0 : index
    %16 = vector.load %arg6[%c0_23, %c0_24, %c1_25, %c0_26] : memref<1x18x18x128xbf16, #tpu.memory_space<vmem>>, vector<1x16x16x128xbf16>
    %17 = vector.shape_cast %16 : vector<1x16x16x128xbf16> to vector<256x128xbf16>
    %c0_27 = arith.constant 0 : index
    %c0_28 = arith.constant 0 : index
    %c2 = arith.constant 2 : index
    %c0_29 = arith.constant 0 : index
    %18 = vector.load %arg6[%c0_27, %c0_28, %c2, %c0_29] : memref<1x18x18x128xbf16, #tpu.memory_space<vmem>>, vector<1x16x16x128xbf16>
    %19 = vector.shape_cast %18 : vector<1x16x16x128xbf16> to vector<256x128xbf16>
    %c0_30 = arith.constant 0 : index
    %c1_31 = arith.constant 1 : index
    %c0_32 = arith.constant 0 : index
    %c0_33 = arith.constant 0 : index
    %20 = vector.load %arg6[%c0_30, %c1_31, %c0_32, %c0_33] : memref<1x18x18x128xbf16, #tpu.memory_space<vmem>>, vector<1x16x16x128xbf16>
    %21 = vector.shape_cast %20 : vector<1x16x16x128xbf16> to vector<256x128xbf16>
    %c0_34 = arith.constant 0 : index
    %c1_35 = arith.constant 1 : index
    %c1_36 = arith.constant 1 : index
    %c0_37 = arith.constant 0 : index
    %22 = vector.load %arg6[%c0_34, %c1_35, %c1_36, %c0_37] : memref<1x18x18x128xbf16, #tpu.memory_space<vmem>>, vector<1x16x16x128xbf16>
    %23 = vector.shape_cast %22 : vector<1x16x16x128xbf16> to vector<256x128xbf16>
    %c0_38 = arith.constant 0 : index
    %c1_39 = arith.constant 1 : index
    %c2_40 = arith.constant 2 : index
    %c0_41 = arith.constant 0 : index
    %24 = vector.load %arg6[%c0_38, %c1_39, %c2_40, %c0_41] : memref<1x18x18x128xbf16, #tpu.memory_space<vmem>>, vector<1x16x16x128xbf16>
    %25 = vector.shape_cast %24 : vector<1x16x16x128xbf16> to vector<256x128xbf16>
    %c0_42 = arith.constant 0 : index
    %c2_43 = arith.constant 2 : index
    %c0_44 = arith.constant 0 : index
    %c0_45 = arith.constant 0 : index
    %26 = vector.load %arg6[%c0_42, %c2_43, %c0_44, %c0_45] : memref<1x18x18x128xbf16, #tpu.memory_space<vmem>>, vector<1x16x16x128xbf16>
    %27 = vector.shape_cast %26 : vector<1x16x16x128xbf16> to vector<256x128xbf16>
    %c0_46 = arith.constant 0 : index
    %c2_47 = arith.constant 2 : index
    %c1_48 = arith.constant 1 : index
    %c0_49 = arith.constant 0 : index
    %28 = vector.load %arg6[%c0_46, %c2_47, %c1_48, %c0_49] : memref<1x18x18x128xbf16, #tpu.memory_space<vmem>>, vector<1x16x16x128xbf16>
    %29 = vector.shape_cast %28 : vector<1x16x16x128xbf16> to vector<256x128xbf16>
    %c0_50 = arith.constant 0 : index
    %c2_51 = arith.constant 2 : index
    %c2_52 = arith.constant 2 : index
    %c0_53 = arith.constant 0 : index
    %30 = vector.load %arg6[%c0_50, %c2_51, %c2_52, %c0_53] : memref<1x18x18x128xbf16, #tpu.memory_space<vmem>>, vector<1x16x16x128xbf16>
    %31 = vector.shape_cast %30 : vector<1x16x16x128xbf16> to vector<256x128xbf16>
    %32 = tpu.concatenate %15, %17, %21, %23 in 1 : vector<256x128xbf16>, vector<256x128xbf16>, vector<256x128xbf16>, vector<256x128xbf16> -> vector<256x512xbf16>
    %c0_54 = arith.constant 0 : index
    %c0_55 = arith.constant 0 : index
    %c0_56 = arith.constant 0 : index
    %33 = vector.load %arg4[%c0_54, %c0_55, %c0_56] : memref<4x512x128xbf16, #tpu.memory_space<vmem>>, vector<1x512x128xbf16>
    %34 = vector.shape_cast %33 : vector<1x512x128xbf16> to vector<512x128xbf16>
    %cst_57 = arith.constant dense<0.000000e+00> : vector<256x128xf32>
    %35 = tpu.matmul %32, %34, %cst_57 {dimension_numbers = #tpu.dot_dimension_numbers<[1], [0], [0], [1], [0, 0, 1, 1], [], []>} : vector<256x512xbf16>, vector<512x128xbf16>, vector<256x128xf32> -> vector<256x128xf32>
    %36 = vector.extract_strided_slice %35 {offsets = [0, 0], sizes = [256, 3], strides = [1, 1]} : vector<256x128xf32> to vector<256x3xf32>
    %37 = math.tanh %36 : vector<256x3xf32>
    %38 = vector.shape_cast %37 : vector<256x3xf32> to vector<16x16x3xf32>
    %c0_58 = arith.constant 0 : index
    %c0_59 = arith.constant 0 : index
    %c0_60 = arith.constant 0 : index
    %c0_61 = arith.constant 0 : index
    %c0_62 = arith.constant 0 : index
    %39 = vector.load %arg5[%c0_58, %c0_59, %c0_60, %c0_61, %c0_62] : memref<2x2x16x16x3xf32, #tpu.memory_space<vmem>>, vector<1x1x16x16x3xf32>
    %40 = vector.shape_cast %39 : vector<1x1x16x16x3xf32> to vector<16x16x3xf32>
    %41 = vector.shape_cast %38 : vector<16x16x3xf32> to vector<1x1x16x16x3xf32>
    tpu.vector_store %arg5[%c0_58, %c0_59, %c0_60, %c0_61, %c0_62], %41 {strides = array<i32>} : memref<2x2x16x16x3xf32, #tpu.memory_space<vmem>>, vector<1x1x16x16x3xf32>,
    %42 = tpu.concatenate %17, %19, %23, %25 in 1 : vector<256x128xbf16>, vector<256x128xbf16>, vector<256x128xbf16>, vector<256x128xbf16> -> vector<256x512xbf16>
    %c1_63 = arith.constant 1 : index
    %c0_64 = arith.constant 0 : index
    %c0_65 = arith.constant 0 : index
    %43 = vector.load %arg4[%c1_63, %c0_64, %c0_65] : memref<4x512x128xbf16, #tpu.memory_space<vmem>>, vector<1x512x128xbf16>
    %44 = vector.shape_cast %43 : vector<1x512x128xbf16> to vector<512x128xbf16>
    %cst_66 = arith.constant dense<0.000000e+00> : vector<256x128xf32>
    %45 = tpu.matmul %42, %44, %cst_66 {dimension_numbers = #tpu.dot_dimension_numbers<[1], [0], [0], [1], [0, 0, 1, 1], [], []>} : vector<256x512xbf16>, vector<512x128xbf16>, vector<256x128xf32> -> vector<256x128xf32>
    %46 = vector.extract_strided_slice %45 {offsets = [0, 0], sizes = [256, 3], strides = [1, 1]} : vector<256x128xf32> to vector<256x3xf32>
    %47 = math.tanh %46 : vector<256x3xf32>
    %48 = vector.shape_cast %47 : vector<256x3xf32> to vector<16x16x3xf32>
    %c0_67 = arith.constant 0 : index
    %c1_68 = arith.constant 1 : index
    %c0_69 = arith.constant 0 : index
    %c0_70 = arith.constant 0 : index
    %c0_71 = arith.constant 0 : index
    %49 = vector.load %arg5[%c0_67, %c1_68, %c0_69, %c0_70, %c0_71] : memref<2x2x16x16x3xf32, #tpu.memory_space<vmem>>, vector<1x1x16x16x3xf32>
    %50 = vector.shape_cast %49 : vector<1x1x16x16x3xf32> to vector<16x16x3xf32>
    %51 = vector.shape_cast %48 : vector<16x16x3xf32> to vector<1x1x16x16x3xf32>
    tpu.vector_store %arg5[%c0_67, %c1_68, %c0_69, %c0_70, %c0_71], %51 {strides = array<i32>} : memref<2x2x16x16x3xf32, #tpu.memory_space<vmem>>, vector<1x1x16x16x3xf32>,
    %52 = tpu.concatenate %21, %23, %27, %29 in 1 : vector<256x128xbf16>, vector<256x128xbf16>, vector<256x128xbf16>, vector<256x128xbf16> -> vector<256x512xbf16>
    %c2_72 = arith.constant 2 : index
    %c0_73 = arith.constant 0 : index
    %c0_74 = arith.constant 0 : index
    %53 = vector.load %arg4[%c2_72, %c0_73, %c0_74] : memref<4x512x128xbf16, #tpu.memory_space<vmem>>, vector<1x512x128xbf16>
    %54 = vector.shape_cast %53 : vector<1x512x128xbf16> to vector<512x128xbf16>
    %cst_75 = arith.constant dense<0.000000e+00> : vector<256x128xf32>
    %55 = tpu.matmul %52, %54, %cst_75 {dimension_numbers = #tpu.dot_dimension_numbers<[1], [0], [0], [1], [0, 0, 1, 1], [], []>} : vector<256x512xbf16>, vector<512x128xbf16>, vector<256x128xf32> -> vector<256x128xf32>
    %56 = vector.extract_strided_slice %55 {offsets = [0, 0], sizes = [256, 3], strides = [1, 1]} : vector<256x128xf32> to vector<256x3xf32>
    %57 = math.tanh %56 : vector<256x3xf32>
    %58 = vector.shape_cast %57 : vector<256x3xf32> to vector<16x16x3xf32>
    %c1_76 = arith.constant 1 : index
    %c0_77 = arith.constant 0 : index
    %c0_78 = arith.constant 0 : index
    %c0_79 = arith.constant 0 : index
    %c0_80 = arith.constant 0 : index
    %59 = vector.load %arg5[%c1_76, %c0_77, %c0_78, %c0_79, %c0_80] : memref<2x2x16x16x3xf32, #tpu.memory_space<vmem>>, vector<1x1x16x16x3xf32>
    %60 = vector.shape_cast %59 : vector<1x1x16x16x3xf32> to vector<16x16x3xf32>
    %61 = vector.shape_cast %58 : vector<16x16x3xf32> to vector<1x1x16x16x3xf32>
    tpu.vector_store %arg5[%c1_76, %c0_77, %c0_78, %c0_79, %c0_80], %61 {strides = array<i32>} : memref<2x2x16x16x3xf32, #tpu.memory_space<vmem>>, vector<1x1x16x16x3xf32>,
    %62 = tpu.concatenate %23, %25, %29, %31 in 1 : vector<256x128xbf16>, vector<256x128xbf16>, vector<256x128xbf16>, vector<256x128xbf16> -> vector<256x512xbf16>
    %c3 = arith.constant 3 : index
    %c0_81 = arith.constant 0 : index
    %c0_82 = arith.constant 0 : index
    %63 = vector.load %arg4[%c3, %c0_81, %c0_82] : memref<4x512x128xbf16, #tpu.memory_space<vmem>>, vector<1x512x128xbf16>
    %64 = vector.shape_cast %63 : vector<1x512x128xbf16> to vector<512x128xbf16>
    %cst_83 = arith.constant dense<0.000000e+00> : vector<256x128xf32>
    %65 = tpu.matmul %62, %64, %cst_83 {dimension_numbers = #tpu.dot_dimension_numbers<[1], [0], [0], [1], [0, 0, 1, 1], [], []>} : vector<256x512xbf16>, vector<512x128xbf16>, vector<256x128xf32> -> vector<256x128xf32>
    %66 = vector.extract_strided_slice %65 {offsets = [0, 0], sizes = [256, 3], strides = [1, 1]} : vector<256x128xf32> to vector<256x3xf32>
    %67 = math.tanh %66 : vector<256x3xf32>
    %68 = vector.shape_cast %67 : vector<256x3xf32> to vector<16x16x3xf32>
    %c1_84 = arith.constant 1 : index
    %c1_85 = arith.constant 1 : index
    %c0_86 = arith.constant 0 : index
    %c0_87 = arith.constant 0 : index
    %c0_88 = arith.constant 0 : index
    %69 = vector.load %arg5[%c1_84, %c1_85, %c0_86, %c0_87, %c0_88] : memref<2x2x16x16x3xf32, #tpu.memory_space<vmem>>, vector<1x1x16x16x3xf32>
    %70 = vector.shape_cast %69 : vector<1x1x16x16x3xf32> to vector<16x16x3xf32>
    %71 = vector.shape_cast %68 : vector<16x16x3xf32> to vector<1x1x16x16x3xf32>
    tpu.vector_store %arg5[%c1_84, %c1_85, %c0_86, %c0_87, %c0_88], %71 {strides = array<i32>} : memref<2x2x16x16x3xf32, #tpu.memory_space<vmem>>, vector<1x1x16x16x3xf32>,
    return
  }
  func.func @transform_0(%arg0: i32) -> (i32, i32, i32, i32) {
    %c0_i32 = arith.constant 0 : i32
    %c0_i32_0 = arith.constant 0 : i32
    %c0_i32_1 = arith.constant 0 : i32
    %c0_i32_2 = arith.constant 0 : i32
    return %arg0, %c0_i32, %c0_i32_0, %c0_i32_1 : i32, i32, i32, i32
  }
  func.func @transform_1(%arg0: i32) -> (i32, i32, i32, i32) {
    %c0_i32 = arith.constant 0 : i32
    %c0_i32_0 = arith.constant 0 : i32
    %c0_i32_1 = arith.constant 0 : i32
    %c0_i32_2 = arith.constant 0 : i32
    %c0_i32_3 = arith.constant 0 : i32
    return %c0_i32, %c0_i32_0, %c0_i32_1, %c0_i32_2 : i32, i32, i32, i32
  }
  func.func @transform_2(%arg0: i32) -> (i32, i32, i32, i32) {
    %c0_i32 = arith.constant 0 : i32
    %c0_i32_0 = arith.constant 0 : i32
    %c0_i32_1 = arith.constant 0 : i32
    %c0_i32_2 = arith.constant 0 : i32
    %c0_i32_3 = arith.constant 0 : i32
    return %c0_i32, %c0_i32_0, %c0_i32_1, %c0_i32_2 : i32, i32, i32, i32
  }
  func.func @transform_3(%arg0: i32) -> (i32, i32, i32) {
    %c0_i32 = arith.constant 0 : i32
    %c0_i32_0 = arith.constant 0 : i32
    %c0_i32_1 = arith.constant 0 : i32
    %c0_i32_2 = arith.constant 0 : i32
    return %c0_i32, %c0_i32_0, %c0_i32_1 : i32, i32, i32
  }
  func.func @transform_4(%arg0: i32) -> (i32, i32, i32, i32, i32) {
    %c0_i32 = arith.constant 0 : i32
    %c0_i32_0 = arith.constant 0 : i32
    %c0_i32_1 = arith.constant 0 : i32
    %c0_i32_2 = arith.constant 0 : i32
    %c0_i32_3 = arith.constant 0 : i32
    return %c0_i32, %c0_i32_0, %arg0, %c0_i32_1, %c0_i32_2 : i32, i32, i32, i32, i32
  }
}

</mosaic_0001>

<bundles_post_ra>
// kernel: dcgan_generator_forward.4
= control target key start
LH: loop header
LB: loop body
LE: loop exit
PB: predicated region body
PF: predicated region fallthrough
CT: control target
= control target key end

     0   :  { %10 = vsyncpa [#allocation3], 0  ;;  %s1924_s15 = smov 0   ;;  %s2034_s0 = inlined_call_operand.vmem [shape: bf16[2,1,128], index: 0, kind: input, shape index: {}]   ;;  %s2035_s1 = inlined_call_operand.hbm [shape: bf16[128,2048], index: 1, kind: input, shape index: {}]   ;;  %s2036_s2 = inlined_call_operand.vmem [shape: bf16[2,16,128], index: 2, kind: output, shape index: {0}]   ;;  %s2037_s3 = inlined_call_operand.vmem [shape: f32[2,1,128], index: 3, kind: output, shape index: {1}]   ;;  %s2038_s4 = inlined_call_operand.vmem [shape: f32[2,1,128], index: 4, kind: output, shape index: {2}]  }
   0x1 LB: > { %s1930_s16 = sadd.s32 4294967295, %s1890_s15   ;;  %p1680_p0 = scmp.ge.s32.totalorder %s1890_s15, 1  ;;  %s1890_s15 = sphi %s1924_s15, %s16_s15  }
   0x2   : > { %p146_p1 = scmp.lt.s32.totalorder %s1890_s15, 3  ;;  %s1892_s17 = smov [#allocation2]  }
   0x3   : > { %s158_s18 = sshll.u32 %s1892_s17, 4  ;;  %p2039_p3 = scmp.eq.s32.totalorder %s1930_s16, 0  ;;  %s159_s18 = int_to_ptr.vmem [resolvable:$true] %s158_s18 }
   0x4   : > { %p1934_p2 = pnand %p1680_p0, %p146_p1  ;;  %s1852_s23 = scalar_lea.hbm %s2035_s1, 16384 }
   0x5   : > { %p1853_p6 = scmp.ne.s32.totalorder %s2035_s1, %s1852_s23  ;;  %p1859_p10 = scmp.lt.u32.totalorder %s1852_s23, %s2035_s1 }
   0x6   : > { %s2041_s19 = scalar_select %p1934_p2, 1, 0 }
   0x7   : > { %p1831_p4 = pneg %p1934_p2 }
   0x9   : > { %p1943_p5 = pnand %p2039_p3, %p1831_p4 }
   0xb   : > { %p1854_p7 = pneg %p1943_p5 }
   0xd   : > { %p1855_p8 = pnand %p1854_p7, %p1853_p6 }
   0xf   : > { %p1856_p9 = pneg %p1855_p8 }
  0x11   : > { %p1861_p11 = pnand %p1859_p10, %p1856_p9 }
  0x13   : > { %1864 = shalt.err (!%p1861_p11)
}
  0x14   : > { %s1865_s28 = scalar_lea.vmem %s159_s18, 16384  ;;  %p1873_p1 = scmp.lt.s32.totalorder %s159_s18, %s159_s18 }
  0x15   : > { %p1866_p12 = scmp.ne.s32.totalorder %s159_s18, %s1865_s28  ;;  %p1874_p4 = scmp.lt.s32.totalorder %s1865_s28, %s1865_s28 }
  0x17   : > { %p1868_p13 = pnand %p1866_p12, %p1854_p7  ;;  %p1875_p3 = por %p1874_p4, %p1873_p1 }
  0x19   : > { %p1869_p0 = pneg %p1868_p13 }
  0x1b   : > { %p1876_p2 = pnand %p1875_p3, %p1869_p0 }
  0x1d   : > { %1879 = shalt.err (!%p1876_p2)
}
  0x1e   : > { %s1893_s29 = smov 1024   ;;  %s1894_s30 = smov 64  }
  0x1f   : > { %1834 = dma.hbm_to_vmem [thread:$0]  (!%p1943_p5), %s2035_s1, 16384, %s159_s18, [#allocation3], %s1893_s29, %s1893_s29, %s1894_s30  }
  0x20   : > { %p2043_p6 = scmp.ne.s32.totalorder %s2041_s19, 0 }
  0x21   : > { %p2044_p8 = scmp.eq.s32.totalorder (!%p2043_p6), %s1930_s16, 0 }
  0x22   : > { %180 = sbr.rel (%p2043_p6) target bundleno = 414 (0x19e), region = 28 }
  0x29   : > { %1885 = dma.done.wait (%p2044_p8), [#allocation3], 16384   ;;  %p2045_p7 = pmov %p2044_p8 }
  0x2a   : > { %v1895_v0 = vmov 0   ;;  %v226_v1 = vld [vmem:[#allocation2] sm:$0xff]  ;;  %v227_v3 = vld [vmem:[#allocation2 + $0x8] sm:$0xff]  ;;  %p210_p2 = scmp.lt.s32.totalorder %s1930_s16, 1  ;;  %v228_v63 = vld [vmem:[#allocation2 + $0x10] sm:$0xff] }
  0x2b   : > { %1887 = vsyncadd (%p2045_p7), [#allocation3], 4294950912  ;;  %1026 = vmatprep.mubr.bf16.mxu0 %v1895_v0  ;;  %1067 = vmatprep.mubr.bf16.mxu1 %v1895_v0  ;;  %v234_v2 = vld [vmem:[#allocation2 + $0x40] sm:$0xff]  ;;  %v235_v5 = vld [vmem:[#allocation2 + $0x48] sm:$0xff] }
  0x2c   : > { %v1688_v4 = vcombine.high %v226_v1, %v234_v2  ;;  %v1687_v6 = vcombine.low %v226_v1, %v234_v2  ;;  %v242_v7 = vld [vmem:[#allocation2 + $0x80] sm:$0xff]  ;;  %v1690_v9 = vcombine.high %v227_v3, %v235_v5  ;;  %v1689_v10 = vcombine.low %v227_v3, %v235_v5  ;;  %v243_v12 = vld [vmem:[#allocation2 + $0x88] sm:$0xff]  ;;  %s2047_s16 = smov (!%p210_p2, %s1930_s16), 1  ;;  %v236_v1 = vld [vmem:[#allocation2 + $0x50] sm:$0xff] }
  0x2d   : > { %v250_v8 = vld [vmem:[#allocation2 + $0xc0] sm:$0xff]  ;;  %v251_v13 = vld [vmem:[#allocation2 + $0xc8] sm:$0xff]  ;;  %v229_v2 = vld [vmem:[#allocation2 + $0x18] sm:$0xff]  ;;  %s212_s9 = scalar_lea.vmem %s2034_s0, %s2047_s16  ;;  %s1819_s10 = sshll.u32 %s2047_s16, 3 }
  0x2e   : > { %v1704_v11 = vcombine.high %v242_v7, %v250_v8  ;;  %v258_v14 = vld [vmem:[#allocation2 + $0x100] sm:$0xff]  ;;  %994 = vmatprep.subr.bf16.mxu0 %v1688_v4  ;;  %v1706_v15 = vcombine.high %v243_v12, %v251_v13  ;;  %v259_v17 = vld [vmem:[#allocation2 + $0x108] sm:$0xff]  ;;  %1035 = vmatprep.subr.bf16.mxu1 %v1690_v9  ;;  %v1703_v19 = vcombine.low %v242_v7, %v250_v8  ;;  %v237_v3 = vld [vmem:[#allocation2 + $0x58] sm:$0xff]  ;;  %s217_s13 = scalar_lea.vmem %s2036_s2, %s1819_s10  ;;  %s220_s18 = scalar_lea.vmem %s2037_s3, %s2047_s16 }
  0x2f   : > { %v266_v16 = vld [vmem:[#allocation2 + $0x140] sm:$0xff]  ;;  %v267_v18 = vld [vmem:[#allocation2 + $0x148] sm:$0xff]  ;;  %995 = vmatpush1.bf16.msra.mxu0 %v1687_v6  ;;  %1036 = vmatpush1.bf16.msra.mxu1 %v1689_v10  ;;  %v1705_v20 = vcombine.low %v243_v12, %v251_v13  ;;  %v1692_v6 = vcombine.high %v228_v63, %v236_v1  ;;  %v1694_v7 = vcombine.high %v229_v2, %v237_v3  ;;  %v244_v8 = vld [vmem:[#allocation2 + $0x90] sm:$0xff]  ;;  %s223_s21 = scalar_lea.vmem %s2038_s4, %s2047_s16 }
  0x30   : > { %996 = vmatprep.subr.bf16.mxu0 %v1704_v11  ;;  %v1720_v21 = vcombine.high %v258_v14, %v266_v16  ;;  %1037 = vmatprep.subr.bf16.mxu1 %v1706_v15  ;;  %v1722_v22 = vcombine.high %v259_v17, %v267_v18  ;;  %v274_v23 = vld [vmem:[#allocation2 + $0x180] sm:$0xff]  ;;  %v275_v25 = vld [vmem:[#allocation2 + $0x188] sm:$0xff]  ;;  %v1719_v27 = vcombine.low %v258_v14, %v266_v16  ;;  %v252_v9 = vld [vmem:[#allocation2 + $0xd0] sm:$0xff] }
  0x31   : > { %v282_v24 = vld [vmem:[#allocation2 + $0x1c0] sm:$0xff]  ;;  %v283_v26 = vld [vmem:[#allocation2 + $0x1c8] sm:$0xff]  ;;  %v1721_v28 = vcombine.low %v259_v17, %v267_v18  ;;  %v245_v10 = vld [vmem:[#allocation2 + $0x98] sm:$0xff]  ;;  %v1691_v13 = vcombine.low %v228_v63, %v236_v1  ;;  %v1693_v14 = vcombine.low %v229_v2, %v237_v3  ;;  %v1708_v15 = vcombine.high %v244_v8, %v252_v9 }
  0x32   : > { %v1736_v29 = vcombine.high %v274_v23, %v282_v24  ;;  %v1738_v30 = vcombine.high %v275_v25, %v283_v26  ;;  %v290_v31 = vld [vmem:[#allocation2 + $0x200] sm:$0xff]  ;;  %v291_v33 = vld [vmem:[#allocation2 + $0x208] sm:$0xff]  ;;  %v1735_v35 = vcombine.low %v274_v23, %v282_v24  ;;  %v1737_v36 = vcombine.low %v275_v25, %v283_v26  ;;  %v253_v11 = vld [vmem:[#allocation2 + $0xd8] sm:$0xff] }
  0x33   : > { %997 = vmatpush1.bf16.msra.mxu0 %v1703_v19  ;;  %1038 = vmatpush1.bf16.msra.mxu1 %v1705_v20  ;;  %v298_v32 = vld [vmem:[#allocation2 + $0x240] sm:$0xff]  ;;  %v299_v34 = vld [vmem:[#allocation2 + $0x248] sm:$0xff]  ;;  %v1710_v16 = vcombine.high %v245_v10, %v253_v11  ;;  %v260_v17 = vld [vmem:[#allocation2 + $0x110] sm:$0xff] }
  0x34   : > { %998 = vmatprep.subr.bf16.mxu0 %v1720_v21  ;;  %1039 = vmatprep.subr.bf16.mxu1 %v1722_v22  ;;  %v1752_v37 = vcombine.high %v290_v31, %v298_v32  ;;  %v1754_v38 = vcombine.high %v291_v33, %v299_v34  ;;  %v306_v39 = vld [vmem:[#allocation2 + $0x280] sm:$0xff]  ;;  %v307_v41 = vld [vmem:[#allocation2 + $0x288] sm:$0xff]  ;;  %v1751_v43 = vcombine.low %v290_v31, %v298_v32  ;;  %v268_v18 = vld [vmem:[#allocation2 + $0x150] sm:$0xff] }
  0x35   : > { %v314_v40 = vld [vmem:[#allocation2 + $0x2c0] sm:$0xff]  ;;  %v315_v42 = vld [vmem:[#allocation2 + $0x2c8] sm:$0xff]  ;;  %v1753_v44 = vcombine.low %v291_v33, %v299_v34  ;;  %v261_v19 = vld [vmem:[#allocation2 + $0x118] sm:$0xff]  ;;  %v1707_v21 = vcombine.low %v244_v8, %v252_v9  ;;  %v1709_v22 = vcombine.low %v245_v10, %v253_v11  ;;  %v1724_v23 = vcombine.high %v260_v17, %v268_v18 }
  0x36   : > { %v1768_v45 = vcombine.high %v306_v39, %v314_v40  ;;  %v1770_v46 = vcombine.high %v307_v41, %v315_v42  ;;  %v322_v47 = vld [vmem:[#allocation2 + $0x300] sm:$0xff]  ;;  %v323_v49 = vld [vmem:[#allocation2 + $0x308] sm:$0xff]  ;;  %v1767_v51 = vcombine.low %v306_v39, %v314_v40  ;;  %v1769_v52 = vcombine.low %v307_v41, %v315_v42  ;;  %v269_v20 = vld [vmem:[#allocation2 + $0x158] sm:$0xff] }
  0x37   : > { %999 = vmatpush1.bf16.msra.mxu0 %v1719_v27  ;;  %1040 = vmatpush1.bf16.msra.mxu1 %v1721_v28  ;;  %v330_v48 = vld [vmem:[#allocation2 + $0x340] sm:$0xff]  ;;  %v331_v50 = vld [vmem:[#allocation2 + $0x348] sm:$0xff]  ;;  %v1726_v24 = vcombine.high %v261_v19, %v269_v20  ;;  %v276_v25 = vld [vmem:[#allocation2 + $0x190] sm:$0xff] }
  0x38   : > { %1000 = vmatprep.subr.bf16.mxu0 %v1736_v29  ;;  %1041 = vmatprep.subr.bf16.mxu1 %v1738_v30  ;;  %v1784_v53 = vcombine.high %v322_v47, %v330_v48  ;;  %v1786_v54 = vcombine.high %v323_v49, %v331_v50  ;;  %v338_v55 = vld [vmem:[#allocation2 + $0x380] sm:$0xff]  ;;  %v339_v57 = vld [vmem:[#allocation2 + $0x388] sm:$0xff]  ;;  %v1783_v59 = vcombine.low %v322_v47, %v330_v48  ;;  %v284_v26 = vld [vmem:[#allocation2 + $0x1d0] sm:$0xff] }
  0x39   : > { %v346_v56 = vld [vmem:[#allocation2 + $0x3c0] sm:$0xff]  ;;  %v347_v58 = vld [vmem:[#allocation2 + $0x3c8] sm:$0xff]  ;;  %v1785_v60 = vcombine.low %v323_v49, %v331_v50  ;;  %v277_v27 = vld [vmem:[#allocation2 + $0x198] sm:$0xff]  ;;  %v1723_v29 = vcombine.low %v260_v17, %v268_v18  ;;  %v1725_v30 = vcombine.low %v261_v19, %v269_v20  ;;  %v1740_v31 = vcombine.high %v276_v25, %v284_v26 }
  0x3a   : > { %v1800_v61 = vcombine.high %v338_v55, %v346_v56  ;;  %v1802_v62 = vcombine.high %v339_v57, %v347_v58  ;;  %v1799_v4 = vcombine.low %v338_v55, %v346_v56  ;;  %v1801_v5 = vcombine.low %v339_v57, %v347_v58  ;;  %v1979_v12 = vld [vmem:[%s212_s9] sm:$0x1]  ;;  %v285_v28 = vld [vmem:[#allocation2 + $0x1d8] sm:$0xff]  ;;  %v292_v33 = vld [vmem:[#allocation2 + $0x210] sm:$0xff] }
  0x3b   : > { %1001 = vmatpush1.bf16.msra.mxu0 %v1735_v35  ;;  %1042 = vmatpush1.bf16.msra.mxu1 %v1737_v36  ;;  %v1742_v32 = vcombine.high %v277_v27, %v285_v28  ;;  %v300_v34 = vld [vmem:[#allocation2 + $0x250] sm:$0xff]  ;;  %v293_v35 = vld [vmem:[#allocation2 + $0x218] sm:$0xff]  ;;  %v230_v2 = vld [vmem:[#allocation2 + $0x20] sm:$0xff] }
  0x3c   : > { %1002 = vmatprep.subr.bf16.mxu0 %v1752_v37  ;;  %1043 = vmatprep.subr.bf16.mxu1 %v1754_v38  ;;  %v301_v36 = vld [vmem:[#allocation2 + $0x258] sm:$0xff]  ;;  %v1739_v37 = vcombine.low %v276_v25, %v284_v26  ;;  %v1741_v38 = vcombine.low %v277_v27, %v285_v28  ;;  %v1756_v39 = vcombine.high %v292_v33, %v300_v34  ;;  %v308_v41 = vld [vmem:[#allocation2 + $0x290] sm:$0xff]  ;;  %v238_v3 = vld [vmem:[#allocation2 + $0x60] sm:$0xff] }
  0x3d   : > { %v1758_v40 = vcombine.high %v293_v35, %v301_v36  ;;  %v316_v42 = vld [vmem:[#allocation2 + $0x2d0] sm:$0xff]  ;;  %v1696_v8 = vcombine.high %v230_v2, %v238_v3  ;;  %v246_v10 = vld [vmem:[#allocation2 + $0xa0] sm:$0xff] }
  0x3e   : > { %v1772_v47 = vcombine.high %v308_v41, %v316_v42  ;;  %v324_v49 = vld [vmem:[#allocation2 + $0x310] sm:$0xff]  ;;  %v254_v11 = vld [vmem:[#allocation2 + $0xe0] sm:$0xff] }
  0x3f   : > { %1003 = vmatpush1.bf16.msra.mxu0 %v1751_v43  ;;  %1044 = vmatpush1.bf16.msra.mxu1 %v1753_v44  ;;  %v309_v43 = vld [vmem:[#allocation2 + $0x298] sm:$0xff]  ;;  %v332_v50 = vld [vmem:[#allocation2 + $0x350] sm:$0xff]  ;;  %v1712_v17 = vcombine.high %v246_v10, %v254_v11  ;;  %v262_v19 = vld [vmem:[#allocation2 + $0x120] sm:$0xff] }
  0x40   : > { %1004 = vmatprep.subr.bf16.mxu0 %v1768_v45  ;;  %1045 = vmatprep.subr.bf16.mxu1 %v1770_v46  ;;  %v317_v44 = vld [vmem:[#allocation2 + $0x2d8] sm:$0xff]  ;;  %v1755_v45 = vcombine.low %v292_v33, %v300_v34  ;;  %v1757_v46 = vcombine.low %v293_v35, %v301_v36  ;;  %v1788_v55 = vcombine.high %v324_v49, %v332_v50  ;;  %v340_v57 = vld [vmem:[#allocation2 + $0x390] sm:$0xff]  ;;  %v270_v20 = vld [vmem:[#allocation2 + $0x160] sm:$0xff] }
  0x41   : > { %v1774_v48 = vcombine.high %v309_v43, %v317_v44  ;;  %v348_v58 = vld [vmem:[#allocation2 + $0x3d0] sm:$0xff]  ;;  %v1728_v25 = vcombine.high %v262_v19, %v270_v20  ;;  %v278_v27 = vld [vmem:[#allocation2 + $0x1a0] sm:$0xff] }
  0x42   : > { %v1804_v63 = vcombine.high %v340_v57, %v348_v58  ;;  %v286_v28 = vld [vmem:[#allocation2 + $0x1e0] sm:$0xff] }
  0x43   : > { %1005 = vmatpush1.bf16.msra.mxu0 %v1767_v51  ;;  %1046 = vmatpush1.bf16.msra.mxu1 %v1769_v52  ;;  %v325_v51 = vld [vmem:[#allocation2 + $0x318] sm:$0xff]  ;;  %v1744_v33 = vcombine.high %v278_v27, %v286_v28  ;;  %v294_v35 = vld [vmem:[#allocation2 + $0x220] sm:$0xff] }
  0x44   : > { %1006 = vmatprep.subr.bf16.mxu0 %v1784_v53  ;;  %1047 = vmatprep.subr.bf16.mxu1 %v1786_v54  ;;  %v333_v52 = vld [vmem:[#allocation2 + $0x358] sm:$0xff]  ;;  %v1771_v53 = vcombine.low %v308_v41, %v316_v42  ;;  %v1773_v54 = vcombine.low %v309_v43, %v317_v44  ;;  %v302_v36 = vld [vmem:[#allocation2 + $0x260] sm:$0xff] }
  0x45   : > { %v1790_v56 = vcombine.high %v325_v51, %v333_v52  ;;  %v1760_v41 = vcombine.high %v294_v35, %v302_v36  ;;  %v310_v43 = vld [vmem:[#allocation2 + $0x2a0] sm:$0xff] }
  0x46   : > { %v318_v44 = vld [vmem:[#allocation2 + $0x2e0] sm:$0xff] }
  0x47   : > { %1007 = vmatpush1.bf16.msra.mxu0 %v1783_v59  ;;  %1048 = vmatpush1.bf16.msra.mxu1 %v1785_v60  ;;  %v341_v59 = vld [vmem:[#allocation2 + $0x398] sm:$0xff] }
  0x48   : > { %1008 = vmatprep.subr.bf16.mxu0 %v1800_v61  ;;  %1049 = vmatprep.subr.bf16.mxu1 %v1802_v62  ;;  %v349_v60 = vld [vmem:[#allocation2 + $0x3d8] sm:$0xff]  ;;  %v1787_v61 = vcombine.low %v324_v49, %v332_v50  ;;  %v1789_v62 = vcombine.low %v325_v51, %v333_v52  ;;  %v1776_v49 = vcombine.high %v310_v43, %v318_v44  ;;  %v326_v51 = vld [vmem:[#allocation2 + $0x320] sm:$0xff] }
  0x49   : > { %v1806_v1 = vcombine.high %v341_v59, %v349_v60  ;;  %v334_v52 = vld [vmem:[#allocation2 + $0x360] sm:$0xff] }
  0x4b   : > { %1009 = vmatpush1.bf16.msra.mxu0 %v1799_v4  ;;  %1050 = vmatpush1.bf16.msra.mxu1 %v1801_v5  ;;  %v231_v4 = vld [vmem:[#allocation2 + $0x28] sm:$0xff] }
  0x4c   : > { %1076 = vmatprep.subr.bf16.mxu0 %v1692_v6  ;;  %1117 = vmatprep.subr.bf16.mxu1 %v1694_v7  ;;  %v239_v5 = vld [vmem:[#allocation2 + $0x68] sm:$0xff]  ;;  %v1803_v6 = vcombine.low %v340_v57, %v348_v58  ;;  %v1805_v7 = vcombine.low %v341_v59, %v349_v60  ;;  %v1792_v57 = vcombine.high %v326_v51, %v334_v52  ;;  %v342_v59 = vld [vmem:[#allocation2 + $0x3a0] sm:$0xff] }
  0x4d   : > { %v1698_v9 = vcombine.high %v231_v4, %v239_v5  ;;  %v350_v60 = vld [vmem:[#allocation2 + $0x3e0] sm:$0xff] }
  0x4e   : > { %1027 = vmatmul.mubr.bf16.vlgmr.msra.gmra.mrb[0].mxu0 %v1979_v12  ;;  %1068 = vmatmul.mubr.bf16.vlgmr.msra.gmra.mrb[0].mxu1 %v1979_v12 }
  0x4f   : > { %1077 = vmatpush1.bf16.msra.mxu0 %v1691_v13  ;;  %1118 = vmatpush1.bf16.msra.mxu1 %v1693_v14  ;;  %v247_v13 = vld [vmem:[#allocation2 + $0xa8] sm:$0xff] }
  0x50   : > { %1078 = vmatprep.subr.bf16.mxu0 %v1708_v15  ;;  %1119 = vmatprep.subr.bf16.mxu1 %v1710_v16  ;;  %v255_v14 = vld [vmem:[#allocation2 + $0xe8] sm:$0xff]  ;;  %v1695_v15 = vcombine.low %v230_v2, %v238_v3  ;;  %v1697_v16 = vcombine.low %v231_v4, %v239_v5  ;;  %v1808_v2 = vcombine.high %v342_v59, %v350_v60  ;;  %v232_v4 = vld [vmem:[#allocation2 + $0x30] sm:$0xff] }
  0x51   : > { %1108 = vmatprep.mubr.bf16.mxu0 %v1895_v0  ;;  %1149 = vmatprep.mubr.bf16.mxu1 %v1895_v0  ;;  %v1714_v18 = vcombine.high %v247_v13, %v255_v14  ;;  %v240_v5 = vld [vmem:[#allocation2 + $0x70] sm:$0xff] }
  0x53   : > { %1079 = vmatpush1.bf16.msra.mxu0 %v1707_v21  ;;  %1120 = vmatpush1.bf16.msra.mxu1 %v1709_v22  ;;  %v263_v21 = vld [vmem:[#allocation2 + $0x128] sm:$0xff] }
  0x54   : > { %1080 = vmatprep.subr.bf16.mxu0 %v1724_v23  ;;  %1121 = vmatprep.subr.bf16.mxu1 %v1726_v24  ;;  %v271_v22 = vld [vmem:[#allocation2 + $0x168] sm:$0xff]  ;;  %v1711_v23 = vcombine.low %v246_v10, %v254_v11  ;;  %v1713_v24 = vcombine.low %v247_v13, %v255_v14  ;;  %v1700_v10 = vcombine.high %v232_v4, %v240_v5  ;;  %v248_v13 = vld [vmem:[#allocation2 + $0xb0] sm:$0xff] }
  0x55   : > { %v1730_v26 = vcombine.high %v263_v21, %v271_v22  ;;  %v256_v14 = vld [vmem:[#allocation2 + $0xf0] sm:$0xff] }
  0x57   : > { %1081 = vmatpush1.bf16.msra.mxu0 %v1723_v29  ;;  %1122 = vmatpush1.bf16.msra.mxu1 %v1725_v30  ;;  %v279_v29 = vld [vmem:[#allocation2 + $0x1a8] sm:$0xff] }
  0x58   : > { %1082 = vmatprep.subr.bf16.mxu0 %v1740_v31  ;;  %1123 = vmatprep.subr.bf16.mxu1 %v1742_v32  ;;  %v287_v30 = vld [vmem:[#allocation2 + $0x1e8] sm:$0xff]  ;;  %v1727_v31 = vcombine.low %v262_v19, %v270_v20  ;;  %v1729_v32 = vcombine.low %v263_v21, %v271_v22  ;;  %v1716_v19 = vcombine.high %v248_v13, %v256_v14  ;;  %v264_v21 = vld [vmem:[#allocation2 + $0x130] sm:$0xff] }
  0x59   : > { %v1746_v34 = vcombine.high %v279_v29, %v287_v30  ;;  %v272_v22 = vld [vmem:[#allocation2 + $0x170] sm:$0xff] }
  0x5b   : > { %1083 = vmatpush1.bf16.msra.mxu0 %v1739_v37  ;;  %1124 = vmatpush1.bf16.msra.mxu1 %v1741_v38  ;;  %v295_v37 = vld [vmem:[#allocation2 + $0x228] sm:$0xff] }
  0x5c   : > { %1084 = vmatprep.subr.bf16.mxu0 %v1756_v39  ;;  %1125 = vmatprep.subr.bf16.mxu1 %v1758_v40  ;;  %v303_v38 = vld [vmem:[#allocation2 + $0x268] sm:$0xff]  ;;  %v1743_v39 = vcombine.low %v278_v27, %v286_v28  ;;  %v1745_v40 = vcombine.low %v279_v29, %v287_v30  ;;  %v1732_v27 = vcombine.high %v264_v21, %v272_v22  ;;  %v280_v29 = vld [vmem:[#allocation2 + $0x1b0] sm:$0xff] }
  0x5d   : > { %v1762_v42 = vcombine.high %v295_v37, %v303_v38  ;;  %v288_v30 = vld [vmem:[#allocation2 + $0x1f0] sm:$0xff] }
  0x5f   : > { %1085 = vmatpush1.bf16.msra.mxu0 %v1755_v45  ;;  %1126 = vmatpush1.bf16.msra.mxu1 %v1757_v46  ;;  %v311_v45 = vld [vmem:[#allocation2 + $0x2a8] sm:$0xff] }
  0x60   : > { %1086 = vmatprep.subr.bf16.mxu0 %v1772_v47  ;;  %1127 = vmatprep.subr.bf16.mxu1 %v1774_v48  ;;  %v319_v46 = vld [vmem:[#allocation2 + $0x2e8] sm:$0xff]  ;;  %v1759_v47 = vcombine.low %v294_v35, %v302_v36  ;;  %v1761_v48 = vcombine.low %v295_v37, %v303_v38  ;;  %v1748_v35 = vcombine.high %v280_v29, %v288_v30  ;;  %v296_v37 = vld [vmem:[#allocation2 + $0x230] sm:$0xff] }
  0x61   : > { %v1778_v50 = vcombine.high %v311_v45, %v319_v46  ;;  %v304_v38 = vld [vmem:[#allocation2 + $0x270] sm:$0xff] }
  0x63   : > { %1087 = vmatpush1.bf16.msra.mxu0 %v1771_v53  ;;  %1128 = vmatpush1.bf16.msra.mxu1 %v1773_v54  ;;  %v327_v53 = vld [vmem:[#allocation2 + $0x328] sm:$0xff] }
  0x64   : > { %1088 = vmatprep.subr.bf16.mxu0 %v1788_v55  ;;  %1129 = vmatprep.subr.bf16.mxu1 %v1790_v56  ;;  %v335_v54 = vld [vmem:[#allocation2 + $0x368] sm:$0xff]  ;;  %v1775_v55 = vcombine.low %v310_v43, %v318_v44  ;;  %v1777_v56 = vcombine.low %v311_v45, %v319_v46  ;;  %v1764_v43 = vcombine.high %v296_v37, %v304_v38  ;;  %v312_v44 = vld [vmem:[#allocation2 + $0x2b0] sm:$0xff]  ;;  %v313_v46 = vld [vmem:[#allocation2 + $0x2b8] sm:$0xff] }
  0x65   : > { %v1794_v58 = vcombine.high %v327_v53, %v335_v54  ;;  %v320_v45 = vld [vmem:[#allocation2 + $0x2f0] sm:$0xff] }
  0x67   : > { %1089 = vmatpush1.bf16.msra.mxu0 %v1787_v61  ;;  %1130 = vmatpush1.bf16.msra.mxu1 %v1789_v62  ;;  %v343_v61 = vld [vmem:[#allocation2 + $0x3a8] sm:$0xff] }
  0x68   : > { %1090 = vmatprep.subr.bf16.mxu0 %v1804_v63  ;;  %1131 = vmatprep.subr.bf16.mxu1 %v1806_v1  ;;  %v351_v62 = vld [vmem:[#allocation2 + $0x3e8] sm:$0xff]  ;;  %v1791_v63 = vcombine.low %v326_v51, %v334_v52  ;;  %v1793_v1 = vcombine.low %v327_v53, %v335_v54  ;;  %v328_v52 = vld [vmem:[#allocation2 + $0x330] sm:$0xff]  ;;  %v329_v54 = vld [vmem:[#allocation2 + $0x338] sm:$0xff] }
  0x69   : > { %v1810_v3 = vcombine.high %v343_v61, %v351_v62  ;;  %v336_v53 = vld [vmem:[#allocation2 + $0x370] sm:$0xff] }
  0x6b   : > { %1091 = vmatpush1.bf16.msra.mxu0 %v1803_v6  ;;  %1132 = vmatpush1.bf16.msra.mxu1 %v1805_v7  ;;  %v233_v6 = vld [vmem:[#allocation2 + $0x38] sm:$0xff] }
  0x6c   : > { %1158 = vmatprep.subr.bf16.mxu0 %v1696_v8  ;;  %1199 = vmatprep.subr.bf16.mxu1 %v1698_v9  ;;  %v241_v7 = vld [vmem:[#allocation2 + $0x78] sm:$0xff]  ;;  %v1807_v8 = vcombine.low %v342_v59, %v350_v60  ;;  %v1809_v9 = vcombine.low %v343_v61, %v351_v62  ;;  %v344_v60 = vld [vmem:[#allocation2 + $0x3b0] sm:$0xff] }
  0x6d   : > { %v1702_v11 = vcombine.high %v233_v6, %v241_v7  ;;  %v352_v61 = vld [vmem:[#allocation2 + $0x3f0] sm:$0xff]  ;;  %v345_v62 = vld [vmem:[#allocation2 + $0x3b8] sm:$0xff] }
  0x6e   : > { %1109 = vmatmul.mubr.bf16.vlgmr.msra.gmra.mrb[4].mxu0 %v1979_v12  ;;  %1150 = vmatmul.mubr.bf16.vlgmr.msra.gmra.mrb[4].mxu1 %v1979_v12 }
  0x6f   : > { %1159 = vmatpush1.bf16.msra.mxu0 %v1695_v15  ;;  %1200 = vmatpush1.bf16.msra.mxu1 %v1697_v16  ;;  %v249_v15 = vld [vmem:[#allocation2 + $0xb8] sm:$0xff] }
  0x70   : > { %1160 = vmatprep.subr.bf16.mxu0 %v1712_v17  ;;  %1201 = vmatprep.subr.bf16.mxu1 %v1714_v18  ;;  %v257_v16 = vld [vmem:[#allocation2 + $0xf8] sm:$0xff]  ;;  %v1699_v17 = vcombine.low %v232_v4, %v240_v5  ;;  %v1701_v18 = vcombine.low %v233_v6, %v241_v7  ;;  %v1811_v5 = vcombine.low %v344_v60, %v352_v61  ;;  %v1896_v7 = vmov 1966171168  }
  0x71   : > { %1190 = vmatprep.mubr.bf16.mxu0 %v1895_v0  ;;  %1231 = vmatprep.mubr.bf16.mxu1 %v1895_v0  ;;  %v1718_v20 = vcombine.high %v249_v15, %v257_v16 }
  0x73   : > { %1161 = vmatpush1.bf16.msra.mxu0 %v1711_v23  ;;  %1202 = vmatpush1.bf16.msra.mxu1 %v1713_v24  ;;  %v265_v23 = vld [vmem:[#allocation2 + $0x138] sm:$0xff] }
  0x74   : > { %1162 = vmatprep.subr.bf16.mxu0 %v1728_v25  ;;  %1203 = vmatprep.subr.bf16.mxu1 %v1730_v26  ;;  %v273_v24 = vld [vmem:[#allocation2 + $0x178] sm:$0xff]  ;;  %v1715_v25 = vcombine.low %v248_v13, %v256_v14  ;;  %v1717_v26 = vcombine.low %v249_v15, %v257_v16 }
  0x75   : > { %v1734_v28 = vcombine.high %v265_v23, %v273_v24 }
  0x77   : > { %1163 = vmatpush1.bf16.msra.mxu0 %v1727_v31  ;;  %1204 = vmatpush1.bf16.msra.mxu1 %v1729_v32  ;;  %v281_v31 = vld [vmem:[#allocation2 + $0x1b8] sm:$0xff] }
  0x78   : > { %1164 = vmatprep.subr.bf16.mxu0 %v1744_v33  ;;  %1205 = vmatprep.subr.bf16.mxu1 %v1746_v34  ;;  %v289_v32 = vld [vmem:[#allocation2 + $0x1f8] sm:$0xff]  ;;  %v1731_v33 = vcombine.low %v264_v21, %v272_v22  ;;  %v1733_v34 = vcombine.low %v265_v23, %v273_v24 }
  0x79   : > { %v1750_v36 = vcombine.high %v281_v31, %v289_v32 }
  0x7b   : > { %1165 = vmatpush1.bf16.msra.mxu0 %v1743_v39  ;;  %1206 = vmatpush1.bf16.msra.mxu1 %v1745_v40  ;;  %v297_v39 = vld [vmem:[#allocation2 + $0x238] sm:$0xff] }
  0x7c   : > { %1166 = vmatprep.subr.bf16.mxu0 %v1760_v41  ;;  %1207 = vmatprep.subr.bf16.mxu1 %v1762_v42  ;;  %v305_v40 = vld [vmem:[#allocation2 + $0x278] sm:$0xff]  ;;  %v1747_v41 = vcombine.low %v280_v29, %v288_v30  ;;  %v1749_v42 = vcombine.low %v281_v31, %v289_v32 }
  0x7f   : > { %1167 = vmatpush1.bf16.msra.mxu0 %v1759_v47  ;;  %1208 = vmatpush1.bf16.msra.mxu1 %v1761_v48  ;;  %v321_v47 = vld [vmem:[#allocation2 + $0x2f8] sm:$0xff]  ;;  %v1763_v48 = vcombine.low %v296_v37, %v304_v38 }
  0x80   : > { %1168 = vmatprep.subr.bf16.mxu0 %v1776_v49  ;;  %1209 = vmatprep.subr.bf16.mxu1 %v1778_v50  ;;  %v1765_v49 = vcombine.low %v297_v39, %v305_v40  ;;  %v1780_v50 = vcombine.high %v312_v44, %v320_v45  ;;  %v1782_v51 = vcombine.high %v313_v46, %v321_v47 }
  0x83   : > { %1169 = vmatpush1.bf16.msra.mxu0 %v1775_v55  ;;  %1210 = vmatpush1.bf16.msra.mxu1 %v1777_v56  ;;  %v337_v55 = vld [vmem:[#allocation2 + $0x378] sm:$0xff]  ;;  %v1779_v56 = vcombine.low %v312_v44, %v320_v45 }
  0x84   : > { %1170 = vmatprep.subr.bf16.mxu0 %v1792_v57  ;;  %1211 = vmatprep.subr.bf16.mxu1 %v1794_v58  ;;  %v1781_v57 = vcombine.low %v313_v46, %v321_v47  ;;  %v1796_v58 = vcombine.high %v328_v52, %v336_v53  ;;  %v1798_v59 = vcombine.high %v329_v54, %v337_v55 }
  0x87   : > { %1171 = vmatpush1.bf16.msra.mxu0 %v1791_v63  ;;  %1212 = vmatpush1.bf16.msra.mxu1 %v1793_v1  ;;  %v353_v63 = vld [vmem:[#allocation2 + $0x3f8] sm:$0xff]  ;;  %v1795_v1 = vcombine.low %v328_v52, %v336_v53 }
  0x88   : > { %1172 = vmatprep.subr.bf16.mxu0 %v1808_v2  ;;  %1213 = vmatprep.subr.bf16.mxu1 %v1810_v3  ;;  %v1797_v2 = vcombine.low %v329_v54, %v337_v55  ;;  %v1812_v3 = vcombine.high %v344_v60, %v352_v61  ;;  %v1814_v4 = vcombine.high %v345_v62, %v353_v63 }
  0x89   : > { %v1813_v6 = vcombine.low %v345_v62, %v353_v63 }
  0x8b   : > { %1173 = vmatpush1.bf16.msra.mxu0 %v1807_v8  ;;  %1214 = vmatpush1.bf16.msra.mxu1 %v1809_v9  ;;  %v1343_v8 = vunpack.c.l.s4 %v1896_v7  ;;  %v1345_v9 = vlaneseq }
  0x8c   : > { %1240 = vmatprep.subr.bf16.mxu0 %v1700_v10  ;;  %1281 = vmatprep.subr.bf16.mxu1 %v1702_v11  ;;  %v1897_v10 = vmov 1983009808  }
  0x8d   : > { %v1458_v11 = vunpack.c.l.s4 %v1897_v10  ;;  %v1344_v13 = vunpack.c.0.s8 %v1343_v8  ;;  %v1346_v14 = vshrl.u32 %v1345_v9, 7 }
  0x8e   : > { %1191 = vmatmul.mubr.bf16.vlgmr.msra.gmra.mrb[8].mxu0 %v1979_v12  ;;  %1232 = vmatmul.mubr.bf16.vlgmr.msra.gmra.mrb[8].mxu1 %v1979_v12 }
  0x8f   : > { %1241 = vmatpush1.bf16.msra.mxu0 %v1699_v17  ;;  %1282 = vmatpush1.bf16.msra.mxu1 %v1701_v18  ;;  %v1459_v15 = vunpack.c.0.s8 %v1458_v11  ;;  %v1995_v17 = vsub.s32 %v1344_v13, %v1346_v14 }
  0x90   : > { %1242 = vmatprep.subr.bf16.mxu0 %v1716_v19  ;;  %1283 = vmatprep.subr.bf16.mxu1 %v1718_v20 }
  0x91   : > { %1272 = vmatprep.mubr.bf16.mxu0 %v1895_v0  ;;  %1313 = vmatprep.mubr.bf16.mxu1 %v1895_v0  ;;  %v1766_v0 = vcombine.high %v297_v39, %v305_v40  ;;  %v1997_v18 = vsub.s32 %v1459_v15, %v1346_v14 }
  0x93   : > { %1243 = vmatpush1.bf16.msra.mxu0 %v1715_v25  ;;  %1284 = vmatpush1.bf16.msra.mxu1 %v1717_v26 }
  0x94   : > { %1244 = vmatprep.subr.bf16.mxu0 %v1732_v27  ;;  %1285 = vmatprep.subr.bf16.mxu1 %v1734_v28 }
  0x97   : > { %1245 = vmatpush1.bf16.msra.mxu0 %v1731_v33  ;;  %1286 = vmatpush1.bf16.msra.mxu1 %v1733_v34 }
  0x98   : > { %1246 = vmatprep.subr.bf16.mxu0 %v1748_v35  ;;  %1287 = vmatprep.subr.bf16.mxu1 %v1750_v36  ;;  %v1898_v35 = vmov 1934713408  }
  0x99   : > { %v1490_v36 = vunpack.c.l.s4 %v1898_v35 }
  0x9b   : > { %1247 = vmatpush1.bf16.msra.mxu0 %v1747_v41  ;;  %1288 = vmatpush1.bf16.msra.mxu1 %v1749_v42  ;;  %v1491_v38 = vunpack.c.0.s8 %v1490_v36 }
  0x9c   : > { %1248 = vmatprep.subr.bf16.mxu0 %v1764_v43  ;;  %1289 = vmatprep.subr.bf16.mxu1 %v1766_v0 }
  0x9f   : > { %1249 = vmatpush1.bf16.msra.mxu0 %v1763_v48  ;;  %1290 = vmatpush1.bf16.msra.mxu1 %v1765_v49 }
  0xa0   : > { %1250 = vmatprep.subr.bf16.mxu0 %v1780_v50  ;;  %1291 = vmatprep.subr.bf16.mxu1 %v1782_v51  ;;  %v1494_v51 = vsub.s32 %v1491_v38, %v1346_v14 }
  0xa3   : > { %1251 = vmatpush1.bf16.msra.mxu0 %v1779_v56  ;;  %1292 = vmatpush1.bf16.msra.mxu1 %v1781_v57 }
  0xa4   : > { %1252 = vmatprep.subr.bf16.mxu0 %v1796_v58  ;;  %1293 = vmatprep.subr.bf16.mxu1 %v1798_v59 }
  0xa7   : > { %1253 = vmatpush1.bf16.msra.mxu0 %v1795_v1  ;;  %1294 = vmatpush1.bf16.msra.mxu1 %v1797_v2 }
  0xa8   : > { %1254 = vmatprep.subr.bf16.mxu0 %v1812_v3  ;;  %1295 = vmatprep.subr.bf16.mxu1 %v1814_v4 }
  0xab   : > { %1255 = vmatpush1.bf16.msra.mxu0 %v1811_v5  ;;  %1296 = vmatpush1.bf16.msra.mxu1 %v1813_v6 }
  0xae   : > { %1273 = vmatmul.mubr.bf16.vlgmr.msra.gmra.mrb[12].mxu0 %v1979_v12  ;;  %1314 = vmatmul.mubr.bf16.vlgmr.msra.gmra.mrb[12].mxu1 %v1979_v12 }
 0x121   : > { %v1028_v16 = vpop.f32.mrb[0].mxu0  ;;  %v1069_v19 = vpop.f32.mrb[0].mxu1 }
 0x122   : > { %v1030_v20 = vpop.f32.mrb[1].mxu0  ;;  %v1456_v21 = vcombine.low %v1028_v16, %v1069_v19  ;;  %v1071_v23 = vpop.f32.mrb[1].mxu1 }
 0x123   : > { %v1338_v22 = vcombine.low %v1028_v16, %v1030_v20  ;;  %v1032_v24 = vpop.f32.mrb[2].mxu0  ;;  %v1339_v12 = vcombine.low %v1069_v19, %v1071_v23  ;;  %v1464_v25 = vcombine.low %v1030_v20, %v1071_v23  ;;  %v1073_v26 = vpop.f32.mrb[2].mxu1 }
 0x124   : > { %v1033_v27 = vpop.f32.mrb[3].mxu0  ;;  %v1463_v28 = vrot.slane %v1456_v21, %v1997_v18  ;;  %v1074_v30 = vpop.f32.mrb[3].mxu1 }
 0x125   : > { %v1348_v29 = vrot.slane %v1338_v22, %v1995_v17  ;;  %v1355_v31 = vrot.slane %v1339_v12, %v1995_v17  ;;  %v1471_v32 = vrot.slane %v1464_v25, %v1997_v18 }
 0x127   : > { %v1370_v33 = vcombine.low %v1348_v29, %v1355_v31  ;;  %v1488_v34 = vcombine.low %v1463_v28, %v1471_v32 }
 0x129   : > { %v1378_v56 = vrot.slane %v1370_v33, %v1995_v17  ;;  %v1495_v57 = vrot.slane %v1488_v34, %v1494_v51 }
 0x141   : > { %v1110_v37 = vpop.f32.mrb[4].mxu0  ;;  %v1151_v39 = vpop.f32.mrb[4].mxu1 }
 0x142   : > { %v1112_v40 = vpop.f32.mrb[5].mxu0  ;;  %v1472_v41 = vcombine.low %v1110_v37, %v1151_v39  ;;  %v1153_v43 = vpop.f32.mrb[5].mxu1 }
 0x143   : > { %v1340_v42 = vcombine.low %v1110_v37, %v1112_v40  ;;  %v1114_v0 = vpop.f32.mrb[6].mxu0  ;;  %v1341_v44 = vcombine.low %v1151_v39, %v1153_v43  ;;  %v1480_v45 = vcombine.low %v1112_v40, %v1153_v43  ;;  %v1155_v46 = vpop.f32.mrb[6].mxu1 }
 0x144   : > { %v1115_v47 = vpop.f32.mrb[7].mxu0  ;;  %v1479_v48 = vrot.slane %v1472_v41, %v1997_v18  ;;  %v1156_v50 = vpop.f32.mrb[7].mxu1 }
 0x145   : > { %v1362_v49 = vrot.slane %v1340_v42, %v1995_v17  ;;  %v1369_v52 = vrot.slane %v1341_v44, %v1995_v17  ;;  %v1487_v53 = vrot.slane %v1480_v45, %v1997_v18 }
 0x147   : > { %v1371_v54 = vcombine.low %v1362_v49, %v1369_v52  ;;  %v1496_v55 = vcombine.low %v1479_v48, %v1487_v53 }
 0x149   : > { %v1385_v58 = vrot.slane %v1371_v54, %v1995_v17  ;;  %v1503_v59 = vrot.slane %v1496_v55, %v1494_v51 }
 0x14b   : > { %v1386_v60 = vcombine.low %v1378_v56, %v1385_v58  ;;  %v1504_v61 = vcombine.low %v1495_v57, %v1503_v59 }
 0x14d   : > { %v1446_v43 = vmul.f32 %v1386_v60, %v1386_v60 }
 0x161   : > { %v1192_v62 = vpop.f32.mrb[8].mxu0  ;;  %v1233_v63 = vpop.f32.mrb[8].mxu1 }
 0x162   : > { %v1194_v1 = vpop.f32.mrb[9].mxu0  ;;  %v1505_v2 = vcombine.low %v1192_v62, %v1233_v63  ;;  %v1235_v4 = vpop.f32.mrb[9].mxu1 }
 0x163   : > { %v1387_v3 = vcombine.low %v1192_v62, %v1194_v1  ;;  %v1196_v5 = vpop.f32.mrb[10].mxu0  ;;  %v1388_v6 = vcombine.low %v1233_v63, %v1235_v4  ;;  %v1513_v7 = vcombine.low %v1194_v1, %v1235_v4  ;;  %v1237_v8 = vpop.f32.mrb[10].mxu1 }
 0x164   : > { %v1197_v9 = vpop.f32.mrb[11].mxu0  ;;  %v1512_v10 = vrot.slane %v1505_v2, %v1997_v18  ;;  %v1238_v13 = vpop.f32.mrb[11].mxu1 }
 0x165   : > { %v1397_v11 = vrot.slane %v1387_v3, %v1995_v17  ;;  %v1404_v14 = vrot.slane %v1388_v6, %v1995_v17  ;;  %v1520_v15 = vrot.slane %v1513_v7, %v1997_v18 }
 0x167   : > { %v1419_v16 = vcombine.low %v1397_v11, %v1404_v14  ;;  %v1537_v19 = vcombine.low %v1512_v10, %v1520_v15 }
 0x169   : > { %v1427_v37 = vrot.slane %v1419_v16, %v1995_v17  ;;  %v1544_v38 = vrot.slane %v1537_v19, %v1494_v51 }
 0x181   : > { %v1274_v20 = vpop.f32.mrb[12].mxu0  ;;  %v1315_v21 = vpop.f32.mrb[12].mxu1 }
 0x182   : > { %v1276_v22 = vpop.f32.mrb[13].mxu0  ;;  %v1521_v23 = vcombine.low %v1274_v20, %v1315_v21  ;;  %v1317_v12 = vpop.f32.mrb[13].mxu1 }
 0x183   : > { %v1389_v24 = vcombine.low %v1274_v20, %v1276_v22  ;;  %v1278_v25 = vpop.f32.mrb[14].mxu0  ;;  %v1390_v26 = vcombine.low %v1315_v21, %v1317_v12  ;;  %v1529_v27 = vcombine.low %v1276_v22, %v1317_v12  ;;  %v1319_v28 = vpop.f32.mrb[14].mxu1 }
 0x184   : > { %v1279_v29 = vpop.f32.mrb[15].mxu0  ;;  %v1528_v30 = vrot.slane %v1521_v23, %v1997_v18  ;;  %v1320_v32 = vpop.f32.mrb[15].mxu1 }
 0x185   : > { %v1411_v31 = vrot.slane %v1389_v24, %v1995_v17  ;;  %v1418_v33 = vrot.slane %v1390_v26, %v1995_v17  ;;  %v1536_v34 = vrot.slane %v1529_v27, %v1997_v18 }
 0x187   : > { %v1420_v35 = vcombine.low %v1411_v31, %v1418_v33  ;;  %v1545_v36 = vcombine.low %v1528_v30, %v1536_v34 }
 0x189   : > { %v1434_v39 = vrot.slane %v1420_v35, %v1995_v17  ;;  %v1552_v40 = vrot.slane %v1545_v36, %v1494_v51 }
 0x18b   : > { %v1435_v41 = vcombine.low %v1427_v37, %v1434_v39  ;;  %v1553_v42 = vcombine.low %v1544_v38, %v1552_v40 }
 0x18d   : > { %v1438_v0 = vadd.f32 %v1435_v41, %v1386_v60  ;;  %v1447_v44 = vmul.f32 %v1435_v41, %v1435_v41  ;;  %v1825_v18 = vpack.c.bf16 %v1553_v42, %v1504_v61 }
 0x18f   : > { %v1439_v45 = vrot.slane %v1438_v0, 4  ;;  %v1448_v46 = vadd.f32 %v1447_v44, %v1446_v43  ;;  %1826 = vst [vmem:[%s217_s13] sm:$0xff] %v1825_v18  }
 0x191   : > { %v1440_v47 = vadd.f32 %v1439_v45, %v1438_v0  ;;  %v1449_v48 = vrot.slane %v1448_v46, 4 }
 0x193   : > { %v1441_v49 = vrot.slane %v1440_v47, 2  ;;  %v1450_v17 = vadd.f32 %v1449_v48, %v1448_v46 }
 0x195   : > { %v1442_v50 = vadd.f32 %v1441_v49, %v1440_v47  ;;  %v1451_v51 = vrot.slane %v1450_v17, 2 }
 0x197   : > { %v1443_v52 = vrot.slane %v1442_v50, 1  ;;  %v1452_v53 = vadd.f32 %v1451_v51, %v1450_v17 }
 0x199   : > { %v1444_v54 = vadd.f32 %v1443_v52, %v1442_v50  ;;  %v1453_v55 = vrot.slane %v1452_v53, 1 }
 0x19b   : > { %1445 = vst [vmem:[%s220_s18] sm:$0x1] %v1444_v54  ;;  %v1454_v56 = vadd.f32 %v1453_v55, %v1452_v53 }
 0x19d   : > { %1455 = vst [vmem:[%s223_s21] sm:$0x1] %v1454_v56 }
 0x19e PF: > { %s16_s15 = sadd.s32 1, %s1890_s15  }
 0x19f   : > { %p13_p3 = scmp.ge.s32.totalorder %s16_s15, 4  }
 0x1a1   :  { %15 = sbr.rel (!%p13_p3) target bundleno = 1 (0x1), region = 87 }
 0x1a8   :  { %1609 = vsyncpa [#allocation3], 1 }
 0x1a9   :  { %1611 = vsyncpa [#allocation3 + $0x1], 1 }

// kernel: dcgan_generator_forward.5
= control target key start
LH: loop header
LB: loop body
LE: loop exit
PB: predicated region body
PF: predicated region fallthrough
CT: control target
= control target key end

     0   :  { %12 = vsyncpa [#allocation4], 0  ;;  %s3272_s21 = smov 0   ;;  %s3470_s0 = inlined_call_operand.vmem [shape: bf16[2,4,4,128], index: 0, kind: input, shape index: {}]   ;;  %s3471_s1 = inlined_call_operand.vmem [shape: f32[1,1,1,128], index: 1, kind: input, shape index: {}]   ;;  %s3472_s2 = inlined_call_operand.vmem [shape: f32[1,1,1,128], index: 2, kind: input, shape index: {}]   ;;  %s3473_s3 = inlined_call_operand.hbm [shape: bf16[4,512,128], index: 3, kind: input, shape index: {}]   ;;  %s3474_s4 = inlined_call_operand.vmem [shape: bf16[8,2,4,256], index: 4, kind: output, shape index: {0}]   ;;  %s3475_s5 = inlined_call_operand.vmem [shape: f32[2,1,128], index: 5, kind: output, shape index: {1}]   ;;  %s3476_s6 = inlined_call_operand.vmem [shape: f32[2,1,128], index: 6, kind: output, shape index: {2}]  }
   0x1 LB: > { %s3278_s22 = sadd.s32 4294967295, %s3230_s21   ;;  %p2657_p0 = scmp.ge.s32.totalorder %s3230_s21, 1  ;;  %s3230_s21 = sphi %s3272_s21, %s18_s21  }
   0x2   : > { %p190_p1 = scmp.lt.s32.totalorder %s3230_s21, 3  ;;  %s3232_s23 = smov [#allocation3]  }
   0x3   : > { %s208_s24 = sshll.u32 %s3232_s23, 4  ;;  %p3477_p3 = scmp.eq.s32.totalorder %s3278_s22, 0  ;;  %s209_s24 = int_to_ptr.vmem [resolvable:$true] %s208_s24 }
   0x4   : > { %p3282_p2 = pnand %p2657_p0, %p190_p1  ;;  %s3192_s29 = scalar_lea.hbm %s3473_s3, 16384 }
   0x5   : > { %p3193_p6 = scmp.ne.s32.totalorder %s3473_s3, %s3192_s29  ;;  %p3199_p10 = scmp.lt.u32.totalorder %s3192_s29, %s3473_s3 }
   0x6   : > { %s3479_s25 = scalar_select %p3282_p2, 1, 0 }
   0x7   : > { %p3033_p4 = pneg %p3282_p2 }
   0x9   : > { %p3291_p5 = pnand %p3477_p3, %p3033_p4 }
   0xb   : > { %p3194_p7 = pneg %p3291_p5 }
   0xd   : > { %p3195_p8 = pnand %p3194_p7, %p3193_p6 }
   0xf   : > { %p3196_p9 = pneg %p3195_p8 }
  0x11   : > { %p3201_p11 = pnand %p3199_p10, %p3196_p9 }
  0x13   : > { %3204 = shalt.err (!%p3201_p11)
}
  0x14   : > { %s3205_s10 = scalar_lea.vmem %s209_s24, 16384  ;;  %p3213_p1 = scmp.lt.s32.totalorder %s209_s24, %s209_s24 }
  0x15   : > { %p3206_p12 = scmp.ne.s32.totalorder %s209_s24, %s3205_s10  ;;  %p3214_p4 = scmp.lt.s32.totalorder %s3205_s10, %s3205_s10 }
  0x17   : > { %p3208_p13 = pnand %p3206_p12, %p3194_p7  ;;  %p3215_p3 = por %p3214_p4, %p3213_p1 }
  0x19   : > { %p3209_p0 = pneg %p3208_p13 }
  0x1b   : > { %p3216_p2 = pnand %p3215_p3, %p3209_p0 }
  0x1d   : > { %3219 = shalt.err (!%p3216_p2)
}
  0x1e   : > { %s3233_s11 = smov 64   ;;  %s3234_s12 = smov 4  }
  0x1f   : > { %3036 = dma.hbm_to_vmem [thread:$0]  (!%p3291_p5), %s3473_s3, 16384, %s209_s24, [#allocation4], %s3233_s11, %s3233_s11, %s3234_s12  }
  0x20   : > { %p3481_p6 = scmp.ne.s32.totalorder %s3479_s25, 0 }
  0x21   : > { %p3482_p8 = scmp.eq.s32.totalorder (!%p3481_p6), %s3278_s22, 0 }
  0x22   : > { %232 = sbr.rel (%p3481_p6) target bundleno = 437 (0x1b5), region = 36 }
  0x29   : > { %3225 = dma.done.wait (%p3482_p8), [#allocation4], 16384   ;;  %p3483_p7 = pmov %p3482_p8 }
  0x2a   : > { %v3235_v0 = vmov 0   ;;  %v3052_v1 = vld [vmem:[#allocation3 + $0x40] sm:$0xff]   ;;  %v3056_v5 = vld [vmem:[#allocation3 + $0x48] sm:$0xff]   ;;  %v3060_v9 = vld [vmem:[#allocation3 + $0x50] sm:$0xff]   ;;  %p269_p2 = scmp.lt.s32.totalorder %s3278_s22, 1  ;;  %vm377_vm0 = vcmask 1042432  }
  0x2b   : > { %3227 = vsyncadd (%p3483_p7), [#allocation4], 4294950912  ;;  %288 = vst [vmem:[#allocation2] sm:$0x7] %v3235_v0  ;;  %v3053_v2 = vld [vmem:[#allocation3 + $0xc0] sm:$0xff]   ;;  %2853 = vmatprep.subr.bf16.mxu0 %v3052_v1  ;;  %v3057_v6 = vld [vmem:[#allocation3 + $0xc8] sm:$0xff]  }
  0x2c   : > { %289 = vst [vmem:[#allocation2 + $0x4] sm:$0x7] %v3235_v0  ;;  %290 = vst [vmem:[#allocation2 + $0x8] sm:$0x7] %v3235_v0  ;;  %v3054_v3 = vld [vmem:[#allocation3] sm:$0xff]   ;;  %2875 = vmatprep.subr.bf16.mxu1 %v3053_v2  ;;  %v3058_v7 = vld [vmem:[#allocation3 + $0x8] sm:$0xff]  }
  0x2d   : > { %291 = vst [vmem:[#allocation2 + $0xc] sm:$0x7] %v3235_v0  ;;  %292 = vst [vmem:[#allocation2 + $0x10] sm:$0x7] %v3235_v0  ;;  %v3055_v4 = vld [vmem:[#allocation3 + $0x80] sm:$0xff]   ;;  %2854 = vmatpush3.bf16.msra.mxu0 %v3054_v3  ;;  %v3059_v8 = vld [vmem:[#allocation3 + $0x88] sm:$0xff]  }
  0x2e   : > { %293 = vst [vmem:[#allocation2 + $0x14] sm:$0x7] %v3235_v0  ;;  %2876 = vmatpush3.bf16.msra.mxu1 %v3055_v4  ;;  %2855 = vmatprep.subr.bf16.mxu0 %v3056_v5  ;;  %v3061_v10 = vld [vmem:[#allocation3 + $0xd0] sm:$0xff]   ;;  %v3064_v13 = vld [vmem:[#allocation3 + $0x58] sm:$0xff]   ;;  %v3068_v17 = vld [vmem:[#allocation3 + $0x60] sm:$0xff]   ;;  %s3319_s15 = scalar_select %p269_p2, %s3278_s22, 1 }
  0x2f   : > { %2877 = vmatprep.subr.bf16.mxu1 %v3057_v6  ;;  %v3062_v11 = vld [vmem:[#allocation3 + $0x10] sm:$0xff]   ;;  %v3065_v14 = vld [vmem:[#allocation3 + $0xd8] sm:$0xff]   ;;  %v3069_v18 = vld [vmem:[#allocation3 + $0xe0] sm:$0xff]   ;;  %vm378_vm1 = vsmask.f32 2306  ;;  %vm539_vm9 = vcmask 1040384  }
  0x30   : > { %v3063_v12 = vld [vmem:[#allocation3 + $0x90] sm:$0xff]   ;;  %v3066_v15 = vld [vmem:[#allocation3 + $0x18] sm:$0xff]   ;;  %v3070_v19 = vld [vmem:[#allocation3 + $0x20] sm:$0xff]   ;;  %s2847_s16 = sshll.u32 %s3319_s15, 3  ;;  %vm436_vm2 = vsmask.f32 1280  ;;  %s283_s8 = scalar_lea.vmem %s3475_s5, %s3319_s15 }
  0x31   : > { %2856 = vmatpush3.bf16.msra.mxu0 %v3058_v7  ;;  %v3067_v16 = vld [vmem:[#allocation3 + $0x98] sm:$0xff]   ;;  %v3071_v20 = vld [vmem:[#allocation3 + $0xa0] sm:$0xff]   ;;  %v3072_v21 = vld [vmem:[#allocation3 + $0x68] sm:$0xff]   ;;  %s273_s19 = scalar_lea.vmem %s3470_s0, %s2847_s16  ;;  %vm437_vm4 = vsmask.f32 3336  ;;  %vm540_vm10 = vcmask 1042434   ;;  %s286_s11 = scalar_lea.vmem %s3476_s6, %s3319_s15 }
  0x32   : > { %2878 = vmatpush3.bf16.msra.mxu1 %v3059_v8  ;;  %2857 = vmatprep.subr.bf16.mxu0 %v3060_v9  ;;  %v3073_v22 = vld [vmem:[#allocation3 + $0xe8] sm:$0xff]   ;;  %v3076_v25 = vld [vmem:[#allocation3 + $0x70] sm:$0xff]   ;;  %v3080_v29 = vld [vmem:[#allocation3 + $0x78] sm:$0xff]   ;;  %vm439_vm5 = vsmask.f32 5392  ;;  %vm542_vm13 = vcmask 1044484  }
  0x33   : > { %2879 = vmatprep.subr.bf16.mxu1 %v3061_v10  ;;  %v3074_v23 = vld [vmem:[#allocation3 + $0x28] sm:$0xff]   ;;  %v3077_v26 = vld [vmem:[#allocation3 + $0xf0] sm:$0xff]   ;;  %v3081_v30 = vld [vmem:[#allocation3 + $0xf8] sm:$0xff]   ;;  %vm441_vm6 = vsmask.f32 7448  ;;  %vm544_vm15 = vcmask 1046534  }
  0x34   : > { %v3075_v24 = vld [vmem:[#allocation3 + $0xa8] sm:$0xff]   ;;  %v3078_v27 = vld [vmem:[#allocation3 + $0x30] sm:$0xff]   ;;  %v3082_v31 = vld [vmem:[#allocation3 + $0x38] sm:$0xff]   ;;  %s2664_s26 = sshll.u32 %s3278_s22, 2 }
  0x35   : > { %2858 = vmatpush3.bf16.msra.mxu0 %v3062_v11  ;;  %v3079_v28 = vld [vmem:[#allocation3 + $0xb0] sm:$0xff]   ;;  %v3083_v32 = vld [vmem:[#allocation3 + $0xb8] sm:$0xff]   ;;  %v294_v33 = vld [vmem:[%s273_s19] sm:$0x3]  ;;  %p275_p3 = scmp.lt.s32.totalorder %s2664_s26, 7 }
  0x36   : > { %2880 = vmatpush3.bf16.msra.mxu1 %v3063_v12  ;;  %2859 = vmatprep.subr.bf16.mxu0 %v3064_v13  ;;  %v295_v34 = vld [vmem:[%s273_s19 + $0x2] sm:$0x3]  ;;  %v296_v35 = vld [vmem:[%s273_s19 + $0x4] sm:$0x3]  ;;  %v298_v36 = vunpack.c.l.bf16 %v294_v33  ;;  %v2667_v39 = vld [vmem:[%s3471_s1] ss:$0 sm:$0xff] }
  0x37   : > { %2881 = vmatprep.subr.bf16.mxu1 %v3065_v14  ;;  %v299_v37 = vunpack.c.l.bf16 %v295_v34  ;;  %v300_v38 = vunpack.c.l.bf16 %v296_v35  ;;  %v2668_v40 = vld [vmem:[%s3472_s2] ss:$0 sm:$0xff]  ;;  %v297_v41 = vld [vmem:[%s273_s19 + $0x6] sm:$0x3]  ;;  %v3084_v51 = vld [vmem:[#allocation3 + $0x140] sm:$0xff]   ;;  %s3493_s26 = smov (!%p275_p3, %s2664_s26), 7 }
  0x38   : > { %v309_v42 = vmul.f32 %v2667_v39, %v298_v36  ;;  %v301_v45 = vunpack.c.l.bf16 %v297_v41  ;;  %v2673_v49 = vld.sshfl [vmem:[#allocation2] sm:$0x13 pattern:$0x76325410]  ;;  %v3085_v52 = vld [vmem:[#allocation3 + $0x1c0] sm:$0xff]   ;;  %vm3333_vm3 = vmand %vm377_vm0, %vm378_vm1  ;;  %s2848_s27 = sshll.u32 %s3493_s26, 3 }
  0x39   : > { %2860 = vmatpush3.bf16.msra.mxu0 %v3066_v15  ;;  %v310_v43 = vmul.f32 %v2667_v39, %v299_v37  ;;  %v311_v44 = vmul.f32 %v2667_v39, %v300_v38  ;;  %v444_v61 = vshrl.u32 %v2673_v49, 16  ;;  %v447_v62 = vshll.u32 %v2673_v49, 16  ;;  %v380_v5 = vld [vmem:[#allocation2 + $0x4] sm:$0x7]  ;;  %v383_v6 = vld [vmem:[#allocation2 + $0x8] sm:$0x7]  ;;  %vm438_vm7 = vmor %vm436_vm2, %vm437_vm4  ;;  %s3441_s22 = scalar_lea.vmem %s3474_s4, %s2848_s27 }
  0x3a   : > { %2882 = vmatpush3.bf16.msra.mxu1 %v3067_v16  ;;  %2861 = vmatprep.subr.bf16.mxu0 %v3068_v17  ;;  %v320_v46 = vadd.f32 %v2668_v40, %v309_v42  ;;  %v312_v50 = vmul.f32 %v2667_v39, %v301_v45  ;;  %v386_v10 = vld [vmem:[#allocation2 + $0xc] sm:$0x7]  ;;  %vm440_vm8 = vmor %vm438_vm7, %vm439_vm5 }
  0x3b   : > { %2883 = vmatprep.subr.bf16.mxu1 %v3069_v18  ;;  %v321_v47 = vadd.f32 %v2668_v40, %v310_v43  ;;  %v322_v48 = vadd.f32 %v2668_v40, %v311_v44  ;;  %v446_v13 = vrot.slane %v444_v61, 6  ;;  %vm3347_vm11 = vmor %vm440_vm8, %vm441_vm6 }
  0x3c   : > { %v324_v53 = vmax.f32 %v320_v46, 0.0  ;;  %v323_v56 = vadd.f32 %v2668_v40, %v312_v50  ;;  %vm541_vm12 = vmor %vm539_vm9, %vm540_vm10  ;;  %v3147_v50 = vld [vmem:[#allocation3 + $0x2b0] sm:$0xff]  }
  0x3d   : > { %2862 = vmatpush3.bf16.msra.mxu0 %v3070_v19  ;;  %v325_v54 = vmax.f32 %v321_v47, 0.0  ;;  %v326_v55 = vmax.f32 %v322_v48, 0.0  ;;  %v411_v19 = vcombine.high %v2673_v49, %v2673_v49  ;;  %vm3373_vm14 = vmor %vm541_vm12, %vm542_vm13 }
  0x3e   : > { %2884 = vmatpush3.bf16.msra.mxu1 %v3071_v20  ;;  %2863 = vmatprep.subr.bf16.mxu0 %v3072_v21  ;;  %v2849_v57 = vpack.c.bf16 %v324_v53, %v324_v53  ;;  %v327_v60 = vmax.f32 %v323_v56, 0.0  ;;  %v449_v20 = vrot.slane %v447_v62, 7  ;;  %vm3390_vm0 = vmor %vm3373_vm14, %vm544_vm15 }
  0x3f   : > { %2885 = vmatprep.subr.bf16.mxu1 %v3073_v22  ;;  %v2850_v58 = vpack.c.bf16 %v325_v54, %v325_v54  ;;  %v2851_v59 = vpack.c.bf16 %v326_v55, %v326_v55 }
  0x40   : > { %v345_v63 = vshrl.u32 %v2849_v57, 16  ;;  %v348_v0 = vshll.u32 %v2849_v57, 16  ;;  %v2852_v7 = vpack.c.bf16 %v327_v60, %v327_v60 }
  0x41   : > { %2864 = vmatpush3.bf16.msra.mxu0 %v3074_v23  ;;  %v352_v1 = vshrl.u32 %v2850_v58, 16  ;;  %v355_v2 = vshll.u32 %v2850_v58, 16  ;;  %v359_v3 = vshrl.u32 %v2851_v59, 16  ;;  %v362_v4 = vshll.u32 %v2851_v59, 16 }
  0x42   : > { %2886 = vmatpush3.bf16.msra.mxu1 %v3075_v24  ;;  %2865 = vmatprep.subr.bf16.mxu0 %v3076_v25  ;;  %v347_v8 = vrot.slane %v345_v63, 7  ;;  %v366_v14 = vshrl.u32 %v2852_v7, 16  ;;  %v369_v15 = vshll.u32 %v2852_v7, 16  ;;  %v389_v24 = vld [vmem:[#allocation2 + $0x10] sm:$0x7] }
  0x43   : > { %2887 = vmatprep.subr.bf16.mxu1 %v3077_v26  ;;  %v354_v9 = vrot.slane %v352_v1, 7  ;;  %v361_v11 = vrot.slane %v359_v3, 7 }
  0x44   : > { %v350_v16 = vor.u32 %v348_v0, %v347_v8  ;;  %v368_v21 = vrot.slane %v366_v14, 7 }
  0x45   : > { %2866 = vmatpush3.bf16.msra.mxu0 %v3078_v27  ;;  %v357_v17 = vor.u32 %v355_v2, %v354_v9  ;;  %v364_v18 = vor.u32 %v362_v4, %v361_v11  ;;  %v884_v27 = vlaneseq }
  0x46   : > { %2888 = vmatpush3.bf16.msra.mxu1 %v3079_v28  ;;  %2867 = vmatprep.subr.bf16.mxu0 %v3080_v29  ;;  %v381_v22 = vsel %vm3333_vm3, %v350_v16, %v380_v5  ;;  %v371_v26 = vor.u32 %v369_v15, %v368_v21  ;;  %v450_v28 = vor.u32 %v449_v20, %v446_v13  ;;  %v453_v29 = vshll.u32 %v411_v19, 16 }
  0x47   : > { %2889 = vmatprep.subr.bf16.mxu1 %v3081_v30  ;;  %v384_v23 = vsel %vm3333_vm3, %v357_v17, %v383_v6  ;;  %382 = vst [vmem:[#allocation2 + $0x4] sm:$0x7] %v381_v22  ;;  %v387_v25 = vsel %vm3333_vm3, %v364_v18, %v386_v10  ;;  %v885_v33 = vshrl.u32 %v884_v27, 7 }
  0x48   : > { %385 = vst [vmem:[#allocation2 + $0x8] sm:$0x7] %v384_v23  ;;  %388 = vst [vmem:[#allocation2 + $0xc] sm:$0x7] %v387_v25  ;;  %v390_v30 = vsel %vm3333_vm3, %v371_v26, %v389_v24  ;;  %v451_v34 = vrot.slane %v450_v28, 2  ;;  %v455_v35 = vrot.slane %v453_v29, 7 }
  0x49   : > { %2868 = vmatpush3.bf16.msra.mxu0 %v3082_v31  ;;  %391 = vst [vmem:[#allocation2 + $0x10] sm:$0x7] %v390_v30  ;;  %v3236_v31 = vmov 1983009808  }
  0x4a   : > { %2890 = vmatpush3.bf16.msra.mxu1 %v3083_v32  ;;  %2897 = vmatprep.subr.bf16.mxu0 %v3084_v51  ;;  %v882_v32 = vunpack.c.l.s4 %v3236_v31  ;;  %v456_v63 = vsel %vm3347_vm11, %v451_v34, %v455_v35  ;;  %v3090_v34 = vld [vmem:[#allocation3 + $0x100] sm:$0xff]  }
  0x4b   : > { %2919 = vmatprep.subr.bf16.mxu1 %v3085_v52 }
  0x4c   : > { %v883_v45 = vunpack.c.0.s8 %v882_v32  ;;  %v3110_v32 = vld [vmem:[#allocation3 + $0x128] sm:$0xff]  }
  0x4e   : > { %v2674_v36 = vld.sshfl [vmem:[#allocation2 + $0x4] sm:$0x13 pattern:$0x76325410]  ;;  %v3353_v6 = vsub.s32 %v883_v45, %v885_v33 }
  0x4f   : > { %v2675_v37 = vld.sshfl [vmem:[#allocation2 + $0x8] sm:$0x13 pattern:$0x76325410]  ;;  %v419_v38 = vcombine.high %v2674_v36, %v2674_v36  ;;  %v458_v39 = vshrl.u32 %v2674_v36, 16  ;;  %v461_v40 = vshll.u32 %v2674_v36, 16 }
  0x50   : > { %v2676_v41 = vld.sshfl [vmem:[#allocation2 + $0xc] sm:$0x13 pattern:$0x76325410]  ;;  %v427_v42 = vcombine.high %v2675_v37, %v2675_v37  ;;  %v472_v43 = vshrl.u32 %v2675_v37, 16  ;;  %v475_v44 = vshll.u32 %v2675_v37, 16 }
  0x51   : > { %v435_v46 = vcombine.high %v2676_v41, %v2676_v41  ;;  %v460_v47 = vrot.slane %v458_v39, 6  ;;  %v463_v48 = vrot.slane %v461_v40, 7  ;;  %v467_v49 = vshll.u32 %v419_v38, 16  ;;  %v3092_v36 = vld [vmem:[#allocation3 + $0x148] sm:$0xff]   ;;  %v3091_v38 = vld [vmem:[#allocation3 + $0x180] sm:$0xff]  }
  0x52   : > { %v474_v51 = vrot.slane %v472_v43, 6  ;;  %v477_v52 = vrot.slane %v475_v44, 7  ;;  %v481_v53 = vshll.u32 %v427_v42, 16  ;;  %v486_v54 = vshrl.u32 %v2676_v41, 16  ;;  %v3093_v40 = vld [vmem:[#allocation3 + $0x1c8] sm:$0xff]   ;;  %v3096_v43 = vld [vmem:[#allocation3 + $0x150] sm:$0xff]  }
  0x53   : > { %v464_v55 = vor.u32 %v463_v48, %v460_v47  ;;  %v469_v56 = vrot.slane %v467_v49, 7  ;;  %v489_v57 = vshll.u32 %v2676_v41, 16  ;;  %v495_v58 = vshll.u32 %v435_v46, 16  ;;  %v3094_v41 = vld [vmem:[#allocation3 + $0x108] sm:$0xff]   ;;  %v3097_v44 = vld [vmem:[#allocation3 + $0x1d0] sm:$0xff]  }
  0x54   : > { %v478_v59 = vor.u32 %v477_v52, %v474_v51  ;;  %v483_v60 = vrot.slane %v481_v53, 7  ;;  %v488_v61 = vrot.slane %v486_v54, 6  ;;  %v2688_v62 = vld.sshfl [vmem:[#allocation2 + $0x10] sm:$0x13 pattern:$0x76325410] }
  0x55   : > { %v465_v0 = vrot.slane %v464_v55, 2  ;;  %v491_v1 = vrot.slane %v489_v57, 7  ;;  %v605_v2 = vcombine.high %v2688_v62, %v2688_v62  ;;  %v3186_v3 = vld.sshfl [vmem:[#allocation2] sm:$0xf pattern:$0x76325410] }
  0x56   : > { %v3187_v4 = vld.sshfl [vmem:[#allocation2 + $0x8] sm:$0xf pattern:$0x76325410]  ;;  %v479_v5 = vrot.slane %v478_v59, 2  ;;  %v649_v7 = vshrl.u32 %v2688_v62, 16 }
  0x57   : > { %v652_v8 = vshll.u32 %v2688_v62, 16  ;;  %v470_v9 = vsel %vm3347_vm11, %v465_v0, %v469_v56  ;;  %v492_v10 = vor.u32 %v491_v1, %v488_v61  ;;  %v497_v11 = vrot.slane %v495_v58, 7  ;;  %v3188_v17 = vld.sshfl [vmem:[#allocation2 + $0x4] sm:$0xf pattern:$0x76325410] }
  0x58   : > { %v658_v12 = vshll.u32 %v605_v2, 16  ;;  %v484_v13 = vsel %vm3347_vm11, %v479_v5, %v483_v60  ;;  %v897_v14 = vcombine.low %v456_v63, %v470_v9  ;;  %v651_v15 = vrot.slane %v649_v7, 6  ;;  %v3189_v20 = vld.sshfl [vmem:[#allocation2 + $0xc] sm:$0xf pattern:$0x76325410] }
  0x59   : > { %v654_v16 = vrot.slane %v652_v8, 7  ;;  %v493_v18 = vrot.slane %v492_v10, 2  ;;  %v937_v23 = vcombine.low %v470_v9, %v484_v13  ;;  %v895_v31 = vcombine.low %v3186_v3, %v3187_v4  ;;  %v3095_v42 = vld [vmem:[#allocation3 + $0x188] sm:$0xff]   ;;  %v3098_v46 = vld [vmem:[#allocation3 + $0x110] sm:$0xff]   ;;  %v3100_v51 = vld [vmem:[#allocation3 + $0x158] sm:$0xff]  }
  0x5a   : > { %v660_v19 = vrot.slane %v658_v12, 7  ;;  %v905_v25 = vrot.slane %v897_v14, %v3353_v6  ;;  %v3382_v37 = vcombine.low %v3188_v17, %v3189_v20  ;;  %v2677_v45 = vld.sshfl [vmem:[#allocation2] sm:$0x12 pattern:$0x76325410]  ;;  %v3099_v56 = vld [vmem:[#allocation3 + $0x190] sm:$0xff]  }
  0x5b   : > { %v655_v21 = vor.u32 %v654_v16, %v651_v15  ;;  %v498_v22 = vsel %vm3347_vm11, %v493_v18, %v497_v11  ;;  %v945_v30 = vrot.slane %v937_v23, %v3353_v6  ;;  %v2678_v47 = vld.sshfl [vmem:[#allocation2 + $0x4] sm:$0x12 pattern:$0x76325410]  ;;  %v514_v48 = vcombine.high %v2677_v45, %v2677_v45  ;;  %v3101_v61 = vld [vmem:[#allocation3 + $0x1d8] sm:$0xff]   ;;  %v3104_v10 = vld [vmem:[#allocation3 + $0x160] sm:$0xff]  }
  0x5c   : > { %v898_v24 = vcombine.low %v484_v13, %v498_v22  ;;  %v2681_v49 = vrot.slane %v2677_v45, 9  ;;  %v2679_v52 = vld.sshfl [vmem:[#allocation2 + $0x8] sm:$0x12 pattern:$0x76325410]  ;;  %v522_v53 = vcombine.high %v2678_v47, %v2678_v47  ;;  %v2682_v55 = vrot.slane %v2678_v47, 9 }
  0x5d   : > { %v656_v26 = vrot.slane %v655_v21, 2  ;;  %v2680_v57 = vld.sshfl [vmem:[#allocation2 + $0xc] sm:$0x12 pattern:$0x76325410]  ;;  %v530_v58 = vcombine.high %v2679_v52, %v2679_v52  ;;  %v548_v59 = vrot.slane %v514_v48, 7 }
  0x5e   : > { %v3365_v27 = vrot.slane %v898_v24, %v3353_v6  ;;  %v2683_v60 = vrot.slane %v2679_v52, 9  ;;  %v538_v62 = vcombine.high %v2680_v57, %v2680_v57  ;;  %v552_v63 = vrot.slane %v522_v53, 7  ;;  %v2692_v1 = vld.sshfl [vmem:[#allocation2 + $0x10] sm:$0x12 pattern:$0x76325410] }
  0x5f   : > { %v3369_v28 = vsel %vm3347_vm11, %v656_v26, %v660_v19  ;;  %v2684_v0 = vrot.slane %v2680_v57, 9  ;;  %v549_v2 = vsel %vm3390_vm0, %v2681_v49, %v548_v59  ;;  %v556_v3 = vrot.slane %v530_v58, 7  ;;  %v3102_v7 = vld [vmem:[#allocation3 + $0x118] sm:$0xff]   ;;  %v3105_v17 = vld [vmem:[#allocation3 + $0x1e0] sm:$0xff]   ;;  %v3108_v24 = vld [vmem:[#allocation3 + $0x168] sm:$0xff]  }
  0x60   : > { %v938_v29 = vcombine.low %v498_v22, %v3369_v28  ;;  %v3378_v33 = vcombine.low %v905_v25, %v3365_v27  ;;  %v701_v4 = vcombine.high %v2692_v1, %v2692_v1  ;;  %v2696_v5 = vrot.slane %v2692_v1, 9  ;;  %v3103_v14 = vld [vmem:[#allocation3 + $0x198] sm:$0xff]   ;;  %v3106_v21 = vld [vmem:[#allocation3 + $0x120] sm:$0xff]   ;;  %v3124_v49 = vld [vmem:[#allocation3 + $0x248] sm:$0xff]  }
  0x61   : > { %v553_v8 = vsel %vm3390_vm0, %v2682_v55, %v552_v63  ;;  %v560_v9 = vrot.slane %v538_v62, 7  ;;  %v557_v11 = vsel %vm3390_vm0, %v2683_v60, %v556_v3  ;;  %v3107_v26 = vld [vmem:[#allocation3 + $0x1a0] sm:$0xff]   ;;  %v3125_v52 = vld [vmem:[#allocation3 + $0x2c8] sm:$0xff]   ;;  %v3128_v55 = vld [vmem:[#allocation3 + $0x250] sm:$0xff]  }
  0x62   : > { %v952_v35 = vrot.slane %v938_v29, %v3353_v6  ;;  %1243 = vmatprep.mubr.bf16.mxu0 %v3378_v33  ;;  %v1325_v12 = vcombine.low %v549_v2, %v553_v8  ;;  %v716_v13 = vrot.slane %v701_v4, 7  ;;  %v1343_v16 = vcombine.low %v553_v8, %v557_v11  ;;  %v3120_v45 = vld [vmem:[#allocation3 + $0x240] sm:$0xff]   ;;  %v3126_v53 = vld [vmem:[#allocation3 + $0x208] sm:$0xff]   ;;  %v3129_v57 = vld [vmem:[#allocation3 + $0x2d0] sm:$0xff]  }
  0x63   : > { %1244 = vmatmul.mubr.bf16.vlgmr.msra.gmra.mrb[0].mxu0 %v895_v31  ;;  %v561_v15 = vsel %vm3390_vm0, %v2684_v0, %v560_v9  ;;  %v3121_v47 = vld [vmem:[#allocation3 + $0x2c0] sm:$0xff]   ;;  %v3130_v58 = vld [vmem:[#allocation3 + $0x210] sm:$0xff]   ;;  %v3132_v60 = vld [vmem:[#allocation3 + $0x258] sm:$0xff]  }
  0x64   : > { %v3384_v39 = vcombine.low %v945_v30, %v952_v35  ;;  %2898 = vmatpush3.bf16.msra.mxu0 %v3090_v34  ;;  %v1326_v18 = vcombine.low %v557_v11, %v561_v15  ;;  %v1333_v19 = vrot.slane %v1325_v12, %v3353_v6  ;;  %v3405_v20 = vsel %vm3390_vm0, %v2696_v5, %v716_v13  ;;  %v3109_v30 = vld [vmem:[#allocation3 + $0x1e8] sm:$0xff]   ;;  %v3112_v35 = vld [vmem:[#allocation3 + $0x170] sm:$0xff]   ;;  %v3122_v48 = vld [vmem:[#allocation3 + $0x200] sm:$0xff]  }
  0x65   : > { %2899 = vmatprep.subr.bf16.mxu0 %v3092_v36  ;;  %v1344_v22 = vcombine.low %v561_v15, %v3405_v20  ;;  %v1351_v23 = vrot.slane %v1343_v16, %v3353_v6  ;;  %v3111_v36 = vld [vmem:[#allocation3 + $0x1a8] sm:$0xff]   ;;  %v3131_v59 = vld [vmem:[#allocation3 + $0x290] sm:$0xff]   ;;  %v3133_v0 = vld [vmem:[#allocation3 + $0x2d8] sm:$0xff]  }
  0x66   : > { %1284 = vmatprep.mubr.bf16.mxu1 %v3384_v39  ;;  %v3410_v25 = vrot.slane %v1326_v18, %v3353_v6  ;;  %v3134_v1 = vld [vmem:[#allocation3 + $0x218] sm:$0xff]   ;;  %v3136_v3 = vld [vmem:[#allocation3 + $0x260] sm:$0xff]   ;;  %v3140_v12 = vld [vmem:[#allocation3 + $0x268] sm:$0xff]  }
  0x67   : > { %1285 = vmatmul.mubr.bf16.vlgmr.msra.gmra.mrb[0].mxu1 %v3382_v37  ;;  %v1358_v29 = vrot.slane %v1344_v22, %v3353_v6  ;;  %v3135_v2 = vld [vmem:[#allocation3 + $0x298] sm:$0xff]   ;;  %v3137_v8 = vld [vmem:[#allocation3 + $0x2e0] sm:$0xff]   ;;  %v3141_v15 = vld [vmem:[#allocation3 + $0x2e8] sm:$0xff]  }
  0x68   : > { %2920 = vmatpush3.bf16.msra.mxu1 %v3091_v38  ;;  %2900 = vmatpush3.bf16.msra.mxu0 %v3094_v41  ;;  %v1341_v31 = vcombine.low %v1333_v19, %v3410_v25  ;;  %v3113_v38 = vld [vmem:[#allocation3 + $0x1f0] sm:$0xff]   ;;  %v3116_v41 = vld [vmem:[#allocation3 + $0x178] sm:$0xff]   ;;  %v3138_v11 = vld [vmem:[#allocation3 + $0x220] sm:$0xff]  }
  0x69   : > { %2921 = vmatprep.subr.bf16.mxu1 %v3093_v40  ;;  %2901 = vmatprep.subr.bf16.mxu0 %v3096_v43  ;;  %v3414_v34 = vcombine.low %v1351_v23, %v1358_v29  ;;  %v3114_v40 = vld [vmem:[#allocation3 + $0x130] sm:$0xff]   ;;  %v3117_v43 = vld [vmem:[#allocation3 + $0x1f8] sm:$0xff]   ;;  %v3143_v19 = vld [vmem:[#allocation3 + $0x2a8] sm:$0xff]  }
  0x6a   : > { %1650 = vmatprep.mubr.bf16.mxu0 %v1341_v31  ;;  %v3145_v22 = vld [vmem:[#allocation3 + $0x2f0] sm:$0xff]   ;;  %v3149_v31 = vld [vmem:[#allocation3 + $0x2f8] sm:$0xff]  }
  0x6b   : > { %1691 = vmatprep.mubr.bf16.mxu1 %v3414_v34  ;;  %v3179_v54 = vld [vmem:[#allocation3 + $0x3f0] sm:$0xff]  }
  0x6c   : > { %2922 = vmatpush3.bf16.msra.mxu1 %v3095_v42  ;;  %2902 = vmatpush3.bf16.msra.mxu0 %v3098_v46  ;;  %v3115_v42 = vld [vmem:[#allocation3 + $0x1b0] sm:$0xff]   ;;  %v3119_v46 = vld [vmem:[#allocation3 + $0x1b8] sm:$0xff]  }
  0x6d   : > { %2923 = vmatprep.subr.bf16.mxu1 %v3097_v44  ;;  %2903 = vmatprep.subr.bf16.mxu0 %v3100_v51  ;;  %v3118_v44 = vld [vmem:[#allocation3 + $0x138] sm:$0xff]   ;;  %v3123_v51 = vld [vmem:[#allocation3 + $0x280] sm:$0xff]  }
  0x70   : > { %2924 = vmatpush3.bf16.msra.mxu1 %v3099_v56  ;;  %2904 = vmatpush3.bf16.msra.mxu0 %v3102_v7  ;;  %v3127_v56 = vld [vmem:[#allocation3 + $0x288] sm:$0xff]  }
  0x71   : > { %2925 = vmatprep.subr.bf16.mxu1 %v3101_v61  ;;  %2905 = vmatprep.subr.bf16.mxu0 %v3104_v10 }
  0x74   : > { %2926 = vmatpush3.bf16.msra.mxu1 %v3103_v14  ;;  %2906 = vmatpush3.bf16.msra.mxu0 %v3106_v21  ;;  %v3139_v14 = vld [vmem:[#allocation3 + $0x2a0] sm:$0xff]   ;;  %v3144_v21 = vld [vmem:[#allocation3 + $0x270] sm:$0xff]  }
  0x75   : > { %2927 = vmatprep.subr.bf16.mxu1 %v3105_v17  ;;  %2907 = vmatprep.subr.bf16.mxu0 %v3108_v24  ;;  %v3142_v17 = vld [vmem:[#allocation3 + $0x228] sm:$0xff]   ;;  %v3146_v24 = vld [vmem:[#allocation3 + $0x230] sm:$0xff]  }
  0x78   : > { %2928 = vmatpush3.bf16.msra.mxu1 %v3107_v26  ;;  %2908 = vmatpush3.bf16.msra.mxu0 %v3110_v32  ;;  %v3148_v26 = vld [vmem:[#allocation3 + $0x278] sm:$0xff]  }
  0x79   : > { %2929 = vmatprep.subr.bf16.mxu1 %v3109_v30  ;;  %2909 = vmatprep.subr.bf16.mxu0 %v3112_v35  ;;  %v3190_v30 = vld.sshfl [vmem:[#allocation2 + $0x8] sm:$0xf pattern:$0x76325410]  ;;  %v3150_v32 = vld [vmem:[#allocation3 + $0x238] sm:$0xff]   ;;  %v3154_v35 = vld [vmem:[#allocation3 + $0x340] sm:$0xff]  }
  0x7c   : > { %2930 = vmatpush3.bf16.msra.mxu1 %v3111_v36  ;;  %2910 = vmatpush3.bf16.msra.mxu0 %v3114_v40  ;;  %v3151_v36 = vld [vmem:[#allocation3 + $0x2b8] sm:$0xff]   ;;  %v3158_v40 = vld [vmem:[#allocation3 + $0x348] sm:$0xff]  }
  0x7d   : > { %2931 = vmatprep.subr.bf16.mxu1 %v3113_v38  ;;  %2911 = vmatprep.subr.bf16.mxu0 %v3116_v41  ;;  %v3155_v38 = vld [vmem:[#allocation3 + $0x3c0] sm:$0xff]  }
  0x80   : > { %2932 = vmatpush3.bf16.msra.mxu1 %v3115_v42  ;;  %2912 = vmatpush3.bf16.msra.mxu0 %v3118_v44  ;;  %v3157_v42 = vld [vmem:[#allocation3 + $0x380] sm:$0xff]   ;;  %v3160_v44 = vld [vmem:[#allocation3 + $0x308] sm:$0xff]  }
  0x81   : > { %2933 = vmatprep.subr.bf16.mxu1 %v3117_v43  ;;  %2941 = vmatprep.subr.bf16.mxu0 %v3120_v45  ;;  %v3159_v43 = vld [vmem:[#allocation3 + $0x3c8] sm:$0xff]   ;;  %v3162_v45 = vld [vmem:[#allocation3 + $0x350] sm:$0xff]  }
  0x83   : > { %1651 = vmatmul.mubr.bf16.vlgmr.msra.gmra.mrb[4].mxu0 %v3378_v33  ;;  %v2700_v33 = vld.sshfl [vmem:[#allocation2 + $0x14] sm:$0x13 pattern:$0x76325410] }
  0x84   : > { %2934 = vmatpush3.bf16.msra.mxu1 %v3119_v46  ;;  %2942 = vmatpush3.bf16.msra.mxu0 %v3122_v48  ;;  %v762_v61 = vcombine.high %v2700_v33, %v2700_v33  ;;  %v806_v62 = vshrl.u32 %v2700_v33, 16  ;;  %v809_v63 = vshll.u32 %v2700_v33, 16  ;;  %v3161_v46 = vld [vmem:[#allocation3 + $0x388] sm:$0xff]   ;;  %v3164_v48 = vld [vmem:[#allocation3 + $0x310] sm:$0xff]  }
  0x85   : > { %2963 = vmatprep.subr.bf16.mxu1 %v3121_v47  ;;  %2943 = vmatprep.subr.bf16.mxu0 %v3124_v49  ;;  %v3163_v47 = vld [vmem:[#allocation3 + $0x3d0] sm:$0xff]   ;;  %v3166_v49 = vld [vmem:[#allocation3 + $0x358] sm:$0xff]   ;;  %v3174_v33 = vld [vmem:[#allocation3 + $0x368] sm:$0xff]  }
  0x86   : > { %2061 = vmatprep.mubr.bf16.mxu0 %v3384_v39  ;;  %v808_v4 = vrot.slane %v806_v62, 6  ;;  %v811_v5 = vrot.slane %v809_v63, 7  ;;  %v815_v7 = vshll.u32 %v762_v61, 16  ;;  %v3173_v62 = vld [vmem:[#allocation3 + $0x3a0] sm:$0xff]  }
  0x87   : > { %1692 = vmatmul.mubr.bf16.vlgmr.msra.gmra.mrb[4].mxu1 %v3384_v39 }
  0x88   : > { %2964 = vmatpush3.bf16.msra.mxu1 %v3123_v51  ;;  %2944 = vmatpush3.bf16.msra.mxu0 %v3126_v53  ;;  %v812_v9 = vor.u32 %v811_v5, %v808_v4  ;;  %v817_v10 = vrot.slane %v815_v7, 7  ;;  %v3165_v51 = vld [vmem:[#allocation3 + $0x390] sm:$0xff]   ;;  %v3170_v53 = vld [vmem:[#allocation3 + $0x360] sm:$0xff]   ;;  %v3177_v4 = vld [vmem:[#allocation3 + $0x3a8] sm:$0xff]  }
  0x89   : > { %2965 = vmatprep.subr.bf16.mxu1 %v3125_v52  ;;  %2945 = vmatprep.subr.bf16.mxu0 %v3128_v55  ;;  %v3168_v52 = vld [vmem:[#allocation3 + $0x318] sm:$0xff]   ;;  %v3180_v7 = vld [vmem:[#allocation3 + $0x330] sm:$0xff]  }
  0x8a   : > { %v813_v13 = vrot.slane %v812_v9, 2  ;;  %v2704_v55 = vld.sshfl [vmem:[#allocation2 + $0x14] sm:$0x12 pattern:$0x76325410] }
  0x8b   : > { %v3183_v9 = vld [vmem:[#allocation3 + $0x3f8] sm:$0xff]  }
  0x8c   : > { %2966 = vmatpush3.bf16.msra.mxu1 %v3127_v56  ;;  %2946 = vmatpush3.bf16.msra.mxu0 %v3130_v58  ;;  %v818_v16 = vsel %vm3347_vm11, %v813_v13, %v817_v10  ;;  %v858_v56 = vcombine.high %v2704_v55, %v2704_v55  ;;  %v3171_v58 = vld [vmem:[#allocation3 + $0x3e0] sm:$0xff]   ;;  %v3184_v10 = vld [vmem:[#allocation3 + $0x338] sm:$0xff]  }
  0x8d   : > { %2967 = vmatprep.subr.bf16.mxu1 %v3129_v57  ;;  %2947 = vmatprep.subr.bf16.mxu0 %v3132_v60  ;;  %v1755_v18 = vcombine.low %v3369_v28, %v818_v16  ;;  %v3191_v28 = vld.sshfl [vmem:[#allocation2 + $0x10] sm:$0xf pattern:$0x76325410] }
  0x8e   : > { %v1752_v41 = vcombine.low %v3190_v30, %v3191_v28  ;;  %v3169_v57 = vld [vmem:[#allocation3 + $0x398] sm:$0xff]   ;;  %v873_v60 = vrot.slane %v858_v56, 7 }
  0x8f   : > { %v1769_v23 = vrot.slane %v1755_v18, %v3353_v6 }
  0x90   : > { %2968 = vmatpush3.bf16.msra.mxu1 %v3131_v59  ;;  %2948 = vmatpush3.bf16.msra.mxu0 %v3134_v1  ;;  %v3172_v59 = vld [vmem:[#allocation3 + $0x320] sm:$0xff]   ;;  %v3176_v1 = vld [vmem:[#allocation3 + $0x328] sm:$0xff]  }
  0x91   : > { %2969 = vmatprep.subr.bf16.mxu1 %v3133_v0  ;;  %2949 = vmatprep.subr.bf16.mxu0 %v3136_v3  ;;  %v3425_v29 = vcombine.low %v3365_v27, %v1769_v23  ;;  %v3156_v27 = vld [vmem:[#allocation3 + $0x300] sm:$0xff]   ;;  %v3175_v0 = vld [vmem:[#allocation3 + $0x3e8] sm:$0xff]  }
  0x93   : > { %2102 = vmatprep.mubr.bf16.mxu1 %v3425_v29 }
  0x94   : > { %2970 = vmatpush3.bf16.msra.mxu1 %v3135_v2  ;;  %2950 = vmatpush3.bf16.msra.mxu0 %v3138_v11  ;;  %v3178_v2 = vld [vmem:[#allocation3 + $0x370] sm:$0xff]  }
  0x95   : > { %2971 = vmatprep.subr.bf16.mxu1 %v3137_v8  ;;  %2951 = vmatprep.subr.bf16.mxu0 %v3140_v12  ;;  %v3182_v8 = vld [vmem:[#allocation3 + $0x378] sm:$0xff]  }
  0x98   : > { %2972 = vmatpush3.bf16.msra.mxu1 %v3139_v14  ;;  %2952 = vmatpush3.bf16.msra.mxu0 %v3142_v17 }
  0x99   : > { %2973 = vmatprep.subr.bf16.mxu1 %v3141_v15  ;;  %2953 = vmatprep.subr.bf16.mxu0 %v3144_v21 }
  0x9c   : > { %2974 = vmatpush3.bf16.msra.mxu1 %v3143_v19  ;;  %2954 = vmatpush3.bf16.msra.mxu0 %v3146_v24 }
  0x9d   : > { %2975 = vmatprep.subr.bf16.mxu1 %v3145_v22  ;;  %2955 = vmatprep.subr.bf16.mxu0 %v3148_v26 }
  0xa0   : > { %2976 = vmatpush3.bf16.msra.mxu1 %v3147_v50  ;;  %2956 = vmatpush3.bf16.msra.mxu0 %v3150_v32 }
  0xa1   : > { %2977 = vmatprep.subr.bf16.mxu1 %v3149_v31  ;;  %2985 = vmatprep.subr.bf16.mxu0 %v3154_v35 }
  0xa3   : > { %2062 = vmatmul.mubr.bf16.vlgmr.msra.gmra.mrb[8].mxu0 %v3382_v37  ;;  %v3167_v37 = vld [vmem:[#allocation3 + $0x3d8] sm:$0xff]  }
  0xa4   : > { %2978 = vmatpush3.bf16.msra.mxu1 %v3151_v36  ;;  %2986 = vmatpush3.bf16.msra.mxu0 %v3156_v27 }
  0xa5   : > { %3007 = vmatprep.subr.bf16.mxu1 %v3155_v38  ;;  %2987 = vmatprep.subr.bf16.mxu0 %v3158_v40 }
  0xa6   : > { %2451 = vmatprep.mubr.bf16.mxu0 %v3414_v34  ;;  %v2708_v34 = vrot.slane %v2704_v55, 9 }
  0xa7   : > { %2103 = vmatmul.mubr.bf16.vlgmr.msra.gmra.mrb[8].mxu1 %v1752_v41 }
  0xa8   : > { %3008 = vmatpush3.bf16.msra.mxu1 %v3157_v42  ;;  %2988 = vmatpush3.bf16.msra.mxu0 %v3160_v44  ;;  %v874_v61 = vsel %vm3390_vm0, %v2708_v34, %v873_v60 }
  0xa9   : > { %3009 = vmatprep.subr.bf16.mxu1 %v3159_v43  ;;  %2989 = vmatprep.subr.bf16.mxu0 %v3162_v45  ;;  %v2145_v63 = vcombine.low %v3405_v20, %v874_v61  ;;  %v3181_v20 = vld [vmem:[#allocation3 + $0x3b0] sm:$0xff]  }
  0xab   : > { %v2159_v3 = vrot.slane %v2145_v63, %v3353_v6  ;;  %v3185_v6 = vld [vmem:[#allocation3 + $0x3b8] sm:$0xff]  }
  0xac   : > { %3010 = vmatpush3.bf16.msra.mxu1 %v3161_v46  ;;  %2990 = vmatpush3.bf16.msra.mxu0 %v3164_v48 }
  0xad   : > { %3011 = vmatprep.subr.bf16.mxu1 %v3163_v47  ;;  %2991 = vmatprep.subr.bf16.mxu0 %v3166_v49  ;;  %v2160_v5 = vcombine.low %v3410_v25, %v2159_v3 }
  0xaf   : > { %2492 = vmatprep.mubr.bf16.mxu1 %v2160_v5 }
  0xb0   : > { %3012 = vmatpush3.bf16.msra.mxu1 %v3165_v51  ;;  %2992 = vmatpush3.bf16.msra.mxu0 %v3168_v52 }
  0xb1   : > { %3013 = vmatprep.subr.bf16.mxu1 %v3167_v37  ;;  %2993 = vmatprep.subr.bf16.mxu0 %v3170_v53 }
  0xb4   : > { %3014 = vmatpush3.bf16.msra.mxu1 %v3169_v57  ;;  %2994 = vmatpush3.bf16.msra.mxu0 %v3172_v59 }
  0xb5   : > { %3015 = vmatprep.subr.bf16.mxu1 %v3171_v58  ;;  %2995 = vmatprep.subr.bf16.mxu0 %v3174_v33 }
  0xb8   : > { %3016 = vmatpush3.bf16.msra.mxu1 %v3173_v62  ;;  %2996 = vmatpush3.bf16.msra.mxu0 %v3176_v1 }
  0xb9   : > { %3017 = vmatprep.subr.bf16.mxu1 %v3175_v0  ;;  %2997 = vmatprep.subr.bf16.mxu0 %v3178_v2 }
  0xbc   : > { %3018 = vmatpush3.bf16.msra.mxu1 %v3177_v4  ;;  %2998 = vmatpush3.bf16.msra.mxu0 %v3180_v7 }
  0xbd   : > { %3019 = vmatprep.subr.bf16.mxu1 %v3179_v54  ;;  %2999 = vmatprep.subr.bf16.mxu0 %v3182_v8 }
  0xc0   : > { %3020 = vmatpush3.bf16.msra.mxu1 %v3181_v20  ;;  %3000 = vmatpush3.bf16.msra.mxu0 %v3184_v10 }
  0xc1   : > { %3021 = vmatprep.subr.bf16.mxu1 %v3183_v9 }
  0xc3   : > { %2452 = vmatmul.mubr.bf16.vlgmr.msra.gmra.mrb[12].mxu0 %v3384_v39 }
  0xc4   : > { %3022 = vmatpush3.bf16.msra.mxu1 %v3185_v6 }
  0xc7   : > { %2493 = vmatmul.mubr.bf16.vlgmr.msra.gmra.mrb[12].mxu1 %v3425_v29 }
 0x136   : > { %v2869_v25 = vpop.f32.mrb[0].mxu0 }
 0x137   : > { %v2870_v11 = vpop.f32.mrb[1].mxu0 }
 0x138   : > { %v2871_v12 = vadd.f32 %v2870_v11, %v2869_v25  ;;  %v2872_v13 = vpop.f32.mrb[2].mxu0 }
 0x139   : > { %v2873_v15 = vpop.f32.mrb[3].mxu0 }
 0x13a   : > { %v2891_v14 = vpop.f32.mrb[0].mxu1  ;;  %v2874_v17 = vadd.f32 %v2873_v15, %v2872_v13 }
 0x13b   : > { %v2892_v16 = vpop.f32.mrb[1].mxu1 }
 0x13c   : > { %v2893_v18 = vadd.f32 %v2892_v16, %v2891_v14  ;;  %v2894_v19 = vpop.f32.mrb[2].mxu1 }
 0x13d   : > { %v2895_v21 = vpop.f32.mrb[3].mxu1 }
 0x13e   : > { %v1287_v22 = vadd.f32 %v2893_v18, %v2871_v12  ;;  %v2896_v23 = vadd.f32 %v2895_v21, %v2894_v19 }
 0x140   : > { %v1313_v39 = vcombine.high %v1287_v22, %v1287_v22  ;;  %v1317_v24 = vpack.c.bf16 %v1287_v22, %v1287_v22  ;;  %v1290_v26 = vadd.f32 %v2896_v23, %v2874_v17  ;;  %v1301_v29 = vmul.f32 %v1287_v22, %v1287_v22 }
 0x142   : > { %v1318_v50 = vpack.c.bf16 %v1313_v39, %v1313_v39  ;;  %1321 = vst [vmem:[%s3441_s22] sm:$0x3] %v1317_v24  ;;  %v1293_v30 = vadd.f32 %v1290_v26, %v1287_v22  ;;  %v1302_v28 = vmul.f32 %v1290_v26, %v1290_v26  ;;  %v1314_v31 = vcombine.high %v1290_v26, %v1290_v26 }
 0x143   : > { %v1319_v32 = vpack.c.bf16 %v1290_v26, %v1290_v26 }
 0x144   : > { %1322 = vst [vmem:[%s3441_s22 + $0x8] sm:$0x3] %v1318_v50  ;;  %v1303_v35 = vadd.f32 %v1302_v28, %v1301_v29  ;;  %v1320_v36 = vpack.c.bf16 %v1314_v31, %v1314_v31  ;;  %v1294_v40 = vrot.slane %v1293_v30, 4 }
 0x145   : > { %1323 = vst [vmem:[%s3441_s22 + $0x10] sm:$0x3] %v1319_v32 }
 0x146   : > { %1324 = vst [vmem:[%s3441_s22 + $0x18] sm:$0x3] %v1320_v36  ;;  %v1304_v47 = vrot.slane %v1303_v35, 4  ;;  %v1295_v51 = vadd.f32 %v1294_v40, %v1293_v30 }
 0x148   : > { %v1305_v55 = vadd.f32 %v1304_v47, %v1303_v35  ;;  %v1296_v58 = vrot.slane %v1295_v51, 2 }
 0x14a   : > { %v1306_v0 = vrot.slane %v1305_v55, 2  ;;  %v1297_v4 = vadd.f32 %v1296_v58, %v1295_v51 }
 0x14c   : > { %v1307_v7 = vadd.f32 %v1306_v0, %v1305_v55  ;;  %v1298_v9 = vrot.slane %v1297_v4, 1 }
 0x14e   : > { %v1308_v25 = vrot.slane %v1307_v7, 1  ;;  %v1299_v13 = vadd.f32 %v1298_v9, %v1297_v4 }
 0x150   : > { %v1309_v16 = vadd.f32 %v1308_v25, %v1307_v7 }
 0x156   : > { %v2913_v38 = vpop.f32.mrb[4].mxu0 }
 0x157   : > { %v2914_v27 = vpop.f32.mrb[5].mxu0 }
 0x158   : > { %v2915_v41 = vadd.f32 %v2914_v27, %v2913_v38  ;;  %v2916_v42 = vpop.f32.mrb[6].mxu0 }
 0x159   : > { %v2917_v44 = vpop.f32.mrb[7].mxu0 }
 0x15a   : > { %v2935_v43 = vpop.f32.mrb[4].mxu1  ;;  %v2918_v46 = vadd.f32 %v2917_v44, %v2916_v42 }
 0x15b   : > { %v2936_v45 = vpop.f32.mrb[5].mxu1 }
 0x15c   : > { %v2937_v48 = vadd.f32 %v2936_v45, %v2935_v43  ;;  %v2938_v49 = vpop.f32.mrb[6].mxu1 }
 0x15d   : > { %v2939_v37 = vpop.f32.mrb[7].mxu1 }
 0x15e   : > { %v1694_v52 = vadd.f32 %v2937_v48, %v2915_v41  ;;  %v2940_v53 = vadd.f32 %v2939_v37, %v2938_v49 }
 0x160   : > { %v1720_v56 = vcombine.high %v1694_v52, %v1694_v52  ;;  %v1724_v34 = vpack.c.bf16 %v1694_v52, %v1694_v52  ;;  %v1697_v57 = vadd.f32 %v2940_v53, %v2918_v46  ;;  %v1708_v59 = vmul.f32 %v1694_v52, %v1694_v52 }
 0x162   : > { %v1725_v60 = vpack.c.bf16 %v1720_v56, %v1720_v56  ;;  %1728 = vst [vmem:[%s3441_s22 + $0x2] sm:$0x3] %v1724_v34  ;;  %v1700_v33 = vadd.f32 %v1697_v57, %v1694_v52  ;;  %v1709_v61 = vmul.f32 %v1697_v57, %v1697_v57  ;;  %v1721_v62 = vcombine.high %v1697_v57, %v1697_v57 }
 0x163   : > { %v1726_v63 = vpack.c.bf16 %v1697_v57, %v1697_v57 }
 0x164   : > { %1729 = vst [vmem:[%s3441_s22 + $0xa] sm:$0x3] %v1725_v60  ;;  %v1701_v1 = vrot.slane %v1700_v33, 4  ;;  %v1710_v2 = vadd.f32 %v1709_v61, %v1708_v59  ;;  %v1727_v3 = vpack.c.bf16 %v1721_v62, %v1721_v62 }
 0x165   : > { %1730 = vst [vmem:[%s3441_s22 + $0x12] sm:$0x3] %v1726_v63 }
 0x166   : > { %v1702_v5 = vadd.f32 %v1701_v1, %v1700_v33  ;;  %v1711_v54 = vrot.slane %v1710_v2, 4  ;;  %1731 = vst [vmem:[%s3441_s22 + $0x1a] sm:$0x3] %v1727_v3 }
 0x168   : > { %v1703_v8 = vrot.slane %v1702_v5, 2  ;;  %v1712_v20 = vadd.f32 %v1711_v54, %v1710_v2 }
 0x16a   : > { %v1704_v10 = vadd.f32 %v1703_v8, %v1702_v5  ;;  %v1713_v6 = vrot.slane %v1712_v20, 2 }
 0x16c   : > { %v1705_v11 = vrot.slane %v1704_v10, 1  ;;  %v1714_v12 = vadd.f32 %v1713_v6, %v1712_v20 }
 0x16e   : > { %v1706_v14 = vadd.f32 %v1705_v11, %v1704_v10  ;;  %v1715_v15 = vrot.slane %v1714_v12, 1 }
 0x170   : > { %v1707_v17 = vadd.f32 %v1706_v14, %v1299_v13  ;;  %v1716_v18 = vadd.f32 %v1715_v15, %v1714_v12 }
 0x172   : > { %v1717_v19 = vadd.f32 %v1716_v18, %v1309_v16 }
 0x176   : > { %v2957_v21 = vpop.f32.mrb[8].mxu0 }
 0x177   : > { %v2958_v22 = vpop.f32.mrb[9].mxu0 }
 0x178   : > { %v2959_v23 = vadd.f32 %v2958_v22, %v2957_v21  ;;  %v2960_v39 = vpop.f32.mrb[10].mxu0 }
 0x179   : > { %v2961_v26 = vpop.f32.mrb[11].mxu0 }
 0x17a   : > { %v2979_v24 = vpop.f32.mrb[8].mxu1  ;;  %v2962_v50 = vadd.f32 %v2961_v26, %v2960_v39 }
 0x17b   : > { %v2980_v29 = vpop.f32.mrb[9].mxu1 }
 0x17c   : > { %v2981_v30 = vadd.f32 %v2980_v29, %v2979_v24  ;;  %v2982_v28 = vpop.f32.mrb[10].mxu1 }
 0x17d   : > { %v2983_v31 = vpop.f32.mrb[11].mxu1 }
 0x17e   : > { %v2105_v32 = vadd.f32 %v2981_v30, %v2959_v23  ;;  %v2984_v35 = vadd.f32 %v2983_v31, %v2982_v28 }
 0x180   : > { %v2131_v36 = vcombine.high %v2105_v32, %v2105_v32  ;;  %v2135_v38 = vpack.c.bf16 %v2105_v32, %v2105_v32  ;;  %v2108_v27 = vadd.f32 %v2984_v35, %v2962_v50  ;;  %v2119_v40 = vmul.f32 %v2105_v32, %v2105_v32 }
 0x182   : > { %v2136_v41 = vpack.c.bf16 %v2131_v36, %v2131_v36  ;;  %2805 = vst [vmem:[%s3441_s22 + $0x4] sm:$0x3] %v2135_v38  ;;  %v2111_v42 = vadd.f32 %v2108_v27, %v2105_v32  ;;  %v2120_v43 = vmul.f32 %v2108_v27, %v2108_v27  ;;  %v2132_v44 = vcombine.high %v2108_v27, %v2108_v27 }
 0x183   : > { %v2137_v45 = vpack.c.bf16 %v2108_v27, %v2108_v27 }
 0x184   : > { %2806 = vst [vmem:[%s3441_s22 + $0xc] sm:$0x3] %v2136_v41  ;;  %v2112_v46 = vrot.slane %v2111_v42, 4  ;;  %v2121_v47 = vadd.f32 %v2120_v43, %v2119_v40  ;;  %v2138_v48 = vpack.c.bf16 %v2132_v44, %v2132_v44 }
 0x185   : > { %2807 = vst [vmem:[%s3441_s22 + $0x14] sm:$0x3] %v2137_v45 }
 0x186   : > { %v2113_v49 = vadd.f32 %v2112_v46, %v2111_v42  ;;  %v2122_v51 = vrot.slane %v2121_v47, 4  ;;  %2808 = vst [vmem:[%s3441_s22 + $0x1c] sm:$0x3] %v2138_v48 }
 0x188   : > { %v2114_v37 = vrot.slane %v2113_v49, 2  ;;  %v2123_v52 = vadd.f32 %v2122_v51, %v2121_v47 }
 0x18a   : > { %v2115_v53 = vadd.f32 %v2114_v37, %v2113_v49  ;;  %v2124_v55 = vrot.slane %v2123_v52, 2 }
 0x18c   : > { %v2116_v56 = vrot.slane %v2115_v53, 1  ;;  %v2125_v34 = vadd.f32 %v2124_v55, %v2123_v52 }
 0x18e   : > { %v2117_v57 = vadd.f32 %v2116_v56, %v2115_v53  ;;  %v2126_v58 = vrot.slane %v2125_v34, 1 }
 0x190   : > { %v2118_v59 = vadd.f32 %v2117_v57, %v1707_v17  ;;  %v2127_v60 = vadd.f32 %v2126_v58, %v2125_v34 }
 0x192   : > { %v2128_v33 = vadd.f32 %v2127_v60, %v1717_v19 }
 0x196   : > { %v3001_v61 = vpop.f32.mrb[12].mxu0 }
 0x197   : > { %v3002_v62 = vpop.f32.mrb[13].mxu0 }
 0x198   : > { %v3003_v63 = vadd.f32 %v3002_v62, %v3001_v61  ;;  %v3004_v0 = vpop.f32.mrb[14].mxu0 }
 0x199   : > { %v3005_v2 = vpop.f32.mrb[15].mxu0 }
 0x19a   : > { %v3023_v1 = vpop.f32.mrb[12].mxu1  ;;  %v3006_v4 = vadd.f32 %v3005_v2, %v3004_v0 }
 0x19b   : > { %v3024_v3 = vpop.f32.mrb[13].mxu1 }
 0x19c   : > { %v3025_v5 = vadd.f32 %v3024_v3, %v3023_v1  ;;  %v3026_v54 = vpop.f32.mrb[14].mxu1 }
 0x19d   : > { %v3027_v7 = vpop.f32.mrb[15].mxu1 }
 0x19e   : > { %v2495_v8 = vadd.f32 %v3025_v5, %v3003_v63  ;;  %v3028_v20 = vadd.f32 %v3027_v7, %v3026_v54 }
 0x1a0   : > { %v2521_v9 = vcombine.high %v2495_v8, %v2495_v8  ;;  %v2525_v10 = vpack.c.bf16 %v2495_v8, %v2495_v8  ;;  %v2498_v6 = vadd.f32 %v3028_v20, %v3006_v4  ;;  %v2509_v25 = vmul.f32 %v2495_v8, %v2495_v8 }
 0x1a2   : > { %v2526_v11 = vpack.c.bf16 %v2521_v9, %v2521_v9  ;;  %2841 = vst [vmem:[%s3441_s22 + $0x6] sm:$0x3] %v2525_v10  ;;  %v2501_v12 = vadd.f32 %v2498_v6, %v2495_v8  ;;  %v2510_v13 = vmul.f32 %v2498_v6, %v2498_v6  ;;  %v2522_v14 = vcombine.high %v2498_v6, %v2498_v6 }
 0x1a3   : > { %v2527_v15 = vpack.c.bf16 %v2498_v6, %v2498_v6 }
 0x1a4   : > { %2842 = vst [vmem:[%s3441_s22 + $0xe] sm:$0x3] %v2526_v11  ;;  %v2502_v16 = vrot.slane %v2501_v12, 4  ;;  %v2511_v17 = vadd.f32 %v2510_v13, %v2509_v25  ;;  %v2528_v18 = vpack.c.bf16 %v2522_v14, %v2522_v14 }
 0x1a5   : > { %2843 = vst [vmem:[%s3441_s22 + $0x16] sm:$0x3] %v2527_v15 }
 0x1a6   : > { %v2503_v19 = vadd.f32 %v2502_v16, %v2501_v12  ;;  %v2512_v21 = vrot.slane %v2511_v17, 4  ;;  %2844 = vst [vmem:[%s3441_s22 + $0x1e] sm:$0x3] %v2528_v18 }
 0x1a8   : > { %v2504_v22 = vrot.slane %v2503_v19, 2  ;;  %v2513_v23 = vadd.f32 %v2512_v21, %v2511_v17 }
 0x1aa   : > { %v2505_v39 = vadd.f32 %v2504_v22, %v2503_v19  ;;  %v2514_v24 = vrot.slane %v2513_v23, 2 }
 0x1ac   : > { %v2506_v26 = vrot.slane %v2505_v39, 1  ;;  %v2515_v29 = vadd.f32 %v2514_v24, %v2513_v23 }
 0x1ae   : > { %v2507_v50 = vadd.f32 %v2506_v26, %v2505_v39  ;;  %v2516_v30 = vrot.slane %v2515_v29, 1 }
 0x1b0   : > { %v2508_v28 = vadd.f32 %v2507_v50, %v2118_v59  ;;  %v2517_v31 = vadd.f32 %v2516_v30, %v2515_v29 }
 0x1b2   : > { %v2518_v32 = vadd.f32 %v2517_v31, %v2128_v33  ;;  %2533 = vst [vmem:[%s283_s8] sm:$0x1] %v2508_v28 }
 0x1b4   : > { %2534 = vst [vmem:[%s286_s11] sm:$0x1] %v2518_v32 }
 0x1b5 PF: > { %s18_s21 = sadd.s32 1, %s3230_s21  }
 0x1b6   : > { %p15_p5 = scmp.ge.s32.totalorder %s18_s21, 4  }
 0x1b8   :  { %17 = sbr.rel (!%p15_p5) target bundleno = 1 (0x1), region = 101 }
 0x1bf   :  { %2583 = vsyncpa [#allocation4], 1 }
 0x1c0   :  { %2585 = vsyncpa [#allocation4 + $0x1], 1 }

// kernel: dcgan_generator_forward.6
= control target key start
LH: loop header
LB: loop body
LE: loop exit
PB: predicated region body
PF: predicated region fallthrough
CT: control target
= control target key end

     0   :  { %12 = vsyncpa [#allocation4], 0  ;;  %s3952_s21 = smov 0   ;;  %s4551_s0 = inlined_call_operand.vmem [shape: bf16[2,8,8,128], index: 0, kind: input, shape index: {}]   ;;  %s4552_s1 = inlined_call_operand.vmem [shape: f32[1,1,1,128], index: 1, kind: input, shape index: {}]   ;;  %s4553_s2 = inlined_call_operand.vmem [shape: f32[1,1,1,128], index: 2, kind: input, shape index: {}]   ;;  %s4554_s3 = inlined_call_operand.hbm [shape: bf16[4,512,128], index: 3, kind: input, shape index: {}]   ;;  %s4555_s4 = inlined_call_operand.vmem [shape: bf16[16,2,8,256], index: 4, kind: output, shape index: {0}]   ;;  %s4556_s5 = inlined_call_operand.vmem [shape: f32[2,1,128], index: 5, kind: output, shape index: {1}]   ;;  %s4557_s6 = inlined_call_operand.vmem [shape: f32[2,1,128], index: 6, kind: output, shape index: {2}]  }
   0x1 LB: > { %s3958_s22 = sadd.s32 4294967295, %s3911_s21   ;;  %p3136_p0 = scmp.ge.s32.totalorder %s3911_s21, 1  ;;  %s3911_s21 = sphi %s3952_s21, %s18_s21  }
   0x2   : > { %p190_p1 = scmp.lt.s32.totalorder %s3911_s21, 3  ;;  %s3913_s23 = smov [#allocation3]  }
   0x3   : > { %s208_s24 = sshll.u32 %s3913_s23, 4  ;;  %p4558_p3 = scmp.eq.s32.totalorder %s3958_s22, 0  ;;  %s209_s24 = int_to_ptr.vmem [resolvable:$true] %s208_s24 }
   0x4   : > { %p3962_p2 = pnand %p3136_p0, %p190_p1  ;;  %s3873_s29 = scalar_lea.hbm %s4554_s3, 16384 }
   0x5   : > { %p3874_p6 = scmp.ne.s32.totalorder %s4554_s3, %s3873_s29  ;;  %p3880_p10 = scmp.lt.u32.totalorder %s3873_s29, %s4554_s3 }
   0x6   : > { %s4560_s25 = scalar_select %p3962_p2, 1, 0 }
   0x7   : > { %p3715_p4 = pneg %p3962_p2 }
   0x9   : > { %p3971_p5 = pnand %p4558_p3, %p3715_p4 }
   0xb   : > { %p3875_p7 = pneg %p3971_p5 }
   0xd   : > { %p3876_p8 = pnand %p3875_p7, %p3874_p6 }
   0xf   : > { %p3877_p9 = pneg %p3876_p8 }
  0x11   : > { %p3882_p11 = pnand %p3880_p10, %p3877_p9 }
  0x13   : > { %3885 = shalt.err (!%p3882_p11)
}
  0x14   : > { %s3886_s10 = scalar_lea.vmem %s209_s24, 16384  ;;  %p3894_p1 = scmp.lt.s32.totalorder %s209_s24, %s209_s24 }
  0x15   : > { %p3887_p12 = scmp.ne.s32.totalorder %s209_s24, %s3886_s10  ;;  %p3895_p4 = scmp.lt.s32.totalorder %s3886_s10, %s3886_s10 }
  0x17   : > { %p3889_p13 = pnand %p3887_p12, %p3875_p7  ;;  %p3896_p3 = por %p3895_p4, %p3894_p1 }
  0x19   : > { %p3890_p0 = pneg %p3889_p13 }
  0x1b   : > { %p3897_p2 = pnand %p3896_p3, %p3890_p0 }
  0x1d   : > { %3900 = shalt.err (!%p3897_p2)
}
  0x1e   : > { %s3914_s11 = smov 64   ;;  %s3915_s12 = smov 4  }
  0x1f   : > { %3718 = dma.hbm_to_vmem [thread:$0]  (!%p3971_p5), %s4554_s3, 16384, %s209_s24, [#allocation4], %s3914_s11, %s3914_s11, %s3915_s12  }
  0x20   : > { %p4562_p6 = scmp.ne.s32.totalorder %s4560_s25, 0 }
  0x21   : > { %p4563_p8 = scmp.eq.s32.totalorder (!%p4562_p6), %s3958_s22, 0 }
  0x22   : > { %232 = sbr.rel (%p4562_p6) target bundleno = 482 (0x1e2), region = 36 }
  0x29   : > { %3906 = dma.done.wait (%p4563_p8), [#allocation4], 16384   ;;  %p4564_p7 = pmov %p4563_p8 }
  0x2a   : > { %v3916_v0 = vmov 0   ;;  %v3733_v1 = vld [vmem:[#allocation3 + $0x40] sm:$0xff]   ;;  %v3737_v5 = vld [vmem:[#allocation3 + $0x48] sm:$0xff]   ;;  %v3741_v9 = vld [vmem:[#allocation3 + $0x50] sm:$0xff]   ;;  %p269_p2 = scmp.lt.s32.totalorder %s3958_s22, 1  ;;  %vm475_vm0 = vcmask 1043456  }
  0x2b   : > { %3908 = vsyncadd (%p4564_p7), [#allocation4], 4294950912  ;;  %288 = vst [vmem:[#allocation2] sm:$0xf] %v3916_v0  ;;  %v3734_v2 = vld [vmem:[#allocation3 + $0xc0] sm:$0xff]   ;;  %3391 = vmatprep.subr.bf16.mxu0 %v3733_v1  ;;  %v3738_v6 = vld [vmem:[#allocation3 + $0xc8] sm:$0xff]  }
  0x2c   : > { %289 = vst [vmem:[#allocation2 + $0x4] sm:$0x1] %v3916_v0  ;;  %290 = vst [vmem:[#allocation2 + $0x8] sm:$0xf] %v3916_v0  ;;  %v3735_v3 = vld [vmem:[#allocation3] sm:$0xff]   ;;  %3431 = vmatprep.subr.bf16.mxu1 %v3734_v2  ;;  %v3739_v7 = vld [vmem:[#allocation3 + $0x8] sm:$0xff]  }
  0x2d   : > { %291 = vst [vmem:[#allocation2 + $0xc] sm:$0x1] %v3916_v0  ;;  %292 = vst [vmem:[#allocation2 + $0x10] sm:$0xf] %v3916_v0  ;;  %v3736_v4 = vld [vmem:[#allocation3 + $0x80] sm:$0xff]   ;;  %3392 = vmatpush3.bf16.msra.mxu0 %v3735_v3  ;;  %v3740_v8 = vld [vmem:[#allocation3 + $0x88] sm:$0xff]  }
  0x2e   : > { %293 = vst [vmem:[#allocation2 + $0x14] sm:$0x1] %v3916_v0  ;;  %294 = vst [vmem:[#allocation2 + $0x18] sm:$0xf] %v3916_v0  ;;  %3432 = vmatpush3.bf16.msra.mxu1 %v3736_v4  ;;  %3393 = vmatprep.subr.bf16.mxu0 %v3737_v5  ;;  %v3742_v10 = vld [vmem:[#allocation3 + $0xd0] sm:$0xff]   ;;  %v3745_v13 = vld [vmem:[#allocation3 + $0x58] sm:$0xff]  }
  0x2f   : > { %295 = vst [vmem:[#allocation2 + $0x1c] sm:$0x1] %v3916_v0  ;;  %296 = vst [vmem:[#allocation2 + $0x20] sm:$0xf] %v3916_v0  ;;  %3433 = vmatprep.subr.bf16.mxu1 %v3738_v6  ;;  %v3743_v11 = vld [vmem:[#allocation3 + $0x10] sm:$0xff]   ;;  %v3746_v14 = vld [vmem:[#allocation3 + $0xd8] sm:$0xff]  }
  0x30   : > { %297 = vst [vmem:[#allocation2 + $0x24] sm:$0x1] %v3916_v0  ;;  %298 = vst [vmem:[#allocation2 + $0x28] sm:$0xf] %v3916_v0  ;;  %v3744_v12 = vld [vmem:[#allocation3 + $0x90] sm:$0xff]   ;;  %v3747_v15 = vld [vmem:[#allocation3 + $0x18] sm:$0xff]  }
  0x31   : > { %299 = vst [vmem:[#allocation2 + $0x2c] sm:$0x1] %v3916_v0  ;;  %300 = vst [vmem:[#allocation2 + $0x30] sm:$0xf] %v3916_v0  ;;  %3394 = vmatpush3.bf16.msra.mxu0 %v3739_v7  ;;  %v3748_v16 = vld [vmem:[#allocation3 + $0x98] sm:$0xff]   ;;  %v3749_v17 = vld [vmem:[#allocation3 + $0x60] sm:$0xff]  }
  0x32   : > { %301 = vst [vmem:[#allocation2 + $0x34] sm:$0x1] %v3916_v0  ;;  %302 = vst [vmem:[#allocation2 + $0x38] sm:$0xf] %v3916_v0  ;;  %3434 = vmatpush3.bf16.msra.mxu1 %v3740_v8  ;;  %3395 = vmatprep.subr.bf16.mxu0 %v3741_v9  ;;  %v3750_v18 = vld [vmem:[#allocation3 + $0xe0] sm:$0xff]   ;;  %v3753_v21 = vld [vmem:[#allocation3 + $0x68] sm:$0xff]  }
  0x33   : > { %303 = vst [vmem:[#allocation2 + $0x3c] sm:$0x1] %v3916_v0  ;;  %304 = vst [vmem:[#allocation2 + $0x40] sm:$0xf] %v3916_v0  ;;  %3435 = vmatprep.subr.bf16.mxu1 %v3742_v10  ;;  %v3751_v19 = vld [vmem:[#allocation3 + $0x20] sm:$0xff]   ;;  %v3754_v22 = vld [vmem:[#allocation3 + $0xe8] sm:$0xff]  }
  0x34   : > { %305 = vst [vmem:[#allocation2 + $0x44] sm:$0x1] %v3916_v0  ;;  %306 = vst [vmem:[#allocation2 + $0x48] sm:$0xf] %v3916_v0  ;;  %v3752_v20 = vld [vmem:[#allocation3 + $0xa0] sm:$0xff]   ;;  %v3755_v23 = vld [vmem:[#allocation3 + $0x28] sm:$0xff]  }
  0x35   : > { %307 = vst [vmem:[#allocation2 + $0x4c] sm:$0x1] %v3916_v0  ;;  %3396 = vmatpush3.bf16.msra.mxu0 %v3743_v11  ;;  %s3999_s15 = scalar_select %p269_p2, %s3958_s22, 1  ;;  %v3756_v24 = vld [vmem:[#allocation3 + $0xa8] sm:$0xff]   ;;  %v3757_v25 = vld [vmem:[#allocation3 + $0x70] sm:$0xff]   ;;  %v3761_v29 = vld [vmem:[#allocation3 + $0x78] sm:$0xff]  }
  0x36   : > { %3436 = vmatpush3.bf16.msra.mxu1 %v3744_v12  ;;  %3397 = vmatprep.subr.bf16.mxu0 %v3745_v13  ;;  %v3758_v26 = vld [vmem:[#allocation3 + $0xf0] sm:$0xff]   ;;  %v3762_v30 = vld [vmem:[#allocation3 + $0xf8] sm:$0xff]   ;;  %v3765_v40 = vld [vmem:[#allocation3 + $0x140] sm:$0xff]   ;;  %vm481_vm1 = vcmask 1040384   ;;  %vm476_vm2 = vsmask.f32 7938 }
  0x37   : > { %3437 = vmatprep.subr.bf16.mxu1 %v3746_v14  ;;  %v3759_v27 = vld [vmem:[#allocation3 + $0x30] sm:$0xff]   ;;  %s3362_s16 = sshll.u32 %s3999_s15, 5  ;;  %v3763_v31 = vld [vmem:[#allocation3 + $0x38] sm:$0xff]   ;;  %v3766_v44 = vld [vmem:[#allocation3 + $0x1c0] sm:$0xff]   ;;  %vm482_vm3 = vsmask.f32 256  ;;  %s283_s8 = scalar_lea.vmem %s4556_s5, %s3999_s15 }
  0x38   : > { %v3760_v28 = vld [vmem:[#allocation3 + $0xb0] sm:$0xff]   ;;  %s4005_s19 = scalar_lea.vmem %s4551_s0, %s3362_s16  ;;  %v3764_v32 = vld [vmem:[#allocation3 + $0xb8] sm:$0xff]   ;;  %vm4029_vm4 = vmand %vm475_vm0, %vm476_vm2  ;;  %vm545_vm6 = vsmask.f32 3328  ;;  %vm546_vm7 = vsmask.f32 7440  ;;  %s286_s11 = scalar_lea.vmem %s4557_s6, %s3999_s15 }
  0x39   : > { %3398 = vmatpush3.bf16.msra.mxu0 %v3747_v15  ;;  %v3373_v33 = vld [vmem:[%s4005_s19] sm:$0xff]   ;;  %v478_v57 = vld [vmem:[#allocation2 + $0x8] sm:$0xf]  ;;  %vm4036_vm5 = vmand %vm481_vm1, %vm482_vm3  ;;  %vm684_vm9 = vcmask 1042432   ;;  %vm685_vm10 = vcmask 1046532   ;;  %s3143_s26 = sshll.u32 %s3958_s22, 3 }
  0x3a   : > { %3438 = vmatpush3.bf16.msra.mxu1 %v3748_v16  ;;  %3399 = vmatprep.subr.bf16.mxu0 %v3749_v17  ;;  %v4011_v34 = vld [vmem:[%s4552_s1] ss:$0 sm:$0xff]  ;;  %v3374_v35 = vunpack.c.l.bf16 %v3373_v33  ;;  %v3375_v36 = vunpack.c.h.bf16 %v3373_v33  ;;  %v4024_v46 = vld [vmem:[#allocation2 + $0x4] sm:$0x1]  ;;  %v3388_v61 = vld [vmem:[%s4005_s19 + $0x8] sm:$0xff]   ;;  %p275_p3 = scmp.lt.s32.totalorder %s3143_s26, 15 }
  0x3b   : > { %3439 = vmatprep.subr.bf16.mxu1 %v3750_v18  ;;  %v4016_v37 = vld [vmem:[%s4553_s2] ss:$0 sm:$0xff]  ;;  %v558_v60 = vshll.u32 %v4024_v46, 16  ;;  %v484_v0 = vld [vmem:[#allocation2 + $0xc] sm:$0x1]  ;;  %v3378_v3 = vunpack.c.l.bf16 %v3388_v61  ;;  %v3379_v4 = vunpack.c.h.bf16 %v3388_v61  ;;  %vm4052_vm8 = vmor %vm545_vm6, %vm546_vm7 }
  0x3c   : > { %v331_v38 = vmul.f32 %v3374_v35, %v4011_v34  ;;  %v332_v39 = vmul.f32 %v3375_v36, %v4011_v34  ;;  %v4020_v41 = vld [vmem:[#allocation2] sm:$0xf]  ;;  %v487_v2 = vld [vmem:[#allocation2 + $0x10] sm:$0xf]  ;;  %v490_v5 = vld [vmem:[#allocation2 + $0x14] sm:$0x1] }
  0x3d   : > { %3400 = vmatpush3.bf16.msra.mxu0 %v3751_v19  ;;  %v549_v48 = vshrl.u32 %v4020_v41, 16  ;;  %v552_v49 = vshll.u32 %v4020_v41, 16  ;;  %v333_v11 = vmul.f32 %v3378_v3, %v4011_v34  ;;  %v334_v12 = vmul.f32 %v3379_v4, %v4011_v34  ;;  %vm4244_vm11 = vmor %vm684_vm9, %vm685_vm10  ;;  %s4574_s26 = smov (!%p275_p3, %s3143_s26), 15 }
  0x3e   : > { %3440 = vmatpush3.bf16.msra.mxu1 %v3752_v20  ;;  %3401 = vmatprep.subr.bf16.mxu0 %v3753_v21  ;;  %v346_v42 = vadd.f32 %v4016_v37, %v331_v38  ;;  %v347_v43 = vadd.f32 %v4016_v37, %v332_v39  ;;  %v560_v20 = vrot.slane %v558_v60, 5  ;;  %s3363_s27 = sshll.u32 %s4574_s26, 4 }
  0x3f   : > { %3441 = vmatprep.subr.bf16.mxu1 %v3754_v22  ;;  %v551_v58 = vrot.slane %v549_v48, 4  ;;  %v554_v59 = vrot.slane %v552_v49, 5  ;;  %v348_v17 = vadd.f32 %v4016_v37, %v333_v11  ;;  %v349_v18 = vadd.f32 %v4016_v37, %v334_v12  ;;  %s4486_s22 = scalar_lea.vmem %s4555_s4, %s3363_s27 }
  0x40   : > { %v354_v45 = vmax.f32 %v346_v42, 0.0  ;;  %v355_v47 = vmax.f32 %v347_v43, 0.0 }
  0x41   : > { %3402 = vmatpush3.bf16.msra.mxu0 %v3755_v23  ;;  %v555_v10 = vor.u32 %v554_v59, %v551_v58  ;;  %v356_v21 = vmax.f32 %v348_v17, 0.0  ;;  %v357_v22 = vmax.f32 %v349_v18, 0.0  ;;  %v3870_v23 = vld [vmem:[#allocation3 + $0x3f8] sm:$0xff]  }
  0x42   : > { %3442 = vmatpush3.bf16.msra.mxu1 %v3756_v24  ;;  %3403 = vmatprep.subr.bf16.mxu0 %v3757_v25  ;;  %v3364_v50 = vpack.c.bf16 %v354_v45, %v354_v45  ;;  %v3365_v51 = vpack.c.bf16 %v355_v47, %v355_v47 }
  0x43   : > { %3443 = vmatprep.subr.bf16.mxu1 %v3758_v26  ;;  %v556_v19 = vrot.slane %v555_v10, 4  ;;  %v3366_v24 = vpack.c.bf16 %v356_v21, %v356_v21  ;;  %v4056_v25 = vpack.c.bf16 %v357_v22, %v357_v22  ;;  %v3389_v26 = vld [vmem:[%s4005_s19 + $0x10] sm:$0xff]  }
  0x44   : > { %v395_v52 = vshrl.u32 %v3364_v50, 16  ;;  %v398_v53 = vshll.u32 %v3364_v50, 16  ;;  %v403_v54 = vshrl.u32 %v3365_v51, 16  ;;  %v406_v55 = vshll.u32 %v3365_v51, 16 }
  0x45   : > { %3404 = vmatpush3.bf16.msra.mxu0 %v3759_v27  ;;  %v3382_v27 = vunpack.c.l.bf16 %v3389_v26  ;;  %v561_v36 = vsel %vm4052_vm8, %v556_v19, %v560_v20 }
  0x46   : > { %3444 = vmatpush3.bf16.msra.mxu1 %v3760_v28  ;;  %3405 = vmatprep.subr.bf16.mxu0 %v3761_v29  ;;  %v397_v62 = vrot.slane %v395_v52, 7  ;;  %v405_v1 = vrot.slane %v403_v54, 7  ;;  %v3383_v28 = vunpack.c.h.bf16 %v3389_v26  ;;  %v411_v29 = vshrl.u32 %v3366_v24, 16 }
  0x47   : > { %3445 = vmatprep.subr.bf16.mxu1 %v3762_v30  ;;  %v414_v30 = vshll.u32 %v3366_v24, 16  ;;  %v335_v50 = vmul.f32 %v3382_v27, %v4011_v34  ;;  %v3769_v27 = vld [vmem:[#allocation3 + $0x100] sm:$0xff]  }
  0x48   : > { %v400_v6 = vor.u32 %v398_v53, %v397_v62  ;;  %v401_v7 = vrot.slane %v397_v62, 4  ;;  %v408_v8 = vor.u32 %v406_v55, %v405_v1  ;;  %v409_v9 = vrot.slane %v405_v1, 4  ;;  %v493_v62 = vld [vmem:[#allocation2 + $0x18] sm:$0xf] }
  0x49   : > { %3406 = vmatpush3.bf16.msra.mxu0 %v3763_v31  ;;  %v419_v31 = vshrl.u32 %v4056_v25, 16  ;;  %v336_v51 = vmul.f32 %v3383_v28, %v4011_v34  ;;  %v413_v3 = vrot.slane %v411_v29, 7  ;;  %v499_v28 = vld [vmem:[#allocation2 + $0x20] sm:$0xf]  ;;  %v502_v29 = vld [vmem:[#allocation2 + $0x24] sm:$0x1] }
  0x4a   : > { %3446 = vmatpush3.bf16.msra.mxu1 %v3764_v32  ;;  %3471 = vmatprep.subr.bf16.mxu0 %v3765_v40  ;;  %v479_v13 = vsel %vm4029_vm4, %v400_v6, %v478_v57  ;;  %v485_v14 = vsel %vm4036_vm5, %v401_v7, %v484_v0  ;;  %v488_v15 = vsel %vm4029_vm4, %v408_v8, %v487_v2  ;;  %v422_v32 = vshll.u32 %v4056_v25, 16  ;;  %v496_v0 = vld [vmem:[#allocation2 + $0x1c] sm:$0x1] }
  0x4b   : > { %3511 = vmatprep.subr.bf16.mxu1 %v3766_v44  ;;  %v491_v16 = vsel %vm4036_vm5, %v409_v9, %v490_v5  ;;  %480 = vst [vmem:[#allocation2 + $0x8] sm:$0xf] %v479_v13  ;;  %486 = vst [vmem:[#allocation2 + $0xc] sm:$0x1] %v485_v14  ;;  %v416_v11 = vor.u32 %v414_v30, %v413_v3  ;;  %v417_v12 = vrot.slane %v413_v3, 4  ;;  %v3771_v30 = vld [vmem:[#allocation3 + $0x148] sm:$0xff]  }
  0x4c   : > { %489 = vst [vmem:[#allocation2 + $0x10] sm:$0xf] %v488_v15  ;;  %492 = vst [vmem:[#allocation2 + $0x14] sm:$0x1] %v491_v16 }
  0x4d   : > { %v494_v19 = vsel %vm4029_vm4, %v416_v11, %v493_v62  ;;  %v497_v20 = vsel %vm4036_vm5, %v417_v12, %v496_v0  ;;  %v3776_v0 = vld [vmem:[#allocation3 + $0x1d0] sm:$0xff]  }
  0x4e   : > { %495 = vst [vmem:[#allocation2 + $0x18] sm:$0xf] %v494_v19  ;;  %498 = vst [vmem:[#allocation2 + $0x1c] sm:$0x1] %v497_v20 }
  0x52   : > { %v4061_v33 = vld [vmem:[#allocation2 + $0x8] sm:$0xf]  ;;  %v4063_v35 = vld [vmem:[#allocation2 + $0xc] sm:$0x1] }
  0x53   : > { %v719_v38 = vld [vmem:[#allocation2 + $0x8] sm:$0xf]  ;;  %v563_v39 = vshrl.u32 %v4061_v33, 16  ;;  %v566_v40 = vshll.u32 %v4061_v33, 16  ;;  %v572_v42 = vshll.u32 %v4063_v35, 16  ;;  %v3180_v18 = vcombine.low %v4020_v41, %v4061_v33  ;;  %v3770_v41 = vld [vmem:[#allocation3 + $0x180] sm:$0xff]  }
  0x54   : > { %v720_v43 = vld [vmem:[#allocation2 + $0x10] sm:$0xf]  ;;  %v736_v44 = vshrl.u32 %v719_v38, 16  ;;  %v4070_v45 = vld [vmem:[#allocation2 + $0xc] sm:$0x1]  ;;  %v739_v48 = vshll.u32 %v719_v38, 16 }
  0x55   : > { %v4072_v47 = vld [vmem:[#allocation2 + $0x14] sm:$0x1]  ;;  %v750_v49 = vshrl.u32 %v720_v43, 16  ;;  %v565_v52 = vrot.slane %v563_v39, 4  ;;  %v568_v53 = vrot.slane %v566_v40, 5  ;;  %v574_v54 = vrot.slane %v572_v42, 5 }
  0x56   : > { %v738_v55 = vrot.slane %v736_v44, 4  ;;  %v4076_v57 = vld [vmem:[#allocation2 + $0x10] sm:$0xf]  ;;  %v741_v58 = vrot.slane %v739_v48, 5  ;;  %v745_v59 = vshll.u32 %v4070_v45, 16  ;;  %v753_v61 = vshll.u32 %v720_v43, 16 }
  0x57   : > { %v752_v60 = vrot.slane %v750_v49, 4  ;;  %v569_v1 = vor.u32 %v568_v53, %v565_v52  ;;  %v759_v2 = vshll.u32 %v4072_v47, 16  ;;  %v577_v4 = vshrl.u32 %v4076_v57, 16  ;;  %v4090_v21 = vld [vmem:[#allocation2 + $0x14] sm:$0x1]  ;;  %v3772_v44 = vld [vmem:[#allocation3 + $0x1c8] sm:$0xff]  }
  0x58   : > { %v742_v5 = vor.u32 %v741_v58, %v738_v55  ;;  %v747_v6 = vrot.slane %v745_v59, 5  ;;  %v755_v7 = vrot.slane %v753_v61, 5  ;;  %v580_v8 = vshll.u32 %v4076_v57, 16  ;;  %v4109_v55 = vld [vmem:[%s4005_s19 + $0x18] sm:$0xff]  }
  0x59   : > { %v570_v9 = vrot.slane %v569_v1, 4  ;;  %v761_v10 = vrot.slane %v759_v2, 5  ;;  %v579_v15 = vrot.slane %v577_v4, 4  ;;  %v421_v33 = vrot.slane %v419_v31, 7  ;;  %v3779_v1 = vld [vmem:[#allocation3 + $0x110] sm:$0xff]  }
  0x5a   : > { %v743_v13 = vrot.slane %v742_v5, 4  ;;  %v756_v14 = vor.u32 %v755_v7, %v752_v60  ;;  %v582_v16 = vrot.slane %v580_v8, 5  ;;  %v350_v39 = vadd.f32 %v4016_v37, %v335_v50  ;;  %v4123_v2 = vld [vmem:[#allocation2 + $0x18] sm:$0xf]  ;;  %v4125_v3 = vld [vmem:[#allocation2 + $0x1c] sm:$0x1] }
  0x5b   : > { %v575_v17 = vsel %vm4052_vm8, %v570_v9, %v574_v54  ;;  %v351_v40 = vadd.f32 %v4016_v37, %v336_v51  ;;  %v4101_v42 = vcombine.low %v719_v38, %v720_v43  ;;  %v586_v49 = vshll.u32 %v4090_v21, 16  ;;  %v3773_v51 = vld [vmem:[#allocation3 + $0x108] sm:$0xff]  }
  0x5c   : > { %v4092_v22 = vcombine.low %v561_v36, %v575_v17  ;;  %v748_v24 = vsel %vm4052_vm8, %v743_v13, %v747_v6  ;;  %v757_v26 = vrot.slane %v756_v14, 4  ;;  %v583_v48 = vor.u32 %v582_v16, %v579_v15  ;;  %v3774_v43 = vld [vmem:[#allocation3 + $0x188] sm:$0xff]   ;;  %v3780_v14 = vld [vmem:[#allocation3 + $0x190] sm:$0xff]   ;;  %v3781_v15 = vld [vmem:[#allocation3 + $0x158] sm:$0xff]  }
  0x5d   : > { %v424_v31 = vor.u32 %v422_v32, %v421_v33  ;;  %v425_v50 = vrot.slane %v421_v33, 4  ;;  %v358_v53 = vmax.f32 %v350_v39, 0.0  ;;  %v359_v54 = vmax.f32 %v351_v40, 0.0  ;;  %v3775_v32 = vld [vmem:[#allocation3 + $0x150] sm:$0xff]   ;;  %v4127_v4 = vld [vmem:[#allocation2 + $0x18] sm:$0xf] }
  0x5e   : > { %1456 = vmatprep.mubr.bf16.mxu0 %v4092_v22  ;;  %v762_v36 = vsel %vm4052_vm8, %v757_v26, %v761_v10  ;;  %v689_v38 = vrot.slane %v4024_v46, 5  ;;  %v3386_v60 = vunpack.c.l.bf16 %v4109_v55  ;;  %v4119_v61 = vrot.slane %v583_v48, 4  ;;  %v4135_v10 = vld [vmem:[#allocation2 + $0x1c] sm:$0x1]  ;;  %v3782_v26 = vld [vmem:[#allocation3 + $0x1d8] sm:$0xff]  }
  0x5f   : > { %v4104_v52 = vcombine.low %v748_v24, %v762_v36  ;;  %1457 = vmatmul.mubr.bf16.vlgmr.msra.gmra.mrb[0].mxu0 %v3180_v18  ;;  %v500_v58 = vsel %vm4029_vm4, %v424_v31, %v499_v28  ;;  %v503_v25 = vsel %vm4036_vm5, %v425_v50, %v502_v29  ;;  %v3368_v59 = vpack.c.bf16 %v358_v53, %v358_v53  ;;  %v505_v28 = vld [vmem:[#allocation2 + $0x28] sm:$0xf]  ;;  %v508_v39 = vld [vmem:[#allocation2 + $0x2c] sm:$0x1] }
  0x60   : > { %3472 = vmatpush3.bf16.msra.mxu0 %v3769_v27  ;;  %v4121_v62 = vrot.slane %v586_v49, 5  ;;  %501 = vst [vmem:[#allocation2 + $0x20] sm:$0xf] %v500_v58  ;;  %504 = vst [vmem:[#allocation2 + $0x24] sm:$0x1] %v503_v25  ;;  %v4129_v5 = vpack.c.bf16 %v359_v54, %v359_v54  ;;  %v3387_v6 = vunpack.c.h.bf16 %v4109_v55  ;;  %v591_v7 = vshrl.u32 %v4123_v2, 16 }
  0x61   : > { %1521 = vmatprep.mubr.bf16.mxu1 %v4104_v52  ;;  %3473 = vmatprep.subr.bf16.mxu0 %v3771_v30  ;;  %v594_v8 = vshll.u32 %v4123_v2, 16  ;;  %v600_v9 = vshll.u32 %v4125_v3, 16  ;;  %v764_v11 = vshrl.u32 %v4127_v4, 16  ;;  %v767_v12 = vshll.u32 %v4127_v4, 16  ;;  %v3783_v27 = vld [vmem:[#allocation3 + $0x118] sm:$0xff]   ;;  %v3785_v55 = vld [vmem:[#allocation3 + $0x160] sm:$0xff]  }
  0x62   : > { %1522 = vmatmul.mubr.bf16.vlgmr.msra.gmra.mrb[0].mxu1 %v4101_v42  ;;  %v773_v13 = vshll.u32 %v4135_v10, 16  ;;  %v427_v16 = vshrl.u32 %v3368_v59, 16  ;;  %v337_v17 = vmul.f32 %v3386_v60, %v4011_v34  ;;  %v593_v18 = vrot.slane %v591_v7, 4  ;;  %v3784_v53 = vld [vmem:[#allocation3 + $0x198] sm:$0xff]  }
  0x63   : > { %3512 = vmatpush3.bf16.msra.mxu1 %v3770_v41  ;;  %v596_v19 = vrot.slane %v594_v8, 5  ;;  %v602_v20 = vrot.slane %v600_v9, 5  ;;  %v766_v24 = vrot.slane %v764_v11, 4  ;;  %v769_v29 = vrot.slane %v767_v12, 5 }
  0x64   : > { %3513 = vmatprep.subr.bf16.mxu1 %v3772_v44  ;;  %3474 = vmatpush3.bf16.msra.mxu0 %v3773_v51  ;;  %v4141_v41 = vrot.slane %v773_v13, 5  ;;  %v429_v30 = vrot.slane %v427_v16, 7  ;;  %v430_v33 = vshll.u32 %v3368_v59, 16  ;;  %v589_v40 = vsel %vm4052_vm8, %v4119_v61, %v4121_v62  ;;  %v514_v16 = vld [vmem:[#allocation2 + $0x34] sm:$0x1] }
  0x65   : > { %3475 = vmatprep.subr.bf16.mxu0 %v3775_v32  ;;  %v597_v36 = vor.u32 %v596_v19, %v593_v18  ;;  %v435_v44 = vshrl.u32 %v4129_v5, 16  ;;  %v438_v48 = vshll.u32 %v4129_v5, 16  ;;  %v770_v50 = vor.u32 %v769_v29, %v766_v24  ;;  %v3789_v5 = vld [vmem:[#allocation3 + $0x120] sm:$0xff]  }
  0x66   : > { %v432_v51 = vor.u32 %v430_v33, %v429_v30  ;;  %v433_v54 = vrot.slane %v429_v30, 4  ;;  %v338_v7 = vmul.f32 %v3387_v6, %v4011_v34  ;;  %v3181_v12 = vcombine.low %v4076_v57, %v4123_v2  ;;  %v511_v6 = vld [vmem:[#allocation2 + $0x30] sm:$0xf]  ;;  %v3791_v57 = vld [vmem:[#allocation3 + $0x168] sm:$0xff]  }
  0x67   : > { %3514 = vmatpush3.bf16.msra.mxu1 %v3774_v43  ;;  %v722_v49 = vld [vmem:[#allocation2 + $0x20] sm:$0xf]  ;;  %v4149_v31 = vld [vmem:[#allocation2 + $0x24] sm:$0x1]  ;;  %v352_v43 = vadd.f32 %v4016_v37, %v337_v17  ;;  %v598_v58 = vrot.slane %v597_v36, 4  ;;  %v771_v61 = vrot.slane %v770_v50, 4 }
  0x68   : > { %3515 = vmatprep.subr.bf16.mxu1 %v3776_v0  ;;  %3476 = vmatpush3.bf16.msra.mxu0 %v3779_v1  ;;  %v778_v25 = vshrl.u32 %v722_v49, 16  ;;  %v781_v32 = vshll.u32 %v722_v49, 16  ;;  %v787_v59 = vshll.u32 %v4149_v31, 16  ;;  %v4153_v60 = vld [vmem:[#allocation2 + $0x20] sm:$0xf]  ;;  %v506_v62 = vsel %vm4029_vm4, %v432_v51, %v505_v28  ;;  %v3786_v1 = vld [vmem:[#allocation3 + $0x1e0] sm:$0xff]  }
  0x69   : > { %3477 = vmatprep.subr.bf16.mxu0 %v3781_v15  ;;  %v509_v0 = vsel %vm4036_vm5, %v433_v54, %v508_v39  ;;  %v603_v8 = vsel %vm4052_vm8, %v598_v58, %v602_v20  ;;  %507 = vst [vmem:[#allocation2 + $0x28] sm:$0xf] %v506_v62  ;;  %v4164_v13 = vld [vmem:[#allocation2 + $0x24] sm:$0x1]  ;;  %v605_v15 = vshrl.u32 %v4153_v60, 16  ;;  %v608_v34 = vshll.u32 %v4153_v60, 16 }
  0x6a   : > { %v780_v9 = vrot.slane %v778_v25, 4  ;;  %v783_v11 = vrot.slane %v781_v32, 5  ;;  %510 = vst [vmem:[#allocation2 + $0x2c] sm:$0x1] %v509_v0  ;;  %v3790_v17 = vld [vmem:[#allocation3 + $0x1a0] sm:$0xff]   ;;  %v789_v19 = vrot.slane %v787_v59, 5  ;;  %v776_v28 = vsel %vm4052_vm8, %v771_v61, %v4141_v41 }
  0x6b   : > { %3516 = vmatpush3.bf16.msra.mxu1 %v3780_v14  ;;  %v4166_v14 = vcombine.low %v589_v40, %v603_v8  ;;  %v437_v20 = vrot.slane %v435_v44, 7  ;;  %v360_v2 = vmax.f32 %v352_v43, 0.0  ;;  %v607_v24 = vrot.slane %v605_v15, 4  ;;  %v3792_v39 = vld [vmem:[#allocation3 + $0x1e8] sm:$0xff]   ;;  %v3796_v25 = vld [vmem:[#allocation3 + $0x1f0] sm:$0xff]  }
  0x6c   : > { %3517 = vmatprep.subr.bf16.mxu1 %v3782_v26  ;;  %3478 = vmatpush3.bf16.msra.mxu0 %v3783_v27  ;;  %v784_v18 = vor.u32 %v783_v11, %v780_v9  ;;  %v610_v26 = vrot.slane %v608_v34, 5  ;;  %v353_v27 = vadd.f32 %v4016_v37, %v338_v7  ;;  %v3793_v40 = vld [vmem:[#allocation3 + $0x128] sm:$0xff]   ;;  %v4176_v36 = vcombine.low %v4127_v4, %v722_v49 }
  0x6d   : > { %3479 = vmatprep.subr.bf16.mxu0 %v3785_v55  ;;  %1464 = vmatprep.mubr.bf16.mxu0 %v4166_v14  ;;  %v440_v30 = vor.u32 %v438_v48, %v437_v20  ;;  %v441_v33 = vrot.slane %v437_v20, 4  ;;  %v614_v44 = vshll.u32 %v4164_v13, 16  ;;  %v3370_v50 = vpack.c.bf16 %v360_v2, %v360_v2  ;;  %v3794_v54 = vld [vmem:[#allocation3 + $0x1a8] sm:$0xff]   ;;  %v3795_v55 = vld [vmem:[#allocation3 + $0x170] sm:$0xff]  }
  0x6e   : > { %v785_v29 = vrot.slane %v784_v18, 4  ;;  %1465 = vmatmul.mubr.bf16.gmra.mrb[4].mxu0 %v3181_v12  ;;  %v611_v51 = vor.u32 %v610_v26, %v607_v24  ;;  %v520_v0 = vld [vmem:[#allocation2 + $0x3c] sm:$0x1]  ;;  %v3801_v18 = vld [vmem:[#allocation3 + $0x178] sm:$0xff]   ;;  %v517_v24 = vld [vmem:[#allocation2 + $0x38] sm:$0xf] }
  0x6f   : > { %3518 = vmatpush3.bf16.msra.mxu1 %v3784_v53  ;;  %v361_v53 = vmax.f32 %v353_v27, 0.0  ;;  %v512_v41 = vsel %vm4029_vm4, %v440_v30, %v511_v6  ;;  %v515_v48 = vsel %vm4036_vm5, %v441_v33, %v514_v16  ;;  %v443_v58 = vshrl.u32 %v3370_v50, 16  ;;  %v3803_v30 = vld [vmem:[#allocation3 + $0x138] sm:$0xff]  }
  0x70   : > { %3519 = vmatprep.subr.bf16.mxu1 %v3786_v1  ;;  %3480 = vmatpush3.bf16.msra.mxu0 %v3789_v5  ;;  %v790_v37 = vsel %vm4052_vm8, %v785_v29, %v789_v19  ;;  %v4187_v49 = vld [vmem:[#allocation2 + $0x28] sm:$0xf]  ;;  %513 = vst [vmem:[#allocation2 + $0x30] sm:$0xf] %v512_v41  ;;  %516 = vst [vmem:[#allocation2 + $0x34] sm:$0x1] %v515_v48 }
  0x71   : > { %3481 = vmatprep.subr.bf16.mxu0 %v3791_v57  ;;  %v4185_v4 = vcombine.low %v776_v28, %v790_v37  ;;  %v4189_v43 = vld [vmem:[#allocation2 + $0x2c] sm:$0x1]  ;;  %v619_v32 = vshrl.u32 %v4187_v49, 16  ;;  %v622_v59 = vshll.u32 %v4187_v49, 16  ;;  %v4194_v62 = vld [vmem:[#allocation2 + $0x28] sm:$0xf]  ;;  %v4196_v1 = vpack.c.bf16 %v361_v53, %v361_v53 }
  0x72   : > { %v628_v61 = vshll.u32 %v4189_v43, 16  ;;  %v3799_v5 = vld [vmem:[#allocation3 + $0x130] sm:$0xff]   ;;  %v616_v7 = vrot.slane %v614_v44, 5  ;;  %v4199_v8 = vld [vmem:[#allocation2 + $0x2c] sm:$0x1]  ;;  %v792_v9 = vshrl.u32 %v4194_v62, 16 }
  0x73   : > { %3520 = vmatpush3.bf16.msra.mxu1 %v3790_v17  ;;  %1529 = vmatprep.mubr.bf16.mxu1 %v4185_v4  ;;  %v795_v11 = vshll.u32 %v4194_v62, 16  ;;  %v445_v12 = vrot.slane %v443_v58, 7  ;;  %v612_v15 = vrot.slane %v611_v51, 4  ;;  %v621_v34 = vrot.slane %v619_v32, 4  ;;  %v3800_v17 = vld [vmem:[#allocation3 + $0x1b0] sm:$0xff]   ;;  %v3802_v29 = vld [vmem:[#allocation3 + $0x1f8] sm:$0xff]  }
  0x74   : > { %3521 = vmatprep.subr.bf16.mxu1 %v3792_v39  ;;  %3482 = vmatpush3.bf16.msra.mxu0 %v3793_v40  ;;  %v624_v6 = vrot.slane %v622_v59, 5  ;;  %v801_v16 = vshll.u32 %v4199_v8, 16  ;;  %v794_v19 = vrot.slane %v792_v9, 4  ;;  %v446_v57 = vshll.u32 %v3370_v50, 16  ;;  %v3804_v53 = vld [vmem:[#allocation3 + $0x1b8] sm:$0xff]   ;;  %v3805_v37 = vld [vmem:[#allocation3 + $0x240] sm:$0xff]  }
  0x75   : > { %1530 = vmatmul.mubr.bf16.gmra.mrb[4].mxu1 %v4176_v36  ;;  %3483 = vmatprep.subr.bf16.mxu0 %v3795_v55  ;;  %v797_v20 = vrot.slane %v795_v11, 5  ;;  %v449_v2 = vrot.slane %v445_v12, 4  ;;  %v630_v27 = vrot.slane %v628_v61, 5  ;;  %v451_v28 = vshrl.u32 %v4196_v1, 16  ;;  %v3806_v58 = vld [vmem:[#allocation3 + $0x2c0] sm:$0xff]  }
  0x76   : > { %v625_v26 = vor.u32 %v624_v6, %v621_v34  ;;  %v4206_v39 = vrot.slane %v801_v16, 5  ;;  %v448_v40 = vor.u32 %v446_v57, %v445_v12  ;;  %v617_v50 = vsel %vm4052_vm8, %v612_v15, %v616_v7  ;;  %v523_v11 = vld [vmem:[#allocation2 + $0x40] sm:$0xf]  ;;  %v526_v12 = vld [vmem:[#allocation2 + $0x44] sm:$0x1] }
  0x77   : > { %3522 = vmatpush3.bf16.msra.mxu1 %v3794_v54  ;;  %v798_v33 = vor.u32 %v797_v20, %v794_v19  ;;  %v521_v44 = vsel %vm4036_vm5, %v449_v2, %v520_v0  ;;  %v724_v41 = vld [vmem:[#allocation2 + $0x30] sm:$0xf]  ;;  %v4212_v48 = vld [vmem:[#allocation2 + $0x34] sm:$0x1]  ;;  %v3182_v54 = vcombine.low %v4153_v60, %v4187_v49  ;;  %v454_v55 = vshll.u32 %v4196_v1, 16 }
  0x78   : > { %3523 = vmatprep.subr.bf16.mxu1 %v3796_v25  ;;  %3484 = vmatpush3.bf16.msra.mxu0 %v3799_v5  ;;  %v626_v51 = vrot.slane %v625_v26, 4  ;;  %522 = vst [vmem:[#allocation2 + $0x3c] sm:$0x1] %v521_v44  ;;  %v806_v25 = vshrl.u32 %v724_v41, 16  ;;  %v809_v32 = vshll.u32 %v724_v41, 16  ;;  %v815_v59 = vshll.u32 %v4212_v48, 16 }
  0x79   : > { %3485 = vmatprep.subr.bf16.mxu0 %v3801_v18  ;;  %v4218_v61 = vld [vmem:[#allocation2 + $0x30] sm:$0xf]  ;;  %v453_v0 = vrot.slane %v451_v28, 7  ;;  %v660_v5 = vld [vmem:[#allocation2] sm:$0xe]  ;;  %v799_v9 = vrot.slane %v798_v33, 4  ;;  %v518_v60 = vsel %vm4029_vm4, %v448_v40, %v517_v24 }
  0x7a   : > { %v631_v7 = vsel %vm4052_vm8, %v626_v51, %v630_v27  ;;  %v4224_v49 = vld [vmem:[#allocation2 + $0x34] sm:$0x1]  ;;  %v633_v1 = vshrl.u32 %v4218_v61, 16  ;;  %v808_v34 = vrot.slane %v806_v25, 4  ;;  %v811_v6 = vrot.slane %v809_v32, 5 }
  0x7b   : > { %3524 = vmatpush3.bf16.msra.mxu1 %v3800_v17  ;;  %v4227_v15 = vcombine.low %v617_v50, %v631_v7  ;;  %519 = vst [vmem:[#allocation2 + $0x38] sm:$0xf] %v518_v60  ;;  %v636_v17 = vshll.u32 %v4218_v61, 16  ;;  %v661_v18 = vld [vmem:[#allocation2 + $0x8] sm:$0xe]  ;;  %v817_v20 = vrot.slane %v815_v59, 5  ;;  %v456_v57 = vor.u32 %v454_v55, %v453_v0 }
  0x7c   : > { %3525 = vmatprep.subr.bf16.mxu1 %v3802_v29  ;;  %3486 = vmatpush3.bf16.msra.mxu0 %v3803_v30  ;;  %v635_v16 = vrot.slane %v633_v1, 4  ;;  %v812_v19 = vor.u32 %v811_v6, %v808_v34  ;;  %v457_v2 = vrot.slane %v453_v0, 4  ;;  %v642_v26 = vshll.u32 %v4224_v49, 16 }
  0x7d   : > { %3551 = vmatprep.subr.bf16.mxu0 %v3805_v37  ;;  %1472 = vmatprep.mubr.bf16.mxu0 %v4227_v15  ;;  %v638_v24 = vrot.slane %v636_v17, 5  ;;  %v3156_v27 = vrot.slane %v660_v5, 9  ;;  %v693_v28 = vrot.slane %v4063_v35, 5  ;;  %v804_v29 = vsel %vm4052_vm8, %v799_v9, %v4206_v39  ;;  %v847_v35 = vld [vmem:[#allocation2 + $0x8] sm:$0xe] }
  0x7e   : > { %1473 = vmatmul.mubr.bf16.gmra.mrb[8].mxu0 %v3182_v54  ;;  %v813_v30 = vrot.slane %v812_v19, 4  ;;  %v524_v40 = vsel %vm4029_vm4, %v456_v57, %v523_v11  ;;  %v527_v44 = vsel %vm4036_vm5, %v457_v2, %v526_v12  ;;  %v3157_v39 = vrot.slane %v661_v18, 9  ;;  %v848_v54 = vld [vmem:[#allocation2 + $0x10] sm:$0xe] }
  0x7f   : > { %3526 = vmatpush3.bf16.msra.mxu1 %v3804_v53  ;;  %v4236_v33 = vld [vmem:[#allocation2 + $0x3c] sm:$0x1]  ;;  %v639_v37 = vor.u32 %v638_v24, %v635_v16  ;;  %525 = vst [vmem:[#allocation2 + $0x40] sm:$0xf] %v524_v40  ;;  %528 = vst [vmem:[#allocation2 + $0x44] sm:$0x1] %v527_v44  ;;  %v4252_v51 = vcombine.low %v4194_v62, %v724_v41 }
  0x80   : > { %3591 = vmatprep.subr.bf16.mxu1 %v3806_v58  ;;  %v873_v50 = vrot.slane %v4070_v45, 5  ;;  %v818_v56 = vsel %vm4052_vm8, %v813_v30, %v817_v20  ;;  %v4254_v63 = vld [vmem:[#allocation2 + $0x3c] sm:$0x1]  ;;  %v644_v25 = vrot.slane %v642_v26, 5  ;;  %v656_v32 = vshll.u32 %v4236_v33, 16 }
  0x81   : > { %v4256_v55 = vcombine.low %v804_v29, %v818_v56  ;;  %v690_v45 = vsel %vm4244_vm11, %v3156_v27, %v689_v38  ;;  %v640_v41 = vrot.slane %v639_v37, 4  ;;  %v829_v9 = vshll.u32 %v4254_v63, 16  ;;  %v662_v17 = vld [vmem:[#allocation2 + $0x10] sm:$0xe]  ;;  %v663_v24 = vld [vmem:[#allocation2 + $0x18] sm:$0xe] }
  0x82   : > { %v536_v58 = vld [vmem:[#allocation2 + $0x38] sm:$0xf]  ;;  %v694_v60 = vsel %vm4244_vm11, %v3157_v39, %v693_v28  ;;  %v3164_v1 = vrot.slane %v847_v35, 9  ;;  %v658_v38 = vrot.slane %v656_v32, 5  ;;  %v3165_v6 = vrot.slane %v848_v54, 9 }
  0x83   : > { %v725_v59 = vld [vmem:[#allocation2 + $0x38] sm:$0xf]  ;;  %v647_v0 = vshrl.u32 %v536_v58, 16  ;;  %v650_v5 = vshll.u32 %v536_v58, 16  ;;  %1537 = vmatprep.mubr.bf16.mxu1 %v4256_v55  ;;  %v877_v16 = vrot.slane %v4072_v47, 5  ;;  %v3228_v2 = vcombine.low %v690_v45, %v694_v60 }
  0x84   : > { %v820_v7 = vshrl.u32 %v725_v59, 16  ;;  %v823_v62 = vshll.u32 %v725_v59, 16  ;;  %1538 = vmatmul.mubr.bf16.gmra.mrb[8].mxu1 %v4252_v51  ;;  %v874_v29 = vsel %vm4244_vm11, %v3164_v1, %v873_v50  ;;  %v645_v30 = vsel %vm4052_vm8, %v640_v41, %v644_v25  ;;  %v849_v54 = vld [vmem:[#allocation2 + $0x18] sm:$0xe] }
  0x85   : > { %v649_v11 = vrot.slane %v647_v0, 4  ;;  %v652_v46 = vrot.slane %v650_v5, 5  ;;  %v831_v47 = vrot.slane %v829_v9, 5  ;;  %v3183_v44 = vcombine.low %v4218_v61, %v536_v58  ;;  %v850_v58 = vld [vmem:[#allocation2 + $0x20] sm:$0xe] }
  0x86   : > { %v822_v12 = vrot.slane %v820_v7, 4  ;;  %v825_v34 = vrot.slane %v823_v62, 5  ;;  %v726_v19 = vld [vmem:[#allocation2 + $0x40] sm:$0xf]  ;;  %v4269_v20 = vld [vmem:[#allocation2 + $0x44] sm:$0x1]  ;;  %v878_v45 = vsel %vm4244_vm11, %v3165_v6, %v877_v16 }
  0x87   : > { %v653_v18 = vor.u32 %v652_v46, %v649_v11  ;;  %v834_v26 = vshrl.u32 %v726_v19, 16  ;;  %v837_v27 = vshll.u32 %v726_v19, 16  ;;  %v843_v28 = vshll.u32 %v4269_v20, 16  ;;  %v3807_v6 = vld [vmem:[#allocation3 + $0x200] sm:$0xff]   ;;  %v664_v16 = vld [vmem:[#allocation2 + $0x20] sm:$0xe] }
  0x88   : > { %v826_v57 = vor.u32 %v825_v34, %v822_v12  ;;  %v3158_v56 = vrot.slane %v662_v17, 9  ;;  %v697_v50 = vrot.slane %v4090_v21, 5  ;;  %v3159_v0 = vrot.slane %v663_v24, 9  ;;  %v665_v17 = vld [vmem:[#allocation2 + $0x28] sm:$0xe] }
  0x89   : > { %v654_v40 = vrot.slane %v653_v18, 4  ;;  %v836_v37 = vrot.slane %v834_v26, 4  ;;  %v839_v39 = vrot.slane %v837_v27, 5  ;;  %v845_v7 = vrot.slane %v843_v28, 5  ;;  %v852_v27 = vld [vmem:[#allocation2 + $0x30] sm:$0xe] }
  0x8a   : > { %v827_v35 = vrot.slane %v826_v57, 4  ;;  %v701_v61 = vrot.slane %v4125_v3, 5  ;;  %v4288_v9 = vcombine.low %v874_v29, %v878_v45  ;;  %v3166_v60 = vrot.slane %v849_v54, 9  ;;  %v3811_v28 = vld [vmem:[#allocation3 + $0x208] sm:$0xff]   ;;  %v666_v54 = vld [vmem:[#allocation2 + $0x30] sm:$0xe] }
  0x8b   : > { %v659_v32 = vsel %vm4052_vm8, %v654_v40, %v658_v38  ;;  %v840_v25 = vor.u32 %v839_v39, %v836_v37  ;;  %v4292_v1 = vcombine.low %v725_v59, %v726_v19  ;;  %v698_v3 = vsel %vm4244_vm11, %v3158_v56, %v697_v50  ;;  %v3809_v59 = vld [vmem:[#allocation3 + $0x248] sm:$0xff]   ;;  %v3813_v37 = vld [vmem:[#allocation3 + $0x250] sm:$0xff]   ;;  %v3817_v50 = vld [vmem:[#allocation3 + $0x258] sm:$0xff]  }
  0x8c   : > { %v4282_v5 = vcombine.low %v645_v30, %v659_v32  ;;  %v832_v62 = vsel %vm4052_vm8, %v827_v35, %v831_v47  ;;  %v702_v11 = vsel %vm4244_vm11, %v3159_v0, %v701_v61  ;;  %v881_v12 = vrot.slane %v4135_v10, 5  ;;  %v3812_v39 = vld [vmem:[#allocation3 + $0x288] sm:$0xff]   ;;  %v3815_v56 = vld [vmem:[#allocation3 + $0x210] sm:$0xff]  }
  0x8d   : > { %v841_v41 = vrot.slane %v840_v25, 4  ;;  %v3167_v34 = vrot.slane %v850_v58, 9  ;;  %v885_v38 = vrot.slane %v4149_v31, 5  ;;  %v705_v18 = vrot.slane %v4164_v13, 5  ;;  %v3808_v13 = vld [vmem:[#allocation3 + $0x280] sm:$0xff]  }
  0x8e   : > { %1480 = vmatprep.mubr.bf16.mxu0 %v4282_v5  ;;  %v709_v19 = vrot.slane %v4189_v43, 5  ;;  %v3229_v57 = vcombine.low %v698_v3, %v702_v11  ;;  %v882_v10 = vsel %vm4244_vm11, %v3166_v60, %v881_v12  ;;  %v3160_v24 = vrot.slane %v664_v16, 9  ;;  %v3810_v43 = vld [vmem:[#allocation3 + $0x2c8] sm:$0xff]   ;;  %v3819_v60 = vld [vmem:[#allocation3 + $0x218] sm:$0xff]  }
  0x8f   : > { %1481 = vmatmul.mubr.bf16.gmra.mrb[12].mxu0 %v3183_v44  ;;  %v846_v21 = vsel %vm4052_vm8, %v841_v41, %v845_v7  ;;  %v886_v31 = vsel %vm4244_vm11, %v3167_v34, %v885_v38  ;;  %v3161_v26 = vrot.slane %v665_v17, 9  ;;  %v889_v40 = vrot.slane %v4199_v8, 5  ;;  %v667_v32 = vld [vmem:[#allocation2 + $0x38] sm:$0xe]  ;;  %v3814_v8 = vld [vmem:[#allocation3 + $0x2d0] sm:$0xff]   ;;  %v3820_v16 = vld [vmem:[#allocation3 + $0x298] sm:$0xff]  }
  0x90   : > { %1927 = vmatprep.mubr.bf16.mxu0 %v3228_v2  ;;  %v4298_v46 = vcombine.low %v832_v62, %v846_v21  ;;  %v851_v2 = vld [vmem:[#allocation2 + $0x28] sm:$0xe]  ;;  %v4312_v29 = vcombine.low %v882_v10, %v886_v31  ;;  %v706_v47 = vsel %vm4244_vm11, %v3160_v24, %v705_v18  ;;  %v3169_v35 = vrot.slane %v852_v27, 9  ;;  %v853_v58 = vld [vmem:[#allocation2 + $0x38] sm:$0xe]  ;;  %v3816_v41 = vld [vmem:[#allocation3 + $0x290] sm:$0xff]  }
  0x91   : > { %v3168_v30 = vrot.slane %v851_v2, 9  ;;  %v710_v44 = vsel %vm4244_vm11, %v3161_v26, %v709_v19  ;;  %v713_v45 = vrot.slane %v4224_v49, 5  ;;  %v3162_v25 = vrot.slane %v666_v54, 9  ;;  %v854_v62 = vld [vmem:[#allocation2 + $0x40] sm:$0xe]  ;;  %v3818_v21 = vld [vmem:[#allocation3 + $0x2d8] sm:$0xff]  }
  0x92   : > { %1545 = vmatprep.mubr.bf16.mxu1 %v4298_v46  ;;  %v3230_v0 = vcombine.low %v706_v47, %v710_v44  ;;  %v3163_v7 = vrot.slane %v667_v32, 9  ;;  %v717_v61 = vrot.slane %v4236_v33, 5  ;;  %v897_v3 = vrot.slane %v4254_v63, 5  ;;  %v3823_v17 = vld [vmem:[#allocation3 + $0x220] sm:$0xff]   ;;  %v4345_v2 = vld [vmem:[#allocation2 + $0x18] sm:$0xf] }
  0x93   : > { %1546 = vmatmul.mubr.bf16.gmra.mrb[12].mxu1 %v4292_v1  ;;  %v901_v11 = vrot.slane %v4269_v20, 5  ;;  %v714_v12 = vsel %vm4244_vm11, %v3162_v25, %v713_v45  ;;  %v3171_v38 = vrot.slane %v854_v62, 9  ;;  %v3822_v63 = vld [vmem:[#allocation3 + $0x2e0] sm:$0xff]   ;;  %v4349_v31 = vld [vmem:[#allocation2 + $0x1c] sm:$0x1]  ;;  %v3833_v25 = vld [vmem:[#allocation3 + $0x278] sm:$0xff]  }
  0x94   : > { %1992 = vmatprep.mubr.bf16.mxu1 %v4288_v9  ;;  %v718_v34 = vsel %vm4244_vm11, %v3163_v7, %v717_v61  ;;  %v4338_v18 = vld [vmem:[#allocation2 + $0x10] sm:$0xf]  ;;  %v4347_v10 = vld [vmem:[#allocation2 + $0x14] sm:$0x1]  ;;  %v3828_v32 = vld [vmem:[#allocation3 + $0x2a8] sm:$0xff]  }
  0x95   : > { %v3231_v20 = vcombine.low %v714_v12, %v718_v34  ;;  %v921_v24 = vshrl.u32 %v4338_v18, 16  ;;  %v924_v26 = vshll.u32 %v4338_v18, 16  ;;  %v930_v27 = vshll.u32 %v4347_v10, 16  ;;  %v3830_v61 = vld [vmem:[#allocation3 + $0x2f0] sm:$0xff]  }
  0x97   : > { %1928 = vmatmul.mubr.bf16.vlgmr.msra.gmra.mrb[16].mxu0 %v4092_v22  ;;  %v893_v22 = vrot.slane %v4212_v48, 5  ;;  %v890_v48 = vsel %vm4244_vm11, %v3168_v30, %v889_v40  ;;  %v944_v30 = vshll.u32 %v4349_v31, 16  ;;  %v3827_v40 = vld [vmem:[#allocation3 + $0x228] sm:$0xff]   ;;  %v923_v47 = vrot.slane %v921_v24, 4 }
  0x98   : > { %3552 = vmatpush3.bf16.msra.mxu0 %v3807_v6  ;;  %1935 = vmatprep.mubr.bf16.mxu0 %v3229_v57  ;;  %v3821_v6 = vld [vmem:[#allocation3 + $0x260] sm:$0xff]   ;;  %v902_v57 = vsel %vm4244_vm11, %v3171_v38, %v901_v11  ;;  %v926_v44 = vrot.slane %v924_v26, 5  ;;  %v932_v54 = vrot.slane %v930_v27, 5  ;;  %v4376_v11 = vld [vmem:[#allocation2 + $0x2c] sm:$0x1]  ;;  %v3842_v26 = vld [vmem:[#allocation3 + $0x348] sm:$0xff]  }
  0x99   : > { %3553 = vmatprep.subr.bf16.mxu0 %v3809_v59  ;;  %v894_v49 = vsel %vm4244_vm11, %v3169_v35, %v893_v22  ;;  %v3825_v59 = vld [vmem:[#allocation3 + $0x268] sm:$0xff]   ;;  %v3834_v38 = vld [vmem:[#allocation3 + $0x2f8] sm:$0xff]  }
  0x9a   : > { %v4329_v33 = vcombine.low %v890_v48, %v894_v49  ;;  %v3826_v22 = vld [vmem:[#allocation3 + $0x2e8] sm:$0xff]   ;;  %v3832_v48 = vld [vmem:[#allocation3 + $0x2b0] sm:$0xff]   ;;  %v3835_v49 = vld [vmem:[#allocation3 + $0x238] sm:$0xff]  }
  0x9b   : > { %1993 = vmatmul.mubr.bf16.vlgmr.msra.gmra.mrb[16].mxu1 %v4104_v52 }
  0x9c   : > { %3554 = vmatpush3.bf16.msra.mxu0 %v3811_v28  ;;  %3592 = vmatpush3.bf16.msra.mxu1 %v3808_v13  ;;  %v935_v13 = vshrl.u32 %v4345_v2, 16  ;;  %v3824_v28 = vld [vmem:[#allocation3 + $0x2a0] sm:$0xff]  }
  0x9d   : > { %2000 = vmatprep.mubr.bf16.mxu1 %v4312_v29  ;;  %3593 = vmatprep.subr.bf16.mxu1 %v3810_v43  ;;  %v938_v43 = vshll.u32 %v4345_v2, 16 }
  0x9e   : > { %3555 = vmatprep.subr.bf16.mxu0 %v3813_v37  ;;  %v937_v35 = vrot.slane %v935_v13, 4 }
  0x9f   : > { %1936 = vmatmul.mubr.bf16.gmra.mrb[20].mxu0 %v4166_v14  ;;  %v3170_v14 = vrot.slane %v853_v58, 9 }
  0xa0   : > { %3556 = vmatpush3.bf16.msra.mxu0 %v3815_v56  ;;  %1943 = vmatprep.mubr.bf16.mxu0 %v3230_v0  ;;  %v3829_v56 = vld [vmem:[#allocation3 + $0x270] sm:$0xff]  }
  0xa1   : > { %3594 = vmatpush3.bf16.msra.mxu1 %v3812_v39  ;;  %3557 = vmatprep.subr.bf16.mxu0 %v3817_v50  ;;  %v898_v19 = vsel %vm4244_vm11, %v3170_v14, %v897_v3  ;;  %v940_v39 = vrot.slane %v938_v43, 5  ;;  %v3831_v50 = vld [vmem:[#allocation3 + $0x230] sm:$0xff]  }
  0xa2   : > { %3595 = vmatprep.subr.bf16.mxu1 %v3814_v8  ;;  %v4358_v37 = vcombine.low %v898_v19, %v902_v57  ;;  %v946_v8 = vrot.slane %v944_v30, 5  ;;  %v4374_v3 = vld [vmem:[#allocation2 + $0x24] sm:$0x1]  ;;  %v3840_v57 = vld [vmem:[#allocation3 + $0x300] sm:$0xff]  }
  0xa3   : > { %2001 = vmatmul.mubr.bf16.gmra.mrb[20].mxu1 %v4185_v4  ;;  %v941_v45 = vor.u32 %v940_v39, %v937_v35  ;;  %v958_v34 = vshll.u32 %v4374_v3, 16  ;;  %v3843_v35 = vld [vmem:[#allocation3 + $0x3c8] sm:$0xff]  }
  0xa4   : > { %3558 = vmatpush3.bf16.msra.mxu0 %v3819_v60  ;;  %2008 = vmatprep.mubr.bf16.mxu1 %v4329_v33 }
  0xa5   : > { %3596 = vmatpush3.bf16.msra.mxu1 %v3816_v41  ;;  %3559 = vmatprep.subr.bf16.mxu0 %v3821_v6  ;;  %v942_v7 = vrot.slane %v941_v45, 4  ;;  %v4367_v41 = vld [vmem:[#allocation2 + $0x20] sm:$0xf]  ;;  %v3837_v6 = vld [vmem:[#allocation3 + $0x340] sm:$0xff]   ;;  %v960_v13 = vrot.slane %v958_v34, 5 }
  0xa6   : > { %3597 = vmatprep.subr.bf16.mxu1 %v3818_v21  ;;  %v4372_v21 = vld [vmem:[#allocation2 + $0x28] sm:$0xf]  ;;  %v952_v12 = vshll.u32 %v4367_v41, 16  ;;  %v4400_v45 = vld [vmem:[#allocation2 + $0x34] sm:$0x1] }
  0xa7   : > { %1944 = vmatmul.mubr.bf16.gmra.mrb[24].mxu0 %v4227_v15  ;;  %v927_v15 = vor.u32 %v926_v44, %v923_v47  ;;  %v947_v62 = vsel %vm4052_vm8, %v942_v7, %v946_v8  ;;  %v963_v14 = vshrl.u32 %v4372_v21, 16  ;;  %v3268_v44 = vcombine.low %v4338_v18, %v4345_v2  ;;  %v4398_v2 = vld [vmem:[#allocation2 + $0x38] sm:$0xf]  ;;  %v4402_v8 = vld [vmem:[#allocation2 + $0x3c] sm:$0x1] }
  0xa8   : > { %3560 = vmatpush3.bf16.msra.mxu0 %v3823_v17  ;;  %1951 = vmatprep.mubr.bf16.mxu0 %v3231_v20  ;;  %v972_v17 = vshll.u32 %v4376_v11, 16  ;;  %v954_v20 = vrot.slane %v952_v12, 5  ;;  %v991_v7 = vshrl.u32 %v4398_v2, 16 }
  0xa9   : > { %3598 = vmatpush3.bf16.msra.mxu1 %v3820_v16  ;;  %3561 = vmatprep.subr.bf16.mxu0 %v3825_v59  ;;  %v928_v0 = vrot.slane %v927_v15, 4  ;;  %v966_v16 = vshll.u32 %v4372_v21, 16  ;;  %v965_v19 = vrot.slane %v963_v14, 4  ;;  %v3846_v15 = vld [vmem:[#allocation3 + $0x350] sm:$0xff]  }
  0xaa   : > { %3599 = vmatprep.subr.bf16.mxu1 %v3822_v63  ;;  %v3836_v63 = vld [vmem:[#allocation3 + $0x2b8] sm:$0xff]   ;;  %v974_v30 = vrot.slane %v972_v17, 5  ;;  %v993_v34 = vrot.slane %v991_v7, 4  ;;  %v3850_v14 = vld [vmem:[#allocation3 + $0x390] sm:$0xff]  }
  0xab   : > { %2009 = vmatmul.mubr.bf16.gmra.mrb[24].mxu1 %v4256_v55  ;;  %v933_v58 = vsel %vm4052_vm8, %v928_v0, %v932_v54  ;;  %v968_v24 = vrot.slane %v966_v16, 5  ;;  %v3849_v54 = vld [vmem:[#allocation3 + $0x310] sm:$0xff]   ;;  %v3853_v16 = vld [vmem:[#allocation3 + $0x318] sm:$0xff]  }
  0xac   : > { %3562 = vmatpush3.bf16.msra.mxu0 %v3827_v40  ;;  %2016 = vmatprep.mubr.bf16.mxu1 %v4358_v37  ;;  %v4370_v60 = vcombine.low %v933_v58, %v947_v62  ;;  %v3841_v40 = vld [vmem:[#allocation3 + $0x380] sm:$0xff]   ;;  %v3851_v58 = vld [vmem:[#allocation3 + $0x358] sm:$0xff]   ;;  %v3847_v62 = vld [vmem:[#allocation3 + $0x3d0] sm:$0xff]  }
  0xad   : > { %3600 = vmatpush3.bf16.msra.mxu1 %v3824_v28  ;;  %3563 = vmatprep.subr.bf16.mxu0 %v3829_v56  ;;  %v3838_v28 = vld [vmem:[#allocation3 + $0x3c0] sm:$0xff]   ;;  %v969_v43 = vor.u32 %v968_v24, %v965_v19 }
  0xae   : > { %3601 = vmatprep.subr.bf16.mxu1 %v3826_v22  ;;  %v3844_v22 = vld [vmem:[#allocation3 + $0x308] sm:$0xff]   ;;  %v3855_v19 = vld [vmem:[#allocation3 + $0x360] sm:$0xff]  }
  0xaf   : > { %1952 = vmatmul.mubr.bf16.gmra.mrb[28].mxu0 %v4282_v5  ;;  %v949_v5 = vshrl.u32 %v4367_v41, 16  ;;  %v970_v39 = vrot.slane %v969_v43, 4  ;;  %v4419_v43 = vld [vmem:[#allocation2 + $0x40] sm:$0xf] }
  0xb0   : > { %3564 = vmatpush3.bf16.msra.mxu0 %v3831_v50  ;;  %2406 = vmatprep.mubr.bf16.mxu0 %v4104_v52 }
  0xb1   : > { %3602 = vmatpush3.bf16.msra.mxu1 %v3828_v32  ;;  %3565 = vmatprep.subr.bf16.mxu0 %v3833_v25  ;;  %v951_v59 = vrot.slane %v949_v5, 4  ;;  %v4394_v32 = vld [vmem:[#allocation2 + $0x30] sm:$0xf]  ;;  %v986_v25 = vshll.u32 %v4400_v45, 16 }
  0xb2   : > { %3603 = vmatprep.subr.bf16.mxu1 %v3830_v61  ;;  %v977_v50 = vshrl.u32 %v4394_v32, 16  ;;  %v980_v0 = vshll.u32 %v4394_v32, 16  ;;  %v3845_v61 = vld [vmem:[#allocation3 + $0x388] sm:$0xff]  }
  0xb3   : > { %2017 = vmatmul.mubr.bf16.gmra.mrb[28].mxu1 %v4298_v46  ;;  %v955_v27 = vor.u32 %v954_v20, %v951_v59 }
  0xb4   : > { %3566 = vmatpush3.bf16.msra.mxu0 %v3835_v49  ;;  %2471 = vmatprep.mubr.bf16.mxu1 %v4370_v60  ;;  %v1000_v49 = vshll.u32 %v4402_v8, 16  ;;  %v979_v5 = vrot.slane %v977_v50, 4  ;;  %v982_v12 = vrot.slane %v980_v0, 5 }
  0xb5   : > { %3604 = vmatpush3.bf16.msra.mxu1 %v3832_v48  ;;  %3631 = vmatprep.subr.bf16.mxu0 %v3837_v6  ;;  %v956_v47 = vrot.slane %v955_v27, 4  ;;  %v994_v48 = vshll.u32 %v4398_v2, 16  ;;  %v3269_v6 = vcombine.low %v4367_v41, %v4372_v21  ;;  %v3856_v21 = vld [vmem:[#allocation3 + $0x3e0] sm:$0xff]  }
  0xb6   : > { %3605 = vmatprep.subr.bf16.mxu1 %v3834_v38  ;;  %v983_v17 = vor.u32 %v982_v12, %v979_v5  ;;  %v1002_v20 = vrot.slane %v1000_v49, 5  ;;  %v3858_v27 = vld [vmem:[#allocation3 + $0x320] sm:$0xff]   ;;  %v3863_v49 = vld [vmem:[#allocation3 + $0x3a8] sm:$0xff]   ;;  %v3867_v12 = vld [vmem:[#allocation3 + $0x330] sm:$0xff]  }
  0xb7   : > { %2407 = vmatmul.mubr.bf16.vlgmr.msra.gmra.mrb[32].mxu0 %v4101_v42  ;;  %v961_v56 = vsel %vm4052_vm8, %v956_v47, %v960_v13  ;;  %v975_v42 = vsel %vm4052_vm8, %v970_v39, %v974_v30  ;;  %v996_v38 = vrot.slane %v994_v48, 5  ;;  %v4425_v47 = vld [vmem:[#allocation2 + $0x44] sm:$0x1] }
  0xb8   : > { %3632 = vmatpush3.bf16.msra.mxu0 %v3840_v57  ;;  %2414 = vmatprep.mubr.bf16.mxu0 %v4185_v4  ;;  %v4396_v18 = vcombine.low %v961_v56, %v975_v42  ;;  %v3852_v57 = vld [vmem:[#allocation3 + $0x3d8] sm:$0xff]   ;;  %v984_v24 = vrot.slane %v983_v17, 4  ;;  %v1014_v39 = vshll.u32 %v4425_v47, 16  ;;  %v3859_v42 = vld [vmem:[#allocation3 + $0x3a0] sm:$0xff]   ;;  %v1058_v17 = vrot.slane %v4347_v10, 5 }
  0xb9   : > { %3606 = vmatpush3.bf16.msra.mxu1 %v3836_v63  ;;  %3633 = vmatprep.subr.bf16.mxu0 %v3842_v26  ;;  %v988_v63 = vrot.slane %v986_v25, 5  ;;  %v997_v59 = vor.u32 %v996_v38, %v993_v34  ;;  %v1033_v10 = vld [vmem:[#allocation2 + $0x18] sm:$0xe] }
  0xba   : > { %3671 = vmatprep.subr.bf16.mxu1 %v3838_v28  ;;  %v3860_v28 = vld [vmem:[#allocation3 + $0x368] sm:$0xff]  }
  0xbb   : > { %v998_v26 = vrot.slane %v997_v59, 4  ;;  %v989_v41 = vsel %vm4052_vm8, %v984_v24, %v988_v63  ;;  %v1062_v63 = vrot.slane %v4349_v31, 5  ;;  %v1066_v24 = vrot.slane %v4374_v3, 5  ;;  %v1034_v31 = vld [vmem:[#allocation2 + $0x20] sm:$0xe] }
  0xbc   : > { %2472 = vmatmul.mubr.bf16.vlgmr.msra.gmra.mrb[32].mxu1 %v3268_v44  ;;  %3634 = vmatpush3.bf16.msra.mxu0 %v3844_v22  ;;  %v4427_v44 = vld [vmem:[#allocation2 + $0x4c] sm:$0x1]  ;;  %v1008_v22 = vshll.u32 %v4419_v43, 16 }
  0xbd   : > { %3672 = vmatpush3.bf16.msra.mxu1 %v3841_v40  ;;  %2479 = vmatprep.mubr.bf16.mxu1 %v4396_v18  ;;  %v1003_v13 = vsel %vm4052_vm8, %v998_v26, %v1002_v20  ;;  %v4423_v40 = vld [vmem:[#allocation2 + $0x48] sm:$0xf] }
  0xbe   : > { %3673 = vmatprep.subr.bf16.mxu1 %v3843_v35  ;;  %3635 = vmatprep.subr.bf16.mxu0 %v3846_v15  ;;  %v4421_v30 = vcombine.low %v989_v41, %v1003_v13  ;;  %v1005_v35 = vshrl.u32 %v4419_v43, 16  ;;  %v1019_v56 = vshrl.u32 %v4423_v40, 16  ;;  %v3270_v15 = vcombine.low %v4394_v32, %v4398_v2 }
  0xbf   : > { %2415 = vmatmul.mubr.bf16.gmra.mrb[36].mxu0 %v4176_v36  ;;  %v3854_v36 = vld [vmem:[#allocation3 + $0x398] sm:$0xff]   ;;  %v1022_v50 = vshll.u32 %v4423_v40, 16  ;;  %v1010_v25 = vrot.slane %v1008_v22, 5  ;;  %v1016_v2 = vrot.slane %v1014_v39, 5  ;;  %v3271_v20 = vcombine.low %v4419_v43, %v4423_v40  ;;  %v1036_v22 = vld [vmem:[#allocation2 + $0x30] sm:$0xe] }
  0xc0   : > { %3636 = vmatpush3.bf16.msra.mxu0 %v3849_v54  ;;  %2422 = vmatprep.mubr.bf16.mxu0 %v4256_v55  ;;  %v3862_v54 = vld [vmem:[#allocation3 + $0x328] sm:$0xff]   ;;  %v1007_v0 = vrot.slane %v1005_v35, 4  ;;  %v1021_v7 = vrot.slane %v1019_v56, 4  ;;  %v3173_v41 = vrot.slane %v1033_v10, 9  ;;  %v1070_v13 = vrot.slane %v4376_v11, 5  ;;  %v3872_v43 = vld [vmem:[#allocation3 + $0x3b8] sm:$0xff]  }
  0xc1   : > { %3674 = vmatpush3.bf16.msra.mxu1 %v3845_v61  ;;  %3637 = vmatprep.subr.bf16.mxu0 %v3851_v58  ;;  %v3864_v61 = vld [vmem:[#allocation3 + $0x370] sm:$0xff]   ;;  %v3861_v58 = vld [vmem:[#allocation3 + $0x3e8] sm:$0xff]   ;;  %v1024_v48 = vrot.slane %v1022_v50, 5  ;;  %v1078_v50 = vrot.slane %v4402_v8, 5  ;;  %v1082_v8 = vrot.slane %v4425_v47, 5 }
  0xc2   : > { %3675 = vmatprep.subr.bf16.mxu1 %v3847_v62  ;;  %v1011_v32 = vor.u32 %v1010_v25, %v1007_v0  ;;  %v1063_v3 = vsel %vm4244_vm11, %v3173_v41, %v1062_v63  ;;  %v1037_v39 = vld [vmem:[#allocation2 + $0x38] sm:$0xe]  ;;  %v1039_v0 = vld [vmem:[#allocation2 + $0x48] sm:$0xe] }
  0xc3   : > { %v1025_v62 = vor.u32 %v1024_v48, %v1021_v7  ;;  %v3179_v7 = vrot.slane %v1039_v0, 9 }
  0xc4   : > { %2480 = vmatmul.mubr.bf16.gmra.mrb[36].mxu1 %v3269_v6  ;;  %3638 = vmatpush3.bf16.msra.mxu0 %v3853_v16  ;;  %v1012_v34 = vrot.slane %v1011_v32, 4  ;;  %v3865_v6 = vld [vmem:[#allocation3 + $0x3f0] sm:$0xff]  }
  0xc5   : > { %3676 = vmatpush3.bf16.msra.mxu1 %v3850_v14  ;;  %3639 = vmatprep.subr.bf16.mxu0 %v3855_v19  ;;  %v3869_v14 = vld [vmem:[#allocation3 + $0x378] sm:$0xff]   ;;  %v1026_v38 = vrot.slane %v1025_v62, 4 }
  0xc6   : > { %3677 = vmatprep.subr.bf16.mxu1 %v3852_v57  ;;  %2487 = vmatprep.mubr.bf16.mxu1 %v4421_v30  ;;  %v1017_v16 = vsel %vm4052_vm8, %v1012_v34, %v1016_v2  ;;  %v3871_v19 = vld [vmem:[#allocation3 + $0x338] sm:$0xff]   ;;  %v1032_v57 = vld [vmem:[#allocation2 + $0x10] sm:$0xe] }
  0xc7   : > { %2423 = vmatmul.mubr.bf16.gmra.mrb[40].mxu0 %v4252_v51  ;;  %v1028_v51 = vshll.u32 %v4427_v44, 16  ;;  %v3172_v26 = vrot.slane %v1032_v57, 9 }
  0xc8   : > { %3640 = vmatpush3.bf16.msra.mxu0 %v3858_v27  ;;  %2430 = vmatprep.mubr.bf16.mxu0 %v4298_v46  ;;  %v3174_v27 = vrot.slane %v1034_v31, 9 }
  0xc9   : > { %3678 = vmatpush3.bf16.msra.mxu1 %v3854_v36  ;;  %3641 = vmatprep.subr.bf16.mxu0 %v3860_v28  ;;  %v1030_v5 = vrot.slane %v1028_v51, 5 }
  0xca   : > { %3679 = vmatprep.subr.bf16.mxu1 %v3856_v21  ;;  %v1035_v21 = vld [vmem:[#allocation2 + $0x28] sm:$0xe]  ;;  %v1067_v35 = vsel %vm4244_vm11, %v3174_v27, %v1066_v24 }
  0xcb   : > { %v1031_v59 = vsel %vm4052_vm8, %v1026_v38, %v1030_v5  ;;  %v3175_v28 = vrot.slane %v1035_v21, 9 }
  0xcc   : > { %2488 = vmatmul.mubr.bf16.gmra.mrb[40].mxu1 %v3270_v15  ;;  %3642 = vmatpush3.bf16.msra.mxu0 %v3862_v54  ;;  %v3275_v36 = vcombine.low %v1017_v16, %v1031_v59  ;;  %v3176_v15 = vrot.slane %v1036_v22, 9  ;;  %v3177_v54 = vrot.slane %v1037_v39, 9 }
  0xcd   : > { %3680 = vmatpush3.bf16.msra.mxu1 %v3859_v42  ;;  %3643 = vmatprep.subr.bf16.mxu0 %v3864_v61  ;;  %v1071_v11 = vsel %vm4244_vm11, %v3175_v28, %v1070_v13  ;;  %v1074_v42 = vrot.slane %v4400_v45, 5 }
  0xce   : > { %3681 = vmatprep.subr.bf16.mxu1 %v3861_v58  ;;  %2495 = vmatprep.mubr.bf16.mxu1 %v3275_v36  ;;  %v3317_v56 = vcombine.low %v1067_v35, %v1071_v11 }
  0xcf   : > { %2431 = vmatmul.mubr.bf16.gmra.mrb[44].mxu0 %v4292_v1  ;;  %v3868_v1 = vld [vmem:[#allocation3 + $0x3b0] sm:$0xff]   ;;  %v1075_v51 = vsel %vm4244_vm11, %v3176_v15, %v1074_v42 }
  0xd0   : > { %3644 = vmatpush3.bf16.msra.mxu0 %v3867_v12  ;;  %2862 = vmatprep.mubr.bf16.mxu0 %v4288_v9  ;;  %v1059_v9 = vsel %vm4244_vm11, %v3172_v26, %v1058_v17 }
  0xd1   : > { %3682 = vmatpush3.bf16.msra.mxu1 %v3863_v49  ;;  %3645 = vmatprep.subr.bf16.mxu0 %v3869_v14  ;;  %v3316_v40 = vcombine.low %v1059_v9, %v1063_v3 }
  0xd2   : > { %3683 = vmatprep.subr.bf16.mxu1 %v3865_v6 }
  0xd4   : > { %2496 = vmatmul.mubr.bf16.gmra.mrb[44].mxu1 %v3271_v20  ;;  %3646 = vmatpush3.bf16.msra.mxu0 %v3871_v19 }
  0xd5   : > { %3684 = vmatpush3.bf16.msra.mxu1 %v3868_v1  ;;  %2927 = vmatprep.mubr.bf16.mxu1 %v3316_v40 }
  0xd6   : > { %3685 = vmatprep.subr.bf16.mxu1 %v3870_v23 }
  0xd7   : > { %2863 = vmatmul.mubr.bf16.vlgmr.msra.gmra.mrb[48].mxu0 %v4104_v52  ;;  %v1079_v52 = vsel %vm4244_vm11, %v3177_v54, %v1078_v50 }
  0xd8   : > { %2870 = vmatprep.mubr.bf16.mxu0 %v4312_v29  ;;  %v1038_v29 = vld [vmem:[#allocation2 + $0x40] sm:$0xe]  ;;  %v3318_v25 = vcombine.low %v1075_v51, %v1079_v52 }
  0xd9   : > { %3686 = vmatpush3.bf16.msra.mxu1 %v3872_v43  ;;  %v3178_v45 = vrot.slane %v1038_v29, 9 }
  0xdb   : > { %v1083_v61 = vsel %vm4244_vm11, %v3178_v45, %v1082_v8 }
  0xdc   : > { %2928 = vmatmul.mubr.bf16.vlgmr.msra.gmra.mrb[48].mxu1 %v4370_v60  ;;  %v1086_v60 = vrot.slane %v4427_v44, 5 }
  0xdd   : > { %2935 = vmatprep.mubr.bf16.mxu1 %v3317_v56 }
  0xdf   : > { %2871 = vmatmul.mubr.bf16.gmra.mrb[52].mxu0 %v4185_v4  ;;  %v1087_v4 = vsel %vm4244_vm11, %v3179_v7, %v1086_v60 }
  0xe0   : > { %2878 = vmatprep.mubr.bf16.mxu0 %v4329_v33  ;;  %v3319_v33 = vcombine.low %v1083_v61, %v1087_v4 }
  0xe4   : > { %2936 = vmatmul.mubr.bf16.gmra.mrb[52].mxu1 %v4396_v18 }
  0xe5   : > { %2943 = vmatprep.mubr.bf16.mxu1 %v3318_v25 }
  0xe7   : > { %2879 = vmatmul.mubr.bf16.gmra.mrb[56].mxu0 %v4256_v55 }
  0xe8   : > { %2886 = vmatprep.mubr.bf16.mxu0 %v4358_v37 }
  0xec   : > { %2944 = vmatmul.mubr.bf16.gmra.mrb[56].mxu1 %v4421_v30 }
  0xed   : > { %2951 = vmatprep.mubr.bf16.mxu1 %v3319_v33 }
  0xef   : > { %2887 = vmatmul.mubr.bf16.gmra.mrb[60].mxu0 %v4298_v46 }
  0xf4   : > { %2952 = vmatmul.mubr.bf16.gmra.mrb[60].mxu1 %v3275_v36 }
 0x132   : > { %v3407_v18 = vpop.f32.mrb[0].mxu0 }
 0x133   : > { %v3408_v47 = vpop.f32.mrb[1].mxu0 }
 0x134   : > { %v3409_v44 = vadd.f32 %v3408_v47, %v3407_v18  ;;  %v3410_v58 = vpop.f32.mrb[2].mxu0 }
 0x135   : > { %v3447_v53 = vpop.f32.mrb[0].mxu1  ;;  %v3411_v48 = vpop.f32.mrb[3].mxu0 }
 0x136   : > { %v3448_v49 = vpop.f32.mrb[1].mxu1  ;;  %v3412_v55 = vadd.f32 %v3411_v48, %v3410_v58 }
 0x137   : > { %v3449_v37 = vadd.f32 %v3448_v49, %v3447_v53  ;;  %v3450_v32 = vpop.f32.mrb[2].mxu1 }
 0x138   : > { %v3451_v2 = vpop.f32.mrb[3].mxu1 }
 0x139   : > { %v1524_v30 = vadd.f32 %v3449_v37, %v3409_v44  ;;  %v3452_v62 = vadd.f32 %v3451_v2, %v3450_v32 }
 0x13b   : > { %v1590_v46 = vpack.c.bf16 %v1524_v30, %v1524_v30  ;;  %v1527_v5 = vadd.f32 %v3452_v62, %v3412_v55  ;;  %v1568_v12 = vmul.f32 %v1524_v30, %v1524_v30 }
 0x13d   : > { %1598 = vst [vmem:[%s4486_s22] sm:$0xf] %v1590_v46  ;;  %v1554_v34 = vadd.f32 %v1527_v5, %v1524_v30  ;;  %v1569_v14 = vmul.f32 %v1527_v5, %v1527_v5  ;;  %v1591_v38 = vpack.c.bf16 %v1527_v5, %v1527_v5 }
 0x13f   : > { %v1576_v6 = vadd.f32 %v1569_v14, %v1568_v12  ;;  %1599 = vst [vmem:[%s4486_s22 + $0x10] sm:$0xf] %v1591_v38 }
 0x141   : > { %v3413_v16 = vpop.f32.mrb[4].mxu0 }
 0x142   : > { %v3414_v17 = vpop.f32.mrb[5].mxu0 }
 0x143   : > { %v3415_v63 = vadd.f32 %v3414_v17, %v3413_v16  ;;  %v3416_v59 = vpop.f32.mrb[6].mxu0 }
 0x144   : > { %v3417_v20 = vpop.f32.mrb[7].mxu0 }
 0x145   : > { %v3418_v19 = vadd.f32 %v3417_v20, %v3416_v59 }
 0x148   : > { %v3453_v57 = vpop.f32.mrb[4].mxu1 }
 0x149   : > { %v3454_v24 = vpop.f32.mrb[5].mxu1 }
 0x14a   : > { %v3455_v36 = vadd.f32 %v3454_v24, %v3453_v57  ;;  %v3456_v1 = vpop.f32.mrb[6].mxu1 }
 0x14b   : > { %v3457_v10 = vpop.f32.mrb[7].mxu1 }
 0x14c   : > { %v1532_v26 = vadd.f32 %v3455_v36, %v3415_v63  ;;  %v3458_v31 = vadd.f32 %v3457_v10, %v3456_v1 }
 0x14e   : > { %v1555_v23 = vadd.f32 %v1554_v34, %v1532_v26  ;;  %v1570_v41 = vmul.f32 %v1532_v26, %v1532_v26  ;;  %v1592_v21 = vpack.c.bf16 %v1532_v26, %v1532_v26  ;;  %v1535_v27 = vadd.f32 %v3458_v31, %v3418_v19 }
 0x150   : > { %v1577_v13 = vadd.f32 %v1576_v6, %v1570_v41  ;;  %1600 = vst [vmem:[%s4486_s22 + $0x20] sm:$0xf] %v1592_v21  ;;  %v1556_v9 = vadd.f32 %v1555_v23, %v1535_v27  ;;  %v1571_v28 = vmul.f32 %v1535_v27, %v1535_v27  ;;  %v1593_v3 = vpack.c.bf16 %v1535_v27, %v1535_v27 }
 0x151   : > { %v3419_v40 = vpop.f32.mrb[8].mxu0 }
 0x152   : > { %v1578_v43 = vadd.f32 %v1577_v13, %v1571_v28  ;;  %1601 = vst [vmem:[%s4486_s22 + $0x30] sm:$0xf] %v1593_v3  ;;  %v3420_v35 = vpop.f32.mrb[9].mxu0 }
 0x153   : > { %v3421_v11 = vadd.f32 %v3420_v35, %v3419_v40  ;;  %v3422_v22 = vpop.f32.mrb[10].mxu0 }
 0x154   : > { %v3423_v39 = vpop.f32.mrb[11].mxu0 }
 0x155   : > { %v3424_v56 = vadd.f32 %v3423_v39, %v3422_v22 }
 0x157   : > { %v3459_v15 = vpop.f32.mrb[8].mxu1 }
 0x158   : > { %v3460_v42 = vpop.f32.mrb[9].mxu1 }
 0x159   : > { %v3461_v54 = vadd.f32 %v3460_v42, %v3459_v15  ;;  %v3462_v50 = vpop.f32.mrb[10].mxu1 }
 0x15a   : > { %v3463_v51 = vpop.f32.mrb[11].mxu1 }
 0x15b   : > { %v1540_v52 = vadd.f32 %v3461_v54, %v3421_v11  ;;  %v3464_v29 = vadd.f32 %v3463_v51, %v3462_v50 }
 0x15d   : > { %v1557_v0 = vadd.f32 %v1556_v9, %v1540_v52  ;;  %v1572_v25 = vmul.f32 %v1540_v52, %v1540_v52  ;;  %v1594_v45 = vpack.c.bf16 %v1540_v52, %v1540_v52  ;;  %v1543_v8 = vadd.f32 %v3464_v29, %v3424_v56 }
 0x15f   : > { %v1579_v7 = vadd.f32 %v1578_v43, %v1572_v25  ;;  %1602 = vst [vmem:[%s4486_s22 + $0x40] sm:$0xf] %v1594_v45  ;;  %v1558_v60 = vadd.f32 %v1557_v0, %v1543_v8  ;;  %v1573_v61 = vmul.f32 %v1543_v8, %v1543_v8  ;;  %v1595_v4 = vpack.c.bf16 %v1543_v8, %v1543_v8 }
 0x161   : > { %v1580_v33 = vadd.f32 %v1579_v7, %v1573_v61  ;;  %1603 = vst [vmem:[%s4486_s22 + $0x50] sm:$0xf] %v1595_v4 }
 0x162   : > { %v3425_v18 = vpop.f32.mrb[12].mxu0 }
 0x163   : > { %v3426_v47 = vpop.f32.mrb[13].mxu0 }
 0x164   : > { %v3427_v44 = vadd.f32 %v3426_v47, %v3425_v18  ;;  %v3428_v58 = vpop.f32.mrb[14].mxu0 }
 0x165   : > { %v3429_v53 = vpop.f32.mrb[15].mxu0 }
 0x166   : > { %v3430_v48 = vadd.f32 %v3429_v53, %v3428_v58  ;;  %v3465_v49 = vpop.f32.mrb[12].mxu1 }
 0x167   : > { %v3466_v55 = vpop.f32.mrb[13].mxu1 }
 0x168   : > { %v3467_v37 = vadd.f32 %v3466_v55, %v3465_v49  ;;  %v3468_v32 = vpop.f32.mrb[14].mxu1 }
 0x169   : > { %v3469_v2 = vpop.f32.mrb[15].mxu1 }
 0x16a   : > { %v3487_v30 = vpop.f32.mrb[16].mxu0  ;;  %v1548_v62 = vadd.f32 %v3467_v37, %v3427_v44  ;;  %v3470_v46 = vadd.f32 %v3469_v2, %v3468_v32 }
 0x16b   : > { %v3488_v5 = vpop.f32.mrb[17].mxu0 }
 0x16c   : > { %v3489_v12 = vadd.f32 %v3488_v5, %v3487_v30  ;;  %v3490_v34 = vpop.f32.mrb[18].mxu0  ;;  %v1559_v14 = vadd.f32 %v1558_v60, %v1548_v62  ;;  %v1574_v38 = vmul.f32 %v1548_v62, %v1548_v62  ;;  %v1596_v6 = vpack.c.bf16 %v1548_v62, %v1548_v62 }
 0x16d   : > { %v1551_v16 = vadd.f32 %v3470_v46, %v3430_v48  ;;  %v3491_v17 = vpop.f32.mrb[19].mxu0 }
 0x16e   : > { %v3492_v63 = vadd.f32 %v3491_v17, %v3490_v34  ;;  %v1581_v59 = vadd.f32 %v1580_v33, %v1574_v38  ;;  %1604 = vst [vmem:[%s4486_s22 + $0x60] sm:$0xf] %v1596_v6  ;;  %v3527_v24 = vpop.f32.mrb[16].mxu1 }
 0x16f   : > { %v4495_v20 = vadd.f32 %v1559_v14, %v1551_v16  ;;  %v1575_v19 = vmul.f32 %v1551_v16, %v1551_v16  ;;  %v1597_v57 = vpack.c.bf16 %v1551_v16, %v1551_v16  ;;  %v3528_v36 = vpop.f32.mrb[17].mxu1 }
 0x170   : > { %v3529_v10 = vadd.f32 %v3528_v36, %v3527_v24  ;;  %v3530_v26 = vpop.f32.mrb[18].mxu1 }
 0x171   : > { %v4497_v1 = vadd.f32 %v1581_v59, %v1575_v19  ;;  %1605 = vst [vmem:[%s4486_s22 + $0x70] sm:$0xf] %v1597_v57  ;;  %v3531_v31 = vpop.f32.mrb[19].mxu1 }
 0x172   : > { %v3493_v23 = vpop.f32.mrb[20].mxu0  ;;  %v1995_v41 = vadd.f32 %v3529_v10, %v3489_v12  ;;  %v3532_v21 = vadd.f32 %v3531_v31, %v3530_v26 }
 0x173   : > { %v3494_v27 = vpop.f32.mrb[21].mxu0  ;;  %v1583_v59 = vrot.slane %v4497_v1, 4 }
 0x174   : > { %v3495_v13 = vadd.f32 %v3494_v27, %v3493_v23  ;;  %v3496_v9 = vpop.f32.mrb[22].mxu0  ;;  %v2061_v28 = vpack.c.bf16 %v1995_v41, %v1995_v41  ;;  %v1998_v43 = vadd.f32 %v3532_v21, %v3492_v63  ;;  %v2039_v11 = vmul.f32 %v1995_v41, %v1995_v41 }
 0x175   : > { %v3497_v3 = vpop.f32.mrb[23].mxu0  ;;  %v1561_v63 = vrot.slane %v4495_v20, 4 }
 0x176   : > { %v3498_v40 = vadd.f32 %v3497_v3, %v3496_v9  ;;  %2069 = vst [vmem:[%s4486_s22 + $0x4] sm:$0xf] %v2061_v28  ;;  %v3533_v35 = vpop.f32.mrb[20].mxu1  ;;  %v2025_v22 = vadd.f32 %v1998_v43, %v1995_v41  ;;  %v2040_v39 = vmul.f32 %v1998_v43, %v1998_v43  ;;  %v2062_v56 = vpack.c.bf16 %v1998_v43, %v1998_v43 }
 0x177   : > { %v3534_v15 = vpop.f32.mrb[21].mxu1  ;;  %v1562_v27 = vadd.f32 %v1561_v63, %v4495_v20 }
 0x178   : > { %v3535_v42 = vadd.f32 %v3534_v15, %v3533_v35  ;;  %v3536_v54 = vpop.f32.mrb[22].mxu1  ;;  %v2047_v50 = vadd.f32 %v2040_v39, %v2039_v11  ;;  %2070 = vst [vmem:[%s4486_s22 + $0x14] sm:$0xf] %v2062_v56 }
 0x179   : > { %v3537_v51 = vpop.f32.mrb[23].mxu1 }
 0x17a   : > { %v3499_v52 = vpop.f32.mrb[24].mxu0  ;;  %v2003_v29 = vadd.f32 %v3535_v42, %v3495_v13  ;;  %v3538_v0 = vadd.f32 %v3537_v51, %v3536_v54  ;;  %v1584_v13 = vadd.f32 %v1583_v59, %v4497_v1  ;;  %v1563_v54 = vrot.slane %v1562_v27, 2 }
 0x17b   : > { %v3500_v25 = vpop.f32.mrb[25].mxu0 }
 0x17c   : > { %v3501_v45 = vadd.f32 %v3500_v25, %v3499_v52  ;;  %v3502_v8 = vpop.f32.mrb[26].mxu0  ;;  %v2026_v7 = vadd.f32 %v2025_v22, %v2003_v29  ;;  %v2041_v60 = vmul.f32 %v2003_v29, %v2003_v29  ;;  %v2063_v61 = vpack.c.bf16 %v2003_v29, %v2003_v29 }
 0x17d   : > { %v3503_v4 = vpop.f32.mrb[27].mxu0  ;;  %v2006_v33 = vadd.f32 %v3538_v0, %v3498_v40 }
 0x17e   : > { %v3504_v18 = vadd.f32 %v3503_v4, %v3502_v8  ;;  %v2048_v47 = vadd.f32 %v2047_v50, %v2041_v60  ;;  %2071 = vst [vmem:[%s4486_s22 + $0x24] sm:$0xf] %v2063_v61  ;;  %v3539_v44 = vpop.f32.mrb[24].mxu1  ;;  %v1585_v50 = vrot.slane %v1584_v13, 2  ;;  %v1564_v61 = vadd.f32 %v1563_v54, %v1562_v27 }
 0x17f   : > { %v2027_v58 = vadd.f32 %v2026_v7, %v2006_v33  ;;  %v2042_v53 = vmul.f32 %v2006_v33, %v2006_v33  ;;  %v2064_v48 = vpack.c.bf16 %v2006_v33, %v2006_v33  ;;  %v3540_v49 = vpop.f32.mrb[25].mxu1 }
 0x180   : > { %v3541_v55 = vadd.f32 %v3540_v49, %v3539_v44  ;;  %v3542_v37 = vpop.f32.mrb[26].mxu1  ;;  %v1586_v4 = vadd.f32 %v1585_v50, %v1584_v13 }
 0x181   : > { %v2049_v32 = vadd.f32 %v2048_v47, %v2042_v53  ;;  %2072 = vst [vmem:[%s4486_s22 + $0x34] sm:$0xf] %v2064_v48  ;;  %v3543_v2 = vpop.f32.mrb[27].mxu1 }
 0x182   : > { %v3505_v30 = vpop.f32.mrb[28].mxu0  ;;  %v2011_v62 = vadd.f32 %v3541_v55, %v3501_v45  ;;  %v3544_v46 = vadd.f32 %v3543_v2, %v3542_v37 }
 0x183   : > { %v3506_v5 = vpop.f32.mrb[29].mxu0 }
 0x184   : > { %v3507_v12 = vadd.f32 %v3506_v5, %v3505_v30  ;;  %v3508_v34 = vpop.f32.mrb[30].mxu0  ;;  %v2028_v14 = vadd.f32 %v2027_v58, %v2011_v62  ;;  %v2043_v38 = vmul.f32 %v2011_v62, %v2011_v62  ;;  %v2065_v6 = vpack.c.bf16 %v2011_v62, %v2011_v62 }
 0x185   : > { %v2014_v16 = vadd.f32 %v3544_v46, %v3504_v18  ;;  %v3509_v17 = vpop.f32.mrb[31].mxu0  ;;  %v1565_v62 = vrot.slane %v1564_v61, 1 }
 0x186   : > { %v3510_v19 = vadd.f32 %v3509_v17, %v3508_v34  ;;  %v2050_v57 = vadd.f32 %v2049_v32, %v2043_v38  ;;  %2073 = vst [vmem:[%s4486_s22 + $0x44] sm:$0xf] %v2065_v6  ;;  %v3545_v26 = vpop.f32.mrb[28].mxu1 }
 0x187   : > { %v2029_v24 = vadd.f32 %v2028_v14, %v2014_v16  ;;  %v2044_v36 = vmul.f32 %v2014_v16, %v2014_v16  ;;  %v2066_v10 = vpack.c.bf16 %v2014_v16, %v2014_v16  ;;  %v3546_v31 = vpop.f32.mrb[29].mxu1 }
 0x188   : > { %v3547_v41 = vadd.f32 %v3546_v31, %v3545_v26  ;;  %v3548_v21 = vpop.f32.mrb[30].mxu1 }
 0x189   : > { %v2051_v23 = vadd.f32 %v2050_v57, %v2044_v36  ;;  %2074 = vst [vmem:[%s4486_s22 + $0x54] sm:$0xf] %v2066_v10  ;;  %v3549_v9 = vpop.f32.mrb[31].mxu1  ;;  %v1566_v10 = vadd.f32 %v1565_v62, %v1564_v61 }
 0x18a   : > { %v3567_v28 = vpop.f32.mrb[32].mxu0  ;;  %v2019_v3 = vadd.f32 %v3547_v41, %v3507_v12  ;;  %v3550_v43 = vadd.f32 %v3549_v9, %v3548_v21  ;;  %v1587_v12 = vrot.slane %v1586_v4, 1 }
 0x18b   : > { %v3568_v40 = vpop.f32.mrb[33].mxu0 }
 0x18c   : > { %v3569_v35 = vadd.f32 %v3568_v40, %v3567_v28  ;;  %v3570_v11 = vpop.f32.mrb[34].mxu0  ;;  %v2030_v22 = vadd.f32 %v2029_v24, %v2019_v3  ;;  %v2045_v39 = vmul.f32 %v2019_v3, %v2019_v3  ;;  %v2067_v56 = vpack.c.bf16 %v2019_v3, %v2019_v3 }
 0x18d   : > { %v2022_v15 = vadd.f32 %v3550_v43, %v3510_v19  ;;  %v3571_v42 = vpop.f32.mrb[35].mxu0  ;;  %v1588_v28 = vadd.f32 %v1587_v12, %v1586_v4 }
 0x18e   : > { %v3572_v51 = vadd.f32 %v3571_v42, %v3570_v11  ;;  %v2052_v20 = vadd.f32 %v2051_v23, %v2045_v39  ;;  %2075 = vst [vmem:[%s4486_s22 + $0x64] sm:$0xf] %v2067_v56 }
 0x18f   : > { %v2031_v1 = vadd.f32 %v2030_v22, %v2022_v15  ;;  %v2046_v52 = vmul.f32 %v2022_v15, %v2022_v15  ;;  %v2068_v29 = vpack.c.bf16 %v2022_v15, %v2022_v15  ;;  %v3607_v0 = vpop.f32.mrb[32].mxu1 }
 0x190   : > { %v3608_v25 = vpop.f32.mrb[33].mxu1 }
 0x191   : > { %v2032_v45 = vrot.slane %v2031_v1, 4  ;;  %v2053_v8 = vadd.f32 %v2052_v20, %v2046_v52  ;;  %2076 = vst [vmem:[%s4486_s22 + $0x74] sm:$0xf] %v2068_v29  ;;  %v3609_v7 = vadd.f32 %v3608_v25, %v3607_v0  ;;  %v3610_v60 = vpop.f32.mrb[34].mxu1 }
 0x192   : > { %v3611_v33 = vpop.f32.mrb[35].mxu1  ;;  %v3573_v18 = vpop.f32.mrb[36].mxu0 }
 0x193   : > { %v2033_v47 = vadd.f32 %v2032_v45, %v2031_v1  ;;  %v2054_v44 = vrot.slane %v2053_v8, 4  ;;  %v2474_v58 = vadd.f32 %v3609_v7, %v3569_v35  ;;  %v3612_v53 = vadd.f32 %v3611_v33, %v3610_v60  ;;  %v3574_v48 = vpop.f32.mrb[37].mxu0 }
 0x194   : > { %v3575_v49 = vadd.f32 %v3574_v48, %v3573_v18  ;;  %v3576_v55 = vpop.f32.mrb[38].mxu0 }
 0x195   : > { %v2034_v37 = vrot.slane %v2033_v47, 2  ;;  %v2055_v32 = vadd.f32 %v2054_v44, %v2053_v8  ;;  %v2540_v2 = vpack.c.bf16 %v2474_v58, %v2474_v58  ;;  %v3577_v30 = vpop.f32.mrb[39].mxu0  ;;  %v2477_v46 = vadd.f32 %v3612_v53, %v3572_v51 }
 0x196   : > { %v3578_v5 = vadd.f32 %v3577_v30, %v3576_v55  ;;  %v2518_v6 = vmul.f32 %v2474_v58, %v2474_v58 }
 0x197   : > { %v2035_v34 = vadd.f32 %v2034_v37, %v2033_v47  ;;  %v2056_v14 = vrot.slane %v2055_v32, 2  ;;  %3308 = vst [vmem:[%s4486_s22 + $0x8] sm:$0xf] %v2540_v2  ;;  %v3613_v38 = vpop.f32.mrb[36].mxu1  ;;  %v2504_v16 = vadd.f32 %v2477_v46, %v2474_v58  ;;  %v2519_v17 = vmul.f32 %v2477_v46, %v2477_v46 }
 0x198   : > { %v2541_v63 = vpack.c.bf16 %v2477_v46, %v2477_v46  ;;  %v3614_v59 = vpop.f32.mrb[37].mxu1 }
 0x199   : > { %v2036_v19 = vrot.slane %v2035_v34, 1  ;;  %v2057_v57 = vadd.f32 %v2056_v14, %v2055_v32  ;;  %v3615_v24 = vadd.f32 %v3614_v59, %v3613_v38  ;;  %v3616_v36 = vpop.f32.mrb[38].mxu1  ;;  %v2526_v26 = vadd.f32 %v2519_v17, %v2518_v6 }
 0x19a   : > { %3309 = vst [vmem:[%s4486_s22 + $0x18] sm:$0xf] %v2541_v63  ;;  %v3617_v31 = vpop.f32.mrb[39].mxu1  ;;  %v3579_v23 = vpop.f32.mrb[40].mxu0 }
 0x19b   : > { %v2037_v41 = vadd.f32 %v2036_v19, %v2035_v34  ;;  %v2058_v21 = vrot.slane %v2057_v57, 1  ;;  %v2482_v27 = vadd.f32 %v3615_v24, %v3575_v49  ;;  %v3618_v13 = vadd.f32 %v3617_v31, %v3616_v36  ;;  %v3580_v9 = vpop.f32.mrb[41].mxu0 }
 0x19c   : > { %v3581_v3 = vadd.f32 %v3580_v9, %v3579_v23  ;;  %v3582_v43 = vpop.f32.mrb[42].mxu0 }
 0x19d   : > { %v4514_v40 = vadd.f32 %v2037_v41, %v1566_v10  ;;  %v2059_v35 = vadd.f32 %v2058_v21, %v2057_v57  ;;  %v2505_v11 = vadd.f32 %v2504_v16, %v2482_v27  ;;  %v2520_v22 = vmul.f32 %v2482_v27, %v2482_v27  ;;  %v3583_v39 = vpop.f32.mrb[43].mxu0 }
 0x19e   : > { %v2542_v56 = vpack.c.bf16 %v2482_v27, %v2482_v27  ;;  %v2485_v15 = vadd.f32 %v3618_v13, %v3578_v5  ;;  %v3584_v42 = vadd.f32 %v3583_v39, %v3582_v43 }
 0x19f   : > { %v4516_v54 = vadd.f32 %v2059_v35, %v1588_v28  ;;  %v2527_v50 = vadd.f32 %v2526_v26, %v2520_v22  ;;  %v3619_v51 = vpop.f32.mrb[40].mxu1 }
 0x1a0   : > { %3310 = vst [vmem:[%s4486_s22 + $0x28] sm:$0xf] %v2542_v56  ;;  %v2506_v20 = vadd.f32 %v2505_v11, %v2485_v15  ;;  %v2521_v1 = vmul.f32 %v2485_v15, %v2485_v15  ;;  %v2543_v52 = vpack.c.bf16 %v2485_v15, %v2485_v15  ;;  %v3620_v29 = vpop.f32.mrb[41].mxu1 }
 0x1a1   : > { %v3621_v0 = vadd.f32 %v3620_v29, %v3619_v51  ;;  %v3622_v25 = vpop.f32.mrb[42].mxu1 }
 0x1a2   : > { %v2528_v45 = vadd.f32 %v2527_v50, %v2521_v1  ;;  %3311 = vst [vmem:[%s4486_s22 + $0x38] sm:$0xf] %v2543_v52  ;;  %v3623_v8 = vpop.f32.mrb[43].mxu1  ;;  %v3585_v7 = vpop.f32.mrb[44].mxu0 }
 0x1a3   : > { %v2490_v60 = vadd.f32 %v3621_v0, %v3581_v3  ;;  %v3624_v61 = vadd.f32 %v3623_v8, %v3622_v25  ;;  %v3586_v4 = vpop.f32.mrb[45].mxu0 }
 0x1a4   : > { %v3587_v33 = vadd.f32 %v3586_v4, %v3585_v7  ;;  %v3588_v18 = vpop.f32.mrb[46].mxu0 }
 0x1a5   : > { %v2507_v47 = vadd.f32 %v2506_v20, %v2490_v60  ;;  %v2522_v44 = vmul.f32 %v2490_v60, %v2490_v60  ;;  %v2544_v58 = vpack.c.bf16 %v2490_v60, %v2490_v60  ;;  %v2493_v53 = vadd.f32 %v3624_v61, %v3584_v42  ;;  %v3589_v48 = vpop.f32.mrb[47].mxu0 }
 0x1a6   : > { %v3590_v49 = vadd.f32 %v3589_v48, %v3588_v18 }
 0x1a7   : > { %v2529_v55 = vadd.f32 %v2528_v45, %v2522_v44  ;;  %3312 = vst [vmem:[%s4486_s22 + $0x48] sm:$0xf] %v2544_v58  ;;  %v2508_v37 = vadd.f32 %v2507_v47, %v2493_v53  ;;  %v2523_v32 = vmul.f32 %v2493_v53, %v2493_v53  ;;  %v2545_v2 = vpack.c.bf16 %v2493_v53, %v2493_v53  ;;  %v3625_v30 = vpop.f32.mrb[44].mxu1 }
 0x1a8   : > { %v3626_v62 = vpop.f32.mrb[45].mxu1 }
 0x1a9   : > { %v2530_v46 = vadd.f32 %v2529_v55, %v2523_v32  ;;  %3313 = vst [vmem:[%s4486_s22 + $0x58] sm:$0xf] %v2545_v2  ;;  %v3627_v5 = vadd.f32 %v3626_v62, %v3625_v30  ;;  %v3628_v12 = vpop.f32.mrb[46].mxu1 }
 0x1aa   : > { %v3629_v34 = vpop.f32.mrb[47].mxu1  ;;  %v3647_v14 = vpop.f32.mrb[48].mxu0 }
 0x1ab   : > { %v2498_v38 = vadd.f32 %v3627_v5, %v3587_v33  ;;  %v3630_v6 = vadd.f32 %v3629_v34, %v3628_v12  ;;  %v3648_v16 = vpop.f32.mrb[49].mxu0 }
 0x1ac   : > { %v3649_v17 = vadd.f32 %v3648_v16, %v3647_v14  ;;  %v3650_v63 = vpop.f32.mrb[50].mxu0 }
 0x1ad   : > { %v2509_v59 = vadd.f32 %v2508_v37, %v2498_v38  ;;  %v2524_v19 = vmul.f32 %v2498_v38, %v2498_v38  ;;  %v2546_v57 = vpack.c.bf16 %v2498_v38, %v2498_v38  ;;  %v2501_v24 = vadd.f32 %v3630_v6, %v3590_v49  ;;  %v3651_v36 = vpop.f32.mrb[51].mxu0 }
 0x1ae   : > { %v3652_v10 = vadd.f32 %v3651_v36, %v3650_v63 }
 0x1af   : > { %v2531_v26 = vadd.f32 %v2530_v46, %v2524_v19  ;;  %3314 = vst [vmem:[%s4486_s22 + $0x68] sm:$0xf] %v2546_v57  ;;  %v2510_v31 = vadd.f32 %v2509_v59, %v2501_v24  ;;  %v2525_v23 = vmul.f32 %v2501_v24, %v2501_v24  ;;  %v2547_v41 = vpack.c.bf16 %v2501_v24, %v2501_v24  ;;  %v3687_v21 = vpop.f32.mrb[48].mxu1 }
 0x1b0   : > { %v3688_v27 = vpop.f32.mrb[49].mxu1 }
 0x1b1   : > { %v2511_v13 = vrot.slane %v2510_v31, 4  ;;  %v2532_v9 = vadd.f32 %v2531_v26, %v2525_v23  ;;  %3315 = vst [vmem:[%s4486_s22 + $0x78] sm:$0xf] %v2547_v41  ;;  %v3689_v28 = vadd.f32 %v3688_v27, %v3687_v21  ;;  %v3690_v3 = vpop.f32.mrb[50].mxu1 }
 0x1b2   : > { %v3691_v43 = vpop.f32.mrb[51].mxu1  ;;  %v3653_v35 = vpop.f32.mrb[52].mxu0 }
 0x1b3   : > { %v2512_v11 = vadd.f32 %v2511_v13, %v2510_v31  ;;  %v2533_v22 = vrot.slane %v2532_v9, 4  ;;  %v2930_v39 = vadd.f32 %v3689_v28, %v3649_v17  ;;  %v3692_v56 = vadd.f32 %v3691_v43, %v3690_v3  ;;  %v3654_v15 = vpop.f32.mrb[53].mxu0 }
 0x1b4   : > { %v3655_v42 = vadd.f32 %v3654_v15, %v3653_v35  ;;  %v3656_v50 = vpop.f32.mrb[54].mxu0 }
 0x1b5   : > { %v2513_v51 = vrot.slane %v2512_v11, 2  ;;  %v2534_v20 = vadd.f32 %v2533_v22, %v2532_v9  ;;  %v2996_v1 = vpack.c.bf16 %v2930_v39, %v2930_v39  ;;  %v3657_v52 = vpop.f32.mrb[55].mxu0  ;;  %v2933_v29 = vadd.f32 %v3692_v56, %v3652_v10 }
 0x1b6   : > { %v3658_v0 = vadd.f32 %v3657_v52, %v3656_v50  ;;  %v2974_v7 = vmul.f32 %v2930_v39, %v2930_v39 }
 0x1b7   : > { %v2514_v25 = vadd.f32 %v2513_v51, %v2512_v11  ;;  %v2535_v45 = vrot.slane %v2534_v20, 2  ;;  %3352 = vst [vmem:[%s4486_s22 + $0xc] sm:$0xf] %v2996_v1  ;;  %v3693_v8 = vpop.f32.mrb[52].mxu1  ;;  %v2960_v60 = vadd.f32 %v2933_v29, %v2930_v39  ;;  %v2975_v61 = vmul.f32 %v2933_v29, %v2933_v29 }
 0x1b8   : > { %v2997_v4 = vpack.c.bf16 %v2933_v29, %v2933_v29  ;;  %v3694_v33 = vpop.f32.mrb[53].mxu1 }
 0x1b9   : > { %v2515_v18 = vrot.slane %v2514_v25, 1  ;;  %v2536_v47 = vadd.f32 %v2535_v45, %v2534_v20  ;;  %v3695_v44 = vadd.f32 %v3694_v33, %v3693_v8  ;;  %v3696_v58 = vpop.f32.mrb[54].mxu1  ;;  %v2982_v53 = vadd.f32 %v2975_v61, %v2974_v7 }
 0x1ba   : > { %3353 = vst [vmem:[%s4486_s22 + $0x1c] sm:$0xf] %v2997_v4  ;;  %v3697_v48 = vpop.f32.mrb[55].mxu1  ;;  %v3659_v49 = vpop.f32.mrb[56].mxu0 }
 0x1bb   : > { %v2516_v55 = vadd.f32 %v2515_v18, %v2514_v25  ;;  %v2537_v37 = vrot.slane %v2536_v47, 1  ;;  %v2938_v32 = vadd.f32 %v3695_v44, %v3655_v42  ;;  %v3698_v2 = vadd.f32 %v3697_v48, %v3696_v58  ;;  %v3660_v30 = vpop.f32.mrb[57].mxu0 }
 0x1bc   : > { %v3661_v62 = vadd.f32 %v3660_v30, %v3659_v49  ;;  %v3662_v46 = vpop.f32.mrb[58].mxu0 }
 0x1bd   : > { %v4527_v5 = vadd.f32 %v2516_v55, %v4514_v40  ;;  %v2538_v12 = vadd.f32 %v2537_v37, %v2536_v47  ;;  %v2961_v34 = vadd.f32 %v2960_v60, %v2938_v32  ;;  %v2976_v14 = vmul.f32 %v2938_v32, %v2938_v32  ;;  %v3663_v38 = vpop.f32.mrb[59].mxu0 }
 0x1be   : > { %v2998_v6 = vpack.c.bf16 %v2938_v32, %v2938_v32  ;;  %v2941_v16 = vadd.f32 %v3698_v2, %v3658_v0  ;;  %v3664_v17 = vadd.f32 %v3663_v38, %v3662_v46 }
 0x1bf   : > { %v4530_v63 = vadd.f32 %v2538_v12, %v4516_v54  ;;  %v2983_v59 = vadd.f32 %v2982_v53, %v2976_v14  ;;  %v3699_v19 = vpop.f32.mrb[56].mxu1 }
 0x1c0   : > { %3354 = vst [vmem:[%s4486_s22 + $0x2c] sm:$0xf] %v2998_v6  ;;  %v2962_v57 = vadd.f32 %v2961_v34, %v2941_v16  ;;  %v2977_v24 = vmul.f32 %v2941_v16, %v2941_v16  ;;  %v2999_v36 = vpack.c.bf16 %v2941_v16, %v2941_v16  ;;  %v3700_v10 = vpop.f32.mrb[57].mxu1 }
 0x1c1   : > { %v3701_v40 = vadd.f32 %v3700_v10, %v3699_v19  ;;  %v3702_v26 = vpop.f32.mrb[58].mxu1 }
 0x1c2   : > { %v2984_v31 = vadd.f32 %v2983_v59, %v2977_v24  ;;  %3355 = vst [vmem:[%s4486_s22 + $0x3c] sm:$0xf] %v2999_v36  ;;  %v3703_v23 = vpop.f32.mrb[59].mxu1  ;;  %v3665_v41 = vpop.f32.mrb[60].mxu0 }
 0x1c3   : > { %v2946_v21 = vadd.f32 %v3701_v40, %v3661_v62  ;;  %v3704_v27 = vadd.f32 %v3703_v23, %v3702_v26  ;;  %v3666_v13 = vpop.f32.mrb[61].mxu0 }
 0x1c4   : > { %v3667_v9 = vadd.f32 %v3666_v13, %v3665_v41  ;;  %v3668_v54 = vpop.f32.mrb[62].mxu0 }
 0x1c5   : > { %v2963_v28 = vadd.f32 %v2962_v57, %v2946_v21  ;;  %v2978_v3 = vmul.f32 %v2946_v21, %v2946_v21  ;;  %v3000_v43 = vpack.c.bf16 %v2946_v21, %v2946_v21  ;;  %v2949_v35 = vadd.f32 %v3704_v27, %v3664_v17  ;;  %v3669_v11 = vpop.f32.mrb[63].mxu0 }
 0x1c6   : > { %v3670_v22 = vadd.f32 %v3669_v11, %v3668_v54 }
 0x1c7   : > { %v2985_v39 = vadd.f32 %v2984_v31, %v2978_v3  ;;  %3356 = vst [vmem:[%s4486_s22 + $0x4c] sm:$0xf] %v3000_v43  ;;  %v2964_v56 = vadd.f32 %v2963_v28, %v2949_v35  ;;  %v2979_v15 = vmul.f32 %v2949_v35, %v2949_v35  ;;  %v3001_v42 = vpack.c.bf16 %v2949_v35, %v2949_v35  ;;  %v3705_v50 = vpop.f32.mrb[60].mxu1 }
 0x1c8   : > { %v3706_v51 = vpop.f32.mrb[61].mxu1 }
 0x1c9   : > { %v2986_v20 = vadd.f32 %v2985_v39, %v2979_v15  ;;  %3357 = vst [vmem:[%s4486_s22 + $0x5c] sm:$0xf] %v3001_v42  ;;  %v3707_v1 = vadd.f32 %v3706_v51, %v3705_v50  ;;  %v3708_v52 = vpop.f32.mrb[62].mxu1 }
 0x1ca   : > { %v3709_v29 = vpop.f32.mrb[63].mxu1 }
 0x1cb   : > { %v2954_v0 = vadd.f32 %v3707_v1, %v3667_v9  ;;  %v3710_v25 = vadd.f32 %v3709_v29, %v3708_v52 }
 0x1cd   : > { %v2965_v45 = vadd.f32 %v2964_v56, %v2954_v0  ;;  %v2980_v8 = vmul.f32 %v2954_v0, %v2954_v0  ;;  %v3002_v7 = vpack.c.bf16 %v2954_v0, %v2954_v0  ;;  %v2957_v60 = vadd.f32 %v3710_v25, %v3670_v22 }
 0x1cf   : > { %v2987_v61 = vadd.f32 %v2986_v20, %v2980_v8  ;;  %3358 = vst [vmem:[%s4486_s22 + $0x6c] sm:$0xf] %v3002_v7  ;;  %v2966_v4 = vadd.f32 %v2965_v45, %v2957_v60  ;;  %v2981_v33 = vmul.f32 %v2957_v60, %v2957_v60  ;;  %v3003_v18 = vpack.c.bf16 %v2957_v60, %v2957_v60 }
 0x1d1   : > { %v2967_v47 = vrot.slane %v2966_v4, 4  ;;  %v2988_v44 = vadd.f32 %v2987_v61, %v2981_v33  ;;  %3359 = vst [vmem:[%s4486_s22 + $0x7c] sm:$0xf] %v3003_v18 }
 0x1d3   : > { %v2968_v58 = vadd.f32 %v2967_v47, %v2966_v4  ;;  %v2989_v53 = vrot.slane %v2988_v44, 4 }
 0x1d5   : > { %v2969_v48 = vrot.slane %v2968_v58, 2  ;;  %v2990_v49 = vadd.f32 %v2989_v53, %v2988_v44 }
 0x1d7   : > { %v2970_v55 = vadd.f32 %v2969_v48, %v2968_v58  ;;  %v2991_v37 = vrot.slane %v2990_v49, 2 }
 0x1d9   : > { %v2971_v32 = vrot.slane %v2970_v55, 1  ;;  %v2992_v2 = vadd.f32 %v2991_v37, %v2990_v49 }
 0x1db   : > { %v2972_v30 = vadd.f32 %v2971_v32, %v2970_v55  ;;  %v2993_v62 = vrot.slane %v2992_v2, 1 }
 0x1dd   : > { %v2973_v46 = vadd.f32 %v2972_v30, %v4527_v5  ;;  %v2994_v12 = vadd.f32 %v2993_v62, %v2992_v2 }
 0x1df   : > { %v2995_v34 = vadd.f32 %v2994_v12, %v4530_v63  ;;  %3012 = vst [vmem:[%s283_s8] sm:$0x1] %v2973_v46 }
 0x1e1   : > { %3013 = vst [vmem:[%s286_s11] sm:$0x1] %v2995_v34 }
 0x1e2 PF: > { %s18_s21 = sadd.s32 1, %s3911_s21  }
 0x1e3   : > { %p15_p5 = scmp.ge.s32.totalorder %s18_s21, 4  }
 0x1e5   :  { %17 = sbr.rel (!%p15_p5) target bundleno = 1 (0x1), region = 101 }
 0x1ec   :  { %3062 = vsyncpa [#allocation4], 1 }
 0x1ed   :  { %3064 = vsyncpa [#allocation4 + $0x1], 1 }

// kernel: dcgan_generator_forward.7
= control target key start
LH: loop header
LB: loop body
LE: loop exit
PB: predicated region body
PF: predicated region fallthrough
CT: control target
= control target key end

     0   :  { %s8861_s15 = smov 0   ;;  %s8863_s16 = smov 0   ;;  %s11598_s0 = inlined_call_operand.vmem [shape: bf16[2,16,16,128], index: 0, kind: input, shape index: {}]   ;;  %s11599_s1 = inlined_call_operand.vmem [shape: f32[1,1,1,128], index: 1, kind: input, shape index: {}]   ;;  %s11600_s2 = inlined_call_operand.vmem [shape: f32[1,1,1,128], index: 2, kind: input, shape index: {}]   ;;  %s11601_s3 = inlined_call_operand.vmem [shape: bf16[4,512,128], index: 3, kind: input, shape index: {}]   ;;  %s11602_s4 = inlined_call_operand.vmem [shape: f32[2,2,32,16,3], index: 4, kind: output, shape index: {}]  }
   0x1   :  { %s8865_s17 = smov 0  }
   0x2 LB: > { %s8874_s18 = sadd.s32 4294967295, %s8833_s17   ;;  %s8876_s19 = sadd.s32 1, %s8833_s17   ;;  %s8833_s17 = sphi %s8865_s17, %s11803_s17   ;;  %s8829_s16 = sphi %s8863_s16, %s11802_s16   ;;  %s8825_s15 = sphi %s8861_s15, %s11801_s15  }
   0x3   : > { %s107_s20 = ssub.s32 %s8833_s17, %s8876_s19  ;;  %s110_s21 = sadd.s32 1, %s8829_s16 }
   0x4   : > { %p108_p0 = scmp.eq.s32.totalorder %s107_s20, 0  ;;  %p120_p1 = scmp.ne.s32.totalorder %s8829_s16, %s8825_s15 }
   0x5   : > { %p121_p2 = scmp.eq.s32.totalorder %s8874_s18, 1  ;;  %p6594_p3 = scmp.ge.s32.totalorder %s8833_s17, 1 }
   0x6   : > { %s8884_s22 = scalar_select %p108_p0, %s8829_s16, %s110_s21  }
   0x7   : > { %p8886_p4 = por %p121_p2, %p120_p1  ;;  %p162_p5 = scmp.lt.s32.totalorder %s8833_s17, 3 }
   0x9   : > { %p163_p6 = pnand %p6594_p3, %p162_p5 }
   0xb   : > { %166 = sbr.rel (%p163_p6) target bundleno = 949 (0x3b5), region = 36 }
  0x12   : > { %v8281_v0 = vld [vmem:[%s11601_s3 + $0x40] sm:$0xff]   ;;  %v8835_v2 = vmov 0   ;;  %v8285_v5 = vld [vmem:[%s11601_s3 + $0x48] sm:$0xff]   ;;  %v8289_v9 = vld [vmem:[%s11601_s3 + $0x50] sm:$0xff]   ;;  %p187_p7 = scmp.lt.s32.totalorder %s8874_s18, 1  ;;  %v11674_v53 = vmov 0 }
  0x13   : > { %v8282_v1 = vld [vmem:[%s11601_s3] sm:$0xff]   ;;  %194 = vst [vmem:[#allocation2] sm:$0xf] %v8835_v2  ;;  %195 = vst [vmem:[#allocation2 + $0x4] sm:$0xf] %v8835_v2  ;;  %7360 = vmatprep.subr.bf16.mxu0 %v8281_v0  ;;  %v8286_v6 = vld [vmem:[%s11601_s3 + $0x8] sm:$0xff]  }
  0x14   : > { %196 = vst [vmem:[#allocation2 + $0x8] sm:$0x1] %v8835_v2  ;;  %197 = vst [vmem:[#allocation2 + $0xc] sm:$0xf] %v8835_v2  ;;  %v8283_v3 = vld [vmem:[%s11601_s3 + $0xc0] sm:$0xff]   ;;  %7361 = vmatpush3.bf16.msra.mxu0 %v8282_v1  ;;  %v8287_v7 = vld [vmem:[%s11601_s3 + $0xc8] sm:$0xff]  }
  0x15   : > { %198 = vst [vmem:[#allocation2 + $0x10] sm:$0xf] %v8835_v2  ;;  %199 = vst [vmem:[#allocation2 + $0x14] sm:$0x1] %v8835_v2  ;;  %v8284_v4 = vld [vmem:[%s11601_s3 + $0x80] sm:$0xff]   ;;  %7472 = vmatprep.subr.bf16.mxu1 %v8283_v3  ;;  %7362 = vmatprep.subr.bf16.mxu0 %v8285_v5  ;;  %v8288_v8 = vld [vmem:[%s11601_s3 + $0x88] sm:$0xff]  }
  0x16   : > { %200 = vst [vmem:[#allocation2 + $0x18] sm:$0xf] %v8835_v2  ;;  %201 = vst [vmem:[#allocation2 + $0x1c] sm:$0xf] %v8835_v2  ;;  %7473 = vmatpush3.bf16.msra.mxu1 %v8284_v4  ;;  %v8290_v10 = vld [vmem:[%s11601_s3 + $0x10] sm:$0xff]   ;;  %v8293_v13 = vld [vmem:[%s11601_s3 + $0x58] sm:$0xff]  }
  0x17   : > { %202 = vst [vmem:[#allocation2 + $0x20] sm:$0x1] %v8835_v2  ;;  %203 = vst [vmem:[#allocation2 + $0x24] sm:$0xf] %v8835_v2  ;;  %7474 = vmatprep.subr.bf16.mxu1 %v8287_v7  ;;  %v8291_v11 = vld [vmem:[%s11601_s3 + $0xd0] sm:$0xff]   ;;  %v8294_v14 = vld [vmem:[%s11601_s3 + $0x18] sm:$0xff]  }
  0x18   : > { %204 = vst [vmem:[#allocation2 + $0x28] sm:$0xf] %v8835_v2  ;;  %205 = vst [vmem:[#allocation2 + $0x2c] sm:$0x1] %v8835_v2  ;;  %7363 = vmatpush3.bf16.msra.mxu0 %v8286_v6  ;;  %v8292_v12 = vld [vmem:[%s11601_s3 + $0x90] sm:$0xff]   ;;  %v8295_v15 = vld [vmem:[%s11601_s3 + $0xd8] sm:$0xff]  }
  0x19   : > { %206 = vst [vmem:[#allocation2 + $0x30] sm:$0xf] %v8835_v2  ;;  %207 = vst [vmem:[#allocation2 + $0x34] sm:$0xf] %v8835_v2  ;;  %7364 = vmatprep.subr.bf16.mxu0 %v8289_v9  ;;  %v8296_v16 = vld [vmem:[%s11601_s3 + $0x98] sm:$0xff]   ;;  %v8297_v17 = vld [vmem:[%s11601_s3 + $0x60] sm:$0xff]  }
  0x1a   : > { %208 = vst [vmem:[#allocation2 + $0x38] sm:$0x1] %v8835_v2  ;;  %209 = vst [vmem:[#allocation2 + $0x3c] sm:$0xf] %v8835_v2  ;;  %7475 = vmatpush3.bf16.msra.mxu1 %v8288_v8  ;;  %v8298_v18 = vld [vmem:[%s11601_s3 + $0x20] sm:$0xff]   ;;  %v8301_v21 = vld [vmem:[%s11601_s3 + $0x68] sm:$0xff]  }
  0x1b   : > { %210 = vst [vmem:[#allocation2 + $0x40] sm:$0xf] %v8835_v2  ;;  %211 = vst [vmem:[#allocation2 + $0x44] sm:$0x1] %v8835_v2  ;;  %7476 = vmatprep.subr.bf16.mxu1 %v8291_v11  ;;  %v8299_v19 = vld [vmem:[%s11601_s3 + $0xe0] sm:$0xff]   ;;  %v8302_v22 = vld [vmem:[%s11601_s3 + $0x28] sm:$0xff]  }
  0x1c   : > { %212 = vst [vmem:[#allocation2 + $0x48] sm:$0xf] %v8835_v2  ;;  %213 = vst [vmem:[#allocation2 + $0x4c] sm:$0xf] %v8835_v2  ;;  %7365 = vmatpush3.bf16.msra.mxu0 %v8290_v10  ;;  %v8300_v20 = vld [vmem:[%s11601_s3 + $0xa0] sm:$0xff]   ;;  %v8303_v23 = vld [vmem:[%s11601_s3 + $0xe8] sm:$0xff]  }
  0x1d   : > { %214 = vst [vmem:[#allocation2 + $0x50] sm:$0x1] %v8835_v2  ;;  %215 = vst [vmem:[#allocation2 + $0x54] sm:$0xf] %v8835_v2  ;;  %7366 = vmatprep.subr.bf16.mxu0 %v8293_v13  ;;  %v8304_v24 = vld [vmem:[%s11601_s3 + $0xa8] sm:$0xff]   ;;  %v8305_v25 = vld [vmem:[%s11601_s3 + $0x70] sm:$0xff]  }
  0x1e   : > { %216 = vst [vmem:[#allocation2 + $0x58] sm:$0xf] %v8835_v2  ;;  %217 = vst [vmem:[#allocation2 + $0x5c] sm:$0x1] %v8835_v2  ;;  %7477 = vmatpush3.bf16.msra.mxu1 %v8292_v12  ;;  %s188_s8 = scalar_select %p187_p7, %s8874_s18, 1  ;;  %v8306_v26 = vld [vmem:[%s11601_s3 + $0x30] sm:$0xff]  }
  0x1f   : > { %218 = vst [vmem:[#allocation2 + $0x60] sm:$0xf] %v8835_v2  ;;  %219 = vst [vmem:[#allocation2 + $0x64] sm:$0xf] %v8835_v2  ;;  %7478 = vmatprep.subr.bf16.mxu1 %v8295_v15  ;;  %v8307_v27 = vld [vmem:[%s11601_s3 + $0xf0] sm:$0xff]   ;;  %v8309_v29 = vld [vmem:[%s11601_s3 + $0x78] sm:$0xff]  }
  0x20   : > { %220 = vst [vmem:[#allocation2 + $0x68] sm:$0x1] %v8835_v2  ;;  %221 = vst [vmem:[#allocation2 + $0x6c] sm:$0xf] %v8835_v2  ;;  %7367 = vmatpush3.bf16.msra.mxu0 %v8294_v14  ;;  %v8308_v28 = vld [vmem:[%s11601_s3 + $0xb0] sm:$0xff]   ;;  %s7246_s21 = sshll.u32 %s188_s8, 7 }
  0x21   : > { %222 = vst [vmem:[#allocation2 + $0x70] sm:$0xf] %v8835_v2  ;;  %223 = vst [vmem:[#allocation2 + $0x74] sm:$0x1] %v8835_v2  ;;  %7368 = vmatprep.subr.bf16.mxu0 %v8297_v17  ;;  %v8310_v30 = vld [vmem:[%s11601_s3 + $0x38] sm:$0xff]   ;;  %s8988_s30 = scalar_lea.vmem %s11598_s0, %s7246_s21  ;;  %v8314_v44 = vld [vmem:[%s11601_s3 + $0x140] sm:$0xff]  }
  0x22   : > { %224 = vst [vmem:[#allocation2 + $0x78] sm:$0xf] %v8835_v2  ;;  %225 = vst [vmem:[#allocation2 + $0x7c] sm:$0xf] %v8835_v2  ;;  %7479 = vmatpush3.bf16.msra.mxu1 %v8296_v16  ;;  %v8311_v31 = vld [vmem:[%s11601_s3 + $0xf8] sm:$0xff]   ;;  %v7282_v43 = vld [vmem:[%s8988_s30] sm:$0xff]  }
  0x23   : > { %226 = vst [vmem:[#allocation2 + $0x80] sm:$0x1] %v8835_v2  ;;  %227 = vst [vmem:[#allocation2 + $0x84] sm:$0xf] %v8835_v2  ;;  %7480 = vmatprep.subr.bf16.mxu1 %v8299_v19  ;;  %v959_v32 = vld [vmem:[#allocation2] sm:$0xf]  ;;  %v7283_v47 = vunpack.c.l.bf16 %v7282_v43  ;;  %v7284_v51 = vunpack.c.h.bf16 %v7282_v43 }
  0x24   : > { %228 = vst [vmem:[#allocation2 + $0x88] sm:$0xf] %v8835_v2  ;;  %229 = vst [vmem:[#allocation2 + $0x8c] sm:$0x1] %v8835_v2  ;;  %7369 = vmatpush3.bf16.msra.mxu0 %v8298_v18  ;;  %v960_v33 = vld [vmem:[#allocation2 + $0x4] sm:$0xf] }
  0x25   : > { %230 = vst [vmem:[#allocation2 + $0x90] sm:$0xf] %v8835_v2  ;;  %231 = vst [vmem:[#allocation2 + $0x94] sm:$0xf] %v8835_v2  ;;  %7370 = vmatprep.subr.bf16.mxu0 %v8301_v21  ;;  %v991_v34 = vld [vmem:[#allocation2 + $0x8] sm:$0x1]  ;;  %v6680_v0 = vcombine.low %v959_v32, %v960_v33 }
  0x26   : > { %232 = vst [vmem:[#allocation2 + $0x98] sm:$0x1] %v8835_v2  ;;  %233 = vst [vmem:[#allocation2 + $0x9c] sm:$0xf] %v8835_v2  ;;  %7481 = vmatpush3.bf16.msra.mxu1 %v8300_v20  ;;  %vm1007_vm0 = vsmask.f32 3328 }
  0x27   : > { %234 = vst [vmem:[#allocation2 + $0xa0] sm:$0xf] %v8835_v2  ;;  %235 = vst [vmem:[#allocation2 + $0xa4] sm:$0x1] %v8835_v2  ;;  %7482 = vmatprep.subr.bf16.mxu1 %v8303_v23  ;;  %vm1008_vm1 = vsmask.f32 7440 }
  0x28   : > { %236 = vst [vmem:[#allocation2 + $0xa8] sm:$0xf] %v8835_v2  ;;  %237 = vst [vmem:[#allocation2 + $0xac] sm:$0xf] %v8835_v2  ;;  %7371 = vmatpush3.bf16.msra.mxu0 %v8302_v22  ;;  %v1011_v35 = vshrl.u32 %v959_v32, 16  ;;  %v1014_v36 = vshll.u32 %v959_v32, 16 }
  0x29   : > { %238 = vst [vmem:[#allocation2 + $0xb0] sm:$0x1] %v8835_v2  ;;  %239 = vst [vmem:[#allocation2 + $0xb4] sm:$0xf] %v8835_v2  ;;  %7372 = vmatprep.subr.bf16.mxu0 %v8305_v25  ;;  %v1020_v37 = vshll.u32 %v960_v33, 16  ;;  %v1024_v38 = vshrl.u32 %v960_v33, 16 }
  0x2a   : > { %240 = vst [vmem:[#allocation2 + $0xb8] sm:$0xf] %v8835_v2  ;;  %241 = vst [vmem:[#allocation2 + $0xbc] sm:$0x1] %v8835_v2  ;;  %7483 = vmatpush3.bf16.msra.mxu1 %v8304_v24  ;;  %v1030_v39 = vshll.u32 %v991_v34, 16  ;;  %v8312_v40 = vld [vmem:[%s11601_s3 + $0xb8] sm:$0xff]  }
  0x2b   : > { %242 = vst [vmem:[#allocation2 + $0xc0] sm:$0xf] %v8835_v2  ;;  %243 = vst [vmem:[#allocation2 + $0xc4] sm:$0xf] %v8835_v2  ;;  %7484 = vmatprep.subr.bf16.mxu1 %v8307_v27  ;;  %v1013_v41 = vrot.slane %v1011_v35, 4  ;;  %v1016_v42 = vrot.slane %v1014_v36, 5 }
  0x2c   : > { %244 = vst [vmem:[#allocation2 + $0xc8] sm:$0x1] %v8835_v2  ;;  %245 = vst [vmem:[#allocation2 + $0xcc] sm:$0xf] %v8835_v2  ;;  %7373 = vmatpush3.bf16.msra.mxu0 %v8306_v26  ;;  %v1022_v45 = vrot.slane %v1020_v37, 5  ;;  %v1026_v46 = vrot.slane %v1024_v38, 4 }
  0x2d   : > { %246 = vst [vmem:[#allocation2 + $0xd0] sm:$0xf] %v8835_v2  ;;  %247 = vst [vmem:[#allocation2 + $0xd4] sm:$0x1] %v8835_v2  ;;  %7374 = vmatprep.subr.bf16.mxu0 %v8309_v29  ;;  %v9000_v48 = vld [vmem:[%s11599_s1] ss:$0 sm:$0xff]  ;;  %v1017_v50 = vor.u32 %v1016_v42, %v1013_v41 }
  0x2e   : > { %7485 = vmatpush3.bf16.msra.mxu1 %v8308_v28  ;;  %v8315_v49 = vld [vmem:[%s11601_s3 + $0x1c0] sm:$0xff]   ;;  %vm9012_vm2 = vmor %vm1007_vm0, %vm1008_vm1  ;;  %v1027_v54 = vor.u32 %v1026_v46, %v1022_v45  ;;  %v1032_v55 = vrot.slane %v1030_v39, 5  ;;  %v319_v56 = vmul.f32 %v7283_v47, %v9000_v48  ;;  %v320_v58 = vmul.f32 %v7284_v51, %v9000_v48  ;;  %v7345_v5 = vld [vmem:[%s8988_s30 + $0x8] sm:$0xff]   ;;  %s184_s5 = sand.u32 1, %s8825_s15   ;;  %s7280_s20 = sshll.u32 (%p8886_p4), %s8874_s18, 8 }
  0x2f   : > { %7486 = vmatprep.subr.bf16.mxu1 %v8311_v31  ;;  %v9008_v52 = vld [vmem:[%s11600_s2] ss:$0 sm:$0xff]  ;;  %v11675_v53 = vsel %vm9012_vm2, 4294967295, %v11674_v53  ;;  %v1018_v57 = vrot.slane %v1017_v50, 4  ;;  %vm518_vm3 = vsmask.f32 256  ;;  %v7287_v7 = vunpack.c.l.bf16 %v7345_v5  ;;  %s11333_s25 = scalar_lea.vmem (%p8886_p4), %s11602_s4, %s7280_s20 }
  0x30   : > { %7375 = vmatpush3.bf16.msra.mxu0 %v8310_v30  ;;  %11676 = vst [vmem:[#allocation4_spill] sm:$0xff] %v11675_v53  ;;  %v1028_v59 = vrot.slane %v1027_v54, 4  ;;  %v358_v60 = vadd.f32 %v9008_v52, %v319_v56  ;;  %v359_v62 = vadd.f32 %v9008_v52, %v320_v58  ;;  %vm519_vm4 = vsmask.f32 4368  ;;  %v8317_v4 = vld [vmem:[%s11601_s3 + $0x100] sm:$0xff]   ;;  %v7346_v9 = vld [vmem:[%s8988_s30 + $0x10] sm:$0xff]  }
  0x31   : > { %7584 = vmatprep.subr.bf16.mxu0 %v8314_v44  ;;  %v1023_v61 = vsel %vm9012_vm2, %v1018_v57, %v1022_v45  ;;  %vm842_vm5 = vcmask 1043456   ;;  %vm843_vm6 = vsmask.f32 7938  ;;  %v7288_v8 = vunpack.c.h.bf16 %v7345_v5  ;;  %v8322_v13 = vld [vmem:[%s11601_s3 + $0x148] sm:$0xff]   ;;  %vm9044_vm8 = vmor %vm518_vm3, %vm519_vm4  ;;  %v7347_v32 = vld [vmem:[%s8988_s30 + $0x18] sm:$0xff]   ;;  %s10169_s15 = sshll.u32 %s184_s5, 10 }
  0x32   : > { %7487 = vmatpush3.bf16.msra.mxu1 %v8312_v40  ;;  %v1033_v63 = vsel %vm9012_vm2, %v1028_v59, %v1032_v55  ;;  %v390_v1 = vmax.f32 %v358_v60, 0.0  ;;  %v391_v3 = vmax.f32 %v359_v62, 0.0  ;;  %vm849_vm7 = vcmask 1040384   ;;  %v845_v20 = vld [vmem:[#allocation2 + $0xc] sm:$0xf]  ;;  %vm9052_vm9 = vmand %vm842_vm5, %vm843_vm6  ;;  %v8330_v43 = vld [vmem:[%s11601_s3 + $0x150] sm:$0xff]  }
  0x33   : > { %7696 = vmatprep.subr.bf16.mxu1 %v8315_v49  ;;  %v9024_v2 = vcombine.low %v1023_v61, %v1033_v63  ;;  %v7291_v11 = vunpack.c.l.bf16 %v7346_v9  ;;  %v7292_v12 = vunpack.c.h.bf16 %v7346_v9  ;;  %v321_v16 = vmul.f32 %v7287_v7, %v9000_v48  ;;  %v8325_v23 = vld [vmem:[%s11601_s3 + $0x108] sm:$0xff]   ;;  %vm9061_vm10 = vmand %vm849_vm7, %vm518_vm3  ;;  %v851_v36 = vld [vmem:[#allocation2 + $0x14] sm:$0x1]  ;;  %s10204_s13 = scalar_lea.vmem [#allocation3], %s10169_s15 }
  0x34   : > { %v7247_v6 = vpack.c.bf16 %v390_v1, %v390_v1  ;;  %v7248_v10 = vpack.c.bf16 %v391_v3, %v391_v3  ;;  %v322_v17 = vmul.f32 %v7288_v8, %v9000_v48  ;;  %v7295_v47 = vunpack.c.l.bf16 %v7347_v32  ;;  %v9075_v55 = vld [vmem:[%s8988_s30 + $0x20] sm:$0xff]   ;;  %v854_v60 = vld [vmem:[#allocation2 + $0x18] sm:$0xf] }
  0x35   : > { %3366 = vmatprep.mubr.bf16.mxu0 %v9024_v2  ;;  %v323_v21 = vmul.f32 %v7291_v11, %v9000_v48  ;;  %v324_v22 = vmul.f32 %v7292_v12, %v9000_v48  ;;  %v360_v26 = vadd.f32 %v9008_v52, %v321_v16  ;;  %v858_v7 = vld [vmem:[#allocation2 + $0x20] sm:$0x1]  ;;  %v7300_v11 = vunpack.c.h.bf16 %v9075_v55  ;;  %v861_v16 = vld [vmem:[#allocation2 + $0x24] sm:$0xf] }
  0x36   : > { %3367 = vmatmul.mubr.bf16.vlgmr.msra.gmra.mrb[0].mxu0 %v6680_v0  ;;  %v522_v14 = vshrl.u32 %v7247_v6, 16  ;;  %v525_v15 = vshll.u32 %v7247_v6, 16  ;;  %v530_v18 = vshrl.u32 %v7248_v10, 16  ;;  %v533_v19 = vshll.u32 %v7248_v10, 16  ;;  %v8333_v6 = vld [vmem:[%s11601_s3 + $0x110] sm:$0xff]  }
  0x37   : > { %7585 = vmatpush3.bf16.msra.mxu0 %v8317_v4  ;;  %v361_v27 = vadd.f32 %v9008_v52, %v322_v17  ;;  %v362_v30 = vadd.f32 %v9008_v52, %v323_v21  ;;  %v363_v31 = vadd.f32 %v9008_v52, %v324_v22  ;;  %v392_v37 = vmax.f32 %v360_v26, 0.0 }
  0x38   : > { %v524_v25 = vrot.slane %v522_v14, 7  ;;  %7586 = vmatprep.subr.bf16.mxu0 %v8322_v13  ;;  %v532_v28 = vrot.slane %v530_v18, 7  ;;  %v7296_v4 = vunpack.c.h.bf16 %v7347_v32  ;;  %v9078_v5 = vmul.f32 %v7295_v47, %v9000_v48 }
  0x39   : > { %v393_v38 = vmax.f32 %v361_v27, 0.0  ;;  %v394_v41 = vmax.f32 %v362_v30, 0.0  ;;  %v395_v42 = vmax.f32 %v363_v31, 0.0  ;;  %v7249_v45 = vpack.c.bf16 %v392_v37, %v392_v37 }
  0x3a   : > { %v527_v33 = vor.u32 %v525_v15, %v524_v25  ;;  %v528_v34 = vrot.slane %v524_v25, 4  ;;  %v535_v39 = vor.u32 %v533_v19, %v532_v28  ;;  %v537_v40 = vrot.slane %v532_v28, 4 }
  0x3b   : > { %7587 = vmatpush3.bf16.msra.mxu0 %v8325_v23  ;;  %v7250_v46 = vpack.c.bf16 %v393_v38, %v393_v38  ;;  %v7251_v51 = vpack.c.bf16 %v394_v41, %v394_v41  ;;  %v7252_v54 = vpack.c.bf16 %v395_v42, %v395_v42  ;;  %v539_v56 = vshrl.u32 %v7249_v45, 16  ;;  %v865_v41 = vld [vmem:[#allocation2 + $0x2c] sm:$0x1]  ;;  %v8338_v42 = vld [vmem:[%s11601_s3 + $0x158] sm:$0xff]  }
  0x3c   : > { %v846_v44 = vsel %vm9052_vm9, %v527_v33, %v845_v20  ;;  %v536_v49 = vsel %vm9044_vm8, %v528_v34, %v535_v39  ;;  %v852_v50 = vsel %vm9061_vm10, %v537_v40, %v851_v36  ;;  %7588 = vmatprep.subr.bf16.mxu0 %v8330_v43  ;;  %v542_v57 = vshll.u32 %v7249_v45, 16 }
  0x3d   : > { %847 = vst [vmem:[#allocation2 + $0xc] sm:$0xf] %v846_v44  ;;  %848 = vst [vmem:[#allocation2 + $0x10] sm:$0xf] %v536_v49  ;;  %v547_v58 = vshrl.u32 %v7250_v46, 16  ;;  %v550_v59 = vshll.u32 %v7250_v46, 16  ;;  %v7299_v10 = vunpack.c.l.bf16 %v9075_v55  ;;  %v326_v27 = vmul.f32 %v7296_v4, %v9000_v48 }
  0x3e   : > { %853 = vst [vmem:[#allocation2 + $0x14] sm:$0x1] %v852_v50  ;;  %v556_v61 = vshrl.u32 %v7251_v51, 16  ;;  %v559_v62 = vshll.u32 %v7251_v51, 16  ;;  %v564_v63 = vshrl.u32 %v7252_v54, 16  ;;  %v567_v0 = vshll.u32 %v7252_v54, 16 }
  0x3f   : > { %v541_v1 = vrot.slane %v539_v56, 7  ;;  %v549_v3 = vrot.slane %v547_v58, 7  ;;  %7589 = vmatpush3.bf16.msra.mxu0 %v8333_v6  ;;  %v8341_v6 = vld [vmem:[%s11601_s3 + $0x118] sm:$0xff]   ;;  %vm1458_vm11 = vcmask 1042432   ;;  %vm1459_vm12 = vcmask 1046532  }
  0x40   : > { %v558_v8 = vrot.slane %v556_v61, 7  ;;  %v566_v9 = vrot.slane %v564_v63, 7  ;;  %7590 = vmatprep.subr.bf16.mxu0 %v8338_v42  ;;  %vm9891_vm13 = vmor %vm1458_vm11, %vm1459_vm12  ;;  %vm3688_vm14 = vcmask 23552  }
  0x41   : > { %v544_v12 = vor.u32 %v542_v57, %v541_v1  ;;  %v545_v13 = vrot.slane %v541_v1, 4  ;;  %v552_v14 = vor.u32 %v550_v59, %v549_v3  ;;  %v554_v15 = vrot.slane %v549_v3, 4 }
  0x42   : > { %v561_v17 = vor.u32 %v559_v62, %v558_v8  ;;  %v562_v18 = vrot.slane %v558_v8, 4  ;;  %v569_v19 = vor.u32 %v567_v0, %v566_v9  ;;  %v571_v20 = vrot.slane %v566_v9, 4 }
  0x43   : > { %v553_v23 = vsel %vm9044_vm8, %v545_v13, %v552_v14  ;;  %v855_v25 = vsel %vm9052_vm9, %v544_v12, %v854_v60  ;;  %v859_v26 = vsel %vm9061_vm10, %v554_v15, %v858_v7  ;;  %v9118_v13 = vadd.f32 %v9008_v52, %v9078_v5  ;;  %7591 = vmatpush3.bf16.msra.mxu0 %v8341_v6 }
  0x44   : > { %v1573_v21 = vld [vmem:[#allocation2 + $0xc] sm:$0xf]  ;;  %v1574_v28 = vld [vmem:[#allocation2 + $0x10] sm:$0xf]  ;;  %856 = vst [vmem:[#allocation2 + $0x18] sm:$0xf] %v855_v25  ;;  %v570_v33 = vsel %vm9044_vm8, %v562_v18, %v569_v19  ;;  %v862_v34 = vsel %vm9052_vm9, %v561_v17, %v861_v16  ;;  %v866_v4 = vsel %vm9061_vm10, %v571_v20, %v865_v41  ;;  %v9121_v14 = vadd.f32 %v9008_v52, %v326_v27 }
  0x45   : > { %v9085_v22 = vld [vmem:[#allocation2 + $0xc] sm:$0xf]  ;;  %v1605_v30 = vld [vmem:[#allocation2 + $0x14] sm:$0x1]  ;;  %v1622_v31 = vshrl.u32 %v1573_v21, 16  ;;  %v1625_v32 = vshll.u32 %v1573_v21, 16  ;;  %v9098_v39 = vcombine.low %v1573_v21, %v1574_v28 }
  0x46   : > { %857 = vst [vmem:[#allocation2 + $0x1c] sm:$0xf] %v553_v23  ;;  %860 = vst [vmem:[#allocation2 + $0x20] sm:$0x1] %v859_v26  ;;  %v1631_v36 = vshll.u32 %v1574_v28, 16  ;;  %v1635_v37 = vshrl.u32 %v1574_v28, 16 }
  0x47   : > { %v1641_v38 = vshll.u32 %v1605_v30, 16  ;;  %11683 = vst [vmem:[#allocation5_spill] sm:$0xff] %v9098_v39  ;;  %v9100_v40 = vld [vmem:[#allocation2 + $0x10] sm:$0xf]  ;;  %863 = vst [vmem:[#allocation2 + $0x24] sm:$0xf] %v862_v34 }
  0x48   : > { %864 = vst [vmem:[#allocation2 + $0x28] sm:$0xf] %v570_v33  ;;  %v1624_v43 = vrot.slane %v1622_v31, 4  ;;  %v1627_v44 = vrot.slane %v1625_v32, 5  ;;  %v992_v45 = vld [vmem:[#allocation2 + $0x14] sm:$0x1]  ;;  %v6681_v63 = vcombine.low %v9085_v22, %v9100_v40 }
  0x49   : > { %v1035_v46 = vshrl.u32 %v9085_v22, 16  ;;  %v1038_v47 = vshll.u32 %v9085_v22, 16  ;;  %v1633_v49 = vrot.slane %v1631_v36, 5  ;;  %v1637_v50 = vrot.slane %v1635_v37, 4  ;;  %867 = vst [vmem:[#allocation2 + $0x2c] sm:$0x1] %v866_v4 }
  0x4a   : > { %v1643_v51 = vrot.slane %v1641_v38, 5  ;;  %v1044_v54 = vshll.u32 %v9100_v40, 16  ;;  %v1628_v56 = vor.u32 %v1627_v44, %v1624_v43  ;;  %v1048_v59 = vshrl.u32 %v9100_v40, 16  ;;  %v8318_v26 = vld [vmem:[%s11601_s3 + $0x180] sm:$0xff]   ;;  %v8323_v31 = vld [vmem:[%s11601_s3 + $0x1c8] sm:$0xff]  }
  0x4b   : > { %v1037_v57 = vrot.slane %v1035_v46, 4  ;;  %v1040_v58 = vrot.slane %v1038_v47, 5  ;;  %v1638_v60 = vor.u32 %v1637_v50, %v1633_v49  ;;  %v1054_v62 = vshll.u32 %v992_v45, 16  ;;  %v1575_v9 = vld [vmem:[#allocation2 + $0x18] sm:$0xf] }
  0x4c   : > { %v1046_v61 = vrot.slane %v1044_v54, 5  ;;  %v1629_v0 = vrot.slane %v1628_v56, 4  ;;  %v1050_v3 = vrot.slane %v1048_v59, 4  ;;  %v1646_v19 = vshrl.u32 %v1575_v9, 16  ;;  %v9127_v25 = vld [vmem:[#allocation2 + $0x18] sm:$0xf] }
  0x4d   : > { %v1041_v1 = vor.u32 %v1040_v58, %v1037_v57  ;;  %v1639_v7 = vrot.slane %v1638_v60, 4  ;;  %v1056_v8 = vrot.slane %v1054_v62, 5  ;;  %v1576_v12 = vld [vmem:[#allocation2 + $0x1c] sm:$0xf]  ;;  %v1606_v18 = vld [vmem:[#allocation2 + $0x20] sm:$0x1] }
  0x4e   : > { %v1634_v15 = vsel %vm9012_vm2, %v1629_v0, %v1633_v49  ;;  %v1051_v17 = vor.u32 %v1050_v3, %v1046_v61  ;;  %v1649_v21 = vshll.u32 %v1575_v9, 16  ;;  %v1655_v22 = vshll.u32 %v1576_v12, 16  ;;  %v9139_v37 = vld [vmem:[#allocation2 + $0x1c] sm:$0xf]  ;;  %v993_v41 = vld [vmem:[#allocation2 + $0x20] sm:$0x1] }
  0x4f   : > { %v1042_v16 = vrot.slane %v1041_v1, 4  ;;  %v1644_v20 = vsel %vm9012_vm2, %v1639_v7, %v1643_v51  ;;  %v1659_v23 = vshrl.u32 %v1576_v12, 16  ;;  %v1648_v30 = vrot.slane %v1646_v19, 4  ;;  %v1577_v44 = vld [vmem:[#allocation2 + $0x24] sm:$0xf]  ;;  %v8326_v57 = vld [vmem:[%s11601_s3 + $0x188] sm:$0xff]  }
  0x50   : > { %v9129_v5 = vcombine.low %v1634_v15, %v1644_v20  ;;  %v1052_v28 = vrot.slane %v1051_v17, 4  ;;  %v1651_v32 = vrot.slane %v1649_v21, 5  ;;  %v1657_v33 = vrot.slane %v1655_v22, 5  ;;  %v8331_v58 = vld [vmem:[%s11601_s3 + $0x1d0] sm:$0xff]   ;;  %v1578_v0 = vld [vmem:[#allocation2 + $0x28] sm:$0xf] }
  0x51   : > { %v1047_v27 = vsel %vm9012_vm2, %v1042_v16, %v1046_v61  ;;  %v1661_v34 = vrot.slane %v1659_v23, 4  ;;  %v1665_v36 = vshll.u32 %v1606_v18, 16  ;;  %v9144_v40 = vcombine.low %v1575_v9, %v1576_v12  ;;  %v8346_v1 = vld [vmem:[%s11601_s3 + $0x160] sm:$0xff]   ;;  %v1607_v7 = vld [vmem:[#allocation2 + $0x2c] sm:$0x1]  ;;  %v8334_v18 = vld [vmem:[%s11601_s3 + $0x190] sm:$0xff]  }
  0x52   : > { %11684 = vst [vmem:[#allocation6_spill] sm:$0xff] %v9129_v5  ;;  %3527 = vmatprep.mubr.bf16.mxu1 %v9129_v5  ;;  %v1057_v38 = vsel %vm9012_vm2, %v1052_v28, %v1056_v8  ;;  %v1059_v42 = vshrl.u32 %v9127_v25, 16  ;;  %v1062_v43 = vshll.u32 %v9127_v25, 16  ;;  %v1652_v46 = vor.u32 %v1651_v32, %v1648_v30  ;;  %v9169_v17 = vld [vmem:[#allocation2 + $0x24] sm:$0xf]  ;;  %7592 = vmatprep.subr.bf16.mxu0 %v8346_v1 }
  0x53   : > { %11685 = vst [vmem:[#allocation7_spill] sm:$0xff] %v9144_v40  ;;  %3528 = vmatmul.mubr.bf16.vlgmr.msra.gmra.mrb[0].mxu1 %v9098_v39  ;;  %v9149_v45 = vcombine.low %v1047_v27, %v1057_v38  ;;  %v1662_v47 = vor.u32 %v1661_v34, %v1657_v33  ;;  %v1667_v49 = vrot.slane %v1665_v36, 5  ;;  %v1068_v54 = vshll.u32 %v9139_v37, 16  ;;  %v9179_v23 = vld [vmem:[#allocation2 + $0x28] sm:$0xf]  ;;  %v8342_v36 = vld [vmem:[%s11601_s3 + $0x198] sm:$0xff]  }
  0x54   : > { %7697 = vmatpush3.bf16.msra.mxu1 %v8318_v26  ;;  %v1061_v50 = vrot.slane %v1059_v42, 4  ;;  %v1064_v51 = vrot.slane %v1062_v43, 5  ;;  %v1072_v56 = vshrl.u32 %v9139_v37, 16  ;;  %v1653_v59 = vrot.slane %v1652_v46, 4  ;;  %v994_v30 = vld [vmem:[#allocation2 + $0x2c] sm:$0x1] }
  0x55   : > { %3374 = vmatprep.mubr.bf16.mxu0 %v9149_v45  ;;  %v1663_v60 = vrot.slane %v1662_v47, 4  ;;  %v1078_v61 = vshll.u32 %v993_v41, 16  ;;  %v6682_v62 = vcombine.low %v9127_v25, %v9139_v37  ;;  %7698 = vmatprep.subr.bf16.mxu1 %v8323_v31  ;;  %v1070_v4 = vrot.slane %v1068_v54, 5  ;;  %v8349_v43 = vld [vmem:[%s11601_s3 + $0x120] sm:$0xff]  }
  0x56   : > { %3375 = vmatmul.mubr.bf16.gmra.mrb[4].mxu0 %v6681_v63  ;;  %v1065_v3 = vor.u32 %v1064_v51, %v1061_v50  ;;  %v1074_v6 = vrot.slane %v1072_v56, 4  ;;  %v1670_v8 = vshrl.u32 %v1577_v44, 16  ;;  %v1658_v9 = vsel %vm9012_vm2, %v1653_v59, %v1657_v33  ;;  %v8339_v63 = vld [vmem:[%s11601_s3 + $0x1d8] sm:$0xff]   ;;  %v8347_v50 = vld [vmem:[%s11601_s3 + $0x1e0] sm:$0xff]  }
  0x57   : > { %v1668_v12 = vsel %vm9012_vm2, %v1663_v60, %v1667_v49  ;;  %v1080_v15 = vrot.slane %v1078_v61, 5  ;;  %v1673_v16 = vshll.u32 %v1577_v44, 16  ;;  %v1679_v26 = vshll.u32 %v1578_v0, 16  ;;  %7593 = vmatpush3.bf16.msra.mxu0 %v8349_v43 }
  0x58   : > { %v9177_v19 = vcombine.low %v1658_v9, %v1668_v12  ;;  %v1066_v20 = vrot.slane %v1065_v3, 4  ;;  %v1075_v21 = vor.u32 %v1074_v6, %v1070_v4  ;;  %v1672_v22 = vrot.slane %v1670_v8, 4  ;;  %7699 = vmatpush3.bf16.msra.mxu1 %v8326_v57  ;;  %v7349_v12 = vld [vmem:[%s8988_s30 + $0x28] sm:$0xff]  }
  0x59   : > { %v1675_v25 = vrot.slane %v1673_v16, 5  ;;  %v1683_v27 = vshrl.u32 %v1578_v0, 16  ;;  %v1689_v28 = vshll.u32 %v1607_v7, 16  ;;  %7700 = vmatprep.subr.bf16.mxu1 %v8331_v58  ;;  %v9184_v33 = vcombine.low %v1577_v44, %v1578_v0 }
  0x5a   : > { %11686 = vst [vmem:[#allocation8_spill] sm:$0xff] %v9177_v19  ;;  %3535 = vmatprep.mubr.bf16.mxu1 %v9177_v19  ;;  %v1071_v31 = vsel %vm9012_vm2, %v1066_v20, %v1070_v4  ;;  %v1076_v32 = vrot.slane %v1075_v21, 4  ;;  %v1083_v34 = vshrl.u32 %v9169_v17, 16  ;;  %v1681_v38 = vrot.slane %v1679_v26, 5  ;;  %v8355_v21 = vld [vmem:[%s11601_s3 + $0x1e8] sm:$0xff]  }
  0x5b   : > { %11687 = vst [vmem:[#allocation9_spill] sm:$0xff] %v9184_v33  ;;  %3536 = vmatmul.mubr.bf16.gmra.mrb[4].mxu1 %v9144_v40  ;;  %v1676_v37 = vor.u32 %v1675_v25, %v1672_v22  ;;  %v1685_v41 = vrot.slane %v1683_v27, 4  ;;  %v1691_v42 = vrot.slane %v1689_v28, 5  ;;  %v1086_v47 = vshll.u32 %v9169_v17, 16 }
  0x5c   : > { %v1081_v44 = vsel %vm9012_vm2, %v1076_v32, %v1080_v15  ;;  %v1085_v46 = vrot.slane %v1083_v34, 4  ;;  %v1092_v49 = vshll.u32 %v9179_v23, 16  ;;  %7701 = vmatpush3.bf16.msra.mxu1 %v8334_v18  ;;  %v1096_v57 = vshrl.u32 %v9179_v23, 16  ;;  %v8350_v15 = vld [vmem:[%s11601_s3 + $0x1a0] sm:$0xff]  }
  0x5d   : > { %v9201_v51 = vcombine.low %v1071_v31, %v1081_v44  ;;  %v1677_v54 = vrot.slane %v1676_v37, 4  ;;  %v1686_v56 = vor.u32 %v1685_v41, %v1681_v38  ;;  %7702 = vmatprep.subr.bf16.mxu1 %v8339_v63  ;;  %v1088_v58 = vrot.slane %v1086_v47, 5  ;;  %v8358_v31 = vld [vmem:[%s11601_s3 + $0x1a8] sm:$0xff]  }
  0x5e   : > { %v1094_v59 = vrot.slane %v1092_v49, 5  ;;  %v1102_v60 = vshll.u32 %v994_v30, 16  ;;  %v6683_v61 = vcombine.low %v9169_v17, %v9179_v23  ;;  %v1098_v3 = vrot.slane %v1096_v57, 4  ;;  %v872_v49 = vld [vmem:[#allocation2 + $0x38] sm:$0x1] }
  0x5f   : > { %3382 = vmatprep.mubr.bf16.mxu0 %v9201_v51  ;;  %v1682_v0 = vsel %vm9012_vm2, %v1677_v54, %v1681_v38  ;;  %v1687_v1 = vrot.slane %v1686_v56, 4  ;;  %v396_v4 = vmax.f32 %v9118_v13, 0.0  ;;  %v1089_v6 = vor.u32 %v1088_v58, %v1085_v46  ;;  %v7350_v56 = vld [vmem:[%s8988_s30 + $0x30] sm:$0xff]  }
  0x60   : > { %3383 = vmatmul.mubr.bf16.gmra.mrb[8].mxu0 %v6682_v62  ;;  %v1104_v7 = vrot.slane %v1102_v60, 5  ;;  %v397_v8 = vmax.f32 %v9121_v14, 0.0  ;;  %v327_v9 = vmul.f32 %v7299_v10, %v9000_v48  ;;  %7703 = vmatpush3.bf16.msra.mxu1 %v8342_v36  ;;  %v1099_v17 = vor.u32 %v1098_v3, %v1094_v59  ;;  %v8354_v10 = vld [vmem:[%s11601_s3 + $0x168] sm:$0xff]  }
  0x61   : > { %v1692_v16 = vsel %vm9012_vm2, %v1687_v1, %v1691_v42  ;;  %v7253_v13 = vpack.c.bf16 %v396_v4, %v396_v4  ;;  %v328_v62 = vmul.f32 %v7300_v11, %v9000_v48  ;;  %7704 = vmatprep.subr.bf16.mxu1 %v8347_v50  ;;  %v1090_v18 = vrot.slane %v1089_v6, 4  ;;  %7594 = vmatprep.subr.bf16.mxu0 %v8354_v10  ;;  %v8357_v11 = vld [vmem:[%s11601_s3 + $0x128] sm:$0xff]   ;;  %v868_v42 = vld [vmem:[#allocation2 + $0x30] sm:$0xf]  ;;  %v875_v6 = vld [vmem:[#allocation2 + $0x3c] sm:$0xf] }
  0x62   : > { %v9226_v14 = vcombine.low %v1682_v0, %v1692_v16  ;;  %v7254_v63 = vpack.c.bf16 %v397_v8, %v397_v8  ;;  %v366_v20 = vadd.f32 %v9008_v52, %v327_v9  ;;  %v1100_v22 = vrot.slane %v1099_v17, 4  ;;  %7595 = vmatpush3.bf16.msra.mxu0 %v8357_v11  ;;  %v7351_v0 = vld [vmem:[%s8988_s30 + $0x38] sm:$0xff]  }
  0x63   : > { %v573_v23 = vshrl.u32 %v7253_v13, 16  ;;  %v576_v25 = vshll.u32 %v7253_v13, 16  ;;  %v367_v55 = vadd.f32 %v9008_v52, %v328_v62  ;;  %v1095_v26 = vsel %vm9012_vm2, %v1090_v18, %v1094_v59 }
  0x64   : > { %3543 = vmatprep.mubr.bf16.mxu1 %v9226_v14  ;;  %v581_v27 = vshrl.u32 %v7254_v63, 16  ;;  %v584_v28 = vshll.u32 %v7254_v63, 16  ;;  %v398_v30 = vmax.f32 %v366_v20, 0.0  ;;  %7705 = vmatpush3.bf16.msra.mxu1 %v8350_v15  ;;  %v1105_v32 = vsel %vm9012_vm2, %v1100_v22, %v1104_v7  ;;  %v879_v15 = vld [vmem:[#allocation2 + $0x44] sm:$0x1] }
  0x65   : > { %3544 = vmatmul.mubr.bf16.gmra.mrb[8].mxu1 %v9184_v33  ;;  %v575_v34 = vrot.slane %v573_v23, 7  ;;  %v399_v36 = vmax.f32 %v367_v55, 0.0  ;;  %v7303_v37 = vunpack.c.l.bf16 %v7349_v12  ;;  %7706 = vmatprep.subr.bf16.mxu1 %v8355_v21  ;;  %v9245_v38 = vcombine.low %v1095_v26, %v1105_v32  ;;  %v9261_v21 = vld [vmem:[%s8988_s30 + $0x40] sm:$0xff]  }
  0x66   : > { %v583_v41 = vrot.slane %v581_v27, 7  ;;  %v7255_v43 = vpack.c.bf16 %v398_v30, %v398_v30  ;;  %v7304_v44 = vunpack.c.h.bf16 %v7349_v12  ;;  %v7307_v13 = vunpack.c.l.bf16 %v7350_v56 }
  0x67   : > { %v578_v46 = vor.u32 %v576_v25, %v575_v34  ;;  %v579_v47 = vrot.slane %v575_v34, 4  ;;  %v7256_v50 = vpack.c.bf16 %v399_v36, %v399_v36  ;;  %v329_v54 = vmul.f32 %v7303_v37, %v9000_v48  ;;  %3390 = vmatprep.mubr.bf16.mxu0 %v9245_v38 }
  0x68   : > { %v586_v57 = vor.u32 %v584_v28, %v583_v41  ;;  %v588_v58 = vrot.slane %v583_v41, 4  ;;  %v590_v59 = vshrl.u32 %v7255_v43, 16  ;;  %v593_v60 = vshll.u32 %v7255_v43, 16  ;;  %7707 = vmatpush3.bf16.msra.mxu1 %v8358_v31  ;;  %3391 = vmatmul.mubr.bf16.gmra.mrb[12].mxu0 %v6683_v61 }
  0x69   : > { %v869_v1 = vsel %vm9052_vm9, %v578_v46, %v868_v42  ;;  %v598_v3 = vshrl.u32 %v7256_v50, 16  ;;  %v601_v4 = vshll.u32 %v7256_v50, 16  ;;  %v330_v7 = vmul.f32 %v7304_v44, %v9000_v48 }
  0x6a   : > { %v587_v8 = vsel %vm9044_vm8, %v579_v47, %v586_v57  ;;  %870 = vst [vmem:[#allocation2 + $0x30] sm:$0xf] %v869_v1  ;;  %v873_v9 = vsel %vm9061_vm10, %v588_v58, %v872_v49  ;;  %v592_v12 = vrot.slane %v590_v59, 7  ;;  %v368_v61 = vadd.f32 %v9008_v52, %v329_v54 }
  0x6b   : > { %871 = vst [vmem:[#allocation2 + $0x34] sm:$0xf] %v587_v8  ;;  %874 = vst [vmem:[#allocation2 + $0x38] sm:$0x1] %v873_v9  ;;  %v600_v16 = vrot.slane %v598_v3, 7  ;;  %v369_v17 = vadd.f32 %v9008_v52, %v330_v7  ;;  %v7308_v62 = vunpack.c.h.bf16 %v7350_v56  ;;  %v7311_v20 = vunpack.c.l.bf16 %v7351_v0 }
  0x6c   : > { %v595_v10 = vor.u32 %v593_v60, %v592_v12  ;;  %v596_v18 = vrot.slane %v592_v12, 4  ;;  %v400_v63 = vmax.f32 %v368_v61, 0.0  ;;  %v331_v55 = vmul.f32 %v7307_v13, %v9000_v48 }
  0x6d   : > { %v603_v22 = vor.u32 %v601_v4, %v600_v16  ;;  %v605_v23 = vrot.slane %v600_v16, 4  ;;  %v401_v25 = vmax.f32 %v369_v17, 0.0  ;;  %v332_v27 = vmul.f32 %v7308_v62, %v9000_v48 }
  0x6e   : > { %v876_v11 = vsel %vm9052_vm9, %v595_v10, %v875_v6  ;;  %v9266_v26 = vpack.c.bf16 %v400_v63, %v400_v63  ;;  %v7312_v28 = vunpack.c.h.bf16 %v7351_v0  ;;  %v9276_v34 = vadd.f32 %v9008_v52, %v331_v55 }
  0x6f   : > { %v604_v30 = vsel %vm9044_vm8, %v596_v18, %v603_v22  ;;  %877 = vst [vmem:[#allocation2 + $0x3c] sm:$0xf] %v876_v11  ;;  %v880_v31 = vsel %vm9061_vm10, %v605_v23, %v879_v15  ;;  %v9273_v32 = vpack.c.bf16 %v401_v25, %v401_v25  ;;  %v9281_v41 = vadd.f32 %v9008_v52, %v332_v27 }
  0x70   : > { %878 = vst [vmem:[#allocation2 + $0x40] sm:$0xf] %v604_v30  ;;  %881 = vst [vmem:[#allocation2 + $0x44] sm:$0x1] %v880_v31  ;;  %v607_v36 = vshrl.u32 %v9266_v26, 16  ;;  %v610_v37 = vshll.u32 %v9266_v26, 16  ;;  %v333_v42 = vmul.f32 %v7311_v20, %v9000_v48  ;;  %v9289_v49 = vmul.f32 %v7312_v28, %v9000_v48 }
  0x71   : > { %v1579_v43 = vld [vmem:[#allocation2 + $0x30] sm:$0xf]  ;;  %v615_v46 = vshrl.u32 %v9273_v32, 16  ;;  %v618_v47 = vshll.u32 %v9273_v32, 16  ;;  %v7315_v50 = vunpack.c.l.bf16 %v9261_v21  ;;  %v7316_v60 = vunpack.c.h.bf16 %v9261_v21  ;;  %v9371_v32 = vld [vmem:[%s11600_s2] ss:$0 sm:$0xff] }
  0x72   : > { %v9284_v44 = vld [vmem:[#allocation2 + $0x30] sm:$0xf]  ;;  %v1580_v54 = vld [vmem:[#allocation2 + $0x34] sm:$0xf]  ;;  %v1608_v56 = vld [vmem:[#allocation2 + $0x38] sm:$0x1]  ;;  %v9293_v59 = vadd.f32 %v9008_v52, %v333_v42 }
  0x73   : > { %v1694_v57 = vshrl.u32 %v1579_v43, 16  ;;  %v1697_v58 = vshll.u32 %v1579_v43, 16  ;;  %v1703_v0 = vshll.u32 %v1580_v54, 16  ;;  %v1707_v1 = vshrl.u32 %v1580_v54, 16  ;;  %v9298_v6 = vld [vmem:[#allocation2 + $0x34] sm:$0xf] }
  0x74   : > { %v1713_v3 = vshll.u32 %v1608_v56, 16  ;;  %v9296_v4 = vcombine.low %v1579_v43, %v1580_v54  ;;  %v995_v8 = vld [vmem:[#allocation2 + $0x38] sm:$0x1]  ;;  %v1107_v9 = vshrl.u32 %v9284_v44, 16  ;;  %v1110_v12 = vshll.u32 %v9284_v44, 16 }
  0x75   : > { %v1696_v48 = vrot.slane %v1694_v57, 4  ;;  %v1699_v7 = vrot.slane %v1697_v58, 5  ;;  %v1705_v15 = vrot.slane %v1703_v0, 5  ;;  %v1709_v61 = vrot.slane %v1707_v1, 4 }
  0x76   : > { %11688 = vst [vmem:[#allocation10_spill] sm:$0xff] %v9296_v4  ;;  %v1715_v52 = vrot.slane %v1713_v3, 5  ;;  %v1116_v16 = vshll.u32 %v9298_v6, 16  ;;  %v1109_v13 = vrot.slane %v1107_v9, 4  ;;  %v1112_v62 = vrot.slane %v1110_v12, 5  ;;  %v8363_v9 = vld [vmem:[%s11601_s3 + $0x1f0] sm:$0xff]  }
  0x77   : > { %v1700_v17 = vor.u32 %v1699_v7, %v1696_v48  ;;  %v1120_v10 = vshrl.u32 %v9298_v6, 16  ;;  %v1581_v18 = vld [vmem:[#allocation2 + $0x3c] sm:$0xf]  ;;  %v1710_v63 = vor.u32 %v1709_v61, %v1705_v15  ;;  %v1126_v22 = vshll.u32 %v995_v8, 16  ;;  %v1582_v25 = vld [vmem:[#allocation2 + $0x40] sm:$0xf]  ;;  %7708 = vmatprep.subr.bf16.mxu1 %v8363_v9 }
  0x78   : > { %v1118_v20 = vrot.slane %v1116_v16, 5  ;;  %v6684_v23 = vcombine.low %v9284_v44, %v9298_v6  ;;  %v1113_v11 = vor.u32 %v1112_v62, %v1109_v13  ;;  %v1609_v28 = vld [vmem:[#allocation2 + $0x44] sm:$0x1]  ;;  %v1718_v30 = vshrl.u32 %v1581_v18, 16  ;;  %v9306_v56 = vld [vmem:[#allocation2 + $0x3c] sm:$0xf] }
  0x79   : > { %v1701_v55 = vrot.slane %v1700_v17, 4  ;;  %v1122_v27 = vrot.slane %v1120_v10, 4  ;;  %v1711_v31 = vrot.slane %v1710_v63, 4  ;;  %v1128_v42 = vrot.slane %v1126_v22, 5  ;;  %v9310_v3 = vld [vmem:[#allocation2 + $0x40] sm:$0xf] }
  0x7a   : > { %v1721_v43 = vshll.u32 %v1581_v18, 16  ;;  %v1727_v54 = vshll.u32 %v1582_v25, 16  ;;  %v1114_v58 = vrot.slane %v1113_v11, 4  ;;  %v1720_v1 = vrot.slane %v1718_v30, 4  ;;  %v8362_v8 = vld [vmem:[%s11601_s3 + $0x170] sm:$0xff]  }
  0x7b   : > { %v1706_v57 = vsel %vm9012_vm2, %v1701_v55, %v1705_v15  ;;  %v1123_v0 = vor.u32 %v1122_v27, %v1118_v20  ;;  %v1716_v44 = vsel %vm9012_vm2, %v1711_v31, %v1715_v52  ;;  %v1731_v7 = vshrl.u32 %v1582_v25, 16  ;;  %v8365_v52 = vld [vmem:[%s11601_s3 + $0x130] sm:$0xff]   ;;  %v996_v63 = vld [vmem:[#allocation2 + $0x44] sm:$0x1]  ;;  %7596 = vmatprep.subr.bf16.mxu0 %v8362_v8 }
  0x7c   : > { %v1723_v6 = vrot.slane %v1721_v43, 5  ;;  %v1729_v48 = vrot.slane %v1727_v54, 5  ;;  %v9320_v12 = vcombine.low %v1706_v57, %v1716_v44  ;;  %v1119_v15 = vsel %vm9012_vm2, %v1114_v58, %v1118_v20  ;;  %v8366_v17 = vld [vmem:[%s11601_s3 + $0x1b0] sm:$0xff]   ;;  %7597 = vmatpush3.bf16.msra.mxu0 %v8365_v52  ;;  %v882_v58 = vld [vmem:[#allocation2 + $0x48] sm:$0xf] }
  0x7d   : > { %v1124_v61 = vrot.slane %v1123_v0, 4  ;;  %v1737_v16 = vshll.u32 %v1609_v28, 16  ;;  %v1733_v62 = vrot.slane %v1731_v7, 4  ;;  %v9330_v10 = vcombine.low %v1581_v18, %v1582_v25  ;;  %7709 = vmatpush3.bf16.msra.mxu1 %v8366_v17  ;;  %v886_v52 = vld [vmem:[#allocation2 + $0x50] sm:$0x1] }
  0x7e   : > { %v1724_v13 = vor.u32 %v1723_v6, %v1720_v1  ;;  %v1131_v22 = vshrl.u32 %v9306_v56, 16  ;;  %3551 = vmatprep.mubr.bf16.mxu1 %v9320_v12  ;;  %v1134_v11 = vshll.u32 %v9306_v56, 16  ;;  %v1140_v27 = vshll.u32 %v9310_v3, 16 }
  0x7f   : > { %11689 = vst [vmem:[#allocation11_spill] sm:$0xff] %v9330_v10  ;;  %v1129_v20 = vsel %vm9012_vm2, %v1124_v61, %v1128_v42  ;;  %v1739_v55 = vrot.slane %v1737_v16, 5  ;;  %3552 = vmatmul.mubr.bf16.gmra.mrb[12].mxu1 %v9296_v4  ;;  %v1734_v28 = vor.u32 %v1733_v62, %v1729_v48  ;;  %v1144_v54 = vshrl.u32 %v9310_v3, 16 }
  0x80   : > { %v9339_v18 = vcombine.low %v1119_v15, %v1129_v20  ;;  %v1725_v25 = vrot.slane %v1724_v13, 4  ;;  %v1133_v30 = vrot.slane %v1131_v22, 4  ;;  %v1136_v31 = vrot.slane %v1134_v11, 5  ;;  %v889_v11 = vld [vmem:[#allocation2 + $0x54] sm:$0xf] }
  0x81   : > { %v1142_v43 = vrot.slane %v1140_v27, 5  ;;  %v1150_v57 = vshll.u32 %v996_v63, 16  ;;  %v1735_v0 = vrot.slane %v1734_v28, 4  ;;  %v6685_v1 = vcombine.low %v9306_v56, %v9310_v3 }
  0x82   : > { %3398 = vmatprep.mubr.bf16.mxu0 %v9339_v18  ;;  %v1730_v42 = vsel %vm9012_vm2, %v1725_v25, %v1729_v48  ;;  %v609_v44 = vrot.slane %v607_v36, 7  ;;  %v1137_v6 = vor.u32 %v1136_v31, %v1133_v30  ;;  %v1146_v7 = vrot.slane %v1144_v54, 4  ;;  %v9390_v30 = vld [vmem:[%s8988_s30 + $0x48] sm:$0xff]  }
  0x83   : > { %3399 = vmatmul.mubr.bf16.gmra.mrb[16].mxu0 %v6684_v23  ;;  %v1152_v8 = vrot.slane %v1150_v57, 5  ;;  %v617_v9 = vrot.slane %v615_v46, 7  ;;  %v1740_v15 = vsel %vm9012_vm2, %v1735_v0, %v1739_v55  ;;  %v402_v16 = vmax.f32 %v9276_v34, 0.0 }
  0x84   : > { %v612_v48 = vor.u32 %v610_v37, %v609_v44  ;;  %v613_v61 = vrot.slane %v609_v44, 4  ;;  %v9356_v56 = vcombine.low %v1730_v42, %v1740_v15  ;;  %v1138_v3 = vrot.slane %v1137_v6, 4 }
  0x85   : > { %v1147_v36 = vor.u32 %v1146_v7, %v1142_v43  ;;  %v620_v23 = vor.u32 %v618_v47, %v617_v9  ;;  %v622_v17 = vrot.slane %v617_v9, 4  ;;  %v403_v13 = vmax.f32 %v9281_v41, 0.0 }
  0x86   : > { %v883_v46 = vsel %vm9052_vm9, %v612_v48, %v882_v58  ;;  %v7259_v62 = vpack.c.bf16 %v402_v16, %v402_v16  ;;  %3559 = vmatprep.mubr.bf16.mxu1 %v9356_v56  ;;  %v1143_v26 = vsel %vm9012_vm2, %v1138_v3, %v1142_v43  ;;  %v373_v41 = vadd.f32 %v9371_v32, %v9289_v49  ;;  %v9384_v49 = vld [vmem:[%s11599_s1] ss:$0 sm:$0xff] }
  0x87   : > { %v1148_v34 = vrot.slane %v1147_v36, 4  ;;  %v621_v37 = vsel %vm9044_vm8, %v613_v61, %v620_v23  ;;  %884 = vst [vmem:[#allocation2 + $0x48] sm:$0xf] %v883_v46  ;;  %3560 = vmatmul.mubr.bf16.gmra.mrb[16].mxu1 %v9330_v10  ;;  %v887_v47 = vsel %vm9061_vm10, %v622_v17, %v886_v52  ;;  %v7260_v63 = vpack.c.bf16 %v403_v13, %v403_v13 }
  0x88   : > { %885 = vst [vmem:[#allocation2 + $0x4c] sm:$0xf] %v621_v37  ;;  %v624_v22 = vshrl.u32 %v7259_v62, 16  ;;  %v627_v20 = vshll.u32 %v7259_v62, 16  ;;  %888 = vst [vmem:[#allocation2 + $0x50] sm:$0x1] %v887_v47  ;;  %v335_v28 = vmul.f32 %v9384_v49, %v7315_v50  ;;  %v336_v42 = vmul.f32 %v9384_v49, %v7316_v60 }
  0x89   : > { %v1153_v55 = vsel %vm9012_vm2, %v1148_v34, %v1152_v8  ;;  %v404_v27 = vmax.f32 %v9293_v59, 0.0  ;;  %v405_v25 = vmax.f32 %v373_v41, 0.0  ;;  %v632_v54 = vshrl.u32 %v7260_v63, 16 }
  0x8a   : > { %v9392_v31 = vcombine.low %v1143_v26, %v1153_v55  ;;  %v626_v43 = vrot.slane %v624_v22, 7  ;;  %v635_v57 = vshll.u32 %v7260_v63, 16  ;;  %v9402_v0 = vadd.f32 %v9371_v32, %v335_v28  ;;  %v893_v63 = vld [vmem:[#allocation2 + $0x5c] sm:$0x1] }
  0x8b   : > { %v9394_v58 = vpack.c.bf16 %v404_v27, %v404_v27  ;;  %v9396_v59 = vpack.c.bf16 %v405_v25, %v405_v25  ;;  %v634_v6 = vrot.slane %v632_v54, 7  ;;  %v7319_v7 = vunpack.c.l.bf16 %v9390_v30 }
  0x8c   : > { %3406 = vmatprep.mubr.bf16.mxu0 %v9392_v31  ;;  %v629_v50 = vor.u32 %v627_v20, %v626_v43  ;;  %v630_v44 = vrot.slane %v626_v43, 4  ;;  %v9415_v36 = vadd.f32 %v9371_v32, %v336_v42  ;;  %v7320_v46 = vunpack.c.h.bf16 %v9390_v30 }
  0x8d   : > { %3407 = vmatmul.mubr.bf16.gmra.mrb[20].mxu0 %v6685_v1  ;;  %v641_v8 = vshrl.u32 %v9394_v58, 16  ;;  %v644_v9 = vshll.u32 %v9394_v58, 16  ;;  %v649_v15 = vshrl.u32 %v9396_v59, 16  ;;  %v652_v21 = vshll.u32 %v9396_v59, 16 }
  0x8e   : > { %v1583_v60 = vld [vmem:[#allocation2 + $0x48] sm:$0xf]  ;;  %v637_v61 = vor.u32 %v635_v57, %v634_v6  ;;  %v639_v16 = vrot.slane %v634_v6, 4  ;;  %v890_v3 = vsel %vm9052_vm9, %v629_v50, %v889_v11  ;;  %v9421_v13 = vmul.f32 %v9384_v49, %v7319_v7 }
  0x8f   : > { %v9410_v48 = vld [vmem:[#allocation2 + $0x48] sm:$0xf]  ;;  %v1584_v1 = vld [vmem:[#allocation2 + $0x4c] sm:$0xf]  ;;  %v1742_v23 = vshrl.u32 %v1583_v60, 16  ;;  %v1745_v52 = vshll.u32 %v1583_v60, 16 }
  0x90   : > { %v9417_v17 = vld [vmem:[#allocation2 + $0x4c] sm:$0xf]  ;;  %891 = vst [vmem:[#allocation2 + $0x54] sm:$0xf] %v890_v3  ;;  %v1610_v62 = vld [vmem:[#allocation2 + $0x50] sm:$0x1]  ;;  %v9423_v37 = vcombine.low %v1583_v60, %v1584_v1 }
  0x91   : > { %v1751_v26 = vshll.u32 %v1584_v1, 16  ;;  %v1755_v34 = vshrl.u32 %v1584_v1, 16  ;;  %v997_v41 = vld [vmem:[#allocation2 + $0x50] sm:$0x1]  ;;  %v6686_v47 = vcombine.low %v9410_v48, %v9417_v17  ;;  %v1744_v22 = vrot.slane %v1742_v23, 4 }
  0x92   : > { %11690 = vst [vmem:[#allocation12_spill] sm:$0xff] %v9423_v37  ;;  %v1747_v20 = vrot.slane %v1745_v52, 5  ;;  %v1761_v55 = vshll.u32 %v1610_v62, 16  ;;  %v1155_v11 = vshrl.u32 %v9410_v48, 16  ;;  %v1158_v28 = vshll.u32 %v9410_v48, 16 }
  0x93   : > { %v1753_v27 = vrot.slane %v1751_v26, 5  ;;  %v1757_v25 = vrot.slane %v1755_v34, 4  ;;  %v1164_v30 = vshll.u32 %v9417_v17, 16  ;;  %v1168_v42 = vshrl.u32 %v9417_v17, 16 }
  0x94   : > { %v1748_v43 = vor.u32 %v1747_v20, %v1744_v22  ;;  %v1763_v54 = vrot.slane %v1761_v55, 5  ;;  %v1157_v57 = vrot.slane %v1155_v11, 4  ;;  %v1160_v6 = vrot.slane %v1158_v28, 5 }
  0x95   : > { %v1758_v50 = vor.u32 %v1757_v25, %v1753_v27  ;;  %v1166_v7 = vrot.slane %v1164_v30, 5  ;;  %v1174_v60 = vshll.u32 %v997_v41, 16  ;;  %v1170_v1 = vrot.slane %v1168_v42, 4 }
  0x96   : > { %v1749_v3 = vrot.slane %v1748_v43, 4  ;;  %v638_v23 = vsel %vm9044_vm8, %v630_v44, %v637_v61  ;;  %v894_v52 = vsel %vm9061_vm10, %v639_v16, %v893_v63  ;;  %v1161_v26 = vor.u32 %v1160_v6, %v1157_v57 }
  0x97   : > { %v1759_v62 = vrot.slane %v1758_v50, 4  ;;  %v1176_v34 = vrot.slane %v1174_v60, 5  ;;  %892 = vst [vmem:[#allocation2 + $0x58] sm:$0xf] %v638_v23  ;;  %895 = vst [vmem:[#allocation2 + $0x5c] sm:$0x1] %v894_v52  ;;  %v9438_v55 = vmul.f32 %v9384_v49, %v7320_v46  ;;  %v1171_v11 = vor.u32 %v1170_v1, %v1166_v7 }
  0x98   : > { %v1585_v22 = vld [vmem:[#allocation2 + $0x54] sm:$0xf]  ;;  %v1754_v41 = vsel %vm9012_vm2, %v1749_v3, %v1753_v27  ;;  %v1162_v16 = vrot.slane %v1161_v26, 4  ;;  %v643_v6 = vrot.slane %v641_v8, 7  ;;  %v651_v3 = vrot.slane %v649_v15, 7  ;;  %v8371_v23 = vld [vmem:[%s11601_s3 + $0x1f8] sm:$0xff]  }
  0x99   : > { %v9435_v20 = vld [vmem:[#allocation2 + $0x54] sm:$0xf]  ;;  %v1766_v25 = vshrl.u32 %v1585_v22, 16  ;;  %v1769_v44 = vshll.u32 %v1585_v22, 16  ;;  %v1764_v61 = vsel %vm9012_vm2, %v1759_v62, %v1763_v54  ;;  %v1172_v43 = vrot.slane %v1171_v11, 4  ;;  %7710 = vmatprep.subr.bf16.mxu1 %v8371_v23 }
  0x9a   : > { %v1179_v63 = vshrl.u32 %v9435_v20, 16  ;;  %v1182_v28 = vshll.u32 %v9435_v20, 16  ;;  %v9446_v30 = vcombine.low %v1754_v41, %v1764_v61  ;;  %v1167_v42 = vsel %vm9012_vm2, %v1162_v16, %v1166_v7  ;;  %v8370_v7 = vld [vmem:[%s11601_s3 + $0x178] sm:$0xff]   ;;  %v896_v15 = vld [vmem:[#allocation2 + $0x60] sm:$0xf]  ;;  %v7354_v23 = vld [vmem:[%s8988_s30 + $0x50] sm:$0xff]  }
  0x9b   : > { %v1768_v57 = vrot.slane %v1766_v25, 4  ;;  %v1771_v46 = vrot.slane %v1769_v44, 5  ;;  %v1177_v54 = vsel %vm9012_vm2, %v1172_v43, %v1176_v34  ;;  %v406_v1 = vmax.f32 %v9402_v0, 0.0  ;;  %v8373_v0 = vld [vmem:[%s11601_s3 + $0x138] sm:$0xff]   ;;  %v900_v16 = vld [vmem:[#allocation2 + $0x68] sm:$0x1]  ;;  %7598 = vmatprep.subr.bf16.mxu0 %v8370_v7 }
  0x9c   : > { %11691 = vst [vmem:[#allocation13_spill] sm:$0xff] %v9446_v30  ;;  %v1181_v27 = vrot.slane %v1179_v63, 4  ;;  %v1184_v50 = vrot.slane %v1182_v28, 5  ;;  %3567 = vmatprep.mubr.bf16.mxu1 %v9446_v30  ;;  %v9465_v8 = vcombine.low %v1167_v42, %v1177_v54  ;;  %v646_v62 = vor.u32 %v644_v9, %v643_v6  ;;  %v8374_v34 = vld [vmem:[%s11601_s3 + $0x1b8] sm:$0xff]   ;;  %7599 = vmatpush3.bf16.msra.mxu0 %v8373_v0 }
  0x9d   : > { %v1772_v60 = vor.u32 %v1771_v46, %v1768_v57  ;;  %3568 = vmatmul.mubr.bf16.gmra.mrb[20].mxu1 %v9423_v37  ;;  %v647_v26 = vrot.slane %v643_v6, 4  ;;  %v654_v44 = vor.u32 %v652_v21, %v651_v3  ;;  %v656_v61 = vrot.slane %v651_v3, 4 }
  0x9e   : > { %v1185_v52 = vor.u32 %v1184_v50, %v1181_v27  ;;  %v1586_v41 = vld [vmem:[#allocation2 + $0x58] sm:$0xf]  ;;  %v1611_v11 = vld [vmem:[#allocation2 + $0x5c] sm:$0x1]  ;;  %v7263_v58 = vpack.c.bf16 %v406_v1, %v406_v1  ;;  %3414 = vmatprep.mubr.bf16.mxu0 %v9465_v8  ;;  %7711 = vmatpush3.bf16.msra.mxu1 %v8374_v34  ;;  %v897_v17 = vsel %vm9052_vm9, %v646_v62, %v896_v15 }
  0x9f   : > { %v1773_v25 = vrot.slane %v1772_v60, 4  ;;  %v1775_v9 = vshll.u32 %v1586_v41, 16  ;;  %v1779_v63 = vshrl.u32 %v1586_v41, 16  ;;  %v1785_v28 = vshll.u32 %v1611_v11, 16  ;;  %v9480_v57 = vld [vmem:[#allocation2 + $0x58] sm:$0xf]  ;;  %3415 = vmatmul.mubr.bf16.gmra.mrb[24].mxu0 %v6686_v47 }
  0xa0   : > { %v9478_v43 = vcombine.low %v1585_v22, %v1586_v41  ;;  %v998_v59 = vld [vmem:[#allocation2 + $0x5c] sm:$0x1]  ;;  %v1186_v21 = vrot.slane %v1185_v52, 4  ;;  %v1188_v46 = vshll.u32 %v9480_v57, 16  ;;  %v1192_v42 = vshrl.u32 %v9480_v57, 16 }
  0xa1   : > { %v6687_v27 = vcombine.low %v9435_v20, %v9480_v57  ;;  %v1777_v22 = vrot.slane %v1775_v9, 5  ;;  %v1781_v50 = vrot.slane %v1779_v63, 4  ;;  %v1787_v6 = vrot.slane %v1785_v28, 5  ;;  %898 = vst [vmem:[#allocation2 + $0x60] sm:$0xf] %v897_v17 }
  0xa2   : > { %11692 = vst [vmem:[#allocation14_spill] sm:$0xff] %v9478_v43  ;;  %v1198_v54 = vshll.u32 %v998_v59, 16  ;;  %v1190_v60 = vrot.slane %v1188_v46, 5  ;;  %v1194_v3 = vrot.slane %v1192_v42, 4  ;;  %v655_v48 = vsel %vm9044_vm8, %v647_v26, %v654_v44  ;;  %v903_v41 = vld [vmem:[#allocation2 + $0x6c] sm:$0xf] }
  0xa3   : > { %v1778_v47 = vsel %vm9012_vm2, %v1773_v25, %v1777_v22  ;;  %v1782_v1 = vor.u32 %v1781_v50, %v1777_v22  ;;  %899 = vst [vmem:[#allocation2 + $0x64] sm:$0xf] %v655_v48  ;;  %v901_v20 = vsel %vm9061_vm10, %v656_v61, %v900_v16  ;;  %v407_v26 = vmax.f32 %v9415_v36, 0.0 }
  0xa4   : > { %v1200_v7 = vrot.slane %v1198_v54, 5  ;;  %v1191_v52 = vsel %vm9012_vm2, %v1186_v21, %v1190_v60  ;;  %v1195_v0 = vor.u32 %v1194_v3, %v1190_v60  ;;  %902 = vst [vmem:[#allocation2 + $0x68] sm:$0x1] %v901_v20  ;;  %v658_v34 = vshrl.u32 %v7263_v58, 16 }
  0xa5   : > { %v1783_v62 = vrot.slane %v1782_v1, 4  ;;  %v661_v15 = vshll.u32 %v7263_v58, 16  ;;  %v376_v11 = vadd.f32 %v9371_v32, %v9421_v13  ;;  %v377_v25 = vadd.f32 %v9371_v32, %v9438_v55 }
  0xa6   : > { %v1196_v44 = vrot.slane %v1195_v0, 4  ;;  %v7264_v61 = vpack.c.bf16 %v407_v26, %v407_v26  ;;  %v9505_v16 = vrot.slane %v658_v34, 7  ;;  %v7323_v9 = vunpack.c.l.bf16 %v7354_v23 }
  0xa7   : > { %v1788_v63 = vsel %vm9012_vm2, %v1783_v62, %v1787_v6  ;;  %v408_v28 = vmax.f32 %v376_v11, 0.0  ;;  %v409_v36 = vmax.f32 %v377_v25, 0.0  ;;  %v7324_v57 = vunpack.c.h.bf16 %v7354_v23 }
  0xa8   : > { %v9509_v59 = vcombine.low %v1778_v47, %v1788_v63  ;;  %v1201_v58 = vsel %vm9012_vm2, %v1196_v44, %v1200_v7  ;;  %v663_v13 = vor.u32 %v661_v15, %v9505_v16  ;;  %v666_v46 = vshrl.u32 %v7264_v61, 16  ;;  %v1587_v50 = vld [vmem:[#allocation2 + $0x60] sm:$0xf] }
  0xa9   : > { %v9515_v21 = vcombine.low %v1191_v52, %v1201_v58  ;;  %v669_v42 = vshll.u32 %v7264_v61, 16  ;;  %v9517_v22 = vpack.c.bf16 %v408_v28, %v408_v28  ;;  %v9520_v54 = vld [vmem:[#allocation2 + $0x60] sm:$0xf]  ;;  %v9524_v3 = vpack.c.bf16 %v409_v36, %v409_v36 }
  0xaa   : > { %3575 = vmatprep.mubr.bf16.mxu1 %v9509_v59  ;;  %v1588_v6 = vld [vmem:[#allocation2 + $0x64] sm:$0xf]  ;;  %v904_v60 = vsel %vm9052_vm9, %v663_v13, %v903_v41  ;;  %v339_v48 = vmul.f32 %v9384_v49, %v7323_v9  ;;  %v9528_v17 = vmul.f32 %v9384_v49, %v7324_v57  ;;  %v1790_v1 = vshrl.u32 %v1587_v50, 16 }
  0xab   : > { %3576 = vmatmul.mubr.bf16.gmra.mrb[24].mxu1 %v9478_v43  ;;  %3422 = vmatprep.mubr.bf16.mxu0 %v9515_v21  ;;  %v1612_v47 = vld [vmem:[#allocation2 + $0x68] sm:$0x1]  ;;  %v1793_v7 = vshll.u32 %v1587_v50, 16  ;;  %v1799_v20 = vshll.u32 %v1588_v6, 16  ;;  %v1803_v23 = vshrl.u32 %v1588_v6, 16  ;;  %v9532_v0 = vcombine.low %v1587_v50, %v1588_v6 }
  0xac   : > { %905 = vst [vmem:[#allocation2 + $0x6c] sm:$0xf] %v904_v60  ;;  %3423 = vmatmul.mubr.bf16.gmra.mrb[28].mxu0 %v6687_v27  ;;  %v1809_v52 = vshll.u32 %v1612_v47, 16  ;;  %v9534_v26 = vld [vmem:[#allocation2 + $0x64] sm:$0xf]  ;;  %v1203_v62 = vshrl.u32 %v9520_v54, 16  ;;  %v9538_v15 = vadd.f32 %v9371_v32, %v339_v48 }
  0xad   : > { %11693 = vst [vmem:[#allocation15_spill] sm:$0xff] %v9532_v0  ;;  %v999_v34 = vld [vmem:[#allocation2 + $0x68] sm:$0x1]  ;;  %v1792_v41 = vrot.slane %v1790_v1, 4  ;;  %v1795_v11 = vrot.slane %v1793_v7, 5  ;;  %v1801_v25 = vrot.slane %v1799_v20, 5  ;;  %v6688_v6 = vcombine.low %v9520_v54, %v9534_v26 }
  0xae   : > { %v1805_v44 = vrot.slane %v1803_v23, 4  ;;  %v1811_v61 = vrot.slane %v1809_v52, 5  ;;  %v1205_v9 = vrot.slane %v1203_v62, 4  ;;  %v1206_v63 = vshll.u32 %v9520_v54, 16  ;;  %v907_v48 = vld [vmem:[#allocation2 + $0x74] sm:$0x1] }
  0xaf   : > { %v1212_v27 = vshll.u32 %v9534_v26, 16  ;;  %v1796_v28 = vor.u32 %v1795_v11, %v1792_v41  ;;  %v1216_v57 = vshrl.u32 %v9534_v26, 16  ;;  %v1222_v58 = vshll.u32 %v999_v34, 16 }
  0xb0   : > { %v1806_v36 = vor.u32 %v1805_v44, %v1801_v25  ;;  %v1208_v13 = vrot.slane %v1206_v63, 5  ;;  %v668_v60 = vrot.slane %v666_v46, 7  ;;  %v675_v34 = vshrl.u32 %v9517_v22, 16  ;;  %v8378_v44 = vld [vmem:[%s11601_s3 + $0x2c0] sm:$0xff]  }
  0xb1   : > { %v1214_v50 = vrot.slane %v1212_v27, 5  ;;  %v1797_v47 = vrot.slane %v1796_v28, 4  ;;  %v1218_v7 = vrot.slane %v1216_v57, 4  ;;  %v1224_v20 = vrot.slane %v1222_v58, 5  ;;  %7920 = vmatprep.subr.bf16.mxu1 %v8378_v44 }
  0xb2   : > { %v1807_v1 = vrot.slane %v1806_v36, 4  ;;  %v1209_v23 = vor.u32 %v1208_v13, %v1205_v9  ;;  %v671_v52 = vor.u32 %v669_v42, %v668_v60  ;;  %v673_v62 = vrot.slane %v668_v60, 4  ;;  %v8377_v42 = vld [vmem:[%s11601_s3 + $0x240] sm:$0xff]   ;;  %v910_v13 = vld [vmem:[#allocation2 + $0x78] sm:$0xf] }
  0xb3   : > { %v9545_v55 = vld [vmem:[#allocation2 + $0x6c] sm:$0xf]  ;;  %v1802_v11 = vsel %vm9012_vm2, %v1797_v47, %v1801_v25  ;;  %v1219_v54 = vor.u32 %v1218_v7, %v1214_v50  ;;  %v11695_v27 = vrot.slane %v9505_v16, 4  ;;  %7808 = vmatprep.subr.bf16.mxu0 %v8377_v42  ;;  %v678_v47 = vshll.u32 %v9517_v22, 16 }
  0xb4   : > { %v9547_v41 = vld [vmem:[#allocation2 + $0x6c] sm:$0xf]  ;;  %v1812_v46 = vsel %vm9012_vm2, %v1807_v1, %v1811_v61  ;;  %v1814_v26 = vshrl.u32 %v9545_v55, 16  ;;  %v1210_v63 = vrot.slane %v1209_v23, 4  ;;  %v908_v61 = vsel %vm9061_vm10, %v673_v62, %v907_v48  ;;  %v9581_v62 = vld [vmem:[%s8988_s30 + $0x58] sm:$0xff]  }
  0xb5   : > { %v9561_v9 = vcombine.low %v1802_v11, %v1812_v46  ;;  %v672_v25 = vsel %vm9044_vm8, %v11695_v27, %v671_v52  ;;  %v1220_v28 = vrot.slane %v1219_v54, 4  ;;  %909 = vst [vmem:[#allocation2 + $0x74] sm:$0x1] %v908_v61  ;;  %v1817_v57 = vshll.u32 %v9545_v55, 16 }
  0xb6   : > { %906 = vst [vmem:[#allocation2 + $0x70] sm:$0xf] %v672_v25  ;;  %v1816_v36 = vrot.slane %v1814_v26, 4  ;;  %v1227_v58 = vshrl.u32 %v9547_v41, 16  ;;  %v1215_v16 = vsel %vm9012_vm2, %v1210_v63, %v1214_v50  ;;  %v1230_v60 = vshll.u32 %v9547_v41, 16  ;;  %v9586_v26 = vld [vmem:[%s8988_s30 + $0x60] sm:$0xff]  }
  0xb7   : > { %11694 = vst [vmem:[#allocation16_spill] sm:$0xff] %v9561_v9  ;;  %3583 = vmatprep.mubr.bf16.mxu1 %v9561_v9  ;;  %v677_v48 = vrot.slane %v675_v34, 7  ;;  %v1225_v1 = vsel %vm9012_vm2, %v1220_v28, %v1224_v20  ;;  %v1819_v7 = vrot.slane %v1817_v57, 5  ;;  %v683_v52 = vshrl.u32 %v9524_v3, 16  ;;  %v8739_v9 = vld [vmem:[#allocation2 + $0x50] sm:$0x1] }
  0xb8   : > { %3584 = vmatmul.mubr.bf16.gmra.mrb[28].mxu1 %v9532_v0  ;;  %v1229_v23 = vrot.slane %v1227_v58, 4  ;;  %v9583_v11 = vcombine.low %v1215_v16, %v1225_v1  ;;  %v1232_v46 = vrot.slane %v1230_v60, 5  ;;  %v686_v42 = vshll.u32 %v9524_v3, 16 }
  0xb9   : > { %v680_v50 = vor.u32 %v678_v47, %v677_v48  ;;  %v681_v54 = vrot.slane %v677_v48, 4  ;;  %v1820_v34 = vor.u32 %v1819_v7, %v1816_v36  ;;  %v685_v22 = vrot.slane %v683_v52, 7 }
  0xba   : > { %v379_v20 = vadd.f32 %v9371_v32, %v9528_v17  ;;  %3430 = vmatprep.mubr.bf16.mxu0 %v9583_v11  ;;  %v1233_v44 = vor.u32 %v1232_v46, %v1229_v23  ;;  %v410_v27 = vmax.f32 %v9538_v15, 0.0  ;;  %v7327_v25 = vunpack.c.l.bf16 %v9581_v62  ;;  %v914_v17 = vld [vmem:[#allocation2 + $0x80] sm:$0x1] }
  0xbb   : > { %v911_v63 = vsel %vm9052_vm9, %v680_v50, %v910_v13  ;;  %3431 = vmatmul.mubr.bf16.gmra.mrb[32].mxu0 %v6688_v6  ;;  %v1821_v61 = vrot.slane %v1820_v34, 4  ;;  %v688_v28 = vor.u32 %v686_v42, %v685_v22  ;;  %v690_v36 = vrot.slane %v685_v22, 4 }
  0xbc   : > { %912 = vst [vmem:[#allocation2 + $0x78] sm:$0xf] %v911_v63  ;;  %v411_v57 = vmax.f32 %v379_v20, 0.0  ;;  %v1613_v58 = vld [vmem:[#allocation2 + $0x74] sm:$0x1]  ;;  %v7267_v60 = vpack.c.bf16 %v410_v27, %v410_v27  ;;  %v7328_v48 = vunpack.c.h.bf16 %v9581_v62  ;;  %v9600_v13 = vmul.f32 %v9384_v49, %v7327_v25 }
  0xbd   : > { %v1590_v3 = vld [vmem:[#allocation2 + $0x70] sm:$0xf]  ;;  %v1833_v1 = vshll.u32 %v1613_v58, 16  ;;  %v1000_v23 = vld [vmem:[#allocation2 + $0x74] sm:$0x1]  ;;  %v1234_v52 = vrot.slane %v1233_v44, 4  ;;  %v915_v58 = vsel %vm9061_vm10, %v690_v36, %v914_v17 }
  0xbe   : > { %v9596_v16 = vld [vmem:[#allocation2 + $0x70] sm:$0xf]  ;;  %v1823_v47 = vshll.u32 %v1590_v3, 16  ;;  %v1827_v6 = vshrl.u32 %v1590_v3, 16  ;;  %v9604_v7 = vcombine.low %v9545_v55, %v1590_v3  ;;  %v1246_v34 = vshll.u32 %v1000_v23, 16 }
  0xbf   : > { %v1236_v46 = vshll.u32 %v9596_v16, 16  ;;  %v1240_v50 = vshrl.u32 %v9596_v16, 16  ;;  %v1835_v42 = vrot.slane %v1833_v1, 5  ;;  %v6689_v20 = vcombine.low %v9547_v41, %v9596_v16  ;;  %916 = vst [vmem:[#allocation2 + $0x80] sm:$0x1] %v915_v58 }
  0xc0   : > { %11696 = vst [vmem:[#allocation17_spill] sm:$0xff] %v9604_v7  ;;  %v1825_v22 = vrot.slane %v1823_v47, 5  ;;  %v1829_v62 = vrot.slane %v1827_v6, 4  ;;  %v1248_v25 = vrot.slane %v1246_v34, 5  ;;  %v689_v55 = vsel %vm9044_vm8, %v681_v54, %v688_v28  ;;  %v917_v17 = vld [vmem:[#allocation2 + $0x84] sm:$0xf] }
  0xc1   : > { %v1238_v63 = vrot.slane %v1236_v46, 5  ;;  %v1242_v27 = vrot.slane %v1240_v50, 4  ;;  %913 = vst [vmem:[#allocation2 + $0x7c] sm:$0xf] %v689_v55  ;;  %v7268_v47 = vpack.c.bf16 %v411_v57, %v411_v57  ;;  %v692_v23 = vshrl.u32 %v7267_v60, 16 }
  0xc2   : > { %v1826_v44 = vsel %vm9012_vm2, %v1821_v61, %v1825_v22  ;;  %v1830_v3 = vor.u32 %v1829_v62, %v1825_v22  ;;  %v695_v46 = vshll.u32 %v7267_v60, 16 }
  0xc3   : > { %v1239_v6 = vsel %vm9012_vm2, %v1234_v52, %v1238_v63  ;;  %v1243_v1 = vor.u32 %v1242_v27, %v1238_v63  ;;  %v1591_v41 = vld [vmem:[#allocation2 + $0x78] sm:$0xf]  ;;  %v694_v36 = vrot.slane %v692_v23, 7  ;;  %v700_v57 = vshrl.u32 %v7268_v47, 16 }
  0xc4   : > { %v9618_v16 = vld [vmem:[#allocation2 + $0x78] sm:$0xf]  ;;  %v1831_v54 = vrot.slane %v1830_v3, 4  ;;  %v1838_v28 = vshrl.u32 %v1591_v41, 16  ;;  %v1841_v50 = vshll.u32 %v1591_v41, 16 }
  0xc5   : > { %v1251_v61 = vshrl.u32 %v9618_v16, 16  ;;  %v1244_v34 = vrot.slane %v1243_v1, 4  ;;  %v1254_v22 = vshll.u32 %v9618_v16, 16  ;;  %v697_v58 = vor.u32 %v695_v46, %v694_v36 }
  0xc6   : > { %v1836_v52 = vsel %vm9012_vm2, %v1831_v54, %v1835_v42  ;;  %v1840_v62 = vrot.slane %v1838_v28, 4  ;;  %v1843_v63 = vrot.slane %v1841_v50, 5  ;;  %v698_v0 = vrot.slane %v694_v36, 4 }
  0xc7   : > { %v1253_v27 = vrot.slane %v1251_v61, 4  ;;  %v9624_v55 = vcombine.low %v1826_v44, %v1836_v52  ;;  %v1249_v60 = vsel %vm9012_vm2, %v1244_v34, %v1248_v25  ;;  %v1256_v3 = vrot.slane %v1254_v22, 5  ;;  %v1614_v25 = vld [vmem:[#allocation2 + $0x80] sm:$0x1] }
  0xc8   : > { %v9628_v15 = vcombine.low %v1239_v6, %v1249_v60  ;;  %v1844_v1 = vor.u32 %v1843_v63, %v1840_v62  ;;  %v702_v23 = vrot.slane %v700_v57, 7  ;;  %v1592_v43 = vld [vmem:[#allocation2 + $0x7c] sm:$0xf]  ;;  %v703_v54 = vshll.u32 %v7268_v47, 16  ;;  %v1001_v22 = vld [vmem:[#allocation2 + $0x80] sm:$0x1] }
  0xc9   : > { %11697 = vst [vmem:[#allocation18_spill] sm:$0xff] %v9624_v55  ;;  %3591 = vmatprep.mubr.bf16.mxu1 %v9624_v55  ;;  %v9631_v37 = vld [vmem:[#allocation2 + $0x7c] sm:$0xf]  ;;  %v1257_v42 = vor.u32 %v1256_v3, %v1253_v27  ;;  %v918_v44 = vsel %vm9052_vm9, %v697_v58, %v917_v17  ;;  %v342_v28 = vmul.f32 %v9384_v49, %v7328_v48  ;;  %v1847_v46 = vshll.u32 %v1592_v43, 16  ;;  %v921_v60 = vld [vmem:[#allocation2 + $0x8c] sm:$0x1] }
  0xca   : > { %3592 = vmatmul.mubr.bf16.gmra.mrb[32].mxu1 %v9604_v7  ;;  %3438 = vmatprep.mubr.bf16.mxu0 %v9628_v15  ;;  %v1845_v6 = vrot.slane %v1844_v1, 4  ;;  %v1851_v50 = vshrl.u32 %v1592_v43, 16  ;;  %v9638_v61 = vcombine.low %v1591_v41, %v1592_v43  ;;  %919 = vst [vmem:[#allocation2 + $0x84] sm:$0xf] %v918_v44  ;;  %v1857_v34 = vshll.u32 %v1614_v25, 16 }
  0xcb   : > { %3439 = vmatmul.mubr.bf16.gmra.mrb[36].mxu0 %v6689_v20  ;;  %v1258_v47 = vrot.slane %v1257_v42, 4  ;;  %v1260_v36 = vshll.u32 %v9631_v37, 16  ;;  %v1264_v48 = vshrl.u32 %v9631_v37, 16  ;;  %v1849_v57 = vrot.slane %v1847_v46, 5  ;;  %v9647_v42 = vld [vmem:[%s8988_s30 + $0x68] sm:$0xff]  }
  0xcc   : > { %11698 = vst [vmem:[#allocation19_spill] sm:$0xff] %v9638_v61  ;;  %v1853_v17 = vrot.slane %v1851_v50, 4  ;;  %v1270_v52 = vshll.u32 %v1001_v22, 16  ;;  %v6690_v62 = vcombine.low %v9618_v16, %v9631_v37  ;;  %v1859_v63 = vrot.slane %v1857_v34, 5 }
  0xcd   : > { %v1262_v27 = vrot.slane %v1260_v36, 5  ;;  %v1266_v43 = vrot.slane %v1264_v48, 4  ;;  %v705_v41 = vor.u32 %v703_v54, %v702_v23  ;;  %v1850_v20 = vsel %vm9012_vm2, %v1845_v6, %v1849_v57 }
  0xce   : > { %v1854_v3 = vor.u32 %v1853_v17, %v1849_v57  ;;  %v1272_v58 = vrot.slane %v1270_v52, 5  ;;  %v707_v1 = vrot.slane %v702_v23, 4  ;;  %v380_v16 = vadd.f32 %v9371_v32, %v9600_v13 }
  0xcf   : > { %v1263_v44 = vsel %vm9012_vm2, %v1258_v47, %v1262_v27  ;;  %v1267_v25 = vor.u32 %v1266_v43, %v1262_v27  ;;  %v706_v37 = vsel %vm9044_vm8, %v698_v0, %v705_v41  ;;  %v381_v46 = vadd.f32 %v9371_v32, %v342_v28 }
  0xd0   : > { %v1855_v54 = vrot.slane %v1854_v3, 4  ;;  %920 = vst [vmem:[#allocation2 + $0x88] sm:$0xf] %v706_v37  ;;  %v922_v6 = vsel %vm9061_vm10, %v707_v1, %v921_v60  ;;  %v7332_v23 = vunpack.c.h.bf16 %v9586_v26  ;;  %v412_v47 = vmax.f32 %v380_v16, 0.0 }
  0xd1   : > { %v1268_v50 = vrot.slane %v1267_v25, 4  ;;  %923 = vst [vmem:[#allocation2 + $0x8c] sm:$0x1] %v922_v6  ;;  %v1593_v34 = vld [vmem:[#allocation2 + $0x84] sm:$0xf]  ;;  %v11699_v0 = vunpack.c.l.bf16 %v9586_v26  ;;  %v7335_v13 = vunpack.c.l.bf16 %v9647_v42  ;;  %v413_v41 = vmax.f32 %v381_v46, 0.0 }
  0xd2   : > { %v9659_v22 = vld [vmem:[#allocation2 + $0x84] sm:$0xf]  ;;  %v1860_v48 = vsel %vm9012_vm2, %v1855_v54, %v1859_v63  ;;  %v1862_v57 = vshrl.u32 %v1593_v34, 16  ;;  %v1865_v17 = vshll.u32 %v1593_v34, 16  ;;  %v7269_v25 = vpack.c.bf16 %v412_v47, %v412_v47 }
  0xd3   : > { %v343_v36 = vmul.f32 %v9384_v49, %v11699_v0  ;;  %v1275_v28 = vshrl.u32 %v9659_v22, 16  ;;  %v9668_v52 = vcombine.low %v1850_v20, %v1860_v48  ;;  %v1273_v27 = vsel %vm9012_vm2, %v1268_v50, %v1272_v58 }
  0xd4   : > { %v1278_v43 = vshll.u32 %v9659_v22, 16  ;;  %v9673_v26 = vcombine.low %v1263_v44, %v1273_v27  ;;  %v1864_v60 = vrot.slane %v1862_v57, 4  ;;  %v1867_v3 = vrot.slane %v1865_v17, 5 }
  0xd5   : > { %11700 = vst [vmem:[#allocation20_spill] sm:$0xff] %v9668_v52  ;;  %v1277_v1 = vrot.slane %v1275_v28, 4  ;;  %3599 = vmatprep.mubr.bf16.mxu1 %v9668_v52  ;;  %v7270_v37 = vpack.c.bf16 %v413_v41, %v413_v41  ;;  %v344_v16 = vmul.f32 %v9384_v49, %v7332_v23  ;;  %v382_v58 = vadd.f32 %v9371_v32, %v343_v36 }
  0xd6   : > { %11701 = vst [vmem:[#allocation21_spill] sm:$0xff] %v9673_v26  ;;  %v1280_v63 = vrot.slane %v1278_v43, 5  ;;  %3600 = vmatmul.mubr.bf16.gmra.mrb[36].mxu1 %v9638_v61  ;;  %3446 = vmatprep.mubr.bf16.mxu0 %v9673_v26  ;;  %v1868_v20 = vor.u32 %v1867_v3, %v1864_v60  ;;  %v7336_v44 = vunpack.c.h.bf16 %v9647_v42  ;;  %v345_v54 = vmul.f32 %v9384_v49, %v7335_v13  ;;  %v928_v61 = vld [vmem:[#allocation2 + $0x98] sm:$0x1] }
  0xd7   : > { %3447 = vmatmul.mubr.bf16.gmra.mrb[40].mxu0 %v6690_v62  ;;  %v1594_v6 = vld [vmem:[#allocation2 + $0x88] sm:$0xf]  ;;  %v709_v47 = vshrl.u32 %v7269_v25, 16  ;;  %v712_v0 = vshll.u32 %v7269_v25, 16  ;;  %v383_v23 = vadd.f32 %v9371_v32, %v344_v16 }
  0xd8   : > { %v9682_v46 = vld [vmem:[#allocation2 + $0x88] sm:$0xf]  ;;  %v1281_v50 = vor.u32 %v1280_v63, %v1277_v1  ;;  %v1615_v48 = vld [vmem:[#allocation2 + $0x8c] sm:$0x1]  ;;  %v1869_v57 = vrot.slane %v1868_v20, 4  ;;  %v1871_v17 = vshll.u32 %v1594_v6, 16  ;;  %v9685_v27 = vcombine.low %v1593_v34, %v1594_v6 }
  0xd9   : > { %v1875_v28 = vshrl.u32 %v1594_v6, 16  ;;  %v1881_v36 = vshll.u32 %v1615_v48, 16  ;;  %v1002_v43 = vld [vmem:[#allocation2 + $0x8c] sm:$0x1]  ;;  %v1284_v49 = vshll.u32 %v9682_v46, 16  ;;  %v1288_v62 = vshrl.u32 %v9682_v46, 16 }
  0xda   : > { %11702 = vst [vmem:[#allocation22_spill] sm:$0xff] %v9685_v27  ;;  %v1282_v42 = vrot.slane %v1281_v50, 4  ;;  %v1873_v13 = vrot.slane %v1871_v17, 5  ;;  %v1294_v60 = vshll.u32 %v1002_v43, 16  ;;  %v6691_v3 = vcombine.low %v9659_v22, %v9682_v46  ;;  %v924_v50 = vld [vmem:[#allocation2 + $0x90] sm:$0xf] }
  0xdb   : > { %v1877_v41 = vrot.slane %v1875_v28, 4  ;;  %v1883_v32 = vrot.slane %v1881_v36, 5  ;;  %v1286_v1 = vrot.slane %v1284_v49, 5  ;;  %v1290_v63 = vrot.slane %v1288_v62, 4  ;;  %v9700_v62 = vld [vmem:[%s11599_s1] ss:$0 sm:$0xff] }
  0xdc   : > { %v711_v25 = vrot.slane %v709_v47, 7  ;;  %v1874_v34 = vsel %vm9012_vm2, %v1869_v57, %v1873_v13  ;;  %v1296_v20 = vrot.slane %v1294_v60, 5  ;;  %v717_v6 = vshrl.u32 %v7270_v37, 16 }
  0xdd   : > { %v1878_v16 = vor.u32 %v1877_v41, %v1873_v13  ;;  %v1287_v48 = vsel %vm9012_vm2, %v1282_v42, %v1286_v1  ;;  %v1291_v17 = vor.u32 %v1290_v63, %v1286_v1  ;;  %v720_v46 = vshll.u32 %v7270_v37, 16  ;;  %v9712_v1 = vld [vmem:[%s11600_s2] ss:$0 sm:$0xff]  ;;  %v7358_v63 = vld [vmem:[%s8988_s30 + $0x70] sm:$0xff]  }
  0xde   : > { %v714_v28 = vor.u32 %v712_v0, %v711_v25  ;;  %v715_v43 = vrot.slane %v711_v25, 4  ;;  %v719_v22 = vrot.slane %v717_v6, 7  ;;  %v414_v36 = vmax.f32 %v382_v58, 0.0 }
  0xdf   : > { %v1879_v7 = vrot.slane %v1878_v16, 4  ;;  %v1292_v47 = vrot.slane %v1291_v17, 4  ;;  %v415_v49 = vmax.f32 %v383_v23, 0.0  ;;  %v346_v42 = vmul.f32 %v9700_v62, %v7336_v44  ;;  %v9723_v16 = vld [vmem:[%s8988_s30 + $0x78] sm:$0xff]  }
  0xe0   : > { %v925_v57 = vsel %vm9052_vm9, %v714_v28, %v924_v50  ;;  %v722_v13 = vor.u32 %v720_v46, %v719_v22  ;;  %v724_v37 = vrot.slane %v719_v22, 4  ;;  %v7271_v58 = vpack.c.bf16 %v414_v36, %v414_v36  ;;  %v931_v17 = vld [vmem:[#allocation2 + $0x9c] sm:$0xf]  ;;  %v935_v28 = vld [vmem:[#allocation2 + $0xa4] sm:$0x1] }
  0xe1   : > { %v1884_v0 = vsel %vm9012_vm2, %v1879_v7, %v1883_v32  ;;  %926 = vst [vmem:[#allocation2 + $0x90] sm:$0xf] %v925_v57  ;;  %v1297_v23 = vsel %vm9012_vm2, %v1292_v47, %v1296_v20  ;;  %v7272_v60 = vpack.c.bf16 %v415_v49, %v415_v49  ;;  %v384_v44 = vadd.f32 %v9712_v1, %v345_v54 }
  0xe2   : > { %v9705_v41 = vcombine.low %v1874_v34, %v1884_v0  ;;  %v9716_v25 = vcombine.low %v1287_v48, %v1297_v23  ;;  %v723_v7 = vsel %vm9044_vm8, %v715_v43, %v722_v13  ;;  %v929_v32 = vsel %vm9061_vm10, %v724_v37, %v928_v61 }
  0xe3   : > { %v726_v34 = vshrl.u32 %v7271_v58, 16  ;;  %927 = vst [vmem:[#allocation2 + $0x94] sm:$0xf] %v723_v7  ;;  %930 = vst [vmem:[#allocation2 + $0x98] sm:$0x1] %v929_v32  ;;  %v729_v20 = vshll.u32 %v7271_v58, 16  ;;  %v385_v54 = vadd.f32 %v9712_v1, %v346_v42  ;;  %v7339_v43 = vunpack.c.l.bf16 %v7358_v63 }
  0xe4   : > { %11703 = vst [vmem:[#allocation23_spill] sm:$0xff] %v9705_v41  ;;  %11704 = vst [vmem:[#allocation24_spill] sm:$0xff] %v9716_v25  ;;  %3607 = vmatprep.mubr.bf16.mxu1 %v9705_v41  ;;  %v734_v6 = vshrl.u32 %v7272_v60, 16  ;;  %v737_v50 = vshll.u32 %v7272_v60, 16  ;;  %3454 = vmatprep.mubr.bf16.mxu0 %v9716_v25  ;;  %v416_v61 = vmax.f32 %v384_v44, 0.0  ;;  %v7340_v22 = vunpack.c.h.bf16 %v7358_v63 }
  0xe5   : > { %3608 = vmatmul.mubr.bf16.gmra.mrb[40].mxu1 %v9685_v27  ;;  %v728_v48 = vrot.slane %v726_v34, 7  ;;  %3455 = vmatmul.mubr.bf16.gmra.mrb[44].mxu0 %v6691_v3  ;;  %v417_v36 = vmax.f32 %v385_v54, 0.0  ;;  %v7343_v47 = vunpack.c.l.bf16 %v9723_v16  ;;  %v347_v13 = vmul.f32 %v9700_v62, %v7339_v43 }
  0xe6   : > { %v736_v46 = vrot.slane %v734_v6, 7  ;;  %v9731_v42 = vpack.c.bf16 %v416_v61, %v416_v61  ;;  %v348_v3 = vmul.f32 %v9700_v62, %v7340_v22 }
  0xe7   : > { %v731_v49 = vor.u32 %v729_v20, %v728_v48  ;;  %v732_v0 = vrot.slane %v728_v48, 4  ;;  %v9736_v44 = vpack.c.bf16 %v417_v36, %v417_v36 }
  0xe8   : > { %v1595_v37 = vld [vmem:[#allocation2 + $0x90] sm:$0xf]  ;;  %v739_v23 = vor.u32 %v737_v50, %v736_v46  ;;  %v741_v60 = vrot.slane %v736_v46, 4  ;;  %v743_v54 = vshrl.u32 %v9731_v42, 16  ;;  %v9749_v46 = vadd.f32 %v9712_v1, %v347_v13 }
  0xe9   : > { %v9734_v58 = vld [vmem:[#allocation2 + $0x90] sm:$0xf]  ;;  %v1886_v63 = vshrl.u32 %v1595_v37, 16  ;;  %v1889_v7 = vshll.u32 %v1595_v37, 16  ;;  %v932_v6 = vsel %vm9052_vm9, %v731_v49, %v931_v17  ;;  %v9752_v36 = vadd.f32 %v9712_v1, %v348_v3 }
  0xea   : > { %v1299_v32 = vshrl.u32 %v9734_v58, 16  ;;  %v1302_v34 = vshll.u32 %v9734_v58, 16  ;;  %v740_v20 = vsel %vm9044_vm8, %v732_v0, %v739_v23  ;;  %v936_v50 = vsel %vm9061_vm10, %v741_v60, %v935_v28  ;;  %v1596_v48 = vld [vmem:[#allocation2 + $0x94] sm:$0xf]  ;;  %v1616_v61 = vld [vmem:[#allocation2 + $0x98] sm:$0x1] }
  0xeb   : > { %v1888_v43 = vrot.slane %v1886_v63, 4  ;;  %v1891_v22 = vrot.slane %v1889_v7, 5  ;;  %933 = vst [vmem:[#allocation2 + $0x9c] sm:$0xf] %v932_v6  ;;  %934 = vst [vmem:[#allocation2 + $0xa0] sm:$0xf] %v740_v20  ;;  %v9754_v23 = vcombine.low %v1595_v37, %v1596_v48 }
  0xec   : > { %937 = vst [vmem:[#allocation2 + $0xa4] sm:$0x1] %v936_v50  ;;  %v1895_v0 = vshll.u32 %v1596_v48, 16  ;;  %v1899_v17 = vshrl.u32 %v1596_v48, 16  ;;  %v1905_v49 = vshll.u32 %v1616_v61, 16  ;;  %v1301_v63 = vrot.slane %v1299_v32, 4 }
  0xed   : > { %11705 = vst [vmem:[#allocation25_spill] sm:$0xff] %v9754_v23  ;;  %v9756_v28 = vld [vmem:[#allocation2 + $0x94] sm:$0xf]  ;;  %v1892_v60 = vor.u32 %v1891_v22, %v1888_v43  ;;  %v1003_v57 = vld [vmem:[#allocation2 + $0x98] sm:$0x1]  ;;  %v1304_v7 = vrot.slane %v1302_v34, 5 }
  0xee   : > { %v1308_v20 = vshll.u32 %v9756_v28, 16  ;;  %v1897_v6 = vrot.slane %v1895_v0, 5  ;;  %v1901_v50 = vrot.slane %v1899_v17, 4  ;;  %v1907_v13 = vrot.slane %v1905_v49, 5 }
  0xef   : > { %v1312_v27 = vshrl.u32 %v9756_v28, 16  ;;  %v1893_v3 = vrot.slane %v1892_v60, 4  ;;  %v1305_v10 = vor.u32 %v1304_v7, %v1301_v63  ;;  %v1318_v33 = vshll.u32 %v1003_v57, 16 }
  0xf0   : > { %v1310_v4 = vrot.slane %v1308_v20, 5  ;;  %v1902_v61 = vor.u32 %v1901_v50, %v1897_v6  ;;  %v6692_v48 = vcombine.low %v9734_v58, %v9756_v28  ;;  %v9762_v43 = vrot.slane %v743_v54, 7 }
  0xf1   : > { %v1314_v37 = vrot.slane %v1312_v27, 4  ;;  %v1898_v32 = vsel %vm9012_vm2, %v1893_v3, %v1897_v6  ;;  %v1306_v34 = vrot.slane %v1305_v10, 4  ;;  %v1320_v22 = vrot.slane %v1318_v33, 5 }
  0xf2   : > { %v746_v0 = vshll.u32 %v9731_v42, 16  ;;  %v1903_v17 = vrot.slane %v1902_v61, 4  ;;  %v1597_v60 = vld [vmem:[#allocation2 + $0x9c] sm:$0xf]  ;;  %v1598_v63 = vld [vmem:[#allocation2 + $0xa0] sm:$0xf]  ;;  %v9769_v27 = vmul.f32 %v9700_v62, %v7343_v47 }
  0xf3   : > { %v1315_v49 = vor.u32 %v1314_v37, %v1310_v4  ;;  %v1311_v58 = vsel %vm9012_vm2, %v1306_v34, %v1310_v4  ;;  %v1617_v54 = vld [vmem:[#allocation2 + $0xa4] sm:$0x1]  ;;  %v1910_v28 = vshrl.u32 %v1597_v60, 16  ;;  %v1913_v7 = vshll.u32 %v1597_v60, 16  ;;  %v9775_v50 = vld [vmem:[#allocation2 + $0x9c] sm:$0xf] }
  0xf4   : > { %v1919_v20 = vshll.u32 %v1598_v63, 16  ;;  %v1908_v33 = vsel %vm9012_vm2, %v1903_v17, %v1907_v13  ;;  %v1923_v42 = vshrl.u32 %v1598_v63, 16  ;;  %v1929_v6 = vshll.u32 %v1617_v54, 16  ;;  %v9779_v57 = vld [vmem:[#allocation2 + $0xa0] sm:$0xf] }
  0xf5   : > { %v1316_v10 = vrot.slane %v1315_v49, 4  ;;  %v9777_v3 = vcombine.low %v1898_v32, %v1908_v33  ;;  %v1912_v61 = vrot.slane %v1910_v28, 4  ;;  %v1915_v47 = vrot.slane %v1913_v7, 5  ;;  %v1004_v13 = vld [vmem:[#allocation2 + $0xa4] sm:$0x1] }
  0xf6   : > { %v1921_v37 = vrot.slane %v1919_v20, 5  ;;  %v1925_v34 = vrot.slane %v1923_v42, 4  ;;  %v1931_v40 = vrot.slane %v1929_v6, 5  ;;  %v9783_v39 = vcombine.low %v1597_v60, %v1598_v63 }
  0xf7   : > { %11706 = vst [vmem:[#allocation26_spill] sm:$0xff] %v9777_v3  ;;  %v1321_v4 = vsel %vm9012_vm2, %v1316_v10, %v1320_v22  ;;  %3615 = vmatprep.mubr.bf16.mxu1 %v9777_v3  ;;  %v1916_v49 = vor.u32 %v1915_v47, %v1912_v61  ;;  %v1323_v32 = vshrl.u32 %v9775_v50, 16  ;;  %v1326_v54 = vshll.u32 %v9775_v50, 16  ;;  %v938_v47 = vld [vmem:[#allocation2 + $0xa8] sm:$0xf] }
  0xf8   : > { %11707 = vst [vmem:[#allocation27_spill] sm:$0xff] %v9783_v39  ;;  %v9786_v17 = vcombine.low %v1311_v58, %v1321_v4  ;;  %3616 = vmatmul.mubr.bf16.gmra.mrb[44].mxu1 %v9754_v23  ;;  %v1926_v28 = vor.u32 %v1925_v34, %v1921_v37  ;;  %v1332_v7 = vshll.u32 %v9779_v57, 16  ;;  %v1336_v22 = vshrl.u32 %v9779_v57, 16 }
  0xf9   : > { %v1342_v20 = vshll.u32 %v1004_v13, 16  ;;  %v1917_v60 = vrot.slane %v1916_v49, 4  ;;  %v1325_v63 = vrot.slane %v1323_v32, 4  ;;  %v1328_v33 = vrot.slane %v1326_v54, 5 }
  0xfa   : > { %11708 = vst [vmem:[#allocation28_spill] sm:$0xff] %v9786_v17  ;;  %3462 = vmatprep.mubr.bf16.mxu0 %v9786_v17  ;;  %v6693_v58 = vcombine.low %v9775_v50, %v9779_v57  ;;  %v1927_v10 = vrot.slane %v1926_v28, 4  ;;  %v1334_v42 = vrot.slane %v1332_v7, 5  ;;  %v1338_v6 = vrot.slane %v1336_v22, 4 }
  0xfb   : > { %3463 = vmatmul.mubr.bf16.gmra.mrb[48].mxu0 %v6692_v48  ;;  %v1344_v61 = vrot.slane %v1342_v20, 5  ;;  %v1922_v4 = vsel %vm9012_vm2, %v1917_v60, %v1921_v37  ;;  %v1329_v34 = vor.u32 %v1328_v33, %v1325_v63  ;;  %v748_v13 = vor.u32 %v746_v0, %v9762_v43  ;;  %v942_v48 = vld [vmem:[#allocation2 + $0xb0] sm:$0x1] }
  0xfc   : > { %v751_v23 = vshrl.u32 %v9736_v44, 16  ;;  %v1932_v49 = vsel %vm9012_vm2, %v1927_v10, %v1931_v40  ;;  %v1339_v32 = vor.u32 %v1338_v6, %v1334_v42  ;;  %v754_v57 = vshll.u32 %v9736_v44, 16 }
  0xfd   : > { %v418_v50 = vmax.f32 %v9749_v46, 0.0  ;;  %v9804_v54 = vcombine.low %v1922_v4, %v1932_v49  ;;  %v1330_v28 = vrot.slane %v1329_v34, 4  ;;  %v939_v37 = vsel %vm9052_vm9, %v748_v13, %v938_v47  ;;  %v9829_v13 = vld [vmem:[#allocation2] sm:$0xe] }
  0xfe   : > { %v753_v7 = vrot.slane %v751_v23, 7  ;;  %v1340_v22 = vrot.slane %v1339_v32, 4  ;;  %940 = vst [vmem:[#allocation2 + $0xa8] sm:$0xf] %v939_v37  ;;  %v419_v0 = vmax.f32 %v9752_v36, 0.0  ;;  %v11710_v40 = vunpack.c.h.bf16 %v9723_v16 }
  0xff   : > { %11709 = vst [vmem:[#allocation29_spill] sm:$0xff] %v9804_v54  ;;  %v7275_v20 = vpack.c.bf16 %v418_v50, %v418_v50  ;;  %3623 = vmatprep.mubr.bf16.mxu1 %v9804_v54  ;;  %v1335_v44 = vsel %vm9012_vm2, %v1330_v28, %v1334_v42  ;;  %v388_v23 = vadd.f32 %v9712_v1, %v9769_v27 }
 0x100   : > { %v350_v60 = vmul.f32 %v9700_v62, %v11710_v40  ;;  %v756_v46 = vor.u32 %v754_v57, %v753_v7  ;;  %v758_v63 = vrot.slane %v753_v7, 4  ;;  %3624 = vmatmul.mubr.bf16.gmra.mrb[48].mxu1 %v9783_v39  ;;  %v1345_v36 = vsel %vm9012_vm2, %v1340_v22, %v1344_v61  ;;  %v945_v57 = vld [vmem:[#allocation2 + $0xb4] sm:$0xf] }
 0x101   : > { %v7276_v33 = vpack.c.bf16 %v419_v0, %v419_v0  ;;  %v760_v10 = vshrl.u32 %v7275_v20, 16  ;;  %v763_v16 = vshll.u32 %v7275_v20, 16  ;;  %v9820_v6 = vcombine.low %v1335_v44, %v1345_v36 }
 0x102   : > { %v11712_v62 = vrot.slane %v9762_v43, 4  ;;  %v943_v47 = vsel %vm9061_vm10, %v758_v63, %v942_v48  ;;  %v389_v27 = vadd.f32 %v9712_v1, %v350_v60  ;;  %v420_v61 = vmax.f32 %v388_v23, 0.0  ;;  %v949_v60 = vld [vmem:[#allocation2 + $0xbc] sm:$0x1] }
 0x103   : > { %11711 = vst [vmem:[#allocation30_spill] sm:$0xff] %v9820_v6  ;;  %944 = vst [vmem:[#allocation2 + $0xb0] sm:$0x1] %v943_v47  ;;  %v762_v4 = vrot.slane %v760_v10, 7  ;;  %v768_v34 = vshrl.u32 %v7276_v33, 16  ;;  %3470 = vmatprep.mubr.bf16.mxu0 %v9820_v6  ;;  %v771_v49 = vshll.u32 %v7276_v33, 16 }
 0x104   : > { %v757_v42 = vsel %vm9044_vm8, %v11712_v62, %v756_v46  ;;  %3471 = vmatmul.mubr.bf16.gmra.mrb[52].mxu0 %v6693_v58  ;;  %v421_v50 = vmax.f32 %v389_v27, 0.0  ;;  %v9832_v28 = vpack.c.bf16 %v420_v61, %v420_v61 }
 0x105   : > { %941 = vst [vmem:[#allocation2 + $0xac] sm:$0xf] %v757_v42  ;;  %v765_v43 = vor.u32 %v763_v16, %v762_v4  ;;  %v770_v32 = vrot.slane %v768_v34, 7  ;;  %v1599_v48 = vld [vmem:[#allocation2 + $0xa8] sm:$0xf]  ;;  %v766_v1 = vrot.slane %v762_v4, 4 }
 0x106   : > { %v9834_v7 = vld [vmem:[#allocation2 + $0xa8] sm:$0xf]  ;;  %v1934_v22 = vshrl.u32 %v1599_v48, 16  ;;  %v1937_v0 = vshll.u32 %v1599_v48, 16  ;;  %v777_v63 = vshrl.u32 %v9832_v28, 16 }
 0x107   : > { %v1347_v20 = vshrl.u32 %v9834_v7, 16  ;;  %v1350_v40 = vshll.u32 %v9834_v7, 16  ;;  %v773_v58 = vor.u32 %v771_v49, %v770_v32  ;;  %v775_v44 = vrot.slane %v770_v32, 4 }
 0x108   : > { %v946_v46 = vsel %vm9052_vm9, %v765_v43, %v945_v57  ;;  %v1936_v23 = vrot.slane %v1934_v22, 4  ;;  %v1939_v36 = vrot.slane %v1937_v0, 5  ;;  %v9850_v0 = vpack.c.bf16 %v421_v50, %v421_v50 }
 0x109   : > { %v1349_v33 = vrot.slane %v1347_v20, 4  ;;  %v1352_v10 = vrot.slane %v1350_v40, 5  ;;  %947 = vst [vmem:[#allocation2 + $0xb4] sm:$0xf] %v946_v46  ;;  %v774_v47 = vsel %vm9044_vm8, %v766_v1, %v773_v58  ;;  %v950_v27 = vsel %vm9061_vm10, %v775_v44, %v949_v60 }
 0x10a   : > { %v1618_v62 = vld [vmem:[#allocation2 + $0xb0] sm:$0x1]  ;;  %v1940_v4 = vor.u32 %v1939_v36, %v1936_v23  ;;  %948 = vst [vmem:[#allocation2 + $0xb8] sm:$0xf] %v774_v47  ;;  %951 = vst [vmem:[#allocation2 + $0xbc] sm:$0x1] %v950_v27 }
 0x10b   : > { %v1953_v49 = vshll.u32 %v1618_v62, 16  ;;  %v1005_v43 = vld [vmem:[#allocation2 + $0xb0] sm:$0x1]  ;;  %v1353_v32 = vor.u32 %v1352_v10, %v1349_v33  ;;  %v9856_v10 = vrot.slane %v777_v63, 7  ;;  %v7376_v47 = vpop.f32.mrb[0].mxu0 }
 0x10c   : > { %v1600_v16 = vld [vmem:[#allocation2 + $0xac] sm:$0xf]  ;;  %v1941_v1 = vrot.slane %v1940_v4, 4  ;;  %v1366_v23 = vshll.u32 %v1005_v43, 16 }
 0x10d   : > { %v9842_v42 = vld [vmem:[#allocation2 + $0xac] sm:$0xf]  ;;  %v1943_v34 = vshll.u32 %v1600_v16, 16  ;;  %v1947_v61 = vshrl.u32 %v1600_v16, 16  ;;  %v9852_v60 = vcombine.low %v1599_v48, %v1600_v16  ;;  %v1354_v58 = vrot.slane %v1353_v32, 4 }
 0x10e   : > { %v1356_v57 = vshll.u32 %v9842_v42, 16  ;;  %v1360_v22 = vshrl.u32 %v9842_v42, 16  ;;  %v1955_v33 = vrot.slane %v1953_v49, 5  ;;  %v1368_v50 = vrot.slane %v1366_v23, 5  ;;  %v7377_v49 = vpop.f32.mrb[1].mxu0 }
 0x10f   : > { %v1945_v20 = vrot.slane %v1943_v34, 5  ;;  %v1949_v40 = vrot.slane %v1947_v61, 4  ;;  %11713 = vst [vmem:[#allocation31_spill] sm:$0xff] %v9852_v60  ;;  %v6694_v4 = vcombine.low %v9834_v7, %v9842_v42  ;;  %v780_v16 = vshll.u32 %v9832_v28, 16  ;;  %v9877_v37 = vpop.f32.mrb[2].mxu0 }
 0x110   : > { %v1358_v44 = vrot.slane %v1356_v57, 5  ;;  %v1362_v46 = vrot.slane %v1360_v22, 4  ;;  %v9860_v34 = vld [vmem:[#allocation2 + $0xb4] sm:$0xf] }
 0x111   : > { %v1946_v36 = vsel %vm9012_vm2, %v1941_v1, %v1945_v20  ;;  %v1950_v62 = vor.u32 %v1949_v40, %v1945_v20  ;;  %v9862_v48 = vld [vmem:[#allocation2 + $0xb4] sm:$0xf]  ;;  %v1958_v43 = vshrl.u32 %v9860_v34, 16  ;;  %v1961_v32 = vshll.u32 %v9860_v34, 16  ;;  %v1602_v1 = vld [vmem:[#allocation2 + $0xb8] sm:$0xf] }
 0x112   : > { %v1363_v27 = vor.u32 %v1362_v46, %v1358_v44  ;;  %v1371_v63 = vshrl.u32 %v9862_v48, 16  ;;  %v1359_v57 = vsel %vm9012_vm2, %v1354_v58, %v1358_v44  ;;  %v1619_v7 = vld [vmem:[#allocation2 + $0xbc] sm:$0x1]  ;;  %v1374_v42 = vshll.u32 %v9862_v48, 16 }
 0x113   : > { %v1951_v61 = vrot.slane %v1950_v62, 4  ;;  %v9871_v20 = vadd.f32 %v7377_v49, %v7376_v47  ;;  %v1960_v40 = vrot.slane %v1958_v43, 4  ;;  %v1963_v46 = vrot.slane %v1961_v32, 5  ;;  %v9875_v62 = vld [vmem:[#allocation2 + $0xb8] sm:$0xf]  ;;  %v9883_v47 = vpop.f32.mrb[3].mxu0 }
 0x114   : > { %v1364_v22 = vrot.slane %v1363_v27, 4  ;;  %v1967_v23 = vshll.u32 %v1602_v1, 16  ;;  %v1971_v44 = vshrl.u32 %v1602_v1, 16  ;;  %v1977_v27 = vshll.u32 %v1619_v7, 16  ;;  %v1006_v54 = vld [vmem:[#allocation2 + $0xbc] sm:$0x1] }
 0x115   : > { %v1956_v28 = vsel %vm9012_vm2, %v1951_v61, %v1955_v33  ;;  %v1964_v33 = vor.u32 %v1963_v46, %v1960_v40  ;;  %v8717_v43 = vld [vmem:[#allocation2 + $0x4] sm:$0xf]  ;;  %v1373_v6 = vrot.slane %v1371_v63, 4  ;;  %v1384_v7 = vshrl.u32 %v9875_v62, 16  ;;  %v952_v46 = vld [vmem:[#allocation2 + $0xc0] sm:$0xf] }
 0x116   : > { %v9879_v39 = vcombine.low %v1946_v36, %v1956_v28  ;;  %v1369_v58 = vsel %vm9012_vm2, %v1364_v22, %v1368_v50  ;;  %v1969_v61 = vrot.slane %v1967_v23, 5  ;;  %v1463_v32 = vrot.slane %v8717_v43, 5  ;;  %v8718_v23 = vld [vmem:[#allocation2 + $0x8] sm:$0x1] }
 0x117   : > { %v9885_v49 = vcombine.low %v1359_v57, %v1369_v58  ;;  %v1973_v3 = vrot.slane %v1971_v44, 4  ;;  %v1376_v36 = vrot.slane %v1374_v42, 5  ;;  %v782_v28 = vor.u32 %v780_v16, %v9856_v10 }
 0x118   : > { %11714 = vst [vmem:[#allocation32_spill] sm:$0xff] %v9879_v39  ;;  %3631 = vmatprep.mubr.bf16.mxu1 %v9879_v39  ;;  %v1965_v57 = vrot.slane %v1964_v33, 4  ;;  %v1380_v22 = vshll.u32 %v9875_v62, 16  ;;  %v1390_v40 = vshll.u32 %v1006_v54, 16  ;;  %v1979_v42 = vrot.slane %v1977_v27, 5 }
 0x119   : > { %11715 = vst [vmem:[#allocation33_spill] sm:$0xff] %v9885_v49  ;;  %3632 = vmatmul.mubr.bf16.gmra.mrb[52].mxu1 %v9852_v60  ;;  %3478 = vmatprep.mubr.bf16.mxu0 %v9885_v49  ;;  %v1974_v63 = vor.u32 %v1973_v3, %v1969_v61  ;;  %v1377_v16 = vor.u32 %v1376_v36, %v1373_v6  ;;  %v1466_v58 = vrot.slane %v8718_v23, 5  ;;  %v1386_v60 = vrot.slane %v1384_v7, 4  ;;  %v956_v7 = vld [vmem:[#allocation2 + $0xc8] sm:$0x1] }
 0x11a   : > { %3479 = vmatmul.mubr.bf16.gmra.mrb[56].mxu0 %v6694_v4  ;;  %v1970_v44 = vsel %vm9012_vm2, %v1965_v57, %v1969_v61  ;;  %v1382_v43 = vrot.slane %v1380_v22, 5  ;;  %v11718_v39 = vrot.slane %v9829_v13, 9  ;;  %v785_v54 = vshrl.u32 %v9850_v0, 16 }
 0x11b   : > { %v1975_v49 = vrot.slane %v1974_v63, 4  ;;  %v1378_v41 = vrot.slane %v1377_v16, 4  ;;  %v788_v3 = vshll.u32 %v9850_v0, 16  ;;  %v1392_v4 = vrot.slane %v1390_v40, 5 }
 0x11c   : > { %v1464_v33 = vsel %vm9891_vm13, %v11718_v39, %v1463_v32  ;;  %v1387_v6 = vor.u32 %v1386_v60, %v1382_v43  ;;  %v953_v27 = vsel %vm9052_vm9, %v782_v28, %v952_v46  ;;  %v1465_v36 = vrot.slane %v1463_v32, 4 }
 0x11d   : > { %v1980_v61 = vsel %vm9012_vm2, %v1975_v49, %v1979_v42  ;;  %v9912_v13 = vcombine.low %v9860_v34, %v1602_v1  ;;  %v783_v39 = vrot.slane %v9856_v10, 4  ;;  %v787_v57 = vrot.slane %v785_v54, 7  ;;  %954 = vst [vmem:[#allocation2 + $0xc0] sm:$0xf] %v953_v27  ;;  %v1395_v49 = vld [vmem:[#allocation2 + $0xc] sm:$0xe] }
 0x11e   : > { %v9915_v22 = vcombine.low %v1970_v44, %v1980_v61  ;;  %v1383_v0 = vsel %vm9012_vm2, %v1378_v41, %v1382_v43  ;;  %v1388_v60 = vrot.slane %v1387_v6, 4  ;;  %v1467_v29 = vsel %vm9891_vm13, %v1465_v36, %v1466_v58  ;;  %v8719_v1 = vld [vmem:[#allocation2 + $0x10] sm:$0xf]  ;;  %v8720_v58 = vld [vmem:[#allocation2 + $0x14] sm:$0x1] }
 0x11f   : > { %11719 = vst [vmem:[#allocation34_spill] sm:$0xff] %v9912_v13  ;;  %v790_v32 = vor.u32 %v788_v3, %v787_v57  ;;  %v792_v28 = vrot.slane %v787_v57, 4  ;;  %v6695_v34 = vcombine.low %v9862_v48, %v9875_v62  ;;  %v1470_v40 = vrot.slane %v8719_v1, 5  ;;  %v8721_v54 = vld [vmem:[#allocation2 + $0x1c] sm:$0xf] }
 0x120   : > { %11720 = vst [vmem:[#allocation35_spill] sm:$0xff] %v9915_v22  ;;  %3639 = vmatprep.mubr.bf16.mxu1 %v9915_v22  ;;  %v1393_v10 = vsel %vm9012_vm2, %v1388_v60, %v1392_v4  ;;  %v6776_v16 = vcombine.low %v1464_v33, %v1467_v29  ;;  %v6633_v46 = vrot.slane %v1395_v49, 9  ;;  %v1473_v44 = vrot.slane %v8720_v58, 5  ;;  %v1396_v33 = vld [vmem:[#allocation2 + $0x18] sm:$0xe] }
 0x121   : > { %3640 = vmatmul.mubr.bf16.gmra.mrb[56].mxu1 %v9912_v13  ;;  %v9927_v41 = vcombine.low %v1383_v0, %v1393_v10  ;;  %v791_v63 = vsel %vm9044_vm8, %v783_v39, %v790_v32  ;;  %v957_v42 = vsel %vm9061_vm10, %v792_v28, %v956_v7  ;;  %v1472_v23 = vrot.slane %v1470_v40, 4  ;;  %v2005_v27 = vld [vmem:[#allocation2 + $0xc] sm:$0xe]  ;;  %v8722_v36 = vld [vmem:[#allocation2 + $0x10] sm:$0xf]  ;;  %v8379_v39 = vld [vmem:[%s11601_s3 + $0x200] sm:$0xff]  }
 0x122   : > { %955 = vst [vmem:[#allocation2 + $0xc4] sm:$0xf] %v791_v63  ;;  %958 = vst [vmem:[#allocation2 + $0xc8] sm:$0x1] %v957_v42  ;;  %v1471_v35 = vsel %vm9891_vm13, %v6633_v46, %v1470_v40  ;;  %v1477_v3 = vrot.slane %v8721_v54, 5  ;;  %v2071_v61 = vrot.slane %v8722_v36, 5  ;;  %v7381_v55 = vadd.f32 %v9883_v47, %v9877_v37 }
 0x123   : > { %11721 = vst [vmem:[#allocation36_spill] sm:$0xff] %v9927_v41  ;;  %3486 = vmatprep.mubr.bf16.mxu0 %v9927_v41  ;;  %v1474_v43 = vsel %vm9891_vm13, %v1472_v23, %v1473_v44  ;;  %v6634_v29 = vrot.slane %v1396_v33, 9  ;;  %v8723_v32 = vld [vmem:[#allocation2 + $0x20] sm:$0x1]  ;;  %v8381_v40 = vld [vmem:[%s11601_s3 + $0x248] sm:$0xff]   ;;  %v6648_v63 = vrot.slane %v2005_v27, 9 }
 0x124   : > { %3487 = vmatmul.mubr.bf16.gmra.mrb[60].mxu0 %v6695_v34  ;;  %v9934_v48 = vld [vmem:[#allocation2 + $0xc0] sm:$0xf]  ;;  %v6777_v7 = vcombine.low %v1471_v35, %v1474_v43  ;;  %v1480_v28 = vrot.slane %v8723_v32, 5  ;;  %v1479_v1 = vrot.slane %v1477_v3, 4  ;;  %v8724_v42 = vld [vmem:[#allocation2 + $0x14] sm:$0x1] }
 0x125   : > { %v1982_v62 = vshrl.u32 %v9934_v48, 16  ;;  %v1985_v24 = vshll.u32 %v9934_v48, 16  ;;  %4138 = vmatprep.mubr.bf16.mxu0 %v6776_v16  ;;  %v2074_v16 = vrot.slane %v8724_v42, 5  ;;  %v2073_v44 = vrot.slane %v2071_v61, 4  ;;  %v8383_v35 = vld [vmem:[%s11601_s3 + $0x208] sm:$0xff]   ;;  %v8385_v36 = vld [vmem:[%s11601_s3 + $0x250] sm:$0xff]  }
 0x127   : > { %v1984_v6 = vrot.slane %v1982_v62, 4  ;;  %v1987_v4 = vrot.slane %v1985_v24, 5  ;;  %v9956_v62 = vpop.f32.mrb[0].mxu1  ;;  %v1478_v24 = vsel %vm9891_vm13, %v6634_v29, %v1477_v3 }
 0x128   : > { %v9963_v43 = vpop.f32.mrb[1].mxu1 }
 0x129   : > { %v9945_v57 = vld [vmem:[#allocation2 + $0xc4] sm:$0xf]  ;;  %v9947_v0 = vld [vmem:[#allocation2 + $0xc8] sm:$0x1]  ;;  %v1988_v60 = vor.u32 %v1987_v4, %v1984_v6  ;;  %v1481_v6 = vsel %vm9891_vm13, %v1479_v1, %v1480_v28  ;;  %v9970_v3 = vpop.f32.mrb[2].mxu1  ;;  %v2075_v28 = vsel %vm9891_vm13, %v2073_v44, %v2074_v16  ;;  %v8387_v44 = vld [vmem:[%s11601_s3 + $0x210] sm:$0xff]   ;;  %v7490_v26 = vadd.f32 %v9963_v43, %v9956_v62 }
 0x12a   : > { %v1991_v49 = vshll.u32 %v9945_v57, 16  ;;  %v1995_v10 = vshrl.u32 %v9945_v57, 16  ;;  %v2001_v34 = vshll.u32 %v9947_v0, 16  ;;  %v8725_v4 = vld [vmem:[#allocation2 + $0x28] sm:$0xf] }
 0x12b   : > { %v1989_v46 = vrot.slane %v1988_v60, 4  ;;  %v1484_v27 = vrot.slane %v8725_v4, 5  ;;  %v9974_v60 = vpop.f32.mrb[3].mxu1  ;;  %v2006_v1 = vld [vmem:[#allocation2 + $0x18] sm:$0xe]  ;;  %v3530_v37 = vadd.f32 %v7490_v26, %v9871_v20  ;;  %v8398_v43 = vld [vmem:[%s11601_s3 + $0x2e8] sm:$0xff]  }
 0x12c   : > { %v1993_v23 = vrot.slane %v1991_v49, 5  ;;  %v1997_v58 = vrot.slane %v1995_v10, 4  ;;  %4139 = vmatmul.mubr.bf16.vlgmr.msra.gmra.mrb[64].mxu0 %v9024_v2  ;;  %v2003_v54 = vrot.slane %v2001_v34, 5  ;;  %v1397_v2 = vld [vmem:[#allocation2 + $0x24] sm:$0xe] }
 0x12d   : > { %7809 = vmatpush3.bf16.msra.mxu0 %v8379_v39  ;;  %4146 = vmatprep.mubr.bf16.mxu0 %v6777_v7  ;;  %v2072_v39 = vsel %vm9891_vm13, %v6648_v63, %v2071_v61  ;;  %v9976_v7 = vpop.f32.mrb[4].mxu0  ;;  %v8726_v49 = vld [vmem:[#allocation2 + $0x1c] sm:$0xf]  ;;  %v6635_v42 = vrot.slane %v1397_v2, 9  ;;  %v8728_v2 = vld [vmem:[#allocation2 + $0x20] sm:$0x1]  ;;  %8457 = vtanh.f32 %v3530_v37 }
 0x12e   : > { %v1998_v33 = vor.u32 %v1997_v58, %v1993_v23  ;;  %7810 = vmatprep.subr.bf16.mxu0 %v8381_v40  ;;  %v1994_v29 = vsel %vm9012_vm2, %v1989_v46, %v1993_v23  ;;  %v2078_v10 = vrot.slane %v8726_v49, 5  ;;  %v9982_v34 = vpop.f32.mrb[5].mxu0  ;;  %v6778_v40 = vcombine.low %v1478_v24, %v1481_v6  ;;  %v8727_v58 = vld [vmem:[#allocation2 + $0x2c] sm:$0x1]  ;;  %v8391_v49 = vld [vmem:[%s11601_s3 + $0x218] sm:$0xff]  }
 0x12f   : > { %v9984_v61 = vpop.f32.mrb[6].mxu0  ;;  %v9990_v46 = vcombine.low %v9934_v48, %v9945_v57  ;;  %v1486_v23 = vrot.slane %v1484_v27, 4  ;;  %v1487_v16 = vrot.slane %v8727_v58, 5  ;;  %v6649_v48 = vrot.slane %v2006_v1, 9  ;;  %v8730_v58 = vld [vmem:[#allocation2 + $0x28] sm:$0xf] }
 0x130   : > { %v1999_v32 = vrot.slane %v1998_v33, 4  ;;  %v9995_v24 = vpop.f32.mrb[7].mxu0  ;;  %v9999_v33 = vcombine.low %v2072_v39, %v2075_v28  ;;  %v2080_v6 = vrot.slane %v2078_v10, 4  ;;  %v2081_v4 = vrot.slane %v8728_v2, 5  ;;  %v8740_v62 = vld [vmem:[#allocation2 + $0x44] sm:$0x1] }
 0x131   : > { %7811 = vmatpush3.bf16.msra.mxu0 %v8383_v35  ;;  %11722 = vst [vmem:[#allocation37_spill] sm:$0xff] %v9990_v46  ;;  %v1485_v39 = vsel %vm9891_vm13, %v6635_v42, %v1484_v27  ;;  %v8393_v27 = vld [vmem:[%s11601_s3 + $0x260] sm:$0xff]   ;;  %v7387_v26 = vadd.f32 %v9995_v24, %v9984_v61  ;;  %v2010_v20 = vld [vmem:[#allocation2 + $0x48] sm:$0xe]  ;;  %v8406_v37 = vld [vmem:[%s11601_s3 + $0x2f8] sm:$0xff]  }
 0x132   : > { %v2004_v63 = vsel %vm9012_vm2, %v1999_v32, %v2003_v54  ;;  %7812 = vmatprep.subr.bf16.mxu0 %v8385_v36  ;;  %11724 = vst [vmem:[#allocation39_spill] sm:$0xff] %v9999_v33  ;;  %v8389_v54 = vld [vmem:[%s11601_s3 + $0x258] sm:$0xff]   ;;  %v10005_v36 = vpop.f32.mrb[4].mxu1  ;;  %v8400_v61 = vld [vmem:[%s11601_s3 + $0x2a8] sm:$0xff]  }
 0x133   : > { %v9997_v35 = vcombine.low %v1994_v29, %v2004_v63  ;;  %v10008_v32 = vpop.f32.mrb[5].mxu1  ;;  %v1488_v29 = vsel %vm9891_vm13, %v1486_v23, %v1487_v16  ;;  %v2079_v63 = vsel %vm9891_vm13, %v6649_v48, %v2078_v10  ;;  %v2082_v23 = vsel %vm9891_vm13, %v2080_v6, %v2081_v4  ;;  %v8380_v10 = vld [vmem:[%s11601_s3 + $0x280] sm:$0xff]  }
 0x134   : > { %4147 = vmatmul.mubr.bf16.gmra.mrb[68].mxu0 %v9149_v45  ;;  %v8729_v45 = vld [vmem:[#allocation2 + $0x34] sm:$0xf]  ;;  %v10018_v1 = vpop.f32.mrb[6].mxu1  ;;  %v2085_v16 = vrot.slane %v8730_v58, 5  ;;  %v6779_v2 = vcombine.low %v1485_v39, %v1488_v29  ;;  %v10040_v48 = vcombine.low %v2079_v63, %v2082_v23  ;;  %v8732_v39 = vld [vmem:[#allocation2 + $0x2c] sm:$0x1] }
 0x135   : > { %11723 = vst [vmem:[#allocation38_spill] sm:$0xff] %v9997_v35  ;;  %3647 = vmatprep.mubr.bf16.mxu1 %v9997_v35  ;;  %4154 = vmatprep.mubr.bf16.mxu0 %v6778_v40  ;;  %v1491_v28 = vrot.slane %v8729_v45, 5  ;;  %v1398_v40 = vld [vmem:[#allocation2 + $0x30] sm:$0xe]  ;;  %v10024_v42 = vpop.f32.mrb[7].mxu1  ;;  %v10030_v45 = vpop.f32.mrb[8].mxu0 }
 0x136   : > { %3648 = vmatmul.mubr.bf16.gmra.mrb[60].mxu1 %v9990_v46  ;;  %7813 = vmatpush3.bf16.msra.mxu0 %v8387_v44  ;;  %v2007_v44 = vld [vmem:[#allocation2 + $0x24] sm:$0xe]  ;;  %v8731_v46 = vld [vmem:[#allocation2 + $0x38] sm:$0x1]  ;;  %v10035_v53 = vpop.f32.mrb[9].mxu0  ;;  %11725 = vst [vmem:[#allocation40_spill] sm:$0xff] %v10040_v48 }
 0x137   : > { %4299 = vmatprep.mubr.bf16.mxu1 %v9999_v33  ;;  %7814 = vmatprep.subr.bf16.mxu0 %v8389_v54  ;;  %v6636_v33 = vrot.slane %v1398_v40, 9  ;;  %v1493_v54 = vrot.slane %v1491_v28, 4  ;;  %v1494_v13 = vrot.slane %v8731_v46, 5  ;;  %v8395_v35 = vld [vmem:[%s11601_s3 + $0x220] sm:$0xff]   ;;  %v10042_v6 = vpop.f32.mrb[10].mxu0  ;;  %v6650_v4 = vrot.slane %v2007_v44, 9 }
 0x138   : > { %v2087_v46 = vrot.slane %v2085_v16, 4  ;;  %v2088_v29 = vrot.slane %v8732_v39, 5  ;;  %v8397_v40 = vld [vmem:[%s11601_s3 + $0x268] sm:$0xff]   ;;  %v10051_v58 = vpop.f32.mrb[11].mxu0  ;;  %v8733_v63 = vld [vmem:[#allocation2 + $0x40] sm:$0xf] }
 0x139   : > { %v1498_v23 = vrot.slane %v8733_v63, 5  ;;  %v8399_v44 = vld [vmem:[%s11601_s3 + $0x228] sm:$0xff]   ;;  %v10061_v39 = vpop.f32.mrb[8].mxu1 }
 0x13a   : > { %7815 = vmatpush3.bf16.msra.mxu0 %v8391_v49  ;;  %v8382_v49 = vld [vmem:[%s11601_s3 + $0x2c8] sm:$0xff]  }
 0x13b   : > { %7816 = vmatprep.subr.bf16.mxu0 %v8393_v27  ;;  %v1495_v27 = vsel %vm9891_vm13, %v1493_v54, %v1494_v13  ;;  %v8401_v13 = vld [vmem:[%s11601_s3 + $0x270] sm:$0xff]   ;;  %v2089_v54 = vsel %vm9891_vm13, %v2087_v46, %v2088_v29  ;;  %v1500_v25 = vrot.slane %v1498_v23, 4  ;;  %v10086_v29 = vpop.f32.mrb[12].mxu0 }
 0x13c   : > { %4155 = vmatmul.mubr.bf16.gmra.mrb[72].mxu0 %v9201_v51  ;;  %v1492_v51 = vsel %vm9891_vm13, %v6636_v33, %v1491_v28  ;;  %v1399_v33 = vld [vmem:[#allocation2 + $0x3c] sm:$0xe]  ;;  %v10070_v28 = vpop.f32.mrb[9].mxu1  ;;  %v8403_v46 = vld [vmem:[%s11601_s3 + $0x230] sm:$0xff]  }
 0x13d   : > { %4162 = vmatprep.mubr.bf16.mxu0 %v6779_v2  ;;  %v8384_v2 = vld [vmem:[%s11601_s3 + $0x288] sm:$0xff]   ;;  %v10079_v22 = vpop.f32.mrb[10].mxu1  ;;  %v6780_v41 = vcombine.low %v1492_v51, %v1495_v27  ;;  %v6637_v52 = vrot.slane %v1399_v33, 9  ;;  %v10093_v51 = vpop.f32.mrb[13].mxu0  ;;  %v8736_v33 = vld [vmem:[#allocation2 + $0x38] sm:$0x1] }
 0x13e   : > { %4300 = vmatmul.mubr.bf16.vlgmr.msra.gmra.mrb[64].mxu1 %v9129_v5  ;;  %7817 = vmatpush3.bf16.msra.mxu0 %v8395_v35  ;;  %v2086_v35 = vsel %vm9891_vm13, %v6650_v4, %v2085_v16  ;;  %v2008_v5 = vld [vmem:[#allocation2 + $0x30] sm:$0xe]  ;;  %v10081_v17 = vpop.f32.mrb[11].mxu1  ;;  %v8735_v16 = vld [vmem:[#allocation2 + $0x44] sm:$0x1] }
 0x13f   : > { %7921 = vmatpush3.bf16.msra.mxu1 %v8380_v10  ;;  %4307 = vmatprep.mubr.bf16.mxu1 %v10040_v48  ;;  %v8734_v10 = vld [vmem:[#allocation2 + $0x34] sm:$0xf]  ;;  %v1501_v4 = vrot.slane %v8735_v16, 5  ;;  %v6651_v27 = vrot.slane %v2008_v5, 9  ;;  %v1499_v5 = vsel %vm9891_vm13, %v6637_v52, %v1498_v23  ;;  %v8409_v52 = vld [vmem:[%s11601_s3 + $0x340] sm:$0xff]  }
 0x140   : > { %7922 = vmatprep.subr.bf16.mxu1 %v8382_v49  ;;  %v2092_v63 = vrot.slane %v8734_v10, 5  ;;  %v8386_v48 = vld [vmem:[%s11601_s3 + $0x2d0] sm:$0xff]   ;;  %7818 = vmatprep.subr.bf16.mxu0 %v8397_v40  ;;  %v10088_v49 = vcombine.low %v2086_v35, %v2089_v54  ;;  %v2095_v10 = vrot.slane %v8736_v33, 5  ;;  %v8390_v35 = vld [vmem:[%s11601_s3 + $0x2d8] sm:$0xff]   ;;  %v10099_v54 = vpop.f32.mrb[14].mxu0 }
 0x141   : > { %v8388_v40 = vld [vmem:[%s11601_s3 + $0x290] sm:$0xff]   ;;  %v8407_v33 = vld [vmem:[%s11601_s3 + $0x238] sm:$0xff]  }
 0x142   : > { %7819 = vmatpush3.bf16.msra.mxu0 %v8399_v44  ;;  %11726 = vst [vmem:[#allocation41_spill] sm:$0xff] %v10088_v49  ;;  %v2094_v44 = vrot.slane %v2092_v63, 4 }
 0x143   : > { %7923 = vmatpush3.bf16.msra.mxu1 %v8384_v2  ;;  %7820 = vmatprep.subr.bf16.mxu0 %v8401_v13  ;;  %v8405_v2 = vld [vmem:[%s11601_s3 + $0x278] sm:$0xff]   ;;  %v10104_v13 = vpop.f32.mrb[15].mxu0 }
 0x144   : > { %4163 = vmatmul.mubr.bf16.gmra.mrb[76].mxu0 %v9245_v38  ;;  %7924 = vmatprep.subr.bf16.mxu1 %v8386_v48  ;;  %v1502_v38 = vsel %vm9891_vm13, %v1500_v25, %v1501_v4  ;;  %v8737_v48 = vld [vmem:[#allocation2 + $0x4c] sm:$0xf]  ;;  %v2093_v25 = vsel %vm9891_vm13, %v6651_v27, %v2092_v63  ;;  %v2096_v23 = vsel %vm9891_vm13, %v2094_v44, %v2095_v10  ;;  %v2009_v4 = vld [vmem:[#allocation2 + $0x3c] sm:$0xe]  ;;  %v1508_v44 = vrot.slane %v8739_v9, 5 }
 0x145   : > { %4170 = vmatprep.mubr.bf16.mxu0 %v6780_v41  ;;  %v1505_v16 = vrot.slane %v8737_v48, 5  ;;  %v1400_v41 = vld [vmem:[#allocation2 + $0x48] sm:$0xe]  ;;  %v7493_v10 = vadd.f32 %v9974_v60, %v9970_v3  ;;  %v2102_v9 = vrot.slane %v8740_v62, 5 }
 0x146   : > { %4308 = vmatmul.mubr.bf16.gmra.mrb[68].mxu1 %v9177_v19  ;;  %7821 = vmatpush3.bf16.msra.mxu0 %v8403_v46  ;;  %v8392_v19 = vld [vmem:[%s11601_s3 + $0x298] sm:$0xff]   ;;  %v8738_v46 = vld [vmem:[#allocation2 + $0x40] sm:$0xf]  ;;  %v6638_v63 = vrot.slane %v1400_v41, 9  ;;  %v6653_v41 = vrot.slane %v2010_v20, 9 }
 0x147   : > { %4315 = vmatprep.mubr.bf16.mxu1 %v10088_v49  ;;  %7925 = vmatpush3.bf16.msra.mxu1 %v8388_v40  ;;  %v2099_v48 = vrot.slane %v8738_v46, 5  ;;  %v8394_v40 = vld [vmem:[%s11601_s3 + $0x2e0] sm:$0xff]   ;;  %v6781_v49 = vcombine.low %v1499_v5, %v1502_v38  ;;  %v1507_v27 = vrot.slane %v1505_v16, 4  ;;  %v6652_v46 = vrot.slane %v2009_v4, 9  ;;  %v8741_v5 = vld [vmem:[#allocation2 + $0x58] sm:$0xf] }
 0x148   : > { %7926 = vmatprep.subr.bf16.mxu1 %v8390_v35  ;;  %7822 = vmatprep.subr.bf16.mxu0 %v8405_v2  ;;  %v10134_v35 = vcombine.low %v2093_v25, %v2096_v23  ;;  %v8396_v2 = vld [vmem:[%s11601_s3 + $0x2a0] sm:$0xff]   ;;  %v3533_v3 = vadd.f32 %v7493_v10, %v7381_v55  ;;  %v1506_v60 = vsel %vm9891_vm13, %v6638_v63, %v1505_v16  ;;  %v8743_v4 = vld [vmem:[#allocation2 + $0x5c] sm:$0x1] }
 0x149   : > { %v2101_v47 = vrot.slane %v2099_v48, 4  ;;  %v1509_v55 = vsel %vm9891_vm13, %v1507_v27, %v1508_v44  ;;  %v7499_v16 = vadd.f32 %v10024_v42, %v10018_v1  ;;  %v8404_v1 = vld [vmem:[%s11601_s3 + $0x2b0] sm:$0xff]   ;;  %v7390_v42 = vadd.f32 %v10035_v53, %v10030_v45  ;;  %v8410_v20 = vld [vmem:[%s11601_s3 + $0x3c0] sm:$0xff]  }
 0x14a   : > { %7823 = vmatpush3.bf16.msra.mxu0 %v8407_v33  ;;  %8459 = vtanh.f32 %v3533_v3  ;;  %v8402_v33 = vld [vmem:[%s11601_s3 + $0x2f0] sm:$0xff]   ;;  %v7393_v27 = vadd.f32 %v10051_v58, %v10042_v6  ;;  %v7502_v44 = vadd.f32 %v10070_v28, %v10061_v39  ;;  %v1402_v6 = vld [vmem:[#allocation2 + $0x60] sm:$0xe]  ;;  %v8745_v58 = vld [vmem:[#allocation2 + $0x64] sm:$0xf]  ;;  %v7505_v28 = vadd.f32 %v10081_v17, %v10079_v22 }
 0x14b   : > { %7927 = vmatpush3.bf16.msra.mxu1 %v8392_v19  ;;  %8032 = vmatprep.subr.bf16.mxu0 %v8409_v52  ;;  %v7384_v19 = vadd.f32 %v9982_v34, %v9976_v7  ;;  %v1512_v7 = vrot.slane %v8741_v5, 5  ;;  %v1401_v34 = vld [vmem:[#allocation2 + $0x54] sm:$0xe]  ;;  %v6782_v52 = vcombine.low %v1506_v60, %v1509_v55  ;;  %v1519_v39 = vrot.slane %v8745_v58, 5  ;;  %v8746_v22 = vld [vmem:[#allocation2 + $0x58] sm:$0xf] }
 0x14c   : > { %4171 = vmatmul.mubr.bf16.gmra.mrb[80].mxu0 %v9339_v18  ;;  %7928 = vmatprep.subr.bf16.mxu1 %v8394_v40  ;;  %v7496_v18 = vadd.f32 %v10008_v32, %v10005_v36  ;;  %v2100_v36 = vsel %vm9891_vm13, %v6652_v46, %v2099_v48  ;;  %v2103_v32 = vsel %vm9891_vm13, %v2101_v47, %v2102_v9  ;;  %v6639_v25 = vrot.slane %v1401_v34, 9  ;;  %v8744_v46 = vld [vmem:[#allocation2 + $0x50] sm:$0x1]  ;;  %v8458_v47 = vpop.eup %8457  ;;  %v2011_v17 = vld [vmem:[#allocation2 + $0x54] sm:$0xe] }
 0x14d   : > { %4178 = vmatprep.mubr.bf16.mxu0 %v6781_v49  ;;  %v8742_v49 = vld [vmem:[#allocation2 + $0x4c] sm:$0xf]  ;;  %v1514_v23 = vrot.slane %v1512_v7, 4  ;;  %v1515_v48 = vrot.slane %v8743_v4, 5  ;;  %v3541_v40 = vadd.f32 %v7499_v16, %v7387_v26  ;;  %v10171_v63 = vcombine.low %v2100_v36, %v2103_v32  ;;  %3689 = vst.msk [vmem:[%s10204_s13] sm:$0xff] %vm3688_vm14, %v8458_v47 }
 0x14e   : > { %4316 = vmatmul.mubr.bf16.gmra.mrb[72].mxu1 %v9226_v14  ;;  %v3538_v24 = vadd.f32 %v7496_v18, %v7384_v19  ;;  %v2106_v38 = vrot.slane %v8742_v49, 5  ;;  %v3546_v53 = vadd.f32 %v7502_v44, %v7390_v42  ;;  %v1513_v45 = vsel %vm9891_vm13, %v6639_v25, %v1512_v7  ;;  %v8747_v34 = vld [vmem:[#allocation2 + $0x68] sm:$0x1]  ;;  %v8749_v44 = vld [vmem:[#allocation2 + $0x70] sm:$0xf] }
 0x14f   : > { %4323 = vmatprep.mubr.bf16.mxu1 %v10134_v35  ;;  %7929 = vmatpush3.bf16.msra.mxu1 %v8396_v2  ;;  %v2109_v2 = vrot.slane %v8744_v46, 5  ;;  %v7396_v9 = vadd.f32 %v10093_v51, %v10086_v29  ;;  %v2113_v26 = vrot.slane %v8746_v22, 5  ;;  %v3549_v18 = vadd.f32 %v7505_v28, %v7393_v27  ;;  %v1403_v27 = vld [vmem:[#allocation2 + $0x6c] sm:$0xe]  ;;  %v2012_v58 = vld [vmem:[#allocation2 + $0x60] sm:$0xe] }
 0x150   : > { %7930 = vmatprep.subr.bf16.mxu1 %v8398_v43  ;;  %8461 = vtanh.f32 %v3538_v24  ;;  %v2108_v10 = vrot.slane %v2106_v38, 4  ;;  %v2107_v62 = vsel %vm9891_vm13, %v6653_v41, %v2106_v38  ;;  %v8408_v43 = vld [vmem:[%s11601_s3 + $0x2b8] sm:$0xff]   ;;  %v7399_v29 = vadd.f32 %v10104_v13, %v10099_v54  ;;  %v8751_v22 = vld [vmem:[#allocation2 + $0x74] sm:$0x1] }
 0x151   : > { %8463 = vtanh.f32 %v3541_v40  ;;  %v6640_v55 = vrot.slane %v1402_v6, 9  ;;  %v1521_v7 = vrot.slane %v1519_v39, 4  ;;  %v6654_v13 = vrot.slane %v2011_v17, 9 }
 0x152   : > { %8465 = vtanh.f32 %v3546_v53  ;;  %v2110_v19 = vsel %vm9891_vm13, %v2108_v10, %v2109_v2  ;;  %v7506_v51 = vpop.f32.mrb[12].mxu1  ;;  %v2115_v16 = vrot.slane %v2113_v26, 4  ;;  %v1526_v10 = vrot.slane %v8749_v44, 5  ;;  %v8750_v53 = vld [vmem:[#allocation2 + $0x64] sm:$0xf] }
 0x153   : > { %7931 = vmatpush3.bf16.msra.mxu1 %v8400_v61  ;;  %v7507_v5 = vpop.f32.mrb[13].mxu1  ;;  %v1522_v61 = vrot.slane %v8747_v34, 5  ;;  %8467 = vtanh.f32 %v3549_v18  ;;  %v10215_v54 = vcombine.low %v2107_v62, %v2110_v19  ;;  %v1520_v4 = vsel %vm9891_vm13, %v6640_v55, %v1519_v39 }
 0x154   : > { %4179 = vmatmul.mubr.bf16.gmra.mrb[84].mxu0 %v9392_v31  ;;  %7932 = vmatprep.subr.bf16.mxu1 %v8402_v33  ;;  %v1516_v31 = vsel %vm9891_vm13, %v1514_v23, %v1515_v48  ;;  %v8460_v3 = vpop.eup %8459  ;;  %v7508_v24 = vadd.f32 %v7507_v5, %v7506_v51  ;;  %v7509_v36 = vpop.f32.mrb[14].mxu1  ;;  %v8748_v33 = vld [vmem:[#allocation2 + $0x5c] sm:$0x1]  ;;  %v2176_v47 = vrot.slane %v9945_v57, 5  ;;  %v2179_v19 = vrot.slane %v9947_v0, 5 }
 0x155   : > { %4186 = vmatprep.mubr.bf16.mxu0 %v6782_v52  ;;  %v6783_v60 = vcombine.low %v1513_v45, %v1516_v31  ;;  %3690 = vst.msk [vmem:[%s10204_s13 + $0x8] sm:$0xff] %vm3688_vm14, %v8460_v3  ;;  %v7510_v49 = vpop.f32.mrb[15].mxu1  ;;  %v2116_v41 = vrot.slane %v8748_v33, 5  ;;  %v2120_v45 = vrot.slane %v8750_v53, 5  ;;  %v1528_v17 = vrot.slane %v1526_v10, 4 }
 0x156   : > { %4324 = vmatmul.mubr.bf16.gmra.mrb[76].mxu1 %v9320_v12  ;;  %v7400_v38 = vpop.f32.mrb[16].mxu0  ;;  %v3554_v52 = vadd.f32 %v7508_v24, %v7396_v9  ;;  %v7511_v25 = vadd.f32 %v7510_v49, %v7509_v36  ;;  %v2178_v55 = vrot.slane %v2176_v47, 4  ;;  %v8755_v53 = vld [vmem:[#allocation2 + $0x80] sm:$0x1] }
 0x157   : > { %4331 = vmatprep.mubr.bf16.mxu1 %v10171_v63  ;;  %7933 = vmatpush3.bf16.msra.mxu1 %v8404_v1  ;;  %v7401_v23 = vpop.f32.mrb[17].mxu0  ;;  %v2020_v1 = vld [vmem:[#allocation2 + $0xc0] sm:$0xe]  ;;  %v2117_v6 = vsel %vm9891_vm13, %v2115_v16, %v2116_v41  ;;  %v2122_v0 = vrot.slane %v2120_v45, 4 }
 0x158   : > { %7934 = vmatprep.subr.bf16.mxu1 %v8406_v37  ;;  %v7402_v48 = vadd.f32 %v7401_v23, %v7400_v38  ;;  %v7403_v40 = vpop.f32.mrb[18].mxu0  ;;  %8469 = vtanh.f32 %v3554_v52  ;;  %v3557_v46 = vadd.f32 %v7511_v25, %v7399_v29  ;;  %v2114_v37 = vsel %vm9891_vm13, %v6654_v13, %v2113_v26  ;;  %v1404_v52 = vld [vmem:[#allocation2 + $0x78] sm:$0xe] }
 0x159   : > { %v7404_v2 = vpop.f32.mrb[19].mxu0  ;;  %v6663_v28 = vrot.slane %v2020_v1, 9  ;;  %v1529_v26 = vrot.slane %v8751_v22, 5  ;;  %v10236_v51 = vcombine.low %v2114_v37, %v2117_v6  ;;  %v2180_v49 = vsel %vm9891_vm13, %v2178_v55, %v2179_v19  ;;  %v8754_v1 = vld [vmem:[#allocation2 + $0x70] sm:$0xf] }
 0x15a   : > { %v8462_v32 = vpop.eup %8461  ;;  %v7405_v31 = vadd.f32 %v7404_v2, %v7403_v40  ;;  %8471 = vtanh.f32 %v3557_v46  ;;  %v7512_v39 = vpop.f32.mrb[16].mxu1  ;;  %v6642_v2 = vrot.slane %v1404_v52, 9  ;;  %v2014_v22 = vld [vmem:[#allocation2 + $0x78] sm:$0xe]  ;;  %v8759_v55 = vld [vmem:[#allocation2 + $0x8c] sm:$0x1] }
 0x15b   : > { %7935 = vmatpush3.bf16.msra.mxu1 %v8408_v43  ;;  %3691 = vst.msk [vmem:[%s10204_s13 + $0x10] sm:$0xff] %vm3688_vm14, %v8462_v32  ;;  %v8464_v42 = vpop.eup %8463  ;;  %v6641_v43 = vrot.slane %v1403_v27, 9  ;;  %v7513_v3 = vpop.f32.mrb[17].mxu1  ;;  %11727 = vst [vmem:[#allocation42_spill] sm:$0xff] %v10236_v51  ;;  %v2177_v57 = vsel %vm9891_vm13, %v6663_v28, %v2176_v47  ;;  %v8753_v32 = vld [vmem:[#allocation2 + $0x7c] sm:$0xf] }
 0x15c   : > { %4187 = vmatmul.mubr.bf16.gmra.mrb[88].mxu0 %v9465_v8  ;;  %8144 = vmatprep.subr.bf16.mxu1 %v8410_v20  ;;  %v1523_v8 = vsel %vm9891_vm13, %v1521_v7, %v1522_v61  ;;  %3692 = vst.msk [vmem:[%s10204_s13 + $0x18] sm:$0xff] %vm3688_vm14, %v8464_v42  ;;  %v8466_v62 = vpop.eup %8465  ;;  %v7514_v18 = vadd.f32 %v7513_v3, %v7512_v39  ;;  %v7515_v29 = vpop.f32.mrb[18].mxu1  ;;  %v6655_v20 = vrot.slane %v2012_v58, 9  ;;  %v8752_v7 = vld [vmem:[#allocation2 + $0x68] sm:$0x1]  ;;  %v1533_v13 = vrot.slane %v8753_v32, 5 }
 0x15d   : > { %4194 = vmatprep.mubr.bf16.mxu0 %v6783_v60  ;;  %v6784_v9 = vcombine.low %v1520_v4, %v1523_v8  ;;  %3693 = vst.msk [vmem:[%s10204_s13 + $0x20] sm:$0xff] %vm3688_vm14, %v8466_v62  ;;  %v7516_v60 = vpop.f32.mrb[19].mxu1  ;;  %v8468_v5 = vpop.eup %8467  ;;  %v2123_v34 = vrot.slane %v8752_v7, 5  ;;  %v1527_v36 = vsel %vm9891_vm13, %v6641_v43, %v1526_v10  ;;  %v10250_v33 = vcombine.low %v2177_v57, %v2180_v49  ;;  %v2013_v27 = vld [vmem:[#allocation2 + $0x6c] sm:$0xe] }
 0x15e   : > { %4332 = vmatmul.mubr.bf16.gmra.mrb[80].mxu1 %v9356_v56  ;;  %v3562_v61 = vadd.f32 %v7514_v18, %v7402_v48  ;;  %v7517_v24 = vadd.f32 %v7516_v60, %v7515_v29  ;;  %3694 = vst.msk [vmem:[%s10204_s13 + $0x28] sm:$0xff] %vm3688_vm14, %v8468_v5  ;;  %v2121_v48 = vsel %vm9891_vm13, %v6655_v20, %v2120_v45  ;;  %v2127_v42 = vrot.slane %v8754_v1, 5  ;;  %v8756_v39 = vld [vmem:[#allocation2 + $0x74] sm:$0x1]  ;;  %v1405_v3 = vld [vmem:[#allocation2 + $0x84] sm:$0xe] }
 0x15f   : > { %4339 = vmatprep.mubr.bf16.mxu1 %v10215_v54  ;;  %11728 = vst [vmem:[#allocation43_spill] sm:$0xff] %v10250_v33  ;;  %v2124_v40 = vsel %vm9891_vm13, %v2122_v0, %v2123_v34  ;;  %v1535_v37 = vrot.slane %v1533_v13, 4  ;;  %v6656_v6 = vrot.slane %v2013_v27, 9  ;;  %v2130_v28 = vrot.slane %v8756_v39, 5  ;;  %v8762_v1 = vld [vmem:[#allocation2 + $0x88] sm:$0xf] }
 0x160   : > { %v7406_v38 = vpop.f32.mrb[20].mxu0  ;;  %8473 = vtanh.f32 %v3562_v61  ;;  %v3565_v16 = vadd.f32 %v7517_v24, %v7405_v31  ;;  %v1536_v31 = vrot.slane %v8755_v53, 5  ;;  %v10263_v45 = vcombine.low %v2121_v48, %v2124_v40  ;;  %v8760_v61 = vld [vmem:[#allocation2 + $0x80] sm:$0x1] }
 0x161   : > { %v7407_v41 = vpop.f32.mrb[21].mxu0  ;;  %v2129_v58 = vrot.slane %v2127_v42, 4  ;;  %v1534_v47 = vsel %vm9891_vm13, %v6642_v2, %v1533_v13  ;;  %v2128_v19 = vsel %vm9891_vm13, %v6656_v6, %v2127_v42  ;;  %v6643_v60 = vrot.slane %v1405_v3, 9  ;;  %v11731_v13 = vld [vmem:[#allocation16_spill] sm:$0xff] }
 0x162   : > { %v10253_v25 = vadd.f32 %v7407_v41, %v7406_v38  ;;  %v7409_v23 = vpop.f32.mrb[22].mxu0  ;;  %v8470_v4 = vpop.eup %8469  ;;  %8475 = vtanh.f32 %v3565_v16  ;;  %11729 = vst [vmem:[#allocation44_spill] sm:$0xff] %v10263_v45  ;;  %v1537_v62 = vsel %vm9891_vm13, %v1535_v37, %v1536_v31  ;;  %v1543_v5 = vrot.slane %v8759_v55, 5  ;;  %v8761_v16 = vld [vmem:[#allocation2 + $0x94] sm:$0xf] }
 0x163   : > { %v7410_v8 = vpop.f32.mrb[23].mxu0  ;;  %3695 = vst.msk [vmem:[%s10204_s13 + $0x30] sm:$0xff] %vm3688_vm14, %v8470_v4  ;;  %v6786_v29 = vcombine.low %v1534_v47, %v1537_v62  ;;  %v6657_v7 = vrot.slane %v2014_v22, 9  ;;  %v2137_v24 = vrot.slane %v8760_v61, 5  ;;  %v1547_v41 = vrot.slane %v8761_v16, 5 }
 0x164   : > { %4195 = vmatmul.mubr.bf16.gmra.mrb[92].mxu0 %v9515_v21  ;;  %v1530_v21 = vsel %vm9891_vm13, %v1528_v17, %v1529_v26  ;;  %v10261_v10 = vadd.f32 %v7410_v8, %v7409_v23  ;;  %v8472_v46 = vpop.eup %8471  ;;  %v2131_v17 = vsel %vm9891_vm13, %v2129_v58, %v2130_v28  ;;  %v8758_v26 = vld [vmem:[#allocation2 + $0x7c] sm:$0xf]  ;;  %v2141_v42 = vrot.slane %v8762_v1, 5  ;;  %v8763_v58 = vld [vmem:[#allocation2 + $0x98] sm:$0x1] }
 0x165   : > { %4202 = vmatprep.mubr.bf16.mxu0 %v6784_v9  ;;  %v6785_v44 = vcombine.low %v1527_v36, %v1530_v21  ;;  %3696 = vst.msk [vmem:[%s10204_s13 + $0x38] sm:$0xff] %vm3688_vm14, %v8472_v46  ;;  %v8757_v9 = vld [vmem:[#allocation2 + $0x88] sm:$0xf]  ;;  %v2134_v18 = vrot.slane %v8758_v26, 5  ;;  %v10280_v0 = vcombine.low %v2128_v19, %v2131_v17  ;;  %v1406_v21 = vld [vmem:[#allocation2 + $0x90] sm:$0xe] }
 0x166   : > { %4340 = vmatmul.mubr.bf16.gmra.mrb[84].mxu1 %v9446_v30  ;;  %v1540_v43 = vrot.slane %v8757_v9, 5  ;;  %v2015_v46 = vld [vmem:[#allocation2 + $0x84] sm:$0xe]  ;;  %v6644_v37 = vrot.slane %v1406_v21, 9  ;;  %v1549_v6 = vrot.slane %v1547_v41, 4  ;;  %v1550_v39 = vrot.slane %v8763_v58, 5 }
 0x167   : > { %4347 = vmatprep.mubr.bf16.mxu1 %v10236_v51  ;;  %11730 = vst [vmem:[#allocation45_spill] sm:$0xff] %v10280_v0  ;;  %v2136_v34 = vrot.slane %v2134_v18, 4  ;;  %v2143_v3 = vrot.slane %v2141_v42, 4  ;;  %v11734_v17 = vld [vmem:[#allocation18_spill] sm:$0xff]  ;;  %v1407_v26 = vld [vmem:[#allocation2 + $0x9c] sm:$0xe] }
 0x168   : > { %v1542_v57 = vrot.slane %v1540_v43, 4  ;;  %v1541_v49 = vsel %vm9891_vm13, %v6643_v60, %v1540_v43  ;;  %v11733_v43 = vld [vmem:[#allocation21_spill] sm:$0xff]  ;;  %v1548_v22 = vsel %vm9891_vm13, %v6644_v37, %v1547_v41  ;;  %v8766_v55 = vld [vmem:[#allocation2 + $0x94] sm:$0xf] }
 0x169   : > { %v2138_v40 = vsel %vm9891_vm13, %v2136_v34, %v2137_v24  ;;  %v6645_v34 = vrot.slane %v1407_v26, 9  ;;  %v8767_v24 = vld [vmem:[#allocation2 + $0xa4] sm:$0x1] }
 0x16a   : > { %v1544_v38 = vsel %vm9891_vm13, %v1542_v57, %v1543_v5  ;;  %v2016_v57 = vld [vmem:[#allocation2 + $0x90] sm:$0xe]  ;;  %v2148_v5 = vrot.slane %v8766_v55, 5 }
 0x16b   : > { %v6787_v2 = vcombine.low %v1541_v49, %v1544_v38  ;;  %v6659_v38 = vrot.slane %v2016_v57, 9  ;;  %v11739_v57 = vld [vmem:[#allocation28_spill] sm:$0xff] }
 0x16c   : > { %4203 = vmatmul.mubr.bf16.gmra.mrb[96].mxu0 %v9583_v11  ;;  %v8474_v11 = vpop.eup %8473 }
 0x16d   : > { %4210 = vmatprep.mubr.bf16.mxu0 %v6785_v44  ;;  %3697 = vst.msk [vmem:[%s10204_s13 + $0x40] sm:$0xff] %vm3688_vm14, %v8474_v11  ;;  %v8476_v20 = vpop.eup %8475  ;;  %v8764_v11 = vld [vmem:[#allocation2 + $0x8c] sm:$0x1] }
 0x16e   : > { %4348 = vmatmul.mubr.bf16.gmra.mrb[88].mxu1 %v9509_v59  ;;  %3698 = vst.msk [vmem:[%s10204_s13 + $0x48] sm:$0xff] %vm3688_vm14, %v8476_v20  ;;  %v2144_v19 = vrot.slane %v8764_v11, 5  ;;  %v8770_v11 = vld [vmem:[#allocation2 + $0xa0] sm:$0xf] }
 0x16f   : > { %4355 = vmatprep.mubr.bf16.mxu1 %v10263_v45 }
 0x170   : > { %v7518_v36 = vpop.f32.mrb[20].mxu1  ;;  %v2145_v60 = vsel %vm9891_vm13, %v2143_v3, %v2144_v19  ;;  %v2155_v19 = vrot.slane %v8770_v11, 5 }
 0x171   : > { %v7519_v32 = vpop.f32.mrb[21].mxu1 }
 0x172   : > { %v7520_v52 = vadd.f32 %v7519_v32, %v7518_v36  ;;  %v7521_v23 = vpop.f32.mrb[22].mxu1  ;;  %v7412_v48 = vpop.f32.mrb[24].mxu0  ;;  %v1557_v36 = vrot.slane %v8767_v24, 5 }
 0x173   : > { %v7522_v4 = vpop.f32.mrb[23].mxu1  ;;  %v7413_v44 = vpop.f32.mrb[25].mxu0 }
 0x174   : > { %4211 = vmatmul.mubr.bf16.gmra.mrb[100].mxu0 %v9628_v15  ;;  %v2135_v15 = vsel %vm9891_vm13, %v6657_v7, %v2134_v18  ;;  %v3570_v8 = vadd.f32 %v7520_v52, %v10253_v25  ;;  %v7523_v27 = vadd.f32 %v7522_v4, %v7521_v23  ;;  %v7414_v53 = vadd.f32 %v7413_v44, %v7412_v48  ;;  %v7415_v31 = vpop.f32.mrb[26].mxu0  ;;  %v8765_v18 = vld [vmem:[#allocation2 + $0xa0] sm:$0xf]  ;;  %v11736_v52 = vld [vmem:[#allocation24_spill] sm:$0xff] }
 0x175   : > { %4218 = vmatprep.mubr.bf16.mxu0 %v6786_v29  ;;  %v7416_v47 = vpop.f32.mrb[27].mxu0  ;;  %v10297_v62 = vcombine.low %v2135_v15, %v2138_v40  ;;  %v6658_v25 = vrot.slane %v2015_v46, 9  ;;  %v1554_v29 = vrot.slane %v8765_v18, 5  ;;  %v2150_v23 = vrot.slane %v2148_v5, 4  ;;  %v8768_v15 = vld [vmem:[#allocation2 + $0x98] sm:$0x1] }
 0x176   : > { %4356 = vmatmul.mubr.bf16.gmra.mrb[92].mxu1 %v11731_v13  ;;  %8477 = vtanh.f32 %v3570_v8  ;;  %v3573_v28 = vadd.f32 %v7523_v27, %v10261_v10  ;;  %v7417_v9 = vadd.f32 %v7416_v47, %v7415_v31  ;;  %v1551_v10 = vsel %vm9891_vm13, %v1549_v6, %v1550_v39  ;;  %v8769_v31 = vld [vmem:[#allocation2 + $0xac] sm:$0xf] }
 0x177   : > { %4363 = vmatprep.mubr.bf16.mxu1 %v10280_v0  ;;  %11732 = vst [vmem:[#allocation16_spill] sm:$0xff] %v10297_v62  ;;  %v2142_v20 = vsel %vm9891_vm13, %v6658_v25, %v2141_v42  ;;  %v6788_v7 = vcombine.low %v1548_v22, %v1551_v10  ;;  %v1556_v61 = vrot.slane %v1554_v29, 4  ;;  %v2151_v4 = vrot.slane %v8768_v15, 5  ;;  %v2017_v10 = vld [vmem:[#allocation2 + $0x9c] sm:$0xe] }
 0x178   : > { %8479 = vtanh.f32 %v3573_v28  ;;  %v10310_v49 = vcombine.low %v2142_v20, %v2145_v60  ;;  %v1555_v42 = vsel %vm9891_vm13, %v6645_v34, %v1554_v29  ;;  %v1561_v6 = vrot.slane %v8769_v31, 5  ;;  %v8771_v29 = vld [vmem:[#allocation2 + $0xb0] sm:$0x1]  ;;  %v8774_v15 = vld [vmem:[#allocation2 + $0xac] sm:$0xf] }
 0x179   : > { %v1558_v37 = vsel %vm9891_vm13, %v1556_v61, %v1557_v36  ;;  %v2149_v47 = vsel %vm9891_vm13, %v6659_v38, %v2148_v5  ;;  %v2152_v3 = vsel %vm9891_vm13, %v2150_v23, %v2151_v4  ;;  %v1564_v20 = vrot.slane %v8771_v29, 5  ;;  %v11740_v61 = vld [vmem:[#allocation23_spill] sm:$0xff]  ;;  %v2018_v23 = vld [vmem:[#allocation2 + $0xa8] sm:$0xe] }
 0x17a   : > { %11735 = vst [vmem:[#allocation21_spill] sm:$0xff] %v10310_v49  ;;  %v1563_v18 = vrot.slane %v1561_v6, 4  ;;  %v10327_v60 = vcombine.low %v2149_v47, %v2152_v3  ;;  %v6660_v55 = vrot.slane %v2017_v10, 9  ;;  %v2157_v5 = vrot.slane %v2155_v19, 4  ;;  %v1409_v36 = vld [vmem:[#allocation2 + $0xb4] sm:$0xe] }
 0x17b   : > { %v2162_v4 = vrot.slane %v8774_v15, 5  ;;  %v6661_v47 = vrot.slane %v2018_v23, 9  ;;  %v11743_v29 = vld [vmem:[#allocation26_spill] sm:$0xff]  ;;  %v10362_v23 = vld [vmem:[#allocation2 + $0x1c] sm:$0xf] }
 0x17c   : > { %4219 = vmatmul.mubr.bf16.gmra.mrb[104].mxu0 %v11733_v43  ;;  %v1408_v43 = vld [vmem:[#allocation2 + $0xa8] sm:$0xe]  ;;  %11738 = vst [vmem:[#allocation18_spill] sm:$0xff] %v10327_v60  ;;  %v1565_v24 = vsel %vm9891_vm13, %v1563_v18, %v1564_v20 }
 0x17d   : > { %4226 = vmatprep.mubr.bf16.mxu0 %v6787_v2  ;;  %v11737_v2 = vld [vmem:[#allocation20_spill] sm:$0xff]  ;;  %v6646_v26 = vrot.slane %v1408_v43, 9  ;;  %v8776_v43 = vld [vmem:[#allocation2 + $0xb0] sm:$0x1]  ;;  %v2164_v10 = vrot.slane %v2162_v4, 4 }
 0x17e   : > { %4364 = vmatmul.mubr.bf16.gmra.mrb[96].mxu1 %v11734_v17  ;;  %v7524_v32 = vpop.f32.mrb[24].mxu1  ;;  %v2165_v3 = vrot.slane %v8776_v43, 5 }
 0x17f   : > { %4371 = vmatprep.mubr.bf16.mxu1 %v10297_v62  ;;  %v7525_v21 = vpop.f32.mrb[25].mxu1  ;;  %v7418_v16 = vpop.f32.mrb[28].mxu0 }
 0x180   : > { %v8478_v41 = vpop.eup %8477  ;;  %v7526_v48 = vadd.f32 %v7525_v21, %v7524_v32  ;;  %v7527_v40 = vpop.f32.mrb[26].mxu1  ;;  %v8773_v32 = vld [vmem:[#allocation2 + $0xb8] sm:$0xf] }
 0x181   : > { %v7419_v1 = vpop.f32.mrb[29].mxu0  ;;  %3699 = vst.msk [vmem:[%s10204_s13 + $0x50] sm:$0xff] %vm3688_vm14, %v8478_v41  ;;  %v7528_v8 = vpop.f32.mrb[27].mxu1  ;;  %v1568_v38 = vrot.slane %v8773_v32, 5  ;;  %v2156_v41 = vsel %vm9891_vm13, %v6660_v55, %v2155_v19  ;;  %v10359_v32 = vld [vmem:[#allocation2 + $0x18] sm:$0xf] }
 0x182   : > { %v7420_v27 = vadd.f32 %v7419_v1, %v7418_v16  ;;  %v7421_v44 = vpop.f32.mrb[30].mxu0  ;;  %v8480_v46 = vpop.eup %8479  ;;  %v3578_v58 = vadd.f32 %v7526_v48, %v7414_v53  ;;  %v7529_v39 = vadd.f32 %v7528_v8, %v7527_v40  ;;  %v6789_v53 = vcombine.low %v1555_v42, %v1558_v37  ;;  %v8775_v37 = vld [vmem:[#allocation2 + $0xbc] sm:$0x1] }
 0x183   : > { %v7422_v28 = vpop.f32.mrb[31].mxu0  ;;  %3700 = vst.msk [vmem:[%s10204_s13 + $0x58] sm:$0xff] %vm3688_vm14, %v8480_v46  ;;  %v6647_v42 = vrot.slane %v1409_v36, 9  ;;  %v1570_v46 = vrot.slane %v1568_v38, 4  ;;  %v1571_v31 = vrot.slane %v8775_v37, 5 }
 0x184   : > { %4227 = vmatmul.mubr.bf16.gmra.mrb[108].mxu0 %v11736_v52  ;;  %v7423_v25 = vadd.f32 %v7422_v28, %v7421_v44  ;;  %8481 = vtanh.f32 %v3578_v58  ;;  %v3581_v22 = vadd.f32 %v7529_v39, %v7417_v9  ;;  %v1562_v9 = vsel %vm9891_vm13, %v6646_v26, %v1561_v6 }
 0x185   : > { %4234 = vmatprep.mubr.bf16.mxu0 %v6788_v7  ;;  %v8772_v7 = vld [vmem:[#allocation2 + $0xa4] sm:$0x1]  ;;  %v6790_v1 = vcombine.low %v1562_v9, %v1565_v24  ;;  %v1569_v20 = vsel %vm9891_vm13, %v6647_v42, %v1568_v38  ;;  %v2019_v9 = vld [vmem:[#allocation2 + $0xb4] sm:$0xe]  ;;  %v2244_v42 = vshrl.u32 %v10362_v23, 16 }
 0x186   : > { %4372 = vmatmul.mubr.bf16.gmra.mrb[100].mxu1 %v11737_v2  ;;  %8483 = vtanh.f32 %v3581_v22  ;;  %v2158_v34 = vrot.slane %v8772_v7, 5  ;;  %v11742_v22 = vld [vmem:[#allocation30_spill] sm:$0xff]  ;;  %v8777_v7 = vld [vmem:[#allocation2 + $0xb8] sm:$0xf]  ;;  %v11745_v38 = vld [vmem:[#allocation33_spill] sm:$0xff] }
 0x187   : > { %4379 = vmatprep.mubr.bf16.mxu1 %v10310_v49 }
 0x188   : > { %v2159_v52 = vsel %vm9891_vm13, %v2157_v5, %v2158_v34  ;;  %v2166_v5 = vsel %vm9891_vm13, %v2164_v10, %v2165_v3  ;;  %v2169_v34 = vrot.slane %v8777_v7, 5 }
 0x189   : > { %v10340_v28 = vcombine.low %v2156_v41, %v2159_v52  ;;  %v8778_v41 = vld [vmem:[#allocation2 + $0xbc] sm:$0x1] }
 0x18a   : > { %v2172_v52 = vrot.slane %v8778_v41, 5 }
 0x18b   : > { %v7530_v21 = vpop.f32.mrb[28].mxu1  ;;  %11741 = vst [vmem:[#allocation24_spill] sm:$0xff] %v10340_v28 }
 0x18c   : > { %4235 = vmatmul.mubr.bf16.gmra.mrb[112].mxu0 %v11739_v57  ;;  %v7531_v16 = vpop.f32.mrb[29].mxu1  ;;  %v1572_v57 = vsel %vm9891_vm13, %v1570_v46, %v1571_v31 }
 0x18d   : > { %4242 = vmatprep.mubr.bf16.mxu0 %v6789_v53  ;;  %v7532_v48 = vadd.f32 %v7531_v16, %v7530_v21  ;;  %v7533_v40 = vpop.f32.mrb[30].mxu1  ;;  %v6791_v24 = vcombine.low %v1569_v20, %v1572_v57  ;;  %v6662_v21 = vrot.slane %v2019_v9, 9  ;;  %v2171_v16 = vrot.slane %v2169_v34, 4  ;;  %v2214_v20 = vld [vmem:[#allocation2 + $0x20] sm:$0x1] }
 0x18e   : > { %4380 = vmatmul.mubr.bf16.gmra.mrb[104].mxu1 %v11740_v61  ;;  %v7534_v8 = vpop.f32.mrb[31].mxu1  ;;  %v8482_v44 = vpop.eup %8481  ;;  %v10383_v57 = vld [vmem:[#allocation2 + $0x24] sm:$0xf]  ;;  %v10386_v9 = vld [vmem:[#allocation2 + $0x28] sm:$0xf] }
 0x18f   : > { %4387 = vmatprep.mubr.bf16.mxu1 %v10327_v60  ;;  %v3586_v6 = vadd.f32 %v7532_v48, %v7420_v27  ;;  %v7535_v58 = vadd.f32 %v7534_v8, %v7533_v40  ;;  %v7424_v39 = vpop.f32.mrb[32].mxu0  ;;  %3701 = vst.msk [vmem:[%s10204_s13 + $0x60] sm:$0xff] %vm3688_vm14, %v8482_v44  ;;  %v2231_v48 = vshrl.u32 %v10359_v32, 16  ;;  %v2234_v40 = vshll.u32 %v10359_v32, 16 }
 0x190   : > { %v7425_v11 = vpop.f32.mrb[33].mxu0  ;;  %v8484_v19 = vpop.eup %8483  ;;  %v2170_v44 = vsel %vm9891_vm13, %v6662_v21, %v2169_v34  ;;  %v2173_v46 = vsel %vm9891_vm13, %v2171_v16, %v2172_v52  ;;  %v11749_v34 = vld [vmem:[#allocation6_spill] sm:$0xff]  ;;  %v2250_v52 = vshll.u32 %v2214_v20, 16 }
 0x191   : > { %8485 = vtanh.f32 %v3586_v6  ;;  %v3589_v53 = vadd.f32 %v7535_v58, %v7423_v25  ;;  %v7426_v26 = vadd.f32 %v7425_v11, %v7424_v39  ;;  %v7427_v18 = vpop.f32.mrb[34].mxu0  ;;  %3702 = vst.msk [vmem:[%s10204_s13 + $0x68] sm:$0xff] %vm3688_vm14, %v8484_v19  ;;  %v2163_v25 = vsel %vm9891_vm13, %v6661_v47, %v2162_v4  ;;  %v11746_v4 = vld [vmem:[#allocation29_spill] sm:$0xff] }
 0x192   : > { %v7428_v27 = vpop.f32.mrb[35].mxu0  ;;  %v10357_v36 = vcombine.low %v2163_v25, %v2166_v5  ;;  %v2233_v58 = vrot.slane %v2231_v48, 4  ;;  %v2236_v39 = vrot.slane %v2234_v40, 5  ;;  %v10378_v11 = vcombine.low %v2170_v44, %v2173_v46 }
 0x193   : > { %8487 = vtanh.f32 %v3589_v53  ;;  %v7429_v55 = vadd.f32 %v7428_v27, %v7427_v18  ;;  %v11748_v27 = vld [vmem:[#allocation36_spill] sm:$0xff]  ;;  %v2264_v48 = vshll.u32 %v10386_v9, 16  ;;  %v2268_v40 = vshrl.u32 %v10386_v9, 16 }
 0x194   : > { %4243 = vmatmul.mubr.bf16.gmra.mrb[116].mxu0 %v11742_v22  ;;  %11744 = vst [vmem:[#allocation20_spill] sm:$0xff] %v10357_v36  ;;  %11747 = vst [vmem:[#allocation28_spill] sm:$0xff] %v10378_v11  ;;  %v2246_v22 = vrot.slane %v2244_v42, 4  ;;  %v2237_v21 = vor.u32 %v2236_v39, %v2233_v58  ;;  %v2252_v46 = vrot.slane %v2250_v52, 5  ;;  %v11751_v58 = vld [vmem:[#allocation5_spill] sm:$0xff] }
 0x195   : > { %4250 = vmatprep.mubr.bf16.mxu0 %v6790_v1  ;;  %v2240_v1 = vshll.u32 %v10362_v23, 16  ;;  %v10406_v39 = vrot.slane %v2264_v48, 5 }
 0x196   : > { %4388 = vmatmul.mubr.bf16.gmra.mrb[108].mxu1 %v11743_v29  ;;  %v2238_v42 = vrot.slane %v2237_v21, 4 }
 0x197   : > { %4395 = vmatprep.mubr.bf16.mxu1 %v10340_v28  ;;  %v10380_v19 = vrot.slane %v2240_v1, 5  ;;  %v8412_v1 = vld [vmem:[%s11601_s3 + $0x300] sm:$0xff]  }
 0x199   : > { %v2247_v41 = vor.u32 %v2246_v22, %v10380_v19  ;;  %v11752_v22 = vld [vmem:[#allocation8_spill] sm:$0xff]  ;;  %v2243_v21 = vsel %vm9012_vm2, %v2238_v42, %v10380_v19 }
 0x19b   : > { %v8486_v15 = vpop.eup %8485  ;;  %v2248_v44 = vrot.slane %v2247_v41, 4 }
 0x19c   : > { %4251 = vmatmul.mubr.bf16.gmra.mrb[120].mxu0 %v11745_v38  ;;  %3703 = vst.msk [vmem:[%s10204_s13 + $0x70] sm:$0xff] %vm3688_vm14, %v8486_v15  ;;  %v11750_v38 = vld [vmem:[#allocation32_spill] sm:$0xff]  ;;  %v2258_v15 = vshll.u32 %v10383_v57, 16 }
 0x19d   : > { %4258 = vmatprep.mubr.bf16.mxu0 %v6791_v24  ;;  %v8488_v8 = vpop.eup %8487  ;;  %v7536_v37 = vpop.f32.mrb[32].mxu1  ;;  %v2253_v48 = vsel %vm9012_vm2, %v2248_v44, %v2252_v46  ;;  %v8424_v44 = vld [vmem:[%s11601_s3 + $0x310] sm:$0xff]  }
 0x19e   : > { %4396 = vmatmul.mubr.bf16.gmra.mrb[112].mxu1 %v11746_v4  ;;  %3704 = vst.msk [vmem:[%s10204_s13 + $0x78] sm:$0xff] %vm3688_vm14, %v8488_v8  ;;  %v7537_v31 = vpop.f32.mrb[33].mxu1  ;;  %v7430_v6 = vpop.f32.mrb[36].mxu0  ;;  %v8415_v8 = vld [vmem:[%s11601_s3 + $0x348] sm:$0xff]  }
 0x19f   : > { %4403 = vmatprep.mubr.bf16.mxu1 %v10357_v36  ;;  %v7538_v47 = vadd.f32 %v7537_v31, %v7536_v37  ;;  %v7539_v43 = vpop.f32.mrb[34].mxu1  ;;  %v7431_v3 = vpop.f32.mrb[37].mxu0  ;;  %v2215_v37 = vld [vmem:[#allocation2 + $0x2c] sm:$0x1] }
 0x1a0   : > { %v7540_v10 = vpop.f32.mrb[35].mxu1  ;;  %v7432_v53 = vadd.f32 %v7431_v3, %v7430_v6  ;;  %v7433_v18 = vpop.f32.mrb[38].mxu0  ;;  %v2260_v6 = vrot.slane %v2258_v15, 5 }
 0x1a1   : > { %v3594_v25 = vadd.f32 %v7538_v47, %v7426_v26  ;;  %v7541_v5 = vadd.f32 %v7540_v10, %v7539_v43  ;;  %v7434_v7 = vpop.f32.mrb[39].mxu0  ;;  %v2255_v26 = vshrl.u32 %v10383_v57, 16  ;;  %v2270_v47 = vrot.slane %v2268_v40, 4  ;;  %v10408_v43 = vld [vmem:[#allocation2 + $0x34] sm:$0xf] }
 0x1a2   : > { %v10388_v24 = vadd.f32 %v7434_v7, %v7433_v18 }
 0x1a3   : > { %8489 = vtanh.f32 %v3594_v25  ;;  %v3597_v16 = vadd.f32 %v7541_v5, %v7429_v55  ;;  %v10400_v55 = vld [vmem:[#allocation2 + $0x30] sm:$0xf]  ;;  %v2257_v31 = vrot.slane %v2255_v26, 4 }
 0x1a4   : > { %4259 = vmatmul.mubr.bf16.gmra.mrb[124].mxu0 %v11748_v27  ;;  %v2279_v10 = vshrl.u32 %v10400_v55, 16  ;;  %v2282_v18 = vshll.u32 %v10400_v55, 16  ;;  %v8418_v27 = vld [vmem:[%s11601_s3 + $0x308] sm:$0xff]   ;;  %v11753_v5 = vld [vmem:[#allocation35_spill] sm:$0xff] }
 0x1a5   : > { %4926 = vmatprep.mubr.bf16.mxu0 %v11749_v34  ;;  %8491 = vtanh.f32 %v3597_v16  ;;  %v2274_v16 = vshll.u32 %v2215_v37, 16  ;;  %v8421_v26 = vld [vmem:[%s11601_s3 + $0x350] sm:$0xff]   ;;  %v2261_v40 = vor.u32 %v2260_v6, %v2257_v31  ;;  %v2271_v37 = vor.u32 %v2270_v47, %v10406_v39 }
 0x1a6   : > { %4404 = vmatmul.mubr.bf16.gmra.mrb[116].mxu1 %v11750_v38  ;;  %v2284_v28 = vrot.slane %v2282_v18, 5  ;;  %v10442_v47 = vcombine.low %v2243_v21, %v2253_v48  ;;  %v8430_v21 = vld [vmem:[%s11601_s3 + $0x318] sm:$0xff]  }
 0x1a7   : > { %4411 = vmatprep.mubr.bf16.mxu1 %v10378_v11  ;;  %v2276_v18 = vrot.slane %v2274_v16, 5  ;;  %v11756_v16 = vld [vmem:[#allocation38_spill] sm:$0xff] }
 0x1a9   : > { %v7542_v3 = vpop.f32.mrb[36].mxu1 }
 0x1aa   : > { %v7543_v20 = vpop.f32.mrb[37].mxu1  ;;  %v7436_v25 = vpop.f32.mrb[40].mxu0 }
 0x1ab   : > { %v7544_v41 = vadd.f32 %v7543_v20, %v7542_v3  ;;  %v7545_v52 = vpop.f32.mrb[38].mxu1  ;;  %v7437_v15 = vpop.f32.mrb[41].mxu0  ;;  %v2292_v3 = vshrl.u32 %v10408_v43, 16 }
 0x1ac   : > { %4927 = vmatmul.mubr.bf16.vlgmr.msra.gmra.mrb[128].mxu0 %v11751_v58  ;;  %v7546_v58 = vpop.f32.mrb[39].mxu1  ;;  %v10427_v19 = vadd.f32 %v7437_v15, %v7436_v25  ;;  %v7439_v42 = vpop.f32.mrb[42].mxu0  ;;  %v11755_v25 = vld [vmem:[#allocation7_spill] sm:$0xff]  ;;  %v10449_v15 = vld [vmem:[#allocation2 + $0x3c] sm:$0xf] }
 0x1ad   : > { %8033 = vmatpush3.bf16.msra.mxu0 %v8412_v1  ;;  %4934 = vmatprep.mubr.bf16.mxu0 %v11752_v22  ;;  %v2288_v1 = vshll.u32 %v10408_v43, 16  ;;  %v3602_v20 = vadd.f32 %v7544_v41, %v7432_v53  ;;  %v7547_v11 = vadd.f32 %v7546_v58, %v7545_v52  ;;  %v7440_v36 = vpop.f32.mrb[43].mxu0  ;;  %v8427_v53 = vld [vmem:[%s11601_s3 + $0x358] sm:$0xff]   ;;  %v2294_v52 = vrot.slane %v2292_v3, 4  ;;  %v10474_v3 = vld [vmem:[#allocation2 + $0x44] sm:$0x1] }
 0x1ae   : > { %4412 = vmatmul.mubr.bf16.gmra.mrb[120].mxu1 %v11753_v5  ;;  %8034 = vmatprep.subr.bf16.mxu0 %v8415_v8  ;;  %v8490_v8 = vpop.eup %8489  ;;  %v10436_v46 = vadd.f32 %v7440_v36, %v7439_v42  ;;  %v2272_v36 = vrot.slane %v2271_v37, 4  ;;  %v2303_v48 = vshrl.u32 %v10449_v15, 16 }
 0x1af   : > { %4419 = vmatprep.mubr.bf16.mxu1 %v10250_v33  ;;  %v2281_v33 = vrot.slane %v2279_v10, 4  ;;  %3705 = vst.msk [vmem:[%s10204_s13 + $0x80] sm:$0xff] %vm3688_vm14, %v8490_v8  ;;  %v8492_v31 = vpop.eup %8491  ;;  %8493 = vtanh.f32 %v3602_v20  ;;  %v3605_v6 = vadd.f32 %v7547_v11, %v10388_v24  ;;  %v2262_v10 = vrot.slane %v2261_v40, 4  ;;  %v10452_v24 = vld [vmem:[#allocation2 + $0x40] sm:$0xf] }
 0x1b0   : > { %3706 = vst.msk [vmem:[%s10204_s13 + $0x88] sm:$0xff] %vm3688_vm14, %v8492_v31  ;;  %v10447_v41 = vrot.slane %v2288_v1, 5  ;;  %v2306_v40 = vshll.u32 %v10449_v15, 16  ;;  %v2277_v1 = vsel %vm9012_vm2, %v2272_v36, %v2276_v18  ;;  %v2312_v42 = vshll.u32 %v10452_v24, 16  ;;  %v10483_v31 = vld [vmem:[#allocation2 + $0x4c] sm:$0xf] }
 0x1b1   : > { %8035 = vmatpush3.bf16.msra.mxu0 %v8418_v27  ;;  %v2216_v27 = vld [vmem:[#allocation2 + $0x38] sm:$0x1]  ;;  %8495 = vtanh.f32 %v3605_v6  ;;  %v2285_v11 = vor.u32 %v2284_v28, %v2281_v33  ;;  %v2267_v33 = vsel %vm9012_vm2, %v2262_v10, %v10406_v39  ;;  %v2316_v8 = vshrl.u32 %v10452_v24, 16  ;;  %v8436_v39 = vld [vmem:[%s11601_s3 + $0x320] sm:$0xff]  }
 0x1b2   : > { %8036 = vmatprep.subr.bf16.mxu0 %v8421_v26  ;;  %v8433_v26 = vld [vmem:[%s11601_s3 + $0x360] sm:$0xff]   ;;  %v2298_v28 = vshll.u32 %v2216_v27, 16  ;;  %v2295_v58 = vor.u32 %v2294_v52, %v10447_v41  ;;  %v6936_v20 = vcombine.low %v10359_v32, %v10362_v23  ;;  %v10491_v18 = vcombine.low %v2267_v33, %v2277_v1 }
 0x1b3   : > { %v10472_v37 = vrot.slane %v2285_v11, 4  ;;  %v8413_v10 = vld [vmem:[%s11601_s3 + $0x380] sm:$0xff]   ;;  %v2308_v32 = vrot.slane %v2306_v40, 5  ;;  %v10497_v60 = vrot.slane %v2312_v42, 5  ;;  %v2318_v49 = vrot.slane %v2316_v8, 4  ;;  %v8442_v8 = vld [vmem:[%s11601_s3 + $0x328] sm:$0xff]  }
 0x1b4   : > { %4935 = vmatmul.mubr.bf16.gmra.mrb[132].mxu0 %v11755_v25  ;;  %v2300_v27 = vrot.slane %v2298_v28, 5  ;;  %v2305_v25 = vrot.slane %v2303_v48, 4  ;;  %v11757_v11 = vld [vmem:[#allocation9_spill] sm:$0xff]  ;;  %v2322_v48 = vshll.u32 %v10474_v3, 16 }
 0x1b5   : > { %4942 = vmatprep.mubr.bf16.mxu0 %v9226_v14  ;;  %8037 = vmatpush3.bf16.msra.mxu0 %v8424_v44  ;;  %v10481_v44 = vld [vmem:[#allocation2 + $0x48] sm:$0xf]  ;;  %v2291_v28 = vsel %vm9012_vm2, %v10472_v37, %v10447_v41 }
 0x1b6   : > { %4420 = vmatmul.mubr.bf16.gmra.mrb[124].mxu1 %v11756_v16  ;;  %8038 = vmatprep.subr.bf16.mxu0 %v8427_v53  ;;  %v8439_v53 = vld [vmem:[%s11601_s3 + $0x368] sm:$0xff]   ;;  %v2327_v41 = vshrl.u32 %v10481_v44, 16  ;;  %v2330_v37 = vshll.u32 %v10481_v44, 16 }
 0x1b7   : > { %5087 = vmatprep.mubr.bf16.mxu1 %v10442_v47 }
 0x1b8   : > { %v7548_v6 = vpop.f32.mrb[40].mxu1  ;;  %v7442_v36 = vpop.f32.mrb[44].mxu0 }
 0x1b9   : > { %8039 = vmatpush3.bf16.msra.mxu0 %v8430_v21  ;;  %v7549_v23 = vpop.f32.mrb[41].mxu1  ;;  %v8494_v52 = vpop.eup %8493  ;;  %v2296_v21 = vrot.slane %v2295_v58, 4 }
 0x1ba   : > { %8040 = vmatprep.subr.bf16.mxu0 %v8433_v26  ;;  %v8416_v26 = vld [vmem:[%s11601_s3 + $0x3c8] sm:$0xff]   ;;  %v7550_v62 = vadd.f32 %v7549_v23, %v7548_v6  ;;  %v7551_v33 = vpop.f32.mrb[42].mxu1  ;;  %v7443_v1 = vpop.f32.mrb[45].mxu0  ;;  %3707 = vst.msk [vmem:[%s10204_s13 + $0x90] sm:$0xff] %vm3688_vm14, %v8494_v52 }
 0x1bb   : > { %v7552_v40 = vpop.f32.mrb[43].mxu1  ;;  %v10507_v58 = vadd.f32 %v7443_v1, %v7442_v36  ;;  %v7445_v42 = vpop.f32.mrb[46].mxu0  ;;  %v8445_v36 = vld [vmem:[%s11601_s3 + $0x370] sm:$0xff]   ;;  %v6937_v1 = vcombine.low %v10383_v57, %v10386_v9  ;;  %v11758_v9 = vld [vmem:[#allocation10_spill] sm:$0xff] }
 0x1bc   : > { %4943 = vmatmul.mubr.bf16.gmra.mrb[136].mxu0 %v11757_v11  ;;  %v8496_v6 = vpop.eup %8495  ;;  %v3610_v3 = vadd.f32 %v7550_v62, %v10427_v19  ;;  %v7553_v23 = vadd.f32 %v7552_v40, %v7551_v33  ;;  %v7446_v52 = vpop.f32.mrb[47].mxu0  ;;  %v2336_v11 = vshll.u32 %v10483_v31, 16  ;;  %v2340_v62 = vshrl.u32 %v10483_v31, 16  ;;  %v8422_v33 = vld [vmem:[%s11601_s3 + $0x3d0] sm:$0xff]  }
 0x1bd   : > { %4950 = vmatprep.mubr.bf16.mxu0 %v9320_v12  ;;  %8041 = vmatpush3.bf16.msra.mxu0 %v8436_v39  ;;  %v8419_v39 = vld [vmem:[%s11601_s3 + $0x388] sm:$0xff]   ;;  %3708 = vst.msk [vmem:[%s10204_s13 + $0x98] sm:$0xff] %vm3688_vm14, %v8496_v6  ;;  %v10526_v19 = vadd.f32 %v7446_v52, %v7445_v42  ;;  %v2218_v40 = vld [vmem:[#allocation2 + $0x50] sm:$0x1]  ;;  %v10550_v57 = vld [vmem:[#allocation2 + $0x54] sm:$0xf] }
 0x1be   : > { %5088 = vmatmul.mubr.bf16.vlgmr.msra.gmra.mrb[128].mxu1 %v6936_v20  ;;  %8042 = vmatprep.subr.bf16.mxu0 %v8439_v53  ;;  %v2309_v20 = vor.u32 %v2308_v32, %v2305_v25  ;;  %v2301_v53 = vsel %vm9012_vm2, %v2296_v21, %v2300_v27  ;;  %8497 = vtanh.f32 %v3610_v3  ;;  %v3613_v25 = vadd.f32 %v7553_v23, %v10436_v46  ;;  %v8448_v32 = vld [vmem:[%s11601_s3 + $0x330] sm:$0xff]   ;;  %v10553_v3 = vld [vmem:[#allocation2 + $0x58] sm:$0xf] }
 0x1bf   : > { %8145 = vmatpush3.bf16.msra.mxu1 %v8413_v10  ;;  %5095 = vmatprep.mubr.bf16.mxu1 %v10491_v18  ;;  %v2319_v10 = vor.u32 %v2318_v49, %v10497_v60  ;;  %v2329_v27 = vrot.slane %v2327_v41, 4  ;;  %v2332_v21 = vrot.slane %v2330_v37, 5  ;;  %v8451_v49 = vld [vmem:[%s11601_s3 + $0x378] sm:$0xff]   ;;  %v10545_v46 = vrot.slane %v2336_v11, 5 }
 0x1c0   : > { %8146 = vmatprep.subr.bf16.mxu1 %v8416_v26  ;;  %8499 = vtanh.f32 %v3613_v25  ;;  %v10543_v26 = vcombine.low %v2291_v28, %v2301_v53  ;;  %v2342_v42 = vrot.slane %v2340_v62, 4  ;;  %v2310_v6 = vrot.slane %v2309_v20, 4  ;;  %v8428_v28 = vld [vmem:[%s11601_s3 + $0x3d8] sm:$0xff]   ;;  %v8434_v25 = vld [vmem:[%s11601_s3 + $0x3e0] sm:$0xff]  }
 0x1c1   : > { %8043 = vmatpush3.bf16.msra.mxu0 %v8442_v8  ;;  %v8425_v8 = vld [vmem:[%s11601_s3 + $0x390] sm:$0xff]   ;;  %v2320_v41 = vrot.slane %v2319_v10, 4  ;;  %v2324_v37 = vrot.slane %v2322_v48, 5  ;;  %v8454_v23 = vld [vmem:[%s11601_s3 + $0x338] sm:$0xff]   ;;  %v2333_v52 = vor.u32 %v2332_v21, %v2329_v27  ;;  %v2354_v48 = vshll.u32 %v10550_v57, 16 }
 0x1c2   : > { %8044 = vmatprep.subr.bf16.mxu0 %v8445_v36  ;;  %v2346_v36 = vshll.u32 %v2218_v40, 16  ;;  %v2343_v20 = vor.u32 %v2342_v42, %v10545_v46  ;;  %v2360_v11 = vshll.u32 %v10553_v3, 16  ;;  %v2364_v62 = vshrl.u32 %v10553_v3, 16  ;;  %v8431_v53 = vld [vmem:[%s11601_s3 + $0x398] sm:$0xff]  }
 0x1c3   : > { %8147 = vmatpush3.bf16.msra.mxu1 %v8419_v39  ;;  %v2351_v39 = vshrl.u32 %v10550_v57, 16  ;;  %v2315_v10 = vsel %vm9012_vm2, %v2310_v6, %v10497_v60  ;;  %v2334_v40 = vrot.slane %v2333_v52, 4  ;;  %v2219_v21 = vld [vmem:[#allocation2 + $0x5c] sm:$0x1]  ;;  %v2356_v42 = vrot.slane %v2354_v48, 5 }
 0x1c4   : > { %4951 = vmatmul.mubr.bf16.gmra.mrb[140].mxu0 %v11758_v9  ;;  %8148 = vmatprep.subr.bf16.mxu1 %v8422_v33  ;;  %v2325_v33 = vsel %vm9012_vm2, %v2320_v41, %v2324_v37  ;;  %v2348_v27 = vrot.slane %v2346_v36, 5  ;;  %v10585_v9 = vrot.slane %v2360_v11, 5  ;;  %v2366_v6 = vrot.slane %v2364_v62, 4  ;;  %v10587_v41 = vld [vmem:[#allocation2 + $0x60] sm:$0xf]  ;;  %v11760_v37 = vld [vmem:[#allocation11_spill] sm:$0xff] }
 0x1c5   : > { %4958 = vmatprep.mubr.bf16.mxu0 %v9356_v56  ;;  %8045 = vmatpush3.bf16.msra.mxu0 %v8448_v32  ;;  %v6938_v32 = vcombine.low %v10400_v55, %v10408_v43  ;;  %v10581_v60 = vcombine.low %v2315_v10, %v2325_v33  ;;  %v8437_v55 = vld [vmem:[%s11601_s3 + $0x3a0] sm:$0xff]   ;;  %v2375_v11 = vshrl.u32 %v10587_v41, 16  ;;  %v2378_v62 = vshll.u32 %v10587_v41, 16 }
 0x1c6   : > { %5096 = vmatmul.mubr.bf16.gmra.mrb[132].mxu1 %v6937_v1  ;;  %8046 = vmatprep.subr.bf16.mxu0 %v8451_v49  ;;  %v2353_v49 = vrot.slane %v2351_v39, 4  ;;  %v10599_v36 = vld [vmem:[#allocation2 + $0x64] sm:$0xf]  ;;  %v2339_v39 = vsel %vm9012_vm2, %v2334_v40, %v10545_v46  ;;  %v2367_v10 = vor.u32 %v2366_v6, %v10585_v9  ;;  %v8443_v46 = vld [vmem:[%s11601_s3 + $0x3a8] sm:$0xff]  }
 0x1c7   : > { %5103 = vmatprep.mubr.bf16.mxu1 %v10543_v26  ;;  %8149 = vmatpush3.bf16.msra.mxu1 %v8425_v8  ;;  %11759 = vst [vmem:[#allocation30_spill] sm:$0xff] %v10581_v60  ;;  %v2344_v8 = vrot.slane %v2343_v20, 4 }
 0x1c8   : > { %8150 = vmatprep.subr.bf16.mxu1 %v8428_v28  ;;  %v8498_v1 = vpop.eup %8497  ;;  %v8440_v28 = vld [vmem:[%s11601_s3 + $0x3e8] sm:$0xff]   ;;  %v2357_v48 = vor.u32 %v2356_v42, %v2353_v49  ;;  %v2388_v49 = vshrl.u32 %v10599_v36, 16  ;;  %v2368_v45 = vrot.slane %v2367_v10, 4 }
 0x1c9   : > { %8047 = vmatpush3.bf16.msra.mxu0 %v8454_v23  ;;  %3709 = vst.msk [vmem:[%s10204_s13 + $0xa0] sm:$0xff] %vm3688_vm14, %v8498_v1  ;;  %v2370_v23 = vshll.u32 %v2219_v21, 16  ;;  %v6939_v1 = vcombine.low %v10449_v15, %v10452_v24  ;;  %v2384_v21 = vshll.u32 %v10599_v36, 16  ;;  %v2377_v24 = vrot.slane %v2375_v11, 4  ;;  %v8452_v11 = vld [vmem:[%s11601_s3 + $0x3f8] sm:$0xff]  }
 0x1ca   : > { %v8500_v43 = vpop.eup %8499  ;;  %v2358_v15 = vrot.slane %v2357_v48, 4  ;;  %v2390_v48 = vrot.slane %v2388_v49, 4 }
 0x1cb   : > { %8151 = vmatpush3.bf16.msra.mxu1 %v8431_v53  ;;  %3710 = vst.msk [vmem:[%s10204_s13 + $0xa8] sm:$0xff] %vm3688_vm14, %v8500_v43  ;;  %v7554_v52 = vpop.f32.mrb[44].mxu1  ;;  %v2349_v53 = vsel %vm9012_vm2, %v2344_v8, %v2348_v27  ;;  %v8446_v27 = vld [vmem:[%s11601_s3 + $0x3f0] sm:$0xff]   ;;  %v2372_v8 = vrot.slane %v2370_v23, 5  ;;  %v11761_v23 = vld [vmem:[#allocation12_spill] sm:$0xff] }
 0x1cc   : > { %4959 = vmatmul.mubr.bf16.gmra.mrb[144].mxu0 %v11760_v37  ;;  %8152 = vmatprep.subr.bf16.mxu1 %v8434_v25  ;;  %v7555_v20 = vpop.f32.mrb[45].mxu1 }
 0x1cd   : > { %4966 = vmatprep.mubr.bf16.mxu0 %v9446_v30  ;;  %v7556_v33 = vadd.f32 %v7555_v20, %v7554_v52  ;;  %v7557_v25 = vpop.f32.mrb[46].mxu1  ;;  %v10621_v52 = vcombine.low %v2339_v39, %v2349_v53  ;;  %v2380_v20 = vrot.slane %v2378_v62, 5  ;;  %v10624_v30 = vld [vmem:[#allocation2 + $0x6c] sm:$0xf]  ;;  %v10630_v39 = vrot.slane %v2384_v21, 5 }
 0x1ce   : > { %5104 = vmatmul.mubr.bf16.gmra.mrb[136].mxu1 %v6938_v32  ;;  %v7448_v32 = vpop.f32.mrb[48].mxu0  ;;  %v7558_v40 = vpop.f32.mrb[47].mxu1  ;;  %v2402_v49 = vshll.u32 %v10624_v30, 16 }
 0x1cf   : > { %5111 = vmatprep.mubr.bf16.mxu1 %v10581_v60  ;;  %8153 = vmatpush3.bf16.msra.mxu1 %v8437_v55  ;;  %v7449_v42 = vpop.f32.mrb[49].mxu0  ;;  %v3618_v6 = vadd.f32 %v7556_v33, %v10507_v58  ;;  %v7559_v55 = vadd.f32 %v7558_v40, %v7557_v25  ;;  %v2220_v60 = vld [vmem:[#allocation2 + $0x68] sm:$0x1]  ;;  %v8449_v58 = vld [vmem:[%s11601_s3 + $0x3b0] sm:$0xff]   ;;  %v2381_v62 = vor.u32 %v2380_v20, %v2377_v24  ;;  %v2399_v33 = vshrl.u32 %v10624_v30, 16 }
 0x1d0   : > { %8154 = vmatprep.subr.bf16.mxu1 %v8440_v28  ;;  %v7450_v43 = vadd.f32 %v7449_v42, %v7448_v32  ;;  %v7451_v37 = vpop.f32.mrb[50].mxu0  ;;  %v2394_v53 = vshll.u32 %v2220_v60, 16  ;;  %v2363_v25 = vsel %vm9012_vm2, %v2358_v15, %v10585_v9  ;;  %v2373_v32 = vsel %vm9012_vm2, %v2368_v45, %v2372_v8  ;;  %v10656_v20 = vld [vmem:[#allocation2 + $0x78] sm:$0xf] }
 0x1d1   : > { %v7452_v0 = vpop.f32.mrb[51].mxu0  ;;  %8501 = vtanh.f32 %v3618_v6  ;;  %v3621_v28 = vadd.f32 %v7559_v55, %v10526_v19  ;;  %v10636_v19 = vld [vmem:[#allocation2 + $0x70] sm:$0xf]  ;;  %v2391_v60 = vor.u32 %v2390_v48, %v10630_v39  ;;  %v6940_v8 = vcombine.low %v10481_v44, %v10483_v31 }
 0x1d2   : > { %v7453_v51 = vadd.f32 %v7452_v0, %v7451_v37  ;;  %v2408_v42 = vshll.u32 %v10636_v19, 16  ;;  %v10654_v55 = vcombine.low %v2363_v25, %v2373_v32  ;;  %v2396_v37 = vrot.slane %v2394_v53, 5 }
 0x1d3   : > { %8155 = vmatpush3.bf16.msra.mxu1 %v8443_v46  ;;  %8503 = vtanh.f32 %v3621_v28  ;;  %v7560_v0 = vpop.f32.mrb[48].mxu1  ;;  %v2401_v15 = vrot.slane %v2399_v33, 4  ;;  %v2382_v28 = vrot.slane %v2381_v62, 4  ;;  %v2392_v44 = vrot.slane %v2391_v60, 4 }
 0x1d4   : > { %4967 = vmatmul.mubr.bf16.gmra.mrb[148].mxu0 %v11761_v23  ;;  %8156 = vmatprep.subr.bf16.mxu1 %v8446_v27  ;;  %v7561_v10 = vpop.f32.mrb[49].mxu1  ;;  %v2412_v27 = vshrl.u32 %v10636_v19, 16  ;;  %v2404_v31 = vrot.slane %v2402_v49, 5  ;;  %v2423_v25 = vshrl.u32 %v10656_v20, 16  ;;  %v2426_v32 = vshll.u32 %v10656_v20, 16 }
 0x1d5   : > { %4974 = vmatprep.mubr.bf16.mxu0 %v9509_v59  ;;  %v7562_v46 = vadd.f32 %v7561_v10, %v7560_v0  ;;  %v7563_v40 = vpop.f32.mrb[50].mxu1  ;;  %v2410_v0 = vrot.slane %v2408_v42, 5  ;;  %v2387_v60 = vsel %vm9012_vm2, %v2382_v28, %v10630_v39  ;;  %v2222_v39 = vld [vmem:[#allocation2 + $0x80] sm:$0x1]  ;;  %v10686_v28 = vld [vmem:[#allocation2 + $0x84] sm:$0xf] }
 0x1d6   : > { %5112 = vmatmul.mubr.bf16.gmra.mrb[140].mxu1 %v6939_v1  ;;  %v8455_v1 = vld [vmem:[%s11601_s3 + $0x3b8] sm:$0xff]   ;;  %v7564_v21 = vpop.f32.mrb[51].mxu1  ;;  %v2414_v53 = vrot.slane %v2412_v27, 4  ;;  %v2405_v49 = vor.u32 %v2404_v31, %v2401_v15 }
 0x1d7   : > { %5119 = vmatprep.mubr.bf16.mxu1 %v10621_v52  ;;  %8157 = vmatpush3.bf16.msra.mxu1 %v8449_v58  ;;  %v3626_v9 = vadd.f32 %v7562_v46, %v7450_v43  ;;  %v7565_v6 = vadd.f32 %v7564_v21, %v7563_v40  ;;  %v7454_v45 = vpop.f32.mrb[52].mxu0  ;;  %v11762_v43 = vld [vmem:[#allocation14_spill] sm:$0xff]  ;;  %v2397_v21 = vsel %vm9012_vm2, %v2392_v44, %v2396_v37 }
 0x1d8   : > { %8158 = vmatprep.subr.bf16.mxu1 %v8452_v11  ;;  %v7455_v24 = vpop.f32.mrb[53].mxu0  ;;  %v10660_v11 = vld [vmem:[#allocation2 + $0x7c] sm:$0xf]  ;;  %v2415_v42 = vor.u32 %v2414_v53, %v2410_v0  ;;  %v2406_v37 = vrot.slane %v2405_v49, 4  ;;  %v10689_v44 = vld [vmem:[#allocation2 + $0x88] sm:$0xf] }
 0x1d9   : > { %8505 = vtanh.f32 %v3626_v9  ;;  %v3629_v58 = vadd.f32 %v7565_v6, %v7453_v51  ;;  %v10658_v23 = vadd.f32 %v7455_v24, %v7454_v45  ;;  %v7457_v48 = vpop.f32.mrb[54].mxu0  ;;  %v2221_v51 = vld [vmem:[#allocation2 + $0x74] sm:$0x1]  ;;  %v2432_v46 = vshll.u32 %v10660_v11, 16 }
 0x1da   : > { %v7458_v10 = vpop.f32.mrb[55].mxu0  ;;  %v2436_v40 = vshrl.u32 %v10660_v11, 16  ;;  %v2418_v27 = vshll.u32 %v2221_v51, 16  ;;  %v2425_v9 = vrot.slane %v2423_v25, 4  ;;  %v2428_v6 = vrot.slane %v2426_v32, 5 }
 0x1db   : > { %8159 = vmatpush3.bf16.msra.mxu1 %v8455_v1  ;;  %v8502_v33 = vpop.eup %8501  ;;  %8507 = vtanh.f32 %v3629_v58  ;;  %v10664_v62 = vadd.f32 %v7458_v10, %v7457_v48  ;;  %v6941_v45 = vcombine.low %v10550_v57, %v10553_v3  ;;  %v10684_v58 = vcombine.low %v2387_v60, %v2397_v21  ;;  %v11763_v48 = vld [vmem:[#allocation15_spill] sm:$0xff] }
 0x1dc   : > { %4975 = vmatmul.mubr.bf16.gmra.mrb[152].mxu0 %v11762_v43  ;;  %3711 = vst.msk [vmem:[%s10204_s13 + $0xb0] sm:$0xff] %vm3688_vm14, %v8502_v33  ;;  %v2438_v24 = vrot.slane %v2436_v40, 4  ;;  %v2416_v15 = vrot.slane %v2415_v42, 4  ;;  %v2420_v43 = vrot.slane %v2418_v27, 5  ;;  %v2429_v57 = vor.u32 %v2428_v6, %v2425_v9 }
 0x1dd   : > { %4982 = vmatprep.mubr.bf16.mxu0 %v11731_v13  ;;  %v8504_v1 = vpop.eup %8503  ;;  %v2442_v53 = vshll.u32 %v2222_v39, 16  ;;  %v2447_v10 = vshrl.u32 %v10686_v28, 16  ;;  %v2450_v33 = vshll.u32 %v10686_v28, 16  ;;  %v2456_v25 = vshll.u32 %v10689_v44, 16 }
 0x1de   : > { %5120 = vmatmul.mubr.bf16.gmra.mrb[144].mxu1 %v6940_v8  ;;  %3712 = vst.msk [vmem:[%s10204_s13 + $0xb8] sm:$0xff] %vm3688_vm14, %v8504_v1  ;;  %v10682_v8 = vrot.slane %v2432_v46, 5  ;;  %v2460_v32 = vshrl.u32 %v10689_v44, 16  ;;  %v2411_v46 = vsel %vm9012_vm2, %v2406_v37, %v2410_v0  ;;  %v2421_v40 = vsel %vm9012_vm2, %v2416_v15, %v2420_v43  ;;  %v11765_v0 = vld [vmem:[#allocation17_spill] sm:$0xff]  ;;  %v10713_v15 = vld [vmem:[#allocation2 + $0x90] sm:$0xf] }
 0x1df   : > { %5127 = vmatprep.mubr.bf16.mxu1 %v10654_v55  ;;  %v6942_v1 = vcombine.low %v10587_v41, %v10599_v36  ;;  %v2430_v60 = vrot.slane %v2429_v57, 4  ;;  %v2444_v49 = vrot.slane %v2442_v53, 5  ;;  %v2449_v42 = vrot.slane %v2447_v10, 4  ;;  %v10719_v57 = vld [vmem:[#allocation2 + $0x94] sm:$0xf] }
 0x1e0   : > { %v2439_v3 = vor.u32 %v2438_v24, %v10682_v8  ;;  %v2452_v27 = vrot.slane %v2450_v33, 5  ;;  %v10708_v9 = vcombine.low %v2411_v46, %v2421_v40  ;;  %v10710_v24 = vrot.slane %v2456_v25, 5 }
 0x1e1   : > { %v2462_v39 = vrot.slane %v2460_v32, 4  ;;  %v2435_v36 = vsel %vm9012_vm2, %v2430_v60, %v10682_v8  ;;  %v2471_v60 = vshrl.u32 %v10713_v15, 16 }
 0x1e2   : > { %v2440_v21 = vrot.slane %v2439_v3, 4  ;;  %11764 = vst [vmem:[#allocation33_spill] sm:$0xff] %v10708_v9 }
 0x1e3   : > { %v8506_v31 = vpop.eup %8505  ;;  %v2463_v40 = vor.u32 %v2462_v39, %v10710_v24 }
 0x1e4   : > { %4983 = vmatmul.mubr.bf16.gmra.mrb[156].mxu0 %v11763_v48  ;;  %3713 = vst.msk [vmem:[%s10204_s13 + $0xc0] sm:$0xff] %vm3688_vm14, %v8506_v31  ;;  %v2445_v53 = vsel %vm9012_vm2, %v2440_v21, %v2444_v49  ;;  %v2484_v21 = vshrl.u32 %v10719_v57, 16 }
 0x1e5   : > { %4990 = vmatprep.mubr.bf16.mxu0 %v11734_v17  ;;  %v8508_v51 = vpop.eup %8507 }
 0x1e6   : > { %5128 = vmatmul.mubr.bf16.gmra.mrb[148].mxu1 %v6941_v45  ;;  %3714 = vst.msk [vmem:[%s10204_s13 + $0xc8] sm:$0xff] %vm3688_vm14, %v8508_v51  ;;  %v2223_v45 = vld [vmem:[#allocation2 + $0x8c] sm:$0x1]  ;;  %v2453_v51 = vor.u32 %v2452_v27, %v2449_v42  ;;  %v6943_v42 = vcombine.low %v10624_v30, %v10636_v19  ;;  %v10733_v27 = vld [vmem:[#allocation2 + $0x9c] sm:$0xf] }
 0x1e7   : > { %5135 = vmatprep.mubr.bf16.mxu1 %v10684_v58  ;;  %v2466_v25 = vshll.u32 %v2223_v45, 16  ;;  %v10735_v45 = vcombine.low %v2435_v36, %v2445_v53  ;;  %v2495_v19 = vshrl.u32 %v10733_v27, 16  ;;  %v2498_v36 = vshll.u32 %v10733_v27, 16 }
 0x1e8   : > { %v2454_v39 = vrot.slane %v2453_v51, 4 }
 0x1e9   : > { %11766 = vst [vmem:[#allocation36_spill] sm:$0xff] %v10735_v45 }
 0x1ec   : > { %v7566_v6 = vpop.f32.mrb[52].mxu1  ;;  %4991 = vmatmul.mubr.bf16.gmra.mrb[160].mxu0 %v11765_v0  ;;  %v2464_v0 = vrot.slane %v2463_v40, 4  ;;  %v2459_v40 = vsel %vm9012_vm2, %v2454_v39, %v10710_v24  ;;  %v2500_v24 = vrot.slane %v2498_v36, 5 }
 0x1ed   : > { %v7567_v48 = vpop.f32.mrb[53].mxu1  ;;  %v7460_v37 = vpop.f32.mrb[56].mxu0  ;;  %4998 = vmatprep.mubr.bf16.mxu0 %v11737_v2 }
 0x1ee   : > { %v7568_v43 = vadd.f32 %v7567_v48, %v7566_v6  ;;  %v7569_v41 = vpop.f32.mrb[54].mxu1  ;;  %v7461_v31 = vpop.f32.mrb[57].mxu0  ;;  %5136 = vmatmul.mubr.bf16.gmra.mrb[152].mxu1 %v6942_v1  ;;  %v2474_v1 = vshll.u32 %v10713_v15, 16  ;;  %v2480_v48 = vshll.u32 %v10719_v57, 16 }
 0x1ef   : > { %v7570_v3 = vpop.f32.mrb[55].mxu1  ;;  %v7462_v10 = vadd.f32 %v7461_v31, %v7460_v37  ;;  %v7463_v33 = vpop.f32.mrb[58].mxu0  ;;  %5143 = vmatprep.mubr.bf16.mxu1 %v10708_v9  ;;  %v2224_v37 = vld [vmem:[#allocation2 + $0x98] sm:$0x1]  ;;  %v11767_v31 = vld [vmem:[#allocation19_spill] sm:$0xff]  ;;  %v2497_v9 = vrot.slane %v2495_v19, 4 }
 0x1f0   : > { %v3634_v32 = vadd.f32 %v7568_v43, %v10658_v23  ;;  %v7571_v46 = vadd.f32 %v7570_v3, %v7569_v41  ;;  %v7464_v8 = vpop.f32.mrb[59].mxu0  ;;  %v2468_v23 = vrot.slane %v2466_v25, 5  ;;  %v10737_v43 = vld [vmem:[#allocation2 + $0xa0] sm:$0xf]  ;;  %v2473_v3 = vrot.slane %v2471_v60, 4  ;;  %v11769_v19 = vld [vmem:[#allocation22_spill] sm:$0xff] }
 0x1f1   : > { %v7465_v6 = vadd.f32 %v7464_v8, %v7463_v33  ;;  %v2476_v33 = vrot.slane %v2474_v1, 5  ;;  %v2504_v25 = vshll.u32 %v10737_v43, 16 }
 0x1f2   : > { %8509 = vtanh.f32 %v3634_v32  ;;  %v3637_v49 = vadd.f32 %v7571_v46, %v10664_v62  ;;  %v10740_v62 = vrot.slane %v2480_v48, 5  ;;  %v2486_v32 = vrot.slane %v2484_v21, 4 }
 0x1f3   : > { %v2508_v46 = vshrl.u32 %v10737_v43, 16  ;;  %v2469_v60 = vsel %vm9012_vm2, %v2464_v0, %v2468_v23  ;;  %v2490_v48 = vshll.u32 %v2224_v37, 16  ;;  %v10758_v0 = vrot.slane %v2504_v25, 5  ;;  %v10760_v37 = vld [vmem:[#allocation2 + $0xa8] sm:$0xf] }
 0x1f4   : > { %8511 = vtanh.f32 %v3637_v49  ;;  %v7572_v41 = vpop.f32.mrb[56].mxu1  ;;  %4999 = vmatmul.mubr.bf16.gmra.mrb[164].mxu0 %v11767_v31  ;;  %v2487_v31 = vor.u32 %v2486_v32, %v10740_v62  ;;  %v2501_v25 = vor.u32 %v2500_v24, %v2497_v9  ;;  %v6945_v9 = vcombine.low %v10686_v28, %v10689_v44  ;;  %v2226_v24 = vld [vmem:[#allocation2 + $0xb0] sm:$0x1] }
 0x1f5   : > { %v7573_v30 = vpop.f32.mrb[57].mxu1  ;;  %5006 = vmatprep.mubr.bf16.mxu0 %v11740_v61 }
 0x1f6   : > { %5144 = vmatmul.mubr.bf16.gmra.mrb[156].mxu1 %v6943_v42  ;;  %v7574_v53 = vadd.f32 %v7573_v30, %v7572_v41  ;;  %v7575_v51 = vpop.f32.mrb[58].mxu1  ;;  %v2477_v41 = vor.u32 %v2476_v33, %v2473_v3  ;;  %v6944_v30 = vcombine.low %v10656_v20, %v10660_v11  ;;  %v10762_v33 = vcombine.low %v2459_v40, %v2469_v60  ;;  %v2225_v20 = vld [vmem:[#allocation2 + $0xa4] sm:$0x1]  ;;  %v10766_v11 = vld [vmem:[#allocation2 + $0xac] sm:$0xf] }
 0x1f7   : > { %5151 = vmatprep.mubr.bf16.mxu1 %v10735_v45  ;;  %v7576_v8 = vpop.f32.mrb[59].mxu1  ;;  %v7466_v1 = vpop.f32.mrb[60].mxu0  ;;  %v2488_v36 = vrot.slane %v2487_v31, 4  ;;  %v2514_v40 = vshll.u32 %v2225_v20, 16  ;;  %v2528_v60 = vshll.u32 %v10766_v11, 16 }
 0x1f8   : > { %v3642_v21 = vadd.f32 %v7574_v53, %v7462_v10  ;;  %v7577_v49 = vadd.f32 %v7576_v8, %v7575_v51  ;;  %v7467_v42 = vpop.f32.mrb[61].mxu0  ;;  %v2510_v10 = vrot.slane %v2508_v46, 4  ;;  %11768 = vst [vmem:[#allocation6_spill] sm:$0xff] %v10762_v33  ;;  %v2492_v53 = vrot.slane %v2490_v48, 5 }
 0x1f9   : > { %v10756_v45 = vadd.f32 %v7467_v42, %v7466_v1  ;;  %v7469_v61 = vpop.f32.mrb[62].mxu0  ;;  %v2519_v46 = vshrl.u32 %v10760_v37, 16  ;;  %v2532_v1 = vshrl.u32 %v10766_v11, 16  ;;  %v2516_v20 = vrot.slane %v2514_v40, 5 }
 0x1fa   : > { %8513 = vtanh.f32 %v3642_v21  ;;  %v3645_v39 = vadd.f32 %v7577_v49, %v7465_v6  ;;  %v7470_v23 = vpop.f32.mrb[63].mxu0  ;;  %v2478_v6 = vrot.slane %v2477_v41, 4  ;;  %v2511_v8 = vor.u32 %v2510_v10, %v10758_v0 }
 0x1fb   : > { %v10764_v32 = vadd.f32 %v7470_v23, %v7469_v61  ;;  %v2522_v61 = vshll.u32 %v10760_v37, 16  ;;  %v2493_v49 = vsel %vm9012_vm2, %v2488_v36, %v2492_v53  ;;  %v10789_v28 = vrot.slane %v2528_v60, 5  ;;  %v11771_v53 = vld [vmem:[#allocation25_spill] sm:$0xff] }
 0x1fc   : > { %v8510_v3 = vpop.eup %8509  ;;  %8515 = vtanh.f32 %v3645_v39  ;;  %5007 = vmatmul.mubr.bf16.gmra.mrb[168].mxu0 %v11769_v19  ;;  %v2483_v21 = vsel %vm9012_vm2, %v2478_v6, %v10740_v62  ;;  %v2521_v39 = vrot.slane %v2519_v46, 4  ;;  %v2534_v44 = vrot.slane %v2532_v1, 4  ;;  %v10795_v6 = vld [vmem:[#allocation2 + $0xb4] sm:$0xf] }
 0x1fd   : > { %3715 = vst.msk [vmem:[%s10204_s13 + $0xd0] sm:$0xff] %vm3688_vm14, %v8510_v3  ;;  %5014 = vmatprep.mubr.bf16.mxu0 %v11743_v29  ;;  %v2524_v23 = vrot.slane %v2522_v61, 5  ;;  %v2512_v3 = vrot.slane %v2511_v8, 4  ;;  %v10791_v19 = vcombine.low %v2483_v21, %v2493_v49  ;;  %v2538_v61 = vshll.u32 %v2226_v24, 16 }
 0x1fe   : > { %v8512_v51 = vpop.eup %8511  ;;  %5152 = vmatmul.mubr.bf16.gmra.mrb[160].mxu1 %v6944_v30  ;;  %v2502_v30 = vrot.slane %v2501_v25, 4  ;;  %v2535_v60 = vor.u32 %v2534_v44, %v10789_v28  ;;  %v2543_v1 = vshrl.u32 %v10795_v6, 16 }
 0x1ff   : > { %3716 = vst.msk [vmem:[%s10204_s13 + $0xd8] sm:$0xff] %vm3688_vm14, %v8512_v51  ;;  %5159 = vmatprep.mubr.bf16.mxu1 %v10762_v33  ;;  %v7600_v48 = vpop.f32.mrb[64].mxu0  ;;  %11770 = vst [vmem:[#allocation5_spill] sm:$0xff] %v10791_v19  ;;  %v10798_v51 = vld [vmem:[#allocation2 + $0xb8] sm:$0xf]  ;;  %v2525_v46 = vor.u32 %v2524_v23, %v2521_v39  ;;  %v2517_v40 = vsel %vm9012_vm2, %v2512_v3, %v2516_v20 }
 0x200   : > { %v7601_v42 = vpop.f32.mrb[65].mxu0  ;;  %v2507_v25 = vsel %vm9012_vm2, %v2502_v30, %v10758_v0  ;;  %v2552_v21 = vshll.u32 %v10798_v51, 16  ;;  %v2556_v49 = vshrl.u32 %v10798_v51, 16  ;;  %v2536_v44 = vrot.slane %v2535_v60, 4  ;;  %v10834_v60 = vld [vmem:[#allocation2 + $0xc4] sm:$0xf] }
 0x201   : > { %v10787_v41 = vadd.f32 %v7601_v42, %v7600_v48  ;;  %v7603_v31 = vpop.f32.mrb[66].mxu0  ;;  %v2546_v48 = vshll.u32 %v10795_v6, 16  ;;  %v10818_v30 = vcombine.low %v2507_v25, %v2517_v40  ;;  %v2526_v23 = vrot.slane %v2525_v46, 4  ;;  %v11773_v40 = vld [vmem:[#allocation27_spill] sm:$0xff] }
 0x202   : > { %v7604_v10 = vpop.f32.mrb[67].mxu0  ;;  %v10824_v29 = vrot.slane %v2552_v21, 5 }
 0x203   : > { %v10793_v62 = vadd.f32 %v7604_v10, %v7603_v31  ;;  %v6946_v31 = vcombine.low %v10713_v15, %v10719_v57  ;;  %11772 = vst [vmem:[#allocation8_spill] sm:$0xff] %v10818_v30  ;;  %v2227_v10 = vld [vmem:[#allocation2 + $0xbc] sm:$0x1]  ;;  %v2558_v15 = vrot.slane %v2556_v49, 4  ;;  %v10826_v57 = vld [vmem:[#allocation2 + $0xc0] sm:$0xf] }
 0x204   : > { %v8514_v36 = vpop.eup %8513  ;;  %5015 = vmatmul.mubr.bf16.gmra.mrb[172].mxu0 %v11771_v53  ;;  %v2545_v53 = vrot.slane %v2543_v1, 4  ;;  %v2567_v21 = vshrl.u32 %v10826_v57, 16  ;;  %v2570_v49 = vshll.u32 %v10826_v57, 16 }
 0x205   : > { %3717 = vst.msk [vmem:[%s10204_s13 + $0xe0] sm:$0xff] %vm3688_vm14, %v8514_v36  ;;  %5022 = vmatprep.mubr.bf16.mxu0 %v11746_v4  ;;  %v2540_v36 = vrot.slane %v2538_v61, 5  ;;  %v2531_v61 = vsel %vm9012_vm2, %v2526_v23, %v10789_v28  ;;  %v2559_v28 = vor.u32 %v2558_v15, %v10824_v29  ;;  %v6947_v23 = vcombine.low %v10733_v27, %v10737_v43 }
 0x206   : > { %v8516_v8 = vpop.eup %8515  ;;  %5160 = vmatmul.mubr.bf16.gmra.mrb[164].mxu1 %v6945_v9 }
 0x207   : > { %3718 = vst.msk [vmem:[%s10204_s13 + $0xe8] sm:$0xff] %vm3688_vm14, %v8516_v8  ;;  %5167 = vmatprep.mubr.bf16.mxu1 %v10791_v19  ;;  %v7606_v0 = vpop.f32.mrb[68].mxu0  ;;  %v2548_v8 = vrot.slane %v2546_v48, 5  ;;  %v2562_v48 = vshll.u32 %v2227_v10, 16 }
 0x208   : > { %v7607_v42 = vpop.f32.mrb[69].mxu0 }
 0x209   : > { %v7578_v9 = vpop.f32.mrb[60].mxu1  ;;  %v10820_v24 = vadd.f32 %v7607_v42, %v7606_v0  ;;  %v7609_v39 = vpop.f32.mrb[70].mxu0  ;;  %v2549_v1 = vor.u32 %v2548_v8, %v2545_v53  ;;  %v2569_v53 = vrot.slane %v2567_v21, 4  ;;  %v2572_v8 = vrot.slane %v2570_v49, 5  ;;  %v10860_v21 = vld [vmem:[#allocation2 + $0xd0] sm:$0xf] }
 0x20a   : > { %v7579_v3 = vpop.f32.mrb[61].mxu1  ;;  %v7610_v20 = vpop.f32.mrb[71].mxu0 }
 0x20b   : > { %v7580_v19 = vadd.f32 %v7579_v3, %v7578_v9  ;;  %v7581_v4 = vpop.f32.mrb[62].mxu1  ;;  %v10822_v33 = vadd.f32 %v7610_v20, %v7609_v39  ;;  %v2576_v9 = vshll.u32 %v10834_v60, 16  ;;  %v2573_v49 = vor.u32 %v2572_v8, %v2569_v53 }
 0x20c   : > { %v7582_v25 = vpop.f32.mrb[63].mxu1  ;;  %5023 = vmatmul.mubr.bf16.gmra.mrb[176].mxu0 %v11773_v40 }
 0x20d   : > { %v3650_v46 = vadd.f32 %v7580_v19, %v10756_v45  ;;  %v7583_v0 = vadd.f32 %v7582_v25, %v7581_v4  ;;  %5030 = vmatprep.mubr.bf16.mxu0 %v11750_v38  ;;  %v2541_v4 = vsel %vm9012_vm2, %v2536_v44, %v2540_v36  ;;  %v2550_v36 = vrot.slane %v2549_v1, 4  ;;  %v11774_v38 = vld [vmem:[#allocation31_spill] sm:$0xff] }
 0x20e   : > { %5168 = vmatmul.mubr.bf16.gmra.mrb[168].mxu1 %v6946_v31  ;;  %v2580_v31 = vshrl.u32 %v10834_v60, 16  ;;  %v10849_v20 = vcombine.low %v2531_v61, %v2541_v4  ;;  %v10854_v27 = vrot.slane %v2576_v9, 5 }
 0x20f   : > { %8517 = vtanh.f32 %v3650_v46  ;;  %v3653_v42 = vadd.f32 %v7583_v0, %v10764_v32  ;;  %5175 = vmatprep.mubr.bf16.mxu1 %v10818_v30  ;;  %v7612_v45 = vpop.f32.mrb[72].mxu0  ;;  %v2560_v46 = vrot.slane %v2559_v28, 4  ;;  %v2564_v0 = vrot.slane %v2562_v48, 5 }
 0x210   : > { %v7613_v19 = vpop.f32.mrb[73].mxu0  ;;  %v2582_v43 = vrot.slane %v2580_v31, 4  ;;  %v2555_v48 = vsel %vm9012_vm2, %v2550_v36, %v10824_v29  ;;  %v2600_v29 = vshll.u32 %v10860_v21, 16  ;;  %v6948_v36 = vcombine.low %v10760_v37, %v10766_v11 }
 0x211   : > { %8519 = vtanh.f32 %v3653_v42  ;;  %v7712_v39 = vpop.f32.mrb[64].mxu1  ;;  %v10847_v10 = vadd.f32 %v7613_v19, %v7612_v45  ;;  %v7615_v32 = vpop.f32.mrb[74].mxu0  ;;  %v2228_v42 = vld [vmem:[#allocation2 + $0xc8] sm:$0x1]  ;;  %v10856_v45 = vld [vmem:[#allocation2 + $0xcc] sm:$0xf] }
 0x212   : > { %v7713_v3 = vpop.f32.mrb[65].mxu1  ;;  %v7616_v44 = vpop.f32.mrb[75].mxu0  ;;  %v2586_v4 = vshll.u32 %v2228_v42, 16  ;;  %v2591_v28 = vshrl.u32 %v10856_v45, 16  ;;  %v2583_v9 = vor.u32 %v2582_v43, %v10854_v27  ;;  %v2594_v31 = vshll.u32 %v10856_v45, 16 }
 0x213   : > { %v7714_v15 = vadd.f32 %v7713_v3, %v7712_v39  ;;  %v7715_v25 = vpop.f32.mrb[66].mxu1  ;;  %v10851_v40 = vadd.f32 %v7616_v44, %v7615_v32  ;;  %v2604_v39 = vshrl.u32 %v10860_v21, 16 }
 0x214   : > { %v7716_v30 = vpop.f32.mrb[67].mxu1  ;;  %5031 = vmatmul.mubr.bf16.gmra.mrb[180].mxu0 %v11774_v38  ;;  %v2588_v43 = vrot.slane %v2586_v4, 5 }
 0x215   : > { %v4302_v61 = vadd.f32 %v7714_v15, %v10787_v41  ;;  %v7717_v1 = vadd.f32 %v7716_v30, %v7715_v25  ;;  %5038 = vmatprep.mubr.bf16.mxu0 %v11753_v5  ;;  %v2565_v41 = vsel %vm9012_vm2, %v2560_v46, %v2564_v0  ;;  %v2574_v15 = vrot.slane %v2573_v49, 4  ;;  %v2229_v49 = vld [vmem:[#allocation2 + $0xd4] sm:$0x1] }
 0x216   : > { %5176 = vmatmul.mubr.bf16.gmra.mrb[172].mxu1 %v6947_v23  ;;  %v10880_v53 = vcombine.low %v2555_v48, %v2565_v41  ;;  %v2606_v37 = vrot.slane %v2604_v39, 4  ;;  %v2610_v39 = vshll.u32 %v2229_v49, 16 }
 0x217   : > { %8521 = vtanh.f32 %v4302_v61  ;;  %v4305_v38 = vadd.f32 %v7717_v1, %v10793_v62  ;;  %5183 = vmatprep.mubr.bf16.mxu1 %v10849_v20  ;;  %v7618_v30 = vpop.f32.mrb[76].mxu0  ;;  %v2593_v61 = vrot.slane %v2591_v28, 4  ;;  %v2579_v41 = vsel %vm9012_vm2, %v2574_v15, %v10854_v27 }
 0x218   : > { %v7619_v19 = vpop.f32.mrb[77].mxu0  ;;  %v6949_v27 = vcombine.low %v10795_v6, %v10798_v51  ;;  %v11777_v6 = vld [vmem:[#allocation39_spill] sm:$0xff] }
 0x219   : > { %v8518_v23 = vpop.eup %8517  ;;  %8523 = vtanh.f32 %v4305_v38  ;;  %v7718_v62 = vpop.f32.mrb[68].mxu1  ;;  %v10874_v32 = vadd.f32 %v7619_v19, %v7618_v30  ;;  %v11775_v38 = vld [vmem:[#allocation34_spill] sm:$0xff]  ;;  %v2584_v30 = vrot.slane %v2583_v9, 4  ;;  %v2596_v19 = vrot.slane %v2594_v31, 5 }
 0x21a   : > { %v7621_v3 = vpop.f32.mrb[78].mxu0  ;;  %3719 = vst.msk [vmem:[%s10204_s13 + $0xf0] sm:$0xff] %vm3688_vm14, %v8518_v23  ;;  %v7719_v44 = vpop.f32.mrb[69].mxu1  ;;  %v10887_v23 = vrot.slane %v2600_v29, 5 }
 0x21b   : > { %v7622_v8 = vpop.f32.mrb[79].mxu0  ;;  %v8520_v25 = vpop.eup %8519  ;;  %v7720_v46 = vadd.f32 %v7719_v44, %v7718_v62  ;;  %v2589_v9 = vsel %vm9012_vm2, %v2584_v30, %v2588_v43  ;;  %v2597_v31 = vor.u32 %v2596_v19, %v2593_v61  ;;  %v2612_v19 = vrot.slane %v2610_v39, 5 }
 0x21c   : > { %v7721_v0 = vpop.f32.mrb[70].mxu1  ;;  %v10882_v42 = vadd.f32 %v7622_v8, %v7621_v3  ;;  %3720 = vst.msk [vmem:[%s10204_s13 + $0xf8] sm:$0xff] %vm3688_vm14, %v8520_v25  ;;  %5039 = vmatmul.mubr.bf16.gmra.mrb[184].mxu0 %v11775_v38  ;;  %v2607_v29 = vor.u32 %v2606_v37, %v10887_v23 }
 0x21d   : > { %v7722_v1 = vpop.f32.mrb[71].mxu1  ;;  %v4310_v11 = vadd.f32 %v7720_v46, %v10820_v24  ;;  %5046 = vmatprep.mubr.bf16.mxu0 %v11756_v16  ;;  %v2598_v38 = vrot.slane %v2597_v31, 4 }
 0x21e   : > { %v7723_v48 = vadd.f32 %v7722_v1, %v7721_v0  ;;  %5184 = vmatmul.mubr.bf16.gmra.mrb[176].mxu1 %v6948_v36  ;;  %v10905_v0 = vcombine.low %v2579_v41, %v2589_v9  ;;  %v11776_v1 = vld [vmem:[#allocation37_spill] sm:$0xff]  ;;  %v2608_v30 = vrot.slane %v2607_v29, 4  ;;  %v2614_v29 = vld [vmem:[#allocation2 + $0x18] sm:$0xe] }
 0x21f   : > { %8525 = vtanh.f32 %v4310_v11  ;;  %5191 = vmatprep.mubr.bf16.mxu1 %v10880_v53  ;;  %v7624_v28 = vpop.f32.mrb[80].mxu0  ;;  %v2603_v49 = vsel %vm9012_vm2, %v2598_v38, %v10887_v23  ;;  %v6950_v23 = vcombine.low %v10826_v57, %v10834_v60  ;;  %v11778_v60 = vld [vmem:[#allocation40_spill] sm:$0xff] }
 0x220   : > { %v4313_v4 = vadd.f32 %v7723_v48, %v10822_v33  ;;  %v7625_v24 = vpop.f32.mrb[81].mxu0 }
 0x221   : > { %v8522_v62 = vpop.eup %8521  ;;  %v7724_v3 = vpop.f32.mrb[72].mxu1  ;;  %v10899_v33 = vadd.f32 %v7625_v24, %v7624_v28 }
 0x222   : > { %8527 = vtanh.f32 %v4313_v4  ;;  %v7627_v44 = vpop.f32.mrb[82].mxu0  ;;  %6904 = vst.msk [vmem:[%s10204_s13 + $0x100] sm:$0xff] %vm3688_vm14, %v8522_v62  ;;  %v7725_v36 = vpop.f32.mrb[73].mxu1  ;;  %v2613_v4 = vsel %vm9012_vm2, %v2608_v30, %v2612_v19 }
 0x223   : > { %v7628_v8 = vpop.f32.mrb[83].mxu0  ;;  %v8524_v15 = vpop.eup %8523  ;;  %v7726_v25 = vadd.f32 %v7725_v36, %v7724_v3  ;;  %v10927_v36 = vcombine.low %v2603_v49, %v2613_v4 }
 0x224   : > { %v7727_v46 = vpop.f32.mrb[74].mxu1  ;;  %v10907_v43 = vadd.f32 %v7628_v8, %v7627_v44  ;;  %6905 = vst.msk [vmem:[%s10204_s13 + $0x108] sm:$0xff] %vm3688_vm14, %v8524_v15  ;;  %5047 = vmatmul.mubr.bf16.gmra.mrb[188].mxu0 %v11776_v1  ;;  %v6664_v15 = vrot.slane %v2614_v29, 9 }
 0x225   : > { %v7728_v61 = vpop.f32.mrb[75].mxu1  ;;  %v4318_v37 = vadd.f32 %v7726_v25, %v10847_v10  ;;  %5634 = vmatprep.mubr.bf16.mxu0 %v11777_v6  ;;  %v8779_v10 = vld [vmem:[#allocation2 + $0x1c] sm:$0xf] }
 0x226   : > { %v7729_v11 = vadd.f32 %v7728_v61, %v7727_v46  ;;  %5192 = vmatmul.mubr.bf16.gmra.mrb[180].mxu1 %v6949_v27  ;;  %v2680_v28 = vrot.slane %v8779_v10, 5  ;;  %v8780_v46 = vld [vmem:[#allocation2 + $0x20] sm:$0x1] }
 0x227   : > { %8529 = vtanh.f32 %v4318_v37  ;;  %5199 = vmatprep.mubr.bf16.mxu1 %v10905_v0  ;;  %v7630_v48 = vpop.f32.mrb[84].mxu0  ;;  %v2683_v61 = vrot.slane %v8780_v46, 5 }
 0x228   : > { %v4321_v51 = vadd.f32 %v7729_v11, %v10851_v40  ;;  %v7631_v41 = vpop.f32.mrb[85].mxu0  ;;  %v2682_v25 = vrot.slane %v2680_v28, 4  ;;  %v8781_v11 = vld [vmem:[#allocation2 + $0x28] sm:$0xf] }
 0x229   : > { %v8526_v9 = vpop.eup %8525  ;;  %v7730_v24 = vpop.f32.mrb[76].mxu1  ;;  %v10921_v31 = vadd.f32 %v7631_v41, %v7630_v48  ;;  %v6951_v41 = vcombine.low %v10856_v45, %v10860_v21  ;;  %v11779_v45 = vld [vmem:[#allocation41_spill] sm:$0xff] }
 0x22a   : > { %8531 = vtanh.f32 %v4321_v51  ;;  %v7633_v40 = vpop.f32.mrb[86].mxu0  ;;  %6906 = vst.msk [vmem:[%s10204_s13 + $0x110] sm:$0xff] %vm3688_vm14, %v8526_v9  ;;  %v7731_v39 = vpop.f32.mrb[77].mxu1  ;;  %v2684_v19 = vsel %vm9891_vm13, %v2682_v25, %v2683_v61  ;;  %v8783_v61 = vld [vmem:[#allocation2 + $0x34] sm:$0xf] }
 0x22b   : > { %v7634_v62 = vpop.f32.mrb[87].mxu0  ;;  %v7732_v3 = vadd.f32 %v7731_v39, %v7730_v24  ;;  %v7733_v44 = vpop.f32.mrb[78].mxu1 }
 0x22c   : > { %v8528_v7 = vpop.eup %8527  ;;  %v10929_v27 = vadd.f32 %v7634_v62, %v7633_v40  ;;  %v7734_v8 = vpop.f32.mrb[79].mxu1  ;;  %5635 = vmatmul.mubr.bf16.vlgmr.msra.gmra.mrb[192].mxu0 %v11749_v34  ;;  %v2681_v34 = vsel %vm9891_vm13, %v6664_v15, %v2680_v28 }
 0x22d   : > { %6907 = vst.msk [vmem:[%s10204_s13 + $0x118] sm:$0xff] %vm3688_vm14, %v8528_v7  ;;  %v4326_v1 = vadd.f32 %v7732_v3, %v10874_v32  ;;  %v7735_v57 = vadd.f32 %v7734_v8, %v7733_v44  ;;  %5642 = vmatprep.mubr.bf16.mxu0 %v11778_v60  ;;  %v2687_v32 = vrot.slane %v8781_v11, 5  ;;  %v7096_v40 = vcombine.low %v2681_v34, %v2684_v19  ;;  %v8782_v7 = vld [vmem:[#allocation2 + $0x2c] sm:$0x1] }
 0x22e   : > { %5200 = vmatmul.mubr.bf16.gmra.mrb[184].mxu1 %v6950_v23  ;;  %v2690_v3 = vrot.slane %v8782_v7, 5 }
 0x22f   : > { %8533 = vtanh.f32 %v4326_v1  ;;  %v4329_v38 = vadd.f32 %v7735_v57, %v10882_v42  ;;  %5207 = vmatprep.mubr.bf16.mxu1 %v10927_v36  ;;  %v7636_v30 = vpop.f32.mrb[88].mxu0  ;;  %v2615_v42 = vld [vmem:[#allocation2 + $0x24] sm:$0xe]  ;;  %v2689_v62 = vrot.slane %v2687_v32, 4 }
 0x230   : > { %v7637_v37 = vpop.f32.mrb[89].mxu0  ;;  %v6665_v23 = vrot.slane %v2615_v42, 9 }
 0x231   : > { %v8530_v6 = vpop.eup %8529  ;;  %8535 = vtanh.f32 %v4329_v38  ;;  %v7736_v51 = vpop.f32.mrb[80].mxu1  ;;  %v10942_v48 = vadd.f32 %v7637_v37, %v7636_v30  ;;  %v2616_v30 = vld [vmem:[#allocation2 + $0x30] sm:$0xe] }
 0x232   : > { %v7639_v49 = vpop.f32.mrb[90].mxu0  ;;  %6908 = vst.msk [vmem:[%s10204_s13 + $0x120] sm:$0xff] %vm3688_vm14, %v8530_v6  ;;  %v7737_v4 = vpop.f32.mrb[81].mxu1  ;;  %v2688_v25 = vsel %vm9891_vm13, %v6665_v23, %v2687_v32  ;;  %v8785_v23 = vld [vmem:[#allocation2 + $0x40] sm:$0xf] }
 0x233   : > { %v7640_v10 = vpop.f32.mrb[91].mxu0  ;;  %v7738_v9 = vadd.f32 %v7737_v4, %v7736_v51  ;;  %v7739_v24 = vpop.f32.mrb[82].mxu1  ;;  %v8784_v4 = vld [vmem:[#allocation2 + $0x38] sm:$0x1] }
 0x234   : > { %v8532_v28 = vpop.eup %8531  ;;  %v10948_v29 = vadd.f32 %v7640_v10, %v7639_v49  ;;  %v7740_v39 = vpop.f32.mrb[83].mxu1  ;;  %5643 = vmatmul.mubr.bf16.gmra.mrb[196].mxu0 %v11752_v22  ;;  %v2691_v22 = vsel %vm9891_vm13, %v2689_v62, %v2690_v3  ;;  %v6666_v49 = vrot.slane %v2616_v30, 9  ;;  %v2617_v3 = vld [vmem:[#allocation2 + $0x3c] sm:$0xe] }
 0x235   : > { %6909 = vst.msk [vmem:[%s10204_s13 + $0x128] sm:$0xff] %vm3688_vm14, %v8532_v28  ;;  %v4334_v44 = vadd.f32 %v7738_v9, %v10899_v33  ;;  %v7741_v8 = vadd.f32 %v7740_v39, %v7739_v24  ;;  %5650 = vmatprep.mubr.bf16.mxu0 %v11779_v45  ;;  %v2694_v33 = vrot.slane %v8783_v61, 5  ;;  %v7097_v32 = vcombine.low %v2688_v25, %v2691_v22 }
 0x236   : > { %5208 = vmatmul.mubr.bf16.gmra.mrb[188].mxu1 %v6951_v41  ;;  %v2697_v41 = vrot.slane %v8784_v4, 5 }
 0x237   : > { %8537 = vtanh.f32 %v4334_v44  ;;  %v4337_v21 = vadd.f32 %v7741_v8, %v10907_v43  ;;  %5795 = vmatprep.mubr.bf16.mxu1 %v7096_v40  ;;  %v7642_v15 = vpop.f32.mrb[92].mxu0  ;;  %v2696_v42 = vrot.slane %v2694_v33, 4 }
 0x238   : > { %v7643_v46 = vpop.f32.mrb[93].mxu0 }
 0x239   : > { %v8534_v1 = vpop.eup %8533  ;;  %8539 = vtanh.f32 %v4337_v21  ;;  %v7742_v57 = vpop.f32.mrb[84].mxu1  ;;  %v10960_v60 = vadd.f32 %v7643_v46, %v7642_v15  ;;  %v2698_v40 = vsel %vm9891_vm13, %v2696_v42, %v2697_v41  ;;  %v6667_v46 = vrot.slane %v2617_v3, 9 }
 0x23a   : > { %v7645_v38 = vpop.f32.mrb[94].mxu0  ;;  %6910 = vst.msk [vmem:[%s10204_s13 + $0x130] sm:$0xff] %vm3688_vm14, %v8534_v1  ;;  %v7743_v43 = vpop.f32.mrb[85].mxu1 }
 0x23b   : > { %v7646_v34 = vpop.f32.mrb[95].mxu0  ;;  %v8536_v19 = vpop.eup %8535  ;;  %v7744_v37 = vadd.f32 %v7743_v43, %v7742_v57 }
 0x23c   : > { %v7745_v11 = vpop.f32.mrb[86].mxu1  ;;  %v10964_v6 = vadd.f32 %v7646_v34, %v7645_v38  ;;  %6911 = vst.msk [vmem:[%s10204_s13 + $0x138] sm:$0xff] %vm3688_vm14, %v8536_v19  ;;  %5651 = vmatmul.mubr.bf16.gmra.mrb[200].mxu0 %v9226_v14  ;;  %v2695_v14 = vsel %vm9891_vm13, %v6666_v49, %v2694_v33  ;;  %v8786_v33 = vld [vmem:[#allocation2 + $0x44] sm:$0x1] }
 0x23d   : > { %v7746_v51 = vpop.f32.mrb[87].mxu1  ;;  %v4342_v10 = vadd.f32 %v7744_v37, %v10921_v31  ;;  %5658 = vmatprep.mubr.bf16.mxu0 %v10134_v35  ;;  %v2701_v31 = vrot.slane %v8785_v23, 5  ;;  %v7098_v15 = vcombine.low %v2695_v14, %v2698_v40  ;;  %v2704_v1 = vrot.slane %v8786_v33, 5  ;;  %v8787_v37 = vld [vmem:[#allocation2 + $0x4c] sm:$0xf] }
 0x23e   : > { %v7747_v28 = vadd.f32 %v7746_v51, %v7745_v11  ;;  %5796 = vmatmul.mubr.bf16.vlgmr.msra.gmra.mrb[192].mxu1 %v10442_v47  ;;  %v2618_v51 = vld [vmem:[#allocation2 + $0x48] sm:$0xe]  ;;  %v8788_v40 = vld [vmem:[#allocation2 + $0x50] sm:$0x1] }
 0x23f   : > { %8541 = vtanh.f32 %v4342_v10  ;;  %5803 = vmatprep.mubr.bf16.mxu1 %v7097_v32  ;;  %v7648_v24 = vpop.f32.mrb[96].mxu0  ;;  %v2703_v61 = vrot.slane %v2701_v31, 4 }
 0x240   : > { %v4345_v9 = vadd.f32 %v7747_v28, %v10929_v27  ;;  %v7649_v39 = vpop.f32.mrb[97].mxu0 }
 0x241   : > { %v8538_v62 = vpop.eup %8537  ;;  %v7748_v35 = vpop.f32.mrb[88].mxu1  ;;  %v10977_v47 = vadd.f32 %v7649_v39, %v7648_v24  ;;  %v2705_v34 = vsel %vm9891_vm13, %v2703_v61, %v2704_v1  ;;  %v6668_v24 = vrot.slane %v2618_v51, 9  ;;  %v2711_v39 = vrot.slane %v8788_v40, 5 }
 0x242   : > { %8543 = vtanh.f32 %v4345_v9  ;;  %v7651_v7 = vpop.f32.mrb[98].mxu0  ;;  %6912 = vst.msk [vmem:[%s10204_s13 + $0x140] sm:$0xff] %vm3688_vm14, %v8538_v62  ;;  %v7749_v27 = vpop.f32.mrb[89].mxu1 }
 0x243   : > { %v7652_v44 = vpop.f32.mrb[99].mxu0  ;;  %v8540_v8 = vpop.eup %8539  ;;  %v7750_v45 = vadd.f32 %v7749_v27, %v7748_v35  ;;  %v8789_v27 = vld [vmem:[#allocation2 + $0x58] sm:$0xf] }
 0x244   : > { %v7751_v21 = vpop.f32.mrb[90].mxu1  ;;  %v10981_v25 = vadd.f32 %v7652_v44, %v7651_v7  ;;  %6913 = vst.msk [vmem:[%s10204_s13 + $0x148] sm:$0xff] %vm3688_vm14, %v8540_v8  ;;  %5659 = vmatmul.mubr.bf16.gmra.mrb[204].mxu0 %v9320_v12  ;;  %v2702_v12 = vsel %vm9891_vm13, %v6667_v46, %v2701_v31 }
 0x245   : > { %v7752_v22 = vpop.f32.mrb[91].mxu1  ;;  %v4350_v57 = vadd.f32 %v7750_v45, %v10942_v48  ;;  %5666 = vmatprep.mubr.bf16.mxu0 %v10171_v63  ;;  %v2708_v48 = vrot.slane %v8787_v37, 5  ;;  %v7099_v10 = vcombine.low %v2702_v12, %v2705_v34  ;;  %v2619_v45 = vld [vmem:[#allocation2 + $0x54] sm:$0xe]  ;;  %v11781_v37 = vld [vmem:[#allocation42_spill] sm:$0xff] }
 0x246   : > { %v7753_v38 = vadd.f32 %v7752_v22, %v7751_v21  ;;  %5804 = vmatmul.mubr.bf16.gmra.mrb[196].mxu1 %v10491_v18 }
 0x247   : > { %8545 = vtanh.f32 %v4350_v57  ;;  %5811 = vmatprep.mubr.bf16.mxu1 %v7098_v15  ;;  %v7654_v43 = vpop.f32.mrb[100].mxu0  ;;  %v2710_v14 = vrot.slane %v2708_v48, 4  ;;  %v11780_v57 = vld [vmem:[#allocation13_spill] sm:$0xff] }
 0x248   : > { %v4353_v30 = vadd.f32 %v7753_v38, %v10948_v29  ;;  %v7655_v19 = vpop.f32.mrb[101].mxu0  ;;  %v6669_v38 = vrot.slane %v2619_v45, 9 }
 0x249   : > { %v8542_v11 = vpop.eup %8541  ;;  %v7754_v63 = vpop.f32.mrb[92].mxu1  ;;  %v10994_v18 = vadd.f32 %v7655_v19, %v7654_v43  ;;  %v2712_v7 = vsel %vm9891_vm13, %v2710_v14, %v2711_v39  ;;  %v8790_v43 = vld [vmem:[#allocation2 + $0x5c] sm:$0x1] }
 0x24a   : > { %8547 = vtanh.f32 %v4353_v30  ;;  %v7657_v32 = vpop.f32.mrb[102].mxu0  ;;  %6914 = vst.msk [vmem:[%s10204_s13 + $0x150] sm:$0xff] %vm3688_vm14, %v8542_v11  ;;  %v7755_v29 = vpop.f32.mrb[93].mxu1  ;;  %v2718_v12 = vrot.slane %v8790_v43, 5 }
 0x24b   : > { %v7658_v49 = vpop.f32.mrb[103].mxu0  ;;  %v7756_v4 = vadd.f32 %v7755_v29, %v7754_v63  ;;  %v7757_v41 = vpop.f32.mrb[94].mxu1 }
 0x24c   : > { %v8544_v42 = vpop.eup %8543  ;;  %v10998_v28 = vadd.f32 %v7658_v49, %v7657_v32  ;;  %v7758_v9 = vpop.f32.mrb[95].mxu1  ;;  %5667 = vmatmul.mubr.bf16.gmra.mrb[208].mxu0 %v9356_v56  ;;  %v2709_v56 = vsel %vm9891_vm13, %v6668_v24, %v2708_v48  ;;  %v11782_v48 = vld [vmem:[#allocation30_spill] sm:$0xff]  ;;  %v8791_v49 = vld [vmem:[#allocation2 + $0x64] sm:$0xf] }
 0x24d   : > { %6915 = vst.msk [vmem:[%s10204_s13 + $0x158] sm:$0xff] %vm3688_vm14, %v8544_v42  ;;  %v4358_v23 = vadd.f32 %v7756_v4, %v10960_v60  ;;  %v7759_v31 = vadd.f32 %v7758_v9, %v7757_v41  ;;  %5674 = vmatprep.mubr.bf16.mxu0 %v10215_v54  ;;  %v2715_v60 = vrot.slane %v8789_v27, 5  ;;  %v7100_v61 = vcombine.low %v2709_v56, %v2712_v7  ;;  %v2620_v9 = vld [vmem:[#allocation2 + $0x60] sm:$0xe]  ;;  %v8792_v7 = vld [vmem:[#allocation2 + $0x68] sm:$0x1] }
 0x24e   : > { %5812 = vmatmul.mubr.bf16.gmra.mrb[200].mxu1 %v10543_v26 }
 0x24f   : > { %8549 = vtanh.f32 %v4358_v23  ;;  %v4361_v62 = vadd.f32 %v7759_v31, %v10964_v6  ;;  %5819 = vmatprep.mubr.bf16.mxu1 %v7099_v10  ;;  %v7660_v35 = vpop.f32.mrb[104].mxu0  ;;  %v2717_v30 = vrot.slane %v2715_v60, 4  ;;  %v2716_v32 = vsel %vm9891_vm13, %v6669_v38, %v2715_v60 }
 0x250   : > { %v7661_v3 = vpop.f32.mrb[105].mxu0 }
 0x251   : > { %v8546_v44 = vpop.eup %8545  ;;  %8551 = vtanh.f32 %v4361_v62  ;;  %v7760_v54 = vpop.f32.mrb[96].mxu1  ;;  %v11011_v26 = vadd.f32 %v7661_v3, %v7660_v35  ;;  %v2719_v51 = vsel %vm9891_vm13, %v2717_v30, %v2718_v12  ;;  %v6670_v35 = vrot.slane %v2620_v9, 9 }
 0x252   : > { %v7663_v8 = vpop.f32.mrb[106].mxu0  ;;  %6916 = vst.msk [vmem:[%s10204_s13 + $0x160] sm:$0xff] %vm3688_vm14, %v8546_v44  ;;  %v7761_v6 = vpop.f32.mrb[97].mxu1  ;;  %v7101_v23 = vcombine.low %v2716_v32, %v2719_v51  ;;  %v2725_v3 = vrot.slane %v8792_v7, 5  ;;  %v11783_v44 = vld [vmem:[#allocation44_spill] sm:$0xff]  ;;  %v11784_v51 = vld [vmem:[#allocation45_spill] sm:$0xff] }
 0x253   : > { %v7664_v21 = vpop.f32.mrb[107].mxu0  ;;  %v7762_v22 = vadd.f32 %v7761_v6, %v7760_v54  ;;  %v7763_v46 = vpop.f32.mrb[98].mxu1 }
 0x254   : > { %v8548_v15 = vpop.eup %8547  ;;  %v11015_v33 = vadd.f32 %v7664_v21, %v7663_v8  ;;  %v7764_v1 = vpop.f32.mrb[99].mxu1  ;;  %5675 = vmatmul.mubr.bf16.gmra.mrb[212].mxu0 %v11780_v57  ;;  %v8793_v21 = vld [vmem:[#allocation2 + $0x70] sm:$0xf] }
 0x255   : > { %6917 = vst.msk [vmem:[%s10204_s13 + $0x168] sm:$0xff] %vm3688_vm14, %v8548_v15  ;;  %v4366_v34 = vadd.f32 %v7762_v22, %v10977_v47  ;;  %v7765_v19 = vadd.f32 %v7764_v1, %v7763_v46  ;;  %5682 = vmatprep.mubr.bf16.mxu0 %v11781_v37  ;;  %v2722_v47 = vrot.slane %v8791_v49, 5 }
 0x256   : > { %5820 = vmatmul.mubr.bf16.gmra.mrb[204].mxu1 %v11782_v48  ;;  %v8794_v48 = vld [vmem:[#allocation2 + $0x74] sm:$0x1] }
 0x257   : > { %8553 = vtanh.f32 %v4366_v34  ;;  %v4369_v11 = vadd.f32 %v7765_v19, %v10981_v25  ;;  %5827 = vmatprep.mubr.bf16.mxu1 %v7100_v61  ;;  %v7666_v63 = vpop.f32.mrb[108].mxu0  ;;  %v2724_v56 = vrot.slane %v2722_v47, 4  ;;  %v2621_v61 = vld [vmem:[#allocation2 + $0x6c] sm:$0xe] }
 0x258   : > { %v7667_v29 = vpop.f32.mrb[109].mxu0  ;;  %v6671_v19 = vrot.slane %v2621_v61, 9  ;;  %v2623_v61 = vld [vmem:[#allocation2 + $0x84] sm:$0xe] }
 0x259   : > { %v8550_v42 = vpop.eup %8549  ;;  %8555 = vtanh.f32 %v4369_v11  ;;  %v7766_v4 = vpop.f32.mrb[100].mxu1  ;;  %v11028_v41 = vadd.f32 %v7667_v29, %v7666_v63  ;;  %v2726_v45 = vsel %vm9891_vm13, %v2724_v56, %v2725_v3  ;;  %v2732_v11 = vrot.slane %v8794_v48, 5  ;;  %v8798_v48 = vld [vmem:[#allocation2 + $0x8c] sm:$0x1] }
 0x25a   : > { %v7669_v10 = vpop.f32.mrb[110].mxu0  ;;  %6918 = vst.msk [vmem:[%s10204_s13 + $0x170] sm:$0xff] %vm3688_vm14, %v8550_v42  ;;  %v7767_v25 = vpop.f32.mrb[101].mxu1 }
 0x25b   : > { %v7670_v24 = vpop.f32.mrb[111].mxu0  ;;  %v8552_v14 = vpop.eup %8551  ;;  %v7768_v40 = vadd.f32 %v7767_v25, %v7766_v4  ;;  %v8795_v4 = vld [vmem:[#allocation2 + $0x7c] sm:$0xf] }
 0x25c   : > { %v7769_v39 = vpop.f32.mrb[102].mxu1  ;;  %v11032_v31 = vadd.f32 %v7670_v24, %v7669_v10  ;;  %6919 = vst.msk [vmem:[%s10204_s13 + $0x178] sm:$0xff] %vm3688_vm14, %v8552_v14  ;;  %5683 = vmatmul.mubr.bf16.gmra.mrb[216].mxu0 %v9509_v59  ;;  %v2723_v59 = vsel %vm9891_vm13, %v6670_v35, %v2722_v47  ;;  %v2622_v24 = vld [vmem:[#allocation2 + $0x78] sm:$0xe] }
 0x25d   : > { %v7770_v62 = vpop.f32.mrb[103].mxu1  ;;  %v4374_v27 = vadd.f32 %v7768_v40, %v10994_v18  ;;  %5690 = vmatprep.mubr.bf16.mxu0 %v11783_v44  ;;  %v2729_v18 = vrot.slane %v8793_v21, 5  ;;  %v7102_v43 = vcombine.low %v2723_v59, %v2726_v45  ;;  %v6672_v7 = vrot.slane %v2622_v24, 9  ;;  %v2624_v24 = vld [vmem:[#allocation2 + $0x90] sm:$0xe] }
 0x25e   : > { %v7771_v60 = vadd.f32 %v7770_v62, %v7769_v39  ;;  %5828 = vmatmul.mubr.bf16.gmra.mrb[208].mxu1 %v10621_v52 }
 0x25f   : > { %8557 = vtanh.f32 %v4374_v27  ;;  %5835 = vmatprep.mubr.bf16.mxu1 %v7101_v23  ;;  %v7672_v8 = vpop.f32.mrb[112].mxu0  ;;  %v2731_v37 = vrot.slane %v2729_v18, 4  ;;  %v8796_v27 = vld [vmem:[#allocation2 + $0x80] sm:$0x1] }
 0x260   : > { %v4377_v54 = vadd.f32 %v7771_v60, %v10998_v28  ;;  %v7673_v6 = vpop.f32.mrb[113].mxu0  ;;  %v2739_v60 = vrot.slane %v8796_v27, 5 }
 0x261   : > { %v8554_v15 = vpop.eup %8553  ;;  %v7772_v22 = vpop.f32.mrb[104].mxu1  ;;  %v11045_v52 = vadd.f32 %v7673_v6, %v7672_v8  ;;  %v2733_v47 = vsel %vm9891_vm13, %v2731_v37, %v2732_v11  ;;  %v11785_v8 = vld [vmem:[#allocation16_spill] sm:$0xff]  ;;  %v2746_v11 = vrot.slane %v8798_v48, 5  ;;  %v11791_v48 = vld [vmem:[#allocation26_spill] sm:$0xff] }
 0x262   : > { %8559 = vtanh.f32 %v4377_v54  ;;  %v7675_v46 = vpop.f32.mrb[114].mxu0  ;;  %6920 = vst.msk [vmem:[%s10204_s13 + $0x180] sm:$0xff] %vm3688_vm14, %v8554_v15  ;;  %v7773_v28 = vpop.f32.mrb[105].mxu1 }
 0x263   : > { %v7676_v1 = vpop.f32.mrb[115].mxu0  ;;  %v8556_v57 = vpop.eup %8555  ;;  %v7774_v38 = vadd.f32 %v7773_v28, %v7772_v22 }
 0x264   : > { %v7775_v30 = vpop.f32.mrb[106].mxu1  ;;  %v11049_v12 = vadd.f32 %v7676_v1, %v7675_v46  ;;  %6921 = vst.msk [vmem:[%s10204_s13 + $0x188] sm:$0xff] %vm3688_vm14, %v8556_v57  ;;  %5691 = vmatmul.mubr.bf16.gmra.mrb[220].mxu0 %v11731_v13  ;;  %v2730_v13 = vsel %vm9891_vm13, %v6671_v19, %v2729_v18  ;;  %v8797_v18 = vld [vmem:[#allocation2 + $0x88] sm:$0xf]  ;;  %v6673_v19 = vrot.slane %v2623_v61, 9 }
 0x265   : > { %v7776_v34 = vpop.f32.mrb[107].mxu1  ;;  %v4382_v63 = vadd.f32 %v7774_v38, %v11011_v26  ;;  %5698 = vmatprep.mubr.bf16.mxu0 %v11784_v51  ;;  %v2736_v26 = vrot.slane %v8795_v4, 5  ;;  %v7103_v62 = vcombine.low %v2730_v13, %v2733_v47  ;;  %v11786_v51 = vld [vmem:[#allocation21_spill] sm:$0xff]  ;;  %v8799_v4 = vld [vmem:[#allocation2 + $0x94] sm:$0xf] }
 0x266   : > { %v7777_v32 = vadd.f32 %v7776_v34, %v7775_v30  ;;  %5836 = vmatmul.mubr.bf16.gmra.mrb[212].mxu1 %v10654_v55 }
 0x267   : > { %8561 = vtanh.f32 %v4382_v63  ;;  %5843 = vmatprep.mubr.bf16.mxu1 %v7102_v43  ;;  %v7678_v49 = vpop.f32.mrb[116].mxu0  ;;  %v2738_v3 = vrot.slane %v2736_v26, 4 }
 0x268   : > { %v4385_v29 = vadd.f32 %v7777_v32, %v11015_v33  ;;  %v7679_v42 = vpop.f32.mrb[117].mxu0 }
 0x269   : > { %v8558_v10 = vpop.eup %8557  ;;  %v7778_v9 = vpop.f32.mrb[108].mxu1  ;;  %v11062_v55 = vadd.f32 %v7679_v42, %v7678_v49  ;;  %v2740_v6 = vsel %vm9891_vm13, %v2738_v3, %v2739_v60  ;;  %v6674_v3 = vrot.slane %v2624_v24, 9  ;;  %v8800_v60 = vld [vmem:[#allocation2 + $0x98] sm:$0x1] }
 0x26a   : > { %8563 = vtanh.f32 %v4385_v29  ;;  %v7681_v25 = vpop.f32.mrb[118].mxu0  ;;  %6922 = vst.msk [vmem:[%s10204_s13 + $0x190] sm:$0xff] %vm3688_vm14, %v8558_v10  ;;  %v7779_v33 = vpop.f32.mrb[109].mxu1  ;;  %v11787_v29 = vld [vmem:[#allocation33_spill] sm:$0xff] }
 0x26b   : > { %v7682_v14 = vpop.f32.mrb[119].mxu0  ;;  %v7780_v39 = vadd.f32 %v7779_v33, %v7778_v9  ;;  %v7781_v23 = vpop.f32.mrb[110].mxu1 }
 0x26c   : > { %v8560_v40 = vpop.eup %8559  ;;  %v11066_v35 = vadd.f32 %v7682_v14, %v7681_v25  ;;  %v7782_v56 = vpop.f32.mrb[111].mxu1  ;;  %5699 = vmatmul.mubr.bf16.gmra.mrb[224].mxu0 %v11734_v17  ;;  %v2737_v17 = vsel %vm9891_vm13, %v6672_v7, %v2736_v26  ;;  %v11788_v7 = vld [vmem:[#allocation23_spill] sm:$0xff] }
 0x26d   : > { %6923 = vst.msk [vmem:[%s10204_s13 + $0x198] sm:$0xff] %vm3688_vm14, %v8560_v40  ;;  %v4390_v44 = vadd.f32 %v7780_v39, %v11028_v41  ;;  %v7783_v54 = vadd.f32 %v7782_v56, %v7781_v23  ;;  %5706 = vmatprep.mubr.bf16.mxu0 %v11785_v8  ;;  %v2743_v41 = vrot.slane %v8797_v18, 5  ;;  %v7104_v30 = vcombine.low %v2737_v17, %v2740_v6 }
 0x26e   : > { %5844 = vmatmul.mubr.bf16.gmra.mrb[216].mxu1 %v10684_v58 }
 0x26f   : > { %8565 = vtanh.f32 %v4390_v44  ;;  %v4393_v59 = vadd.f32 %v7783_v54, %v11032_v31  ;;  %5851 = vmatprep.mubr.bf16.mxu1 %v7103_v62  ;;  %v7684_v45 = vpop.f32.mrb[120].mxu0  ;;  %v2745_v37 = vrot.slane %v2743_v41, 4  ;;  %v2753_v44 = vrot.slane %v8800_v60, 5  ;;  %v11794_v60 = vld [vmem:[#allocation29_spill] sm:$0xff] }
 0x270   : > { %v7685_v21 = vpop.f32.mrb[121].mxu0 }
 0x271   : > { %v8562_v15 = vpop.eup %8561  ;;  %8567 = vtanh.f32 %v4393_v59  ;;  %v7784_v22 = vpop.f32.mrb[112].mxu1  ;;  %v11079_v58 = vadd.f32 %v7685_v21, %v7684_v45  ;;  %v2747_v47 = vsel %vm9891_vm13, %v2745_v37, %v2746_v11  ;;  %v11789_v59 = vld [vmem:[#allocation18_spill] sm:$0xff]  ;;  %v11790_v45 = vld [vmem:[#allocation36_spill] sm:$0xff] }
 0x272   : > { %v7687_v46 = vpop.f32.mrb[122].mxu0  ;;  %6924 = vst.msk [vmem:[%s10204_s13 + $0x1a0] sm:$0xff] %vm3688_vm14, %v8562_v15  ;;  %v7785_v31 = vpop.f32.mrb[113].mxu1  ;;  %v8801_v15 = vld [vmem:[#allocation2 + $0xa0] sm:$0xf] }
 0x273   : > { %v7688_v28 = vpop.f32.mrb[123].mxu0  ;;  %v7786_v57 = vadd.f32 %v7785_v31, %v7784_v22  ;;  %v7787_v38 = vpop.f32.mrb[114].mxu1 }
 0x274   : > { %v8564_v1 = vpop.eup %8563  ;;  %v11083_v43 = vadd.f32 %v7688_v28, %v7687_v46  ;;  %v7788_v34 = vpop.f32.mrb[115].mxu1  ;;  %5707 = vmatmul.mubr.bf16.gmra.mrb[228].mxu0 %v11737_v2  ;;  %v2744_v2 = vsel %vm9891_vm13, %v6673_v19, %v2743_v41  ;;  %v2625_v28 = vld [vmem:[#allocation2 + $0x9c] sm:$0xe] }
 0x275   : > { %6925 = vst.msk [vmem:[%s10204_s13 + $0x1a8] sm:$0xff] %vm3688_vm14, %v8564_v1  ;;  %v4398_v63 = vadd.f32 %v7786_v57, %v11045_v52  ;;  %v7789_v32 = vadd.f32 %v7788_v34, %v7787_v38  ;;  %5714 = vmatprep.mubr.bf16.mxu0 %v11786_v51  ;;  %v2750_v52 = vrot.slane %v8799_v4, 5  ;;  %v7105_v23 = vcombine.low %v2744_v2, %v2747_v47  ;;  %v11793_v2 = vld [vmem:[#allocation6_spill] sm:$0xff] }
 0x276   : > { %5852 = vmatmul.mubr.bf16.gmra.mrb[220].mxu1 %v11787_v29  ;;  %v6675_v11 = vrot.slane %v2625_v28, 9 }
 0x277   : > { %8569 = vtanh.f32 %v4398_v63  ;;  %v4401_v49 = vadd.f32 %v7789_v32, %v11049_v12  ;;  %5859 = vmatprep.mubr.bf16.mxu1 %v7104_v30  ;;  %v7690_v13 = vpop.f32.mrb[124].mxu0  ;;  %v2752_v27 = vrot.slane %v2750_v52, 4  ;;  %v2751_v21 = vsel %vm9891_vm13, %v6674_v3, %v2750_v52  ;;  %v8802_v32 = vld [vmem:[#allocation2 + $0xa4] sm:$0x1] }
 0x278   : > { %v7691_v42 = vpop.f32.mrb[125].mxu0  ;;  %v2760_v51 = vrot.slane %v8802_v32, 5  ;;  %v11797_v32 = vld [vmem:[#allocation32_spill] sm:$0xff] }
 0x279   : > { %v8566_v26 = vpop.eup %8565  ;;  %8571 = vtanh.f32 %v4401_v49  ;;  %v7790_v10 = vpop.f32.mrb[116].mxu1  ;;  %v11096_v9 = vadd.f32 %v7691_v42, %v7690_v13  ;;  %v2754_v18 = vsel %vm9891_vm13, %v2752_v27, %v2753_v44  ;;  %v11792_v13 = vld [vmem:[#allocation24_spill] sm:$0xff] }
 0x27a   : > { %v7693_v25 = vpop.f32.mrb[126].mxu0  ;;  %6926 = vst.msk [vmem:[%s10204_s13 + $0x1b0] sm:$0xff] %vm3688_vm14, %v8566_v26  ;;  %v7791_v12 = vpop.f32.mrb[117].mxu1  ;;  %v7106_v34 = vcombine.low %v2751_v21, %v2754_v18  ;;  %v11796_v21 = vld [vmem:[#allocation5_spill] sm:$0xff] }
 0x27b   : > { %v7694_v33 = vpop.f32.mrb[127].mxu0  ;;  %v8568_v14 = vpop.eup %8567  ;;  %v7792_v40 = vadd.f32 %v7791_v12, %v7790_v10  ;;  %v8803_v10 = vld [vmem:[#allocation2 + $0xac] sm:$0xf] }
 0x27c   : > { %v7793_v39 = vpop.f32.mrb[118].mxu1  ;;  %v11100_v62 = vadd.f32 %v7694_v33, %v7693_v25  ;;  %6927 = vst.msk [vmem:[%s10204_s13 + $0x1b8] sm:$0xff] %vm3688_vm14, %v8568_v14  ;;  %5715 = vmatmul.mubr.bf16.gmra.mrb[232].mxu0 %v11788_v7  ;;  %v2626_v14 = vld [vmem:[#allocation2 + $0xa8] sm:$0xe] }
 0x27d   : > { %v7794_v56 = vpop.f32.mrb[119].mxu1  ;;  %v4406_v54 = vadd.f32 %v7792_v40, %v11062_v55  ;;  %5722 = vmatprep.mubr.bf16.mxu0 %v11789_v59  ;;  %v2757_v55 = vrot.slane %v8801_v15, 5  ;;  %v6676_v44 = vrot.slane %v2626_v14, 9 }
 0x27e   : > { %v7795_v8 = vadd.f32 %v7794_v56, %v7793_v39  ;;  %5860 = vmatmul.mubr.bf16.gmra.mrb[224].mxu1 %v11790_v45 }
 0x27f   : > { %8573 = vtanh.f32 %v4406_v54  ;;  %5867 = vmatprep.mubr.bf16.mxu1 %v7105_v23  ;;  %v7824_v6 = vpop.f32.mrb[128].mxu0  ;;  %v2759_v63 = vrot.slane %v2757_v55, 4  ;;  %v2758_v4 = vsel %vm9891_vm13, %v6675_v11, %v2757_v55 }
 0x280   : > { %v4409_v17 = vadd.f32 %v7795_v8, %v11066_v35  ;;  %v7825_v41 = vpop.f32.mrb[129].mxu0  ;;  %v8804_v8 = vld [vmem:[#allocation2 + $0xb0] sm:$0x1] }
 0x281   : > { %v8570_v22 = vpop.eup %8569  ;;  %v7796_v46 = vpop.f32.mrb[120].mxu1  ;;  %v11113_v61 = vadd.f32 %v7825_v41, %v7824_v6  ;;  %v2761_v52 = vsel %vm9891_vm13, %v2759_v63, %v2760_v51  ;;  %v2767_v59 = vrot.slane %v8804_v8, 5  ;;  %v11795_v6 = vld [vmem:[#allocation20_spill] sm:$0xff] }
 0x282   : > { %8575 = vtanh.f32 %v4409_v17  ;;  %v7827_v31 = vpop.f32.mrb[130].mxu0  ;;  %6928 = vst.msk [vmem:[%s10204_s13 + $0x1c0] sm:$0xff] %vm3688_vm14, %v8570_v22  ;;  %v7797_v35 = vpop.f32.mrb[121].mxu1  ;;  %v7107_v7 = vcombine.low %v2758_v4, %v2761_v52  ;;  %v11799_v4 = vld [vmem:[#allocation8_spill] sm:$0xff] }
 0x283   : > { %v7828_v1 = vpop.f32.mrb[131].mxu0  ;;  %v8572_v57 = vpop.eup %8571  ;;  %v7798_v38 = vadd.f32 %v7797_v35, %v7796_v46  ;;  %v8805_v46 = vld [vmem:[#allocation2 + $0xb8] sm:$0xf] }
 0x284   : > { %v7799_v30 = vpop.f32.mrb[122].mxu1  ;;  %v11117_v19 = vadd.f32 %v7828_v1, %v7827_v31  ;;  %6929 = vst.msk [vmem:[%s10204_s13 + $0x1c8] sm:$0xff] %vm3688_vm14, %v8572_v57  ;;  %5723 = vmatmul.mubr.bf16.gmra.mrb[236].mxu0 %v11791_v48  ;;  %v2627_v57 = vld [vmem:[#allocation2 + $0xb4] sm:$0xe] }
 0x285   : > { %v7800_v37 = vpop.f32.mrb[123].mxu1  ;;  %v4414_v29 = vadd.f32 %v7798_v38, %v11079_v58  ;;  %5730 = vmatprep.mubr.bf16.mxu0 %v11792_v13  ;;  %v2764_v58 = vrot.slane %v8803_v10, 5  ;;  %v6677_v51 = vrot.slane %v2627_v57, 9 }
 0x286   : > { %v7801_v49 = vadd.f32 %v7800_v37, %v7799_v30  ;;  %5868 = vmatmul.mubr.bf16.gmra.mrb[228].mxu1 %v11793_v2 }
 0x287   : > { %8577 = vtanh.f32 %v4414_v29  ;;  %5875 = vmatprep.mubr.bf16.mxu1 %v7106_v34  ;;  %v7830_v42 = vpop.f32.mrb[132].mxu0  ;;  %v2766_v54 = vrot.slane %v2764_v58, 4  ;;  %v2765_v15 = vsel %vm9891_vm13, %v6676_v44, %v2764_v58 }
 0x288   : > { %v4417_v47 = vadd.f32 %v7801_v49, %v11083_v43  ;;  %v7831_v26 = vpop.f32.mrb[133].mxu0  ;;  %v8806_v49 = vld [vmem:[#allocation2 + $0xbc] sm:$0x1] }
 0x289   : > { %v8574_v25 = vpop.eup %8573  ;;  %v7802_v24 = vpop.f32.mrb[124].mxu1  ;;  %v11130_v12 = vadd.f32 %v7831_v26, %v7830_v42  ;;  %v2768_v55 = vsel %vm9891_vm13, %v2766_v54, %v2767_v59  ;;  %v2774_v13 = vrot.slane %v8806_v49, 5  ;;  %v11798_v42 = vld [vmem:[#allocation28_spill] sm:$0xff] }
 0x28a   : > { %8579 = vtanh.f32 %v4417_v47  ;;  %v7833_v33 = vpop.f32.mrb[134].mxu0  ;;  %6930 = vst.msk [vmem:[%s10204_s13 + $0x1d0] sm:$0xff] %vm3688_vm14, %v8574_v25  ;;  %v7803_v43 = vpop.f32.mrb[125].mxu1  ;;  %v7108_v48 = vcombine.low %v2765_v15, %v2768_v55 }
 0x28b   : > { %v7834_v40 = vpop.f32.mrb[135].mxu0  ;;  %v7804_v23 = vadd.f32 %v7803_v43, %v7802_v24  ;;  %v7805_v56 = vpop.f32.mrb[126].mxu1  ;;  %v8807_v24 = vld [vmem:[#allocation2 + $0xc4] sm:$0xf] }
 0x28c   : > { %v8576_v39 = vpop.eup %8575  ;;  %v11134_v3 = vadd.f32 %v7834_v40, %v7833_v33  ;;  %v7806_v27 = vpop.f32.mrb[127].mxu1  ;;  %5731 = vmatmul.mubr.bf16.gmra.mrb[240].mxu0 %v11794_v60 }
 0x28d   : > { %6931 = vst.msk [vmem:[%s10204_s13 + $0x1d8] sm:$0xff] %vm3688_vm14, %v8576_v39  ;;  %v4422_v45 = vadd.f32 %v7804_v23, %v11096_v9  ;;  %v7807_v17 = vadd.f32 %v7806_v27, %v7805_v56  ;;  %5738 = vmatprep.mubr.bf16.mxu0 %v11795_v6  ;;  %v2771_v9 = vrot.slane %v8805_v46, 5  ;;  %v2628_v39 = vld [vmem:[#allocation2 + $0xc0] sm:$0xe]  ;;  %v8809_v46 = vld [vmem:[#allocation2 + $0xd0] sm:$0xf] }
 0x28e   : > { %5876 = vmatmul.mubr.bf16.gmra.mrb[232].mxu1 %v11796_v21  ;;  %v6678_v8 = vrot.slane %v2628_v39, 9 }
 0x28f   : > { %8581 = vtanh.f32 %v4422_v45  ;;  %v4425_v18 = vadd.f32 %v7807_v17, %v11100_v62  ;;  %5883 = vmatprep.mubr.bf16.mxu1 %v7107_v7  ;;  %v7836_v41 = vpop.f32.mrb[136].mxu0  ;;  %v2773_v29 = vrot.slane %v2771_v9, 4  ;;  %v2772_v10 = vsel %vm9891_vm13, %v6677_v51, %v2771_v9  ;;  %v8808_v45 = vld [vmem:[#allocation2 + $0xc8] sm:$0x1]  ;;  %v8810_v51 = vld [vmem:[#allocation2 + $0xd4] sm:$0x1] }
 0x290   : > { %v7837_v22 = vpop.f32.mrb[137].mxu0  ;;  %v2781_v17 = vrot.slane %v8808_v45, 5 }
 0x291   : > { %v8578_v31 = vpop.eup %8577  ;;  %8583 = vtanh.f32 %v4425_v18  ;;  %v7936_v28 = vpop.f32.mrb[128].mxu1  ;;  %v11147_v35 = vadd.f32 %v7837_v22, %v7836_v41  ;;  %v2775_v58 = vsel %vm9891_vm13, %v2773_v29, %v2774_v13  ;;  %v11800_v18 = vld [vmem:[#allocation43_spill] sm:$0xff]  ;;  %v2788_v29 = vrot.slane %v8810_v51, 5 }
 0x292   : > { %v7839_v1 = vpop.f32.mrb[138].mxu0  ;;  %6932 = vst.msk [vmem:[%s10204_s13 + $0x1e0] sm:$0xff] %vm3688_vm14, %v8578_v31  ;;  %v7937_v62 = vpop.f32.mrb[129].mxu1  ;;  %v7109_v60 = vcombine.low %v2772_v10, %v2775_v58 }
 0x293   : > { %v7840_v38 = vpop.f32.mrb[139].mxu0  ;;  %v7938_v34 = vadd.f32 %v7937_v62, %v7936_v28  ;;  %v7939_v37 = vpop.f32.mrb[130].mxu1 }
 0x294   : > { %v8580_v30 = vpop.eup %8579  ;;  %v11151_v11 = vadd.f32 %v7840_v38, %v7839_v1  ;;  %v7940_v63 = vpop.f32.mrb[131].mxu1  ;;  %5739 = vmatmul.mubr.bf16.gmra.mrb[244].mxu0 %v11797_v32  ;;  %v2629_v1 = vld [vmem:[#allocation2 + $0xcc] sm:$0xe] }
 0x295   : > { %6933 = vst.msk [vmem:[%s10204_s13 + $0x1e8] sm:$0xff] %vm3688_vm14, %v8580_v30  ;;  %v5090_v2 = vadd.f32 %v7938_v34, %v11113_v61  ;;  %v7941_v47 = vadd.f32 %v7940_v63, %v7939_v37  ;;  %5746 = vmatprep.mubr.bf16.mxu0 %v11798_v42  ;;  %v2778_v61 = vrot.slane %v8807_v24, 5  ;;  %v6679_v63 = vrot.slane %v2629_v1, 9 }
 0x296   : > { %5884 = vmatmul.mubr.bf16.gmra.mrb[236].mxu1 %v11799_v4 }
 0x297   : > { %8585 = vtanh.f32 %v5090_v2  ;;  %v5093_v52 = vadd.f32 %v7941_v47, %v11117_v19  ;;  %5891 = vmatprep.mubr.bf16.mxu1 %v7108_v48  ;;  %v7842_v26 = vpop.f32.mrb[140].mxu0  ;;  %v2780_v59 = vrot.slane %v2778_v61, 4 }
 0x298   : > { %v7843_v25 = vpop.f32.mrb[141].mxu0 }
 0x299   : > { %v8582_v33 = vpop.eup %8581  ;;  %8587 = vtanh.f32 %v5093_v52  ;;  %v7942_v14 = vpop.f32.mrb[132].mxu1  ;;  %v11164_v43 = vadd.f32 %v7843_v25, %v7842_v26  ;;  %v2782_v55 = vsel %vm9891_vm13, %v2780_v59, %v2781_v17 }
 0x29a   : > { %v7845_v40 = vpop.f32.mrb[142].mxu0  ;;  %6934 = vst.msk [vmem:[%s10204_s13 + $0x1f0] sm:$0xff] %vm3688_vm14, %v8582_v33  ;;  %v7943_v19 = vpop.f32.mrb[133].mxu1 }
 0x29b   : > { %v7846_v23 = vpop.f32.mrb[143].mxu0  ;;  %v8584_v56 = vpop.eup %8583  ;;  %v7944_v7 = vadd.f32 %v7943_v19, %v7942_v14 }
 0x29c   : > { %v7945_v27 = vpop.f32.mrb[134].mxu1  ;;  %v11168_v44 = vadd.f32 %v7846_v23, %v7845_v40  ;;  %6935 = vst.msk [vmem:[%s10204_s13 + $0x1f8] sm:$0xff] %vm3688_vm14, %v8584_v56  ;;  %5747 = vmatmul.mubr.bf16.gmra.mrb[248].mxu0 %v11753_v5  ;;  %v2779_v5 = vsel %vm9891_vm13, %v6678_v8, %v2778_v61 }
 0x29d   : > { %v7946_v54 = vpop.f32.mrb[135].mxu1  ;;  %v5098_v6 = vadd.f32 %v7944_v7, %v11130_v12  ;;  %5754 = vmatprep.mubr.bf16.mxu0 %v11800_v18  ;;  %v2785_v12 = vrot.slane %v8809_v46, 5  ;;  %v7110_v34 = vcombine.low %v2779_v5, %v2782_v55 }
 0x29e   : > { %v7947_v21 = vadd.f32 %v7946_v54, %v7945_v27  ;;  %5892 = vmatmul.mubr.bf16.gmra.mrb[240].mxu1 %v10849_v20 }
 0x29f   : > { %8589 = vtanh.f32 %v5098_v6  ;;  %5899 = vmatprep.mubr.bf16.mxu1 %v7109_v60  ;;  %v7848_v15 = vpop.f32.mrb[144].mxu0  ;;  %v2787_v32 = vrot.slane %v2785_v12, 4  ;;  %v2786_v42 = vsel %vm9891_vm13, %v6679_v63, %v2785_v12 }
 0x2a0   : > { %v5101_v41 = vadd.f32 %v7947_v21, %v11134_v3  ;;  %v7849_v22 = vpop.f32.mrb[145].mxu0 }
 0x2a1   : > { %v8586_v9 = vpop.eup %8585  ;;  %v7948_v31 = vpop.f32.mrb[136].mxu1  ;;  %v11181_v20 = vadd.f32 %v7849_v22, %v7848_v15 }
 0x2a2   : > { %8591 = vtanh.f32 %v5101_v41  ;;  %v7851_v28 = vpop.f32.mrb[146].mxu0  ;;  %7064 = vst.msk [vmem:[%s10204_s13 + $0x200] sm:$0xff] %vm3688_vm14, %v8586_v9  ;;  %v7949_v3 = vpop.f32.mrb[137].mxu1 }
 0x2a3   : > { %v7852_v57 = vpop.f32.mrb[147].mxu0  ;;  %v8588_v62 = vpop.eup %8587  ;;  %v7950_v38 = vadd.f32 %v7949_v3, %v7948_v31 }
 0x2a4   : > { %v7951_v30 = vpop.f32.mrb[138].mxu1  ;;  %v7853_v37 = vadd.f32 %v7852_v57, %v7851_v28  ;;  %7065 = vst.msk [vmem:[%s10204_s13 + $0x208] sm:$0xff] %vm3688_vm14, %v8588_v62  ;;  %5755 = vmatmul.mubr.bf16.gmra.mrb[252].mxu0 %v11756_v16  ;;  %v2789_v16 = vsel %vm9891_vm13, %v2787_v32, %v2788_v29 }
 0x2a5   : > { %v7952_v48 = vpop.f32.mrb[139].mxu1  ;;  %v5106_v49 = vadd.f32 %v7950_v38, %v11147_v35  ;;  %v7111_v61 = vcombine.low %v2786_v42, %v2789_v16 }
 0x2a6   : > { %v7953_v13 = vadd.f32 %v7952_v48, %v7951_v30  ;;  %5900 = vmatmul.mubr.bf16.gmra.mrb[244].mxu1 %v10880_v53 }
 0x2a7   : > { %8593 = vtanh.f32 %v5106_v49  ;;  %5907 = vmatprep.mubr.bf16.mxu1 %v7110_v34  ;;  %v7854_v47 = vpop.f32.mrb[148].mxu0 }
 0x2a8   : > { %v5109_v2 = vadd.f32 %v7953_v13, %v11151_v11  ;;  %v7855_v4 = vpop.f32.mrb[149].mxu0 }
 0x2a9   : > { %v8590_v52 = vpop.eup %8589  ;;  %v7954_v26 = vpop.f32.mrb[140].mxu1  ;;  %v7856_v35 = vadd.f32 %v7855_v4, %v7854_v47 }
 0x2aa   : > { %8595 = vtanh.f32 %v5109_v2  ;;  %v7857_v10 = vpop.f32.mrb[150].mxu0  ;;  %7066 = vst.msk [vmem:[%s10204_s13 + $0x210] sm:$0xff] %vm3688_vm14, %v8590_v52  ;;  %v7955_v53 = vpop.f32.mrb[141].mxu1 }
 0x2ab   : > { %v7858_v58 = vpop.f32.mrb[151].mxu0  ;;  %v7956_v25 = vadd.f32 %v7955_v53, %v7954_v26  ;;  %v7957_v24 = vpop.f32.mrb[142].mxu1 }
 0x2ac   : > { %v8592_v11 = vpop.eup %8591  ;;  %v7859_v33 = vadd.f32 %v7858_v58, %v7857_v10  ;;  %v7958_v50 = vpop.f32.mrb[143].mxu1 }
 0x2ad   : > { %7067 = vst.msk [vmem:[%s10204_s13 + $0x218] sm:$0xff] %vm3688_vm14, %v8592_v11  ;;  %v5114_v14 = vadd.f32 %v7956_v25, %v11164_v43  ;;  %v7959_v40 = vadd.f32 %v7958_v50, %v7957_v24 }
 0x2ae   : > { %5908 = vmatmul.mubr.bf16.gmra.mrb[248].mxu1 %v10905_v0 }
 0x2af   : > { %8597 = vtanh.f32 %v5114_v14  ;;  %v5117_v39 = vadd.f32 %v7959_v40, %v11168_v44  ;;  %5915 = vmatprep.mubr.bf16.mxu1 %v7111_v61  ;;  %v7860_v19 = vpop.f32.mrb[152].mxu0 }
 0x2b0   : > { %v7861_v23 = vpop.f32.mrb[153].mxu0 }
 0x2b1   : > { %v8594_v56 = vpop.eup %8593  ;;  %8599 = vtanh.f32 %v5117_v39  ;;  %v7960_v7 = vpop.f32.mrb[144].mxu1  ;;  %v7862_v27 = vadd.f32 %v7861_v23, %v7860_v19 }
 0x2b2   : > { %v7863_v60 = vpop.f32.mrb[154].mxu0  ;;  %7068 = vst.msk [vmem:[%s10204_s13 + $0x220] sm:$0xff] %vm3688_vm14, %v8594_v56  ;;  %v7961_v54 = vpop.f32.mrb[145].mxu1 }
 0x2b3   : > { %v7864_v8 = vpop.f32.mrb[155].mxu0  ;;  %v7962_v59 = vadd.f32 %v7961_v54, %v7960_v7  ;;  %v7963_v45 = vpop.f32.mrb[146].mxu1 }
 0x2b4   : > { %v8596_v43 = vpop.eup %8595  ;;  %v7865_v0 = vadd.f32 %v7864_v8, %v7863_v60  ;;  %v7964_v44 = vpop.f32.mrb[147].mxu1 }
 0x2b5   : > { %7069 = vst.msk [vmem:[%s10204_s13 + $0x228] sm:$0xff] %vm3688_vm14, %v8596_v43  ;;  %v5122_v17 = vadd.f32 %v7962_v59, %v11181_v20  ;;  %v7965_v6 = vadd.f32 %v7964_v44, %v7963_v45 }
 0x2b6   : > { %5916 = vmatmul.mubr.bf16.gmra.mrb[252].mxu1 %v10927_v36 }
 0x2b7   : > { %8601 = vtanh.f32 %v5122_v17  ;;  %v5125_v21 = vadd.f32 %v7965_v6, %v7853_v37  ;;  %v7866_v18 = vpop.f32.mrb[156].mxu0 }
 0x2b8   : > { %v7867_v41 = vpop.f32.mrb[157].mxu0 }
 0x2b9   : > { %v8598_v15 = vpop.eup %8597  ;;  %8603 = vtanh.f32 %v5125_v21  ;;  %v7966_v5 = vpop.f32.mrb[148].mxu1  ;;  %v7868_v55 = vadd.f32 %v7867_v41, %v7866_v18 }
 0x2ba   : > { %v7869_v22 = vpop.f32.mrb[158].mxu0  ;;  %7070 = vst.msk [vmem:[%s10204_s13 + $0x230] sm:$0xff] %vm3688_vm14, %v8598_v15  ;;  %v7967_v46 = vpop.f32.mrb[149].mxu1 }
 0x2bb   : > { %v7870_v12 = vpop.f32.mrb[159].mxu0  ;;  %v8600_v9 = vpop.eup %8599  ;;  %v7968_v31 = vadd.f32 %v7967_v46, %v7966_v5 }
 0x2bc   : > { %v7969_v20 = vpop.f32.mrb[150].mxu1  ;;  %v7871_v28 = vadd.f32 %v7870_v12, %v7869_v22  ;;  %7071 = vst.msk [vmem:[%s10204_s13 + $0x238] sm:$0xff] %vm3688_vm14, %v8600_v9 }
 0x2bd   : > { %v7970_v36 = vpop.f32.mrb[151].mxu1  ;;  %v5130_v1 = vadd.f32 %v7968_v31, %v7856_v35 }
 0x2be   : > { %v7971_v3 = vadd.f32 %v7970_v36, %v7969_v20 }
 0x2bf   : > { %8605 = vtanh.f32 %v5130_v1  ;;  %v7872_v62 = vpop.f32.mrb[160].mxu0 }
 0x2c0   : > { %v5133_v57 = vadd.f32 %v7971_v3, %v7859_v33  ;;  %v7873_v38 = vpop.f32.mrb[161].mxu0 }
 0x2c1   : > { %v8602_v30 = vpop.eup %8601  ;;  %v7972_v34 = vpop.f32.mrb[152].mxu1  ;;  %v7874_v37 = vadd.f32 %v7873_v38, %v7872_v62 }
 0x2c2   : > { %8607 = vtanh.f32 %v5133_v57  ;;  %v7875_v48 = vpop.f32.mrb[162].mxu0  ;;  %7072 = vst.msk [vmem:[%s10204_s13 + $0x240] sm:$0xff] %vm3688_vm14, %v8602_v30  ;;  %v7973_v63 = vpop.f32.mrb[153].mxu1 }
 0x2c3   : > { %v7876_v32 = vpop.f32.mrb[163].mxu0  ;;  %v8604_v51 = vpop.eup %8603  ;;  %v7974_v29 = vadd.f32 %v7973_v63, %v7972_v34 }
 0x2c4   : > { %v7975_v49 = vpop.f32.mrb[154].mxu1  ;;  %v7877_v13 = vadd.f32 %v7876_v32, %v7875_v48  ;;  %7073 = vst.msk [vmem:[%s10204_s13 + $0x248] sm:$0xff] %vm3688_vm14, %v8604_v51 }
 0x2c5   : > { %v7976_v2 = vpop.f32.mrb[155].mxu1  ;;  %v5138_v47 = vadd.f32 %v7974_v29, %v7862_v27 }
 0x2c6   : > { %v7977_v42 = vadd.f32 %v7976_v2, %v7975_v49 }
 0x2c7   : > { %8609 = vtanh.f32 %v5138_v47  ;;  %v7878_v4 = vpop.f32.mrb[164].mxu0 }
 0x2c8   : > { %v5141_v16 = vadd.f32 %v7977_v42, %v7865_v0  ;;  %v7879_v52 = vpop.f32.mrb[165].mxu0 }
 0x2c9   : > { %v8606_v26 = vpop.eup %8605  ;;  %v7978_v35 = vpop.f32.mrb[156].mxu1  ;;  %v7880_v10 = vadd.f32 %v7879_v52, %v7878_v4 }
 0x2ca   : > { %8611 = vtanh.f32 %v5141_v16  ;;  %v7881_v53 = vpop.f32.mrb[166].mxu0  ;;  %7074 = vst.msk [vmem:[%s10204_s13 + $0x250] sm:$0xff] %vm3688_vm14, %v8606_v26  ;;  %v7979_v58 = vpop.f32.mrb[157].mxu1 }
 0x2cb   : > { %v7882_v11 = vpop.f32.mrb[167].mxu0  ;;  %v7980_v24 = vadd.f32 %v7979_v58, %v7978_v35  ;;  %v7981_v61 = vpop.f32.mrb[158].mxu1 }
 0x2cc   : > { %v8608_v25 = vpop.eup %8607  ;;  %v7883_v33 = vadd.f32 %v7882_v11, %v7881_v53  ;;  %v7982_v50 = vpop.f32.mrb[159].mxu1 }
 0x2cd   : > { %7075 = vst.msk [vmem:[%s10204_s13 + $0x258] sm:$0xff] %vm3688_vm14, %v8608_v25  ;;  %v5146_v14 = vadd.f32 %v7980_v24, %v7868_v55  ;;  %v7983_v40 = vadd.f32 %v7982_v50, %v7981_v61 }
 0x2cf   : > { %8613 = vtanh.f32 %v5146_v14  ;;  %v5149_v39 = vadd.f32 %v7983_v40, %v7871_v28  ;;  %v7884_v19 = vpop.f32.mrb[168].mxu0 }
 0x2d0   : > { %v7885_v23 = vpop.f32.mrb[169].mxu0 }
 0x2d1   : > { %v8610_v56 = vpop.eup %8609  ;;  %8615 = vtanh.f32 %v5149_v39  ;;  %v7984_v7 = vpop.f32.mrb[160].mxu1  ;;  %v7886_v27 = vadd.f32 %v7885_v23, %v7884_v19 }
 0x2d2   : > { %v7887_v60 = vpop.f32.mrb[170].mxu0  ;;  %7076 = vst.msk [vmem:[%s10204_s13 + $0x260] sm:$0xff] %vm3688_vm14, %v8610_v56  ;;  %v7985_v54 = vpop.f32.mrb[161].mxu1 }
 0x2d3   : > { %v7888_v8 = vpop.f32.mrb[171].mxu0  ;;  %v7986_v59 = vadd.f32 %v7985_v54, %v7984_v7  ;;  %v7987_v45 = vpop.f32.mrb[162].mxu1 }
 0x2d4   : > { %v8612_v43 = vpop.eup %8611  ;;  %v7889_v0 = vadd.f32 %v7888_v8, %v7887_v60  ;;  %v7988_v44 = vpop.f32.mrb[163].mxu1 }
 0x2d5   : > { %7077 = vst.msk [vmem:[%s10204_s13 + $0x268] sm:$0xff] %vm3688_vm14, %v8612_v43  ;;  %v5154_v17 = vadd.f32 %v7986_v59, %v7874_v37  ;;  %v7989_v6 = vadd.f32 %v7988_v44, %v7987_v45 }
 0x2d7   : > { %8617 = vtanh.f32 %v5154_v17  ;;  %v5157_v21 = vadd.f32 %v7989_v6, %v7877_v13  ;;  %v7890_v18 = vpop.f32.mrb[172].mxu0 }
 0x2d8   : > { %v7891_v41 = vpop.f32.mrb[173].mxu0 }
 0x2d9   : > { %v8614_v15 = vpop.eup %8613  ;;  %8619 = vtanh.f32 %v5157_v21  ;;  %v7990_v5 = vpop.f32.mrb[164].mxu1  ;;  %v7892_v55 = vadd.f32 %v7891_v41, %v7890_v18 }
 0x2da   : > { %v7893_v22 = vpop.f32.mrb[174].mxu0  ;;  %7078 = vst.msk [vmem:[%s10204_s13 + $0x270] sm:$0xff] %vm3688_vm14, %v8614_v15  ;;  %v7991_v46 = vpop.f32.mrb[165].mxu1 }
 0x2db   : > { %v7894_v12 = vpop.f32.mrb[175].mxu0  ;;  %v8616_v9 = vpop.eup %8615  ;;  %v7992_v31 = vadd.f32 %v7991_v46, %v7990_v5 }
 0x2dc   : > { %v7993_v20 = vpop.f32.mrb[166].mxu1  ;;  %v7895_v28 = vadd.f32 %v7894_v12, %v7893_v22  ;;  %7079 = vst.msk [vmem:[%s10204_s13 + $0x278] sm:$0xff] %vm3688_vm14, %v8616_v9 }
 0x2dd   : > { %v7994_v36 = vpop.f32.mrb[167].mxu1  ;;  %v5162_v1 = vadd.f32 %v7992_v31, %v7880_v10 }
 0x2de   : > { %v7995_v3 = vadd.f32 %v7994_v36, %v7993_v20 }
 0x2df   : > { %8621 = vtanh.f32 %v5162_v1  ;;  %v7896_v62 = vpop.f32.mrb[176].mxu0 }
 0x2e0   : > { %v5165_v57 = vadd.f32 %v7995_v3, %v7883_v33  ;;  %v7897_v38 = vpop.f32.mrb[177].mxu0 }
 0x2e1   : > { %v8618_v30 = vpop.eup %8617  ;;  %v7996_v34 = vpop.f32.mrb[168].mxu1  ;;  %v7898_v37 = vadd.f32 %v7897_v38, %v7896_v62 }
 0x2e2   : > { %8623 = vtanh.f32 %v5165_v57  ;;  %v7899_v48 = vpop.f32.mrb[178].mxu0  ;;  %7080 = vst.msk [vmem:[%s10204_s13 + $0x280] sm:$0xff] %vm3688_vm14, %v8618_v30  ;;  %v7997_v63 = vpop.f32.mrb[169].mxu1 }
 0x2e3   : > { %v7900_v32 = vpop.f32.mrb[179].mxu0  ;;  %v8620_v51 = vpop.eup %8619  ;;  %v7998_v29 = vadd.f32 %v7997_v63, %v7996_v34 }
 0x2e4   : > { %v7999_v49 = vpop.f32.mrb[170].mxu1  ;;  %v7901_v13 = vadd.f32 %v7900_v32, %v7899_v48  ;;  %7081 = vst.msk [vmem:[%s10204_s13 + $0x288] sm:$0xff] %vm3688_vm14, %v8620_v51 }
 0x2e5   : > { %v8000_v2 = vpop.f32.mrb[171].mxu1  ;;  %v5170_v47 = vadd.f32 %v7998_v29, %v7886_v27 }
 0x2e6   : > { %v8001_v42 = vadd.f32 %v8000_v2, %v7999_v49 }
 0x2e7   : > { %8625 = vtanh.f32 %v5170_v47  ;;  %v7902_v4 = vpop.f32.mrb[180].mxu0 }
 0x2e8   : > { %v5173_v16 = vadd.f32 %v8001_v42, %v7889_v0  ;;  %v7903_v52 = vpop.f32.mrb[181].mxu0 }
 0x2e9   : > { %v8622_v26 = vpop.eup %8621  ;;  %v8002_v35 = vpop.f32.mrb[172].mxu1  ;;  %v7904_v10 = vadd.f32 %v7903_v52, %v7902_v4 }
 0x2ea   : > { %8627 = vtanh.f32 %v5173_v16  ;;  %v7905_v53 = vpop.f32.mrb[182].mxu0  ;;  %7082 = vst.msk [vmem:[%s10204_s13 + $0x290] sm:$0xff] %vm3688_vm14, %v8622_v26  ;;  %v8003_v58 = vpop.f32.mrb[173].mxu1 }
 0x2eb   : > { %v7906_v11 = vpop.f32.mrb[183].mxu0  ;;  %v8004_v24 = vadd.f32 %v8003_v58, %v8002_v35  ;;  %v8005_v61 = vpop.f32.mrb[174].mxu1 }
 0x2ec   : > { %v8624_v25 = vpop.eup %8623  ;;  %v7907_v33 = vadd.f32 %v7906_v11, %v7905_v53  ;;  %v8006_v50 = vpop.f32.mrb[175].mxu1 }
 0x2ed   : > { %7083 = vst.msk [vmem:[%s10204_s13 + $0x298] sm:$0xff] %vm3688_vm14, %v8624_v25  ;;  %v5178_v14 = vadd.f32 %v8004_v24, %v7892_v55  ;;  %v8007_v40 = vadd.f32 %v8006_v50, %v8005_v61 }
 0x2ef   : > { %8629 = vtanh.f32 %v5178_v14  ;;  %v5181_v39 = vadd.f32 %v8007_v40, %v7895_v28  ;;  %v7908_v19 = vpop.f32.mrb[184].mxu0 }
 0x2f0   : > { %v7909_v23 = vpop.f32.mrb[185].mxu0 }
 0x2f1   : > { %v8626_v56 = vpop.eup %8625  ;;  %8631 = vtanh.f32 %v5181_v39  ;;  %v8008_v7 = vpop.f32.mrb[176].mxu1  ;;  %v7910_v27 = vadd.f32 %v7909_v23, %v7908_v19 }
 0x2f2   : > { %v7911_v60 = vpop.f32.mrb[186].mxu0  ;;  %7084 = vst.msk [vmem:[%s10204_s13 + $0x2a0] sm:$0xff] %vm3688_vm14, %v8626_v56  ;;  %v8009_v54 = vpop.f32.mrb[177].mxu1 }
 0x2f3   : > { %v7912_v8 = vpop.f32.mrb[187].mxu0  ;;  %v8010_v59 = vadd.f32 %v8009_v54, %v8008_v7  ;;  %v8011_v45 = vpop.f32.mrb[178].mxu1 }
 0x2f4   : > { %v8628_v43 = vpop.eup %8627  ;;  %v7913_v0 = vadd.f32 %v7912_v8, %v7911_v60  ;;  %v8012_v44 = vpop.f32.mrb[179].mxu1 }
 0x2f5   : > { %7085 = vst.msk [vmem:[%s10204_s13 + $0x2a8] sm:$0xff] %vm3688_vm14, %v8628_v43  ;;  %v5186_v17 = vadd.f32 %v8010_v59, %v7898_v37  ;;  %v8013_v6 = vadd.f32 %v8012_v44, %v8011_v45 }
 0x2f7   : > { %8633 = vtanh.f32 %v5186_v17  ;;  %v5189_v21 = vadd.f32 %v8013_v6, %v7901_v13  ;;  %v7914_v18 = vpop.f32.mrb[188].mxu0 }
 0x2f8   : > { %v7915_v41 = vpop.f32.mrb[189].mxu0 }
 0x2f9   : > { %v8630_v15 = vpop.eup %8629  ;;  %8635 = vtanh.f32 %v5189_v21  ;;  %v8014_v5 = vpop.f32.mrb[180].mxu1  ;;  %v7916_v55 = vadd.f32 %v7915_v41, %v7914_v18 }
 0x2fa   : > { %v7917_v22 = vpop.f32.mrb[190].mxu0  ;;  %7086 = vst.msk [vmem:[%s10204_s13 + $0x2b0] sm:$0xff] %vm3688_vm14, %v8630_v15  ;;  %v8015_v46 = vpop.f32.mrb[181].mxu1 }
 0x2fb   : > { %v7918_v12 = vpop.f32.mrb[191].mxu0  ;;  %v8632_v9 = vpop.eup %8631  ;;  %v8016_v31 = vadd.f32 %v8015_v46, %v8014_v5 }
 0x2fc   : > { %v8017_v20 = vpop.f32.mrb[182].mxu1  ;;  %v7919_v28 = vadd.f32 %v7918_v12, %v7917_v22  ;;  %7087 = vst.msk [vmem:[%s10204_s13 + $0x2b8] sm:$0xff] %vm3688_vm14, %v8632_v9 }
 0x2fd   : > { %v8018_v36 = vpop.f32.mrb[183].mxu1  ;;  %v5194_v1 = vadd.f32 %v8016_v31, %v7904_v10 }
 0x2fe   : > { %v8019_v3 = vadd.f32 %v8018_v36, %v8017_v20 }
 0x2ff   : > { %8637 = vtanh.f32 %v5194_v1  ;;  %v8048_v62 = vpop.f32.mrb[192].mxu0 }
 0x300   : > { %v5197_v57 = vadd.f32 %v8019_v3, %v7907_v33  ;;  %v8049_v38 = vpop.f32.mrb[193].mxu0 }
 0x301   : > { %v8634_v30 = vpop.eup %8633  ;;  %v8020_v34 = vpop.f32.mrb[184].mxu1  ;;  %v8050_v37 = vadd.f32 %v8049_v38, %v8048_v62 }
 0x302   : > { %8639 = vtanh.f32 %v5197_v57  ;;  %v8051_v48 = vpop.f32.mrb[194].mxu0  ;;  %7088 = vst.msk [vmem:[%s10204_s13 + $0x2c0] sm:$0xff] %vm3688_vm14, %v8634_v30  ;;  %v8021_v63 = vpop.f32.mrb[185].mxu1 }
 0x303   : > { %v8052_v32 = vpop.f32.mrb[195].mxu0  ;;  %v8636_v51 = vpop.eup %8635  ;;  %v8022_v29 = vadd.f32 %v8021_v63, %v8020_v34 }
 0x304   : > { %v8023_v49 = vpop.f32.mrb[186].mxu1  ;;  %v8053_v13 = vadd.f32 %v8052_v32, %v8051_v48  ;;  %7089 = vst.msk [vmem:[%s10204_s13 + $0x2c8] sm:$0xff] %vm3688_vm14, %v8636_v51 }
 0x305   : > { %v8024_v2 = vpop.f32.mrb[187].mxu1  ;;  %v5202_v47 = vadd.f32 %v8022_v29, %v7910_v27 }
 0x306   : > { %v8025_v42 = vadd.f32 %v8024_v2, %v8023_v49 }
 0x307   : > { %8641 = vtanh.f32 %v5202_v47  ;;  %v8054_v4 = vpop.f32.mrb[196].mxu0 }
 0x308   : > { %v5205_v16 = vadd.f32 %v8025_v42, %v7913_v0  ;;  %v8055_v52 = vpop.f32.mrb[197].mxu0 }
 0x309   : > { %v8638_v26 = vpop.eup %8637  ;;  %v8026_v35 = vpop.f32.mrb[188].mxu1  ;;  %v8056_v10 = vadd.f32 %v8055_v52, %v8054_v4 }
 0x30a   : > { %8643 = vtanh.f32 %v5205_v16  ;;  %v8057_v53 = vpop.f32.mrb[198].mxu0  ;;  %7090 = vst.msk [vmem:[%s10204_s13 + $0x2d0] sm:$0xff] %vm3688_vm14, %v8638_v26  ;;  %v8027_v58 = vpop.f32.mrb[189].mxu1 }
 0x30b   : > { %v8058_v11 = vpop.f32.mrb[199].mxu0  ;;  %v8028_v24 = vadd.f32 %v8027_v58, %v8026_v35  ;;  %v8029_v61 = vpop.f32.mrb[190].mxu1 }
 0x30c   : > { %v8640_v25 = vpop.eup %8639  ;;  %v8059_v33 = vadd.f32 %v8058_v11, %v8057_v53  ;;  %v8030_v50 = vpop.f32.mrb[191].mxu1 }
 0x30d   : > { %7091 = vst.msk [vmem:[%s10204_s13 + $0x2d8] sm:$0xff] %vm3688_vm14, %v8640_v25  ;;  %v5210_v14 = vadd.f32 %v8028_v24, %v7916_v55  ;;  %v8031_v40 = vadd.f32 %v8030_v50, %v8029_v61 }
 0x30f   : > { %8645 = vtanh.f32 %v5210_v14  ;;  %v5213_v39 = vadd.f32 %v8031_v40, %v7919_v28  ;;  %v8060_v19 = vpop.f32.mrb[200].mxu0 }
 0x310   : > { %v8061_v23 = vpop.f32.mrb[201].mxu0 }
 0x311   : > { %v8642_v56 = vpop.eup %8641  ;;  %8647 = vtanh.f32 %v5213_v39  ;;  %v8160_v7 = vpop.f32.mrb[192].mxu1  ;;  %v8062_v27 = vadd.f32 %v8061_v23, %v8060_v19 }
 0x312   : > { %v8063_v60 = vpop.f32.mrb[202].mxu0  ;;  %7092 = vst.msk [vmem:[%s10204_s13 + $0x2e0] sm:$0xff] %vm3688_vm14, %v8642_v56  ;;  %v8161_v54 = vpop.f32.mrb[193].mxu1 }
 0x313   : > { %v8064_v8 = vpop.f32.mrb[203].mxu0  ;;  %v8162_v59 = vadd.f32 %v8161_v54, %v8160_v7  ;;  %v8163_v45 = vpop.f32.mrb[194].mxu1 }
 0x314   : > { %v8644_v43 = vpop.eup %8643  ;;  %v8065_v0 = vadd.f32 %v8064_v8, %v8063_v60  ;;  %v8164_v44 = vpop.f32.mrb[195].mxu1 }
 0x315   : > { %7093 = vst.msk [vmem:[%s10204_s13 + $0x2e8] sm:$0xff] %vm3688_vm14, %v8644_v43  ;;  %v5798_v17 = vadd.f32 %v8162_v59, %v8050_v37  ;;  %v8165_v6 = vadd.f32 %v8164_v44, %v8163_v45 }
 0x317   : > { %8649 = vtanh.f32 %v5798_v17  ;;  %v5801_v21 = vadd.f32 %v8165_v6, %v8053_v13  ;;  %v8066_v18 = vpop.f32.mrb[204].mxu0 }
 0x318   : > { %v8067_v41 = vpop.f32.mrb[205].mxu0 }
 0x319   : > { %v8646_v15 = vpop.eup %8645  ;;  %8651 = vtanh.f32 %v5801_v21  ;;  %v8166_v5 = vpop.f32.mrb[196].mxu1  ;;  %v8068_v55 = vadd.f32 %v8067_v41, %v8066_v18 }
 0x31a   : > { %v8069_v22 = vpop.f32.mrb[206].mxu0  ;;  %7094 = vst.msk [vmem:[%s10204_s13 + $0x2f0] sm:$0xff] %vm3688_vm14, %v8646_v15  ;;  %v8167_v46 = vpop.f32.mrb[197].mxu1 }
 0x31b   : > { %v8070_v12 = vpop.f32.mrb[207].mxu0  ;;  %v8648_v9 = vpop.eup %8647  ;;  %v8168_v31 = vadd.f32 %v8167_v46, %v8166_v5 }
 0x31c   : > { %v8169_v20 = vpop.f32.mrb[198].mxu1  ;;  %v8071_v28 = vadd.f32 %v8070_v12, %v8069_v22  ;;  %7095 = vst.msk [vmem:[%s10204_s13 + $0x2f8] sm:$0xff] %vm3688_vm14, %v8648_v9 }
 0x31d   : > { %v8170_v36 = vpop.f32.mrb[199].mxu1  ;;  %v5806_v1 = vadd.f32 %v8168_v31, %v8056_v10 }
 0x31e   : > { %v8171_v3 = vadd.f32 %v8170_v36, %v8169_v20 }
 0x31f   : > { %8653 = vtanh.f32 %v5806_v1  ;;  %v8072_v62 = vpop.f32.mrb[208].mxu0 }
 0x320   : > { %v5809_v57 = vadd.f32 %v8171_v3, %v8059_v33  ;;  %v8073_v38 = vpop.f32.mrb[209].mxu0 }
 0x321   : > { %v8650_v30 = vpop.eup %8649  ;;  %v8172_v34 = vpop.f32.mrb[200].mxu1  ;;  %v8074_v37 = vadd.f32 %v8073_v38, %v8072_v62 }
 0x322   : > { %8655 = vtanh.f32 %v5809_v57  ;;  %v8075_v48 = vpop.f32.mrb[210].mxu0  ;;  %7208 = vst.msk [vmem:[%s10204_s13 + $0x300] sm:$0xff] %vm3688_vm14, %v8650_v30  ;;  %v8173_v63 = vpop.f32.mrb[201].mxu1 }
 0x323   : > { %v8076_v32 = vpop.f32.mrb[211].mxu0  ;;  %v8652_v51 = vpop.eup %8651  ;;  %v8174_v29 = vadd.f32 %v8173_v63, %v8172_v34 }
 0x324   : > { %v8175_v49 = vpop.f32.mrb[202].mxu1  ;;  %v8077_v13 = vadd.f32 %v8076_v32, %v8075_v48  ;;  %7209 = vst.msk [vmem:[%s10204_s13 + $0x308] sm:$0xff] %vm3688_vm14, %v8652_v51 }
 0x325   : > { %v8176_v2 = vpop.f32.mrb[203].mxu1  ;;  %v5814_v47 = vadd.f32 %v8174_v29, %v8062_v27 }
 0x326   : > { %v8177_v42 = vadd.f32 %v8176_v2, %v8175_v49 }
 0x327   : > { %8657 = vtanh.f32 %v5814_v47  ;;  %v8078_v4 = vpop.f32.mrb[212].mxu0 }
 0x328   : > { %v5817_v16 = vadd.f32 %v8177_v42, %v8065_v0  ;;  %v8079_v52 = vpop.f32.mrb[213].mxu0 }
 0x329   : > { %v8654_v26 = vpop.eup %8653  ;;  %v8178_v35 = vpop.f32.mrb[204].mxu1  ;;  %v8080_v10 = vadd.f32 %v8079_v52, %v8078_v4 }
 0x32a   : > { %8659 = vtanh.f32 %v5817_v16  ;;  %v8081_v53 = vpop.f32.mrb[214].mxu0  ;;  %7210 = vst.msk [vmem:[%s10204_s13 + $0x310] sm:$0xff] %vm3688_vm14, %v8654_v26  ;;  %v8179_v58 = vpop.f32.mrb[205].mxu1 }
 0x32b   : > { %v8082_v11 = vpop.f32.mrb[215].mxu0  ;;  %v8180_v24 = vadd.f32 %v8179_v58, %v8178_v35  ;;  %v8181_v61 = vpop.f32.mrb[206].mxu1 }
 0x32c   : > { %v8656_v25 = vpop.eup %8655  ;;  %v8083_v33 = vadd.f32 %v8082_v11, %v8081_v53  ;;  %v8182_v50 = vpop.f32.mrb[207].mxu1 }
 0x32d   : > { %7211 = vst.msk [vmem:[%s10204_s13 + $0x318] sm:$0xff] %vm3688_vm14, %v8656_v25  ;;  %v5822_v14 = vadd.f32 %v8180_v24, %v8068_v55  ;;  %v8183_v40 = vadd.f32 %v8182_v50, %v8181_v61 }
 0x32f   : > { %8661 = vtanh.f32 %v5822_v14  ;;  %v5825_v39 = vadd.f32 %v8183_v40, %v8071_v28  ;;  %v8084_v19 = vpop.f32.mrb[216].mxu0 }
 0x330   : > { %v8085_v23 = vpop.f32.mrb[217].mxu0 }
 0x331   : > { %v8658_v56 = vpop.eup %8657  ;;  %8663 = vtanh.f32 %v5825_v39  ;;  %v8184_v7 = vpop.f32.mrb[208].mxu1  ;;  %v8086_v27 = vadd.f32 %v8085_v23, %v8084_v19 }
 0x332   : > { %v8087_v60 = vpop.f32.mrb[218].mxu0  ;;  %7212 = vst.msk [vmem:[%s10204_s13 + $0x320] sm:$0xff] %vm3688_vm14, %v8658_v56  ;;  %v8185_v54 = vpop.f32.mrb[209].mxu1 }
 0x333   : > { %v8088_v8 = vpop.f32.mrb[219].mxu0  ;;  %v8186_v59 = vadd.f32 %v8185_v54, %v8184_v7  ;;  %v8187_v45 = vpop.f32.mrb[210].mxu1 }
 0x334   : > { %v8660_v43 = vpop.eup %8659  ;;  %v8089_v0 = vadd.f32 %v8088_v8, %v8087_v60  ;;  %v8188_v44 = vpop.f32.mrb[211].mxu1 }
 0x335   : > { %7213 = vst.msk [vmem:[%s10204_s13 + $0x328] sm:$0xff] %vm3688_vm14, %v8660_v43  ;;  %v5830_v17 = vadd.f32 %v8186_v59, %v8074_v37  ;;  %v8189_v6 = vadd.f32 %v8188_v44, %v8187_v45 }
 0x337   : > { %8665 = vtanh.f32 %v5830_v17  ;;  %v5833_v21 = vadd.f32 %v8189_v6, %v8077_v13  ;;  %v8090_v18 = vpop.f32.mrb[220].mxu0 }
 0x338   : > { %v8091_v41 = vpop.f32.mrb[221].mxu0 }
 0x339   : > { %v8662_v15 = vpop.eup %8661  ;;  %8667 = vtanh.f32 %v5833_v21  ;;  %v8190_v5 = vpop.f32.mrb[212].mxu1  ;;  %v8092_v55 = vadd.f32 %v8091_v41, %v8090_v18 }
 0x33a   : > { %v8093_v22 = vpop.f32.mrb[222].mxu0  ;;  %7214 = vst.msk [vmem:[%s10204_s13 + $0x330] sm:$0xff] %vm3688_vm14, %v8662_v15  ;;  %v8191_v46 = vpop.f32.mrb[213].mxu1 }
 0x33b   : > { %v8094_v12 = vpop.f32.mrb[223].mxu0  ;;  %v8664_v9 = vpop.eup %8663  ;;  %v8192_v31 = vadd.f32 %v8191_v46, %v8190_v5 }
 0x33c   : > { %v8193_v20 = vpop.f32.mrb[214].mxu1  ;;  %v8095_v28 = vadd.f32 %v8094_v12, %v8093_v22  ;;  %7215 = vst.msk [vmem:[%s10204_s13 + $0x338] sm:$0xff] %vm3688_vm14, %v8664_v9 }
 0x33d   : > { %v8194_v36 = vpop.f32.mrb[215].mxu1  ;;  %v5838_v1 = vadd.f32 %v8192_v31, %v8080_v10 }
 0x33e   : > { %v8195_v3 = vadd.f32 %v8194_v36, %v8193_v20 }
 0x33f   : > { %8669 = vtanh.f32 %v5838_v1  ;;  %v8096_v62 = vpop.f32.mrb[224].mxu0 }
 0x340   : > { %v5841_v57 = vadd.f32 %v8195_v3, %v8083_v33  ;;  %v8097_v38 = vpop.f32.mrb[225].mxu0 }
 0x341   : > { %v8666_v30 = vpop.eup %8665  ;;  %v8196_v34 = vpop.f32.mrb[216].mxu1  ;;  %v8098_v37 = vadd.f32 %v8097_v38, %v8096_v62 }
 0x342   : > { %8671 = vtanh.f32 %v5841_v57  ;;  %v8099_v48 = vpop.f32.mrb[226].mxu0  ;;  %7216 = vst.msk [vmem:[%s10204_s13 + $0x340] sm:$0xff] %vm3688_vm14, %v8666_v30  ;;  %v8197_v63 = vpop.f32.mrb[217].mxu1 }
 0x343   : > { %v8100_v32 = vpop.f32.mrb[227].mxu0  ;;  %v8668_v51 = vpop.eup %8667  ;;  %v8198_v29 = vadd.f32 %v8197_v63, %v8196_v34 }
 0x344   : > { %v8199_v49 = vpop.f32.mrb[218].mxu1  ;;  %v8101_v13 = vadd.f32 %v8100_v32, %v8099_v48  ;;  %7217 = vst.msk [vmem:[%s10204_s13 + $0x348] sm:$0xff] %vm3688_vm14, %v8668_v51 }
 0x345   : > { %v8200_v2 = vpop.f32.mrb[219].mxu1  ;;  %v5846_v47 = vadd.f32 %v8198_v29, %v8086_v27 }
 0x346   : > { %v8201_v42 = vadd.f32 %v8200_v2, %v8199_v49 }
 0x347   : > { %8673 = vtanh.f32 %v5846_v47  ;;  %v8102_v4 = vpop.f32.mrb[228].mxu0 }
 0x348   : > { %v5849_v16 = vadd.f32 %v8201_v42, %v8089_v0  ;;  %v8103_v52 = vpop.f32.mrb[229].mxu0 }
 0x349   : > { %v8670_v26 = vpop.eup %8669  ;;  %v8202_v35 = vpop.f32.mrb[220].mxu1  ;;  %v8104_v10 = vadd.f32 %v8103_v52, %v8102_v4 }
 0x34a   : > { %8675 = vtanh.f32 %v5849_v16  ;;  %v8105_v53 = vpop.f32.mrb[230].mxu0  ;;  %7218 = vst.msk [vmem:[%s10204_s13 + $0x350] sm:$0xff] %vm3688_vm14, %v8670_v26  ;;  %v8203_v58 = vpop.f32.mrb[221].mxu1 }
 0x34b   : > { %v8106_v11 = vpop.f32.mrb[231].mxu0  ;;  %v8204_v24 = vadd.f32 %v8203_v58, %v8202_v35  ;;  %v8205_v61 = vpop.f32.mrb[222].mxu1 }
 0x34c   : > { %v8672_v25 = vpop.eup %8671  ;;  %v8107_v33 = vadd.f32 %v8106_v11, %v8105_v53  ;;  %v8206_v50 = vpop.f32.mrb[223].mxu1 }
 0x34d   : > { %7219 = vst.msk [vmem:[%s10204_s13 + $0x358] sm:$0xff] %vm3688_vm14, %v8672_v25  ;;  %v5854_v14 = vadd.f32 %v8204_v24, %v8092_v55  ;;  %v8207_v40 = vadd.f32 %v8206_v50, %v8205_v61 }
 0x34f   : > { %8677 = vtanh.f32 %v5854_v14  ;;  %v5857_v39 = vadd.f32 %v8207_v40, %v8095_v28  ;;  %v8108_v19 = vpop.f32.mrb[232].mxu0 }
 0x350   : > { %v8109_v23 = vpop.f32.mrb[233].mxu0 }
 0x351   : > { %v8674_v56 = vpop.eup %8673  ;;  %8679 = vtanh.f32 %v5857_v39  ;;  %v8208_v7 = vpop.f32.mrb[224].mxu1  ;;  %v8110_v27 = vadd.f32 %v8109_v23, %v8108_v19 }
 0x352   : > { %v8111_v60 = vpop.f32.mrb[234].mxu0  ;;  %7220 = vst.msk [vmem:[%s10204_s13 + $0x360] sm:$0xff] %vm3688_vm14, %v8674_v56  ;;  %v8209_v54 = vpop.f32.mrb[225].mxu1 }
 0x353   : > { %v8112_v8 = vpop.f32.mrb[235].mxu0  ;;  %v8210_v59 = vadd.f32 %v8209_v54, %v8208_v7  ;;  %v8211_v45 = vpop.f32.mrb[226].mxu1 }
 0x354   : > { %v8676_v43 = vpop.eup %8675  ;;  %v8113_v0 = vadd.f32 %v8112_v8, %v8111_v60  ;;  %v8212_v44 = vpop.f32.mrb[227].mxu1 }
 0x355   : > { %7221 = vst.msk [vmem:[%s10204_s13 + $0x368] sm:$0xff] %vm3688_vm14, %v8676_v43  ;;  %v5862_v17 = vadd.f32 %v8210_v59, %v8098_v37  ;;  %v8213_v6 = vadd.f32 %v8212_v44, %v8211_v45 }
 0x357   : > { %8681 = vtanh.f32 %v5862_v17  ;;  %v5865_v21 = vadd.f32 %v8213_v6, %v8101_v13  ;;  %v8114_v18 = vpop.f32.mrb[236].mxu0 }
 0x358   : > { %v8115_v41 = vpop.f32.mrb[237].mxu0 }
 0x359   : > { %v8678_v15 = vpop.eup %8677  ;;  %8683 = vtanh.f32 %v5865_v21  ;;  %v8214_v5 = vpop.f32.mrb[228].mxu1  ;;  %v8116_v55 = vadd.f32 %v8115_v41, %v8114_v18 }
 0x35a   : > { %v8117_v22 = vpop.f32.mrb[238].mxu0  ;;  %7222 = vst.msk [vmem:[%s10204_s13 + $0x370] sm:$0xff] %vm3688_vm14, %v8678_v15  ;;  %v8215_v46 = vpop.f32.mrb[229].mxu1 }
 0x35b   : > { %v8118_v12 = vpop.f32.mrb[239].mxu0  ;;  %v8680_v9 = vpop.eup %8679  ;;  %v8216_v31 = vadd.f32 %v8215_v46, %v8214_v5 }
 0x35c   : > { %v8217_v20 = vpop.f32.mrb[230].mxu1  ;;  %v8119_v28 = vadd.f32 %v8118_v12, %v8117_v22  ;;  %7223 = vst.msk [vmem:[%s10204_s13 + $0x378] sm:$0xff] %vm3688_vm14, %v8680_v9 }
 0x35d   : > { %v8218_v36 = vpop.f32.mrb[231].mxu1  ;;  %v5870_v1 = vadd.f32 %v8216_v31, %v8104_v10 }
 0x35e   : > { %v8219_v3 = vadd.f32 %v8218_v36, %v8217_v20 }
 0x35f   : > { %8685 = vtanh.f32 %v5870_v1  ;;  %v8120_v62 = vpop.f32.mrb[240].mxu0 }
 0x360   : > { %v5873_v57 = vadd.f32 %v8219_v3, %v8107_v33  ;;  %v8121_v38 = vpop.f32.mrb[241].mxu0 }
 0x361   : > { %v8682_v30 = vpop.eup %8681  ;;  %v8220_v34 = vpop.f32.mrb[232].mxu1  ;;  %v8122_v37 = vadd.f32 %v8121_v38, %v8120_v62 }
 0x362   : > { %8687 = vtanh.f32 %v5873_v57  ;;  %v8123_v48 = vpop.f32.mrb[242].mxu0  ;;  %7224 = vst.msk [vmem:[%s10204_s13 + $0x380] sm:$0xff] %vm3688_vm14, %v8682_v30  ;;  %v8221_v63 = vpop.f32.mrb[233].mxu1 }
 0x363   : > { %v8124_v32 = vpop.f32.mrb[243].mxu0  ;;  %v8684_v51 = vpop.eup %8683  ;;  %v8222_v29 = vadd.f32 %v8221_v63, %v8220_v34 }
 0x364   : > { %v8223_v49 = vpop.f32.mrb[234].mxu1  ;;  %v8125_v13 = vadd.f32 %v8124_v32, %v8123_v48  ;;  %7225 = vst.msk [vmem:[%s10204_s13 + $0x388] sm:$0xff] %vm3688_vm14, %v8684_v51 }
 0x365   : > { %v8224_v2 = vpop.f32.mrb[235].mxu1  ;;  %v5878_v47 = vadd.f32 %v8222_v29, %v8110_v27 }
 0x366   : > { %v8225_v42 = vadd.f32 %v8224_v2, %v8223_v49 }
 0x367   : > { %8689 = vtanh.f32 %v5878_v47  ;;  %v8126_v4 = vpop.f32.mrb[244].mxu0 }
 0x368   : > { %v5881_v16 = vadd.f32 %v8225_v42, %v8113_v0  ;;  %v8127_v52 = vpop.f32.mrb[245].mxu0 }
 0x369   : > { %v8686_v26 = vpop.eup %8685  ;;  %v8226_v35 = vpop.f32.mrb[236].mxu1  ;;  %v8128_v10 = vadd.f32 %v8127_v52, %v8126_v4 }
 0x36a   : > { %8691 = vtanh.f32 %v5881_v16  ;;  %v8129_v53 = vpop.f32.mrb[246].mxu0  ;;  %7226 = vst.msk [vmem:[%s10204_s13 + $0x390] sm:$0xff] %vm3688_vm14, %v8686_v26  ;;  %v8227_v58 = vpop.f32.mrb[237].mxu1 }
 0x36b   : > { %v8130_v11 = vpop.f32.mrb[247].mxu0  ;;  %v8228_v24 = vadd.f32 %v8227_v58, %v8226_v35  ;;  %v8229_v61 = vpop.f32.mrb[238].mxu1 }
 0x36c   : > { %v8688_v25 = vpop.eup %8687  ;;  %v8131_v33 = vadd.f32 %v8130_v11, %v8129_v53  ;;  %v8230_v50 = vpop.f32.mrb[239].mxu1 }
 0x36d   : > { %7227 = vst.msk [vmem:[%s10204_s13 + $0x398] sm:$0xff] %vm3688_vm14, %v8688_v25  ;;  %v5886_v14 = vadd.f32 %v8228_v24, %v8116_v55  ;;  %v8231_v40 = vadd.f32 %v8230_v50, %v8229_v61  ;;  %v6281_v25 = vld [vmem:[%s10204_s13] sm:$0xff] (%p8886_p4)  ;;  %v6283_v24 = vld [vmem:[%s10204_s13 + $0x8] sm:$0xff] (%p8886_p4)  ;;  %v6285_v61 = vld [vmem:[%s10204_s13 + $0x10] sm:$0xff] (%p8886_p4) }
 0x36e   : > { %v6289_v50 = vld [vmem:[%s10204_s13 + $0x20] sm:$0xff] (%p8886_p4)  ;;  %6282 = vst [vmem:[%s11333_s25] sm:$0xff] (%p8886_p4), %v6281_v25  ;;  %6284 = vst [vmem:[%s11333_s25 + $0x8] sm:$0xff] (%p8886_p4), %v6283_v24  ;;  %v6411_v24 = vld [vmem:[%s10204_s13 + $0x208] sm:$0xff] (%p8886_p4) }
 0x36f   : > { %8693 = vtanh.f32 %v5886_v14  ;;  %v5889_v39 = vadd.f32 %v8231_v40, %v8119_v28  ;;  %v8132_v19 = vpop.f32.mrb[248].mxu0  ;;  %v6291_v14 = vld [vmem:[%s10204_s13 + $0x28] sm:$0xff] (%p8886_p4)  ;;  %6286 = vst [vmem:[%s11333_s25 + $0x10] sm:$0xff] (%p8886_p4), %v6285_v61  ;;  %6290 = vst [vmem:[%s11333_s25 + $0x20] sm:$0xff] (%p8886_p4), %v6289_v50  ;;  %v6293_v40 = vld [vmem:[%s10204_s13 + $0x30] sm:$0xff] (%p8886_p4) }
 0x370   : > { %v8133_v23 = vpop.f32.mrb[249].mxu0  ;;  %6292 = vst [vmem:[%s11333_s25 + $0x28] sm:$0xff] (%p8886_p4), %v6291_v14  ;;  %6294 = vst [vmem:[%s11333_s25 + $0x30] sm:$0xff] (%p8886_p4), %v6293_v40  ;;  %v6409_v25 = vld [vmem:[%s10204_s13 + $0x200] sm:$0xff] (%p8886_p4)  ;;  %v6413_v61 = vld [vmem:[%s10204_s13 + $0x210] sm:$0xff] (%p8886_p4) }
 0x371   : > { %v8690_v56 = vpop.eup %8689  ;;  %8695 = vtanh.f32 %v5889_v39  ;;  %v8232_v7 = vpop.f32.mrb[240].mxu1  ;;  %v8134_v27 = vadd.f32 %v8133_v23, %v8132_v19  ;;  %v6295_v39 = vld [vmem:[%s10204_s13 + $0x38] sm:$0xff] (%p8886_p4)  ;;  %v6297_v19 = vld [vmem:[%s10204_s13 + $0x40] sm:$0xff] (%p8886_p4)  ;;  %v6299_v23 = vld [vmem:[%s10204_s13 + $0x48] sm:$0xff] (%p8886_p4)  ;;  %6410 = vst [vmem:[%s11333_s25 + $0x400] sm:$0xff] (%p8886_p4), %v6409_v25 }
 0x372   : > { %v8135_v60 = vpop.f32.mrb[250].mxu0  ;;  %7228 = vst.msk [vmem:[%s10204_s13 + $0x3a0] sm:$0xff] %vm3688_vm14, %v8690_v56  ;;  %v8233_v54 = vpop.f32.mrb[241].mxu1  ;;  %6296 = vst [vmem:[%s11333_s25 + $0x38] sm:$0xff] (%p8886_p4), %v6295_v39  ;;  %v6301_v56 = vld [vmem:[%s10204_s13 + $0x50] sm:$0xff] (%p8886_p4)  ;;  %v6417_v50 = vld [vmem:[%s10204_s13 + $0x220] sm:$0xff] (%p8886_p4) }
 0x373   : > { %v8136_v8 = vpop.f32.mrb[251].mxu0  ;;  %v8234_v59 = vadd.f32 %v8233_v54, %v8232_v7  ;;  %v8235_v45 = vpop.f32.mrb[242].mxu1  ;;  %6298 = vst [vmem:[%s11333_s25 + $0x40] sm:$0xff] (%p8886_p4), %v6297_v19  ;;  %v6303_v7 = vld [vmem:[%s10204_s13 + $0x58] sm:$0xff] (%p8886_p4)  ;;  %6300 = vst [vmem:[%s11333_s25 + $0x48] sm:$0xff] (%p8886_p4), %v6299_v23  ;;  %v6309_v54 = vld [vmem:[%s10204_s13 + $0x70] sm:$0xff] (%p8886_p4) }
 0x374   : > { %v8692_v43 = vpop.eup %8691  ;;  %v8137_v0 = vadd.f32 %v8136_v8, %v8135_v60  ;;  %v8236_v44 = vpop.f32.mrb[243].mxu1  ;;  %6302 = vst [vmem:[%s11333_s25 + $0x50] sm:$0xff] (%p8886_p4), %v6301_v56  ;;  %6304 = vst [vmem:[%s11333_s25 + $0x58] sm:$0xff] (%p8886_p4), %v6303_v7  ;;  %v6307_v60 = vld [vmem:[%s10204_s13 + $0x68] sm:$0xff] (%p8886_p4)  ;;  %v6311_v8 = vld [vmem:[%s10204_s13 + $0x78] sm:$0xff] (%p8886_p4) }
 0x375   : > { %7229 = vst.msk [vmem:[%s10204_s13 + $0x3a8] sm:$0xff] %vm3688_vm14, %v8692_v43  ;;  %v5894_v17 = vadd.f32 %v8234_v59, %v8122_v37  ;;  %v8237_v6 = vadd.f32 %v8236_v44, %v8235_v45  ;;  %6308 = vst [vmem:[%s11333_s25 + $0x68] sm:$0xff] (%p8886_p4), %v6307_v60  ;;  %v6313_v43 = vld [vmem:[%s10204_s13 + $0x80] sm:$0xff] (%p8886_p4)  ;;  %v6315_v59 = vld [vmem:[%s10204_s13 + $0x88] sm:$0xff] (%p8886_p4) }
 0x376   : > { %6310 = vst [vmem:[%s11333_s25 + $0x70] sm:$0xff] (%p8886_p4), %v6309_v54  ;;  %6312 = vst [vmem:[%s11333_s25 + $0x78] sm:$0xff] (%p8886_p4), %v6311_v8  ;;  %v6317_v45 = vld [vmem:[%s10204_s13 + $0x90] sm:$0xff] (%p8886_p4)  ;;  %v6321_v44 = vld [vmem:[%s10204_s13 + $0xa0] sm:$0xff] (%p8886_p4) }
 0x377   : > { %8697 = vtanh.f32 %v5894_v17  ;;  %v5897_v21 = vadd.f32 %v8237_v6, %v8125_v13  ;;  %v8138_v18 = vpop.f32.mrb[252].mxu0  ;;  %6314 = vst [vmem:[%s11333_s25 + $0x80] sm:$0xff] (%p8886_p4), %v6313_v43  ;;  %6316 = vst [vmem:[%s11333_s25 + $0x88] sm:$0xff] (%p8886_p4), %v6315_v59  ;;  %v6323_v17 = vld [vmem:[%s10204_s13 + $0xa8] sm:$0xff] (%p8886_p4)  ;;  %v6325_v6 = vld [vmem:[%s10204_s13 + $0xb0] sm:$0xff] (%p8886_p4) }
 0x378   : > { %v8139_v41 = vpop.f32.mrb[253].mxu0  ;;  %6318 = vst [vmem:[%s11333_s25 + $0x90] sm:$0xff] (%p8886_p4), %v6317_v45  ;;  %6322 = vst [vmem:[%s11333_s25 + $0xa0] sm:$0xff] (%p8886_p4), %v6321_v44  ;;  %v6419_v14 = vld [vmem:[%s10204_s13 + $0x228] sm:$0xff] (%p8886_p4)  ;;  %v6421_v40 = vld [vmem:[%s10204_s13 + $0x230] sm:$0xff] (%p8886_p4) }
 0x379   : > { %v8694_v15 = vpop.eup %8693  ;;  %8699 = vtanh.f32 %v5897_v21  ;;  %v8238_v5 = vpop.f32.mrb[244].mxu1  ;;  %v8140_v55 = vadd.f32 %v8139_v41, %v8138_v18  ;;  %v6327_v21 = vld [vmem:[%s10204_s13 + $0xb8] sm:$0xff] (%p8886_p4)  ;;  %6324 = vst [vmem:[%s11333_s25 + $0xa8] sm:$0xff] (%p8886_p4), %v6323_v17  ;;  %6326 = vst [vmem:[%s11333_s25 + $0xb0] sm:$0xff] (%p8886_p4), %v6325_v6  ;;  %v6329_v18 = vld [vmem:[%s10204_s13 + $0xc0] sm:$0xff] (%p8886_p4) }
 0x37a   : > { %v8141_v22 = vpop.f32.mrb[254].mxu0  ;;  %7230 = vst.msk [vmem:[%s10204_s13 + $0x3b0] sm:$0xff] %vm3688_vm14, %v8694_v15  ;;  %v8239_v46 = vpop.f32.mrb[245].mxu1  ;;  %6328 = vst [vmem:[%s11333_s25 + $0xb8] sm:$0xff] (%p8886_p4), %v6327_v21  ;;  %v6331_v41 = vld [vmem:[%s10204_s13 + $0xc8] sm:$0xff] (%p8886_p4)  ;;  %v6333_v15 = vld [vmem:[%s10204_s13 + $0xd0] sm:$0xff] (%p8886_p4) }
 0x37b   : > { %v8142_v12 = vpop.f32.mrb[255].mxu0  ;;  %v8696_v9 = vpop.eup %8695  ;;  %v8240_v31 = vadd.f32 %v8239_v46, %v8238_v5  ;;  %6330 = vst [vmem:[%s11333_s25 + $0xc0] sm:$0xff] (%p8886_p4), %v6329_v18  ;;  %6332 = vst [vmem:[%s11333_s25 + $0xc8] sm:$0xff] (%p8886_p4), %v6331_v41  ;;  %v6335_v5 = vld [vmem:[%s10204_s13 + $0xd8] sm:$0xff] (%p8886_p4)  ;;  %v6341_v46 = vld [vmem:[%s10204_s13 + $0xf0] sm:$0xff] (%p8886_p4) }
 0x37c   : > { %v8241_v20 = vpop.f32.mrb[246].mxu1  ;;  %v8143_v28 = vadd.f32 %v8142_v12, %v8141_v22  ;;  %7231 = vst.msk [vmem:[%s10204_s13 + $0x3b8] sm:$0xff] %vm3688_vm14, %v8696_v9  ;;  %6334 = vst [vmem:[%s11333_s25 + $0xd0] sm:$0xff] (%p8886_p4), %v6333_v15  ;;  %v6339_v22 = vld [vmem:[%s10204_s13 + $0xe8] sm:$0xff] (%p8886_p4)  ;;  %v6343_v12 = vld [vmem:[%s10204_s13 + $0xf8] sm:$0xff] (%p8886_p4) }
 0x37d   : > { %v8242_v36 = vpop.f32.mrb[247].mxu1  ;;  %v5902_v1 = vadd.f32 %v8240_v31, %v8128_v10  ;;  %6336 = vst [vmem:[%s11333_s25 + $0xd8] sm:$0xff] (%p8886_p4), %v6335_v5  ;;  %6340 = vst [vmem:[%s11333_s25 + $0xe8] sm:$0xff] (%p8886_p4), %v6339_v22  ;;  %v6345_v9 = vld [vmem:[%s10204_s13 + $0x100] sm:$0xff] (%p8886_p4)  ;;  %v6347_v31 = vld [vmem:[%s10204_s13 + $0x108] sm:$0xff] (%p8886_p4) }
 0x37e   : > { %v8243_v3 = vadd.f32 %v8242_v36, %v8241_v20  ;;  %6342 = vst [vmem:[%s11333_s25 + $0xf0] sm:$0xff] (%p8886_p4), %v6341_v46  ;;  %6344 = vst [vmem:[%s11333_s25 + $0xf8] sm:$0xff] (%p8886_p4), %v6343_v12  ;;  %v6349_v20 = vld [vmem:[%s10204_s13 + $0x110] sm:$0xff] (%p8886_p4)  ;;  %v6353_v36 = vld [vmem:[%s10204_s13 + $0x120] sm:$0xff] (%p8886_p4) }
 0x37f   : > { %8701 = vtanh.f32 %v5902_v1  ;;  %6346 = vst [vmem:[%s11333_s25 + $0x200] sm:$0xff] (%p8886_p4), %v6345_v9  ;;  %6348 = vst [vmem:[%s11333_s25 + $0x208] sm:$0xff] (%p8886_p4), %v6347_v31  ;;  %v6355_v1 = vld [vmem:[%s10204_s13 + $0x128] sm:$0xff] (%p8886_p4)  ;;  %v6423_v39 = vld [vmem:[%s10204_s13 + $0x238] sm:$0xff] (%p8886_p4) }
 0x380   : > { %v5905_v57 = vadd.f32 %v8243_v3, %v8131_v33  ;;  %v6287_v33 = vld [vmem:[%s10204_s13 + $0x18] sm:$0xff] (%p8886_p4)  ;;  %6350 = vst [vmem:[%s11333_s25 + $0x210] sm:$0xff] (%p8886_p4), %v6349_v20  ;;  %v6357_v3 = vld [vmem:[%s10204_s13 + $0x130] sm:$0xff] (%p8886_p4)  ;;  %6354 = vst [vmem:[%s11333_s25 + $0x220] sm:$0xff] (%p8886_p4), %v6353_v36 }
 0x381   : > { %v8698_v62 = vpop.eup %8697  ;;  %v8244_v38 = vpop.f32.mrb[248].mxu1  ;;  %6288 = vst [vmem:[%s11333_s25 + $0x18] sm:$0xff] (%p8886_p4), %v6287_v33  ;;  %6356 = vst [vmem:[%s11333_s25 + $0x228] sm:$0xff] (%p8886_p4), %v6355_v1  ;;  %v6415_v33 = vld [vmem:[%s10204_s13 + $0x218] sm:$0xff] (%p8886_p4)  ;;  %v6425_v19 = vld [vmem:[%s10204_s13 + $0x240] sm:$0xff] (%p8886_p4) }
 0x382   : > { %8703 = vtanh.f32 %v5905_v57  ;;  %7232 = vst.msk [vmem:[%s10204_s13 + $0x3c0] sm:$0xff] %vm3688_vm14, %v8698_v62  ;;  %v8245_v30 = vpop.f32.mrb[249].mxu1  ;;  %6358 = vst [vmem:[%s11333_s25 + $0x230] sm:$0xff] (%p8886_p4), %v6357_v3  ;;  %v6359_v57 = vld [vmem:[%s10204_s13 + $0x138] sm:$0xff] (%p8886_p4)  ;;  %v6361_v62 = vld [vmem:[%s10204_s13 + $0x140] sm:$0xff] (%p8886_p4) }
 0x383   : > { %v8700_v34 = vpop.eup %8699  ;;  %v8246_v37 = vadd.f32 %v8245_v30, %v8244_v38  ;;  %v8247_v48 = vpop.f32.mrb[250].mxu1  ;;  %v6363_v38 = vld [vmem:[%s10204_s13 + $0x148] sm:$0xff] (%p8886_p4)  ;;  %6360 = vst [vmem:[%s11333_s25 + $0x238] sm:$0xff] (%p8886_p4), %v6359_v57  ;;  %6362 = vst [vmem:[%s11333_s25 + $0x240] sm:$0xff] (%p8886_p4), %v6361_v62  ;;  %v6365_v30 = vld [vmem:[%s10204_s13 + $0x150] sm:$0xff] (%p8886_p4) }
 0x384   : > { %7233 = vst.msk [vmem:[%s10204_s13 + $0x3c8] sm:$0xff] %vm3688_vm14, %v8700_v34  ;;  %v8248_v63 = vpop.f32.mrb[251].mxu1  ;;  %6364 = vst [vmem:[%s11333_s25 + $0x248] sm:$0xff] (%p8886_p4), %v6363_v38  ;;  %v6367_v34 = vld [vmem:[%s10204_s13 + $0x158] sm:$0xff] (%p8886_p4)  ;;  %v6427_v23 = vld [vmem:[%s10204_s13 + $0x248] sm:$0xff] (%p8886_p4) }
 0x385   : > { %v5910_v32 = vadd.f32 %v8246_v37, %v8134_v27  ;;  %v8249_v51 = vadd.f32 %v8248_v63, %v8247_v48  ;;  %v6305_v27 = vld [vmem:[%s10204_s13 + $0x60] sm:$0xff] (%p8886_p4)  ;;  %6366 = vst [vmem:[%s11333_s25 + $0x250] sm:$0xff] (%p8886_p4), %v6365_v30  ;;  %6368 = vst [vmem:[%s11333_s25 + $0x258] sm:$0xff] (%p8886_p4), %v6367_v34  ;;  %v6371_v48 = vld [vmem:[%s10204_s13 + $0x168] sm:$0xff] (%p8886_p4) }
 0x386   : > { %6306 = vst [vmem:[%s11333_s25 + $0x60] sm:$0xff] (%p8886_p4), %v6305_v27  ;;  %v6369_v37 = vld [vmem:[%s10204_s13 + $0x160] sm:$0xff] (%p8886_p4)  ;;  %v6373_v63 = vld [vmem:[%s10204_s13 + $0x170] sm:$0xff] (%p8886_p4)  ;;  %6372 = vst [vmem:[%s11333_s25 + $0x268] sm:$0xff] (%p8886_p4), %v6371_v48 }
 0x387   : > { %8705 = vtanh.f32 %v5910_v32  ;;  %v5913_v29 = vadd.f32 %v8249_v51, %v8137_v0  ;;  %v6319_v0 = vld [vmem:[%s10204_s13 + $0x98] sm:$0xff] (%p8886_p4)  ;;  %6370 = vst [vmem:[%s11333_s25 + $0x260] sm:$0xff] (%p8886_p4), %v6369_v37  ;;  %6374 = vst [vmem:[%s11333_s25 + $0x270] sm:$0xff] (%p8886_p4), %v6373_v63  ;;  %v6377_v51 = vld [vmem:[%s10204_s13 + $0x180] sm:$0xff] (%p8886_p4) }
 0x388   : > { %6320 = vst [vmem:[%s11333_s25 + $0x98] sm:$0xff] (%p8886_p4), %v6319_v0  ;;  %v6375_v32 = vld [vmem:[%s10204_s13 + $0x178] sm:$0xff] (%p8886_p4)  ;;  %6378 = vst [vmem:[%s11333_s25 + $0x280] sm:$0xff] (%p8886_p4), %v6377_v51  ;;  %v6429_v56 = vld [vmem:[%s10204_s13 + $0x250] sm:$0xff] (%p8886_p4) }
 0x389   : > { %v8702_v49 = vpop.eup %8701  ;;  %8707 = vtanh.f32 %v5913_v29  ;;  %v8250_v13 = vpop.f32.mrb[252].mxu1  ;;  %6376 = vst [vmem:[%s11333_s25 + $0x278] sm:$0xff] (%p8886_p4), %v6375_v32  ;;  %v6379_v29 = vld [vmem:[%s10204_s13 + $0x188] sm:$0xff] (%p8886_p4)  ;;  %6412 = vst [vmem:[%s11333_s25 + $0x408] sm:$0xff] (%p8886_p4), %v6411_v24  ;;  %v6431_v7 = vld [vmem:[%s10204_s13 + $0x258] sm:$0xff] (%p8886_p4) }
 0x38a   : > { %7234 = vst.msk [vmem:[%s10204_s13 + $0x3d0] sm:$0xff] %vm3688_vm14, %v8702_v49  ;;  %v8251_v2 = vpop.f32.mrb[253].mxu1  ;;  %v6381_v49 = vld [vmem:[%s10204_s13 + $0x190] sm:$0xff] (%p8886_p4)  ;;  %6380 = vst [vmem:[%s11333_s25 + $0x288] sm:$0xff] (%p8886_p4), %v6379_v29  ;;  %v6433_v27 = vld [vmem:[%s10204_s13 + $0x260] sm:$0xff] (%p8886_p4) }
 0x38b   : > { %v8252_v42 = vadd.f32 %v8251_v2, %v8250_v13  ;;  %v8253_v16 = vpop.f32.mrb[254].mxu1  ;;  %6382 = vst [vmem:[%s11333_s25 + $0x290] sm:$0xff] (%p8886_p4), %v6381_v49  ;;  %v6383_v13 = vld [vmem:[%s10204_s13 + $0x198] sm:$0xff] (%p8886_p4)  ;;  %v6385_v2 = vld [vmem:[%s10204_s13 + $0x1a0] sm:$0xff] (%p8886_p4)  ;;  %6414 = vst [vmem:[%s11333_s25 + $0x410] sm:$0xff] (%p8886_p4), %v6413_v61 }
 0x38c   : > { %v8704_v47 = vpop.eup %8703  ;;  %v8254_v4 = vpop.f32.mrb[255].mxu1  ;;  %6384 = vst [vmem:[%s11333_s25 + $0x298] sm:$0xff] (%p8886_p4), %v6383_v13  ;;  %6386 = vst [vmem:[%s11333_s25 + $0x2a0] sm:$0xff] (%p8886_p4), %v6385_v2  ;;  %v6435_v60 = vld [vmem:[%s10204_s13 + $0x268] sm:$0xff] (%p8886_p4)  ;;  %v6437_v54 = vld [vmem:[%s10204_s13 + $0x270] sm:$0xff] (%p8886_p4) }
 0x38d   : > { %7235 = vst.msk [vmem:[%s10204_s13 + $0x3d8] sm:$0xff] %vm3688_vm14, %v8704_v47  ;;  %v5918_v52 = vadd.f32 %v8252_v42, %v8140_v55  ;;  %v8255_v26 = vadd.f32 %v8254_v4, %v8253_v16  ;;  %v6337_v55 = vld [vmem:[%s10204_s13 + $0xe0] sm:$0xff] (%p8886_p4)  ;;  %v6387_v47 = vld [vmem:[%s10204_s13 + $0x1a8] sm:$0xff] (%p8886_p4)  ;;  %v6389_v42 = vld [vmem:[%s10204_s13 + $0x1b0] sm:$0xff] (%p8886_p4) }
 0x38e   : > { %6338 = vst [vmem:[%s11333_s25 + $0xe0] sm:$0xff] (%p8886_p4), %v6337_v55  ;;  %6388 = vst [vmem:[%s11333_s25 + $0x2a8] sm:$0xff] (%p8886_p4), %v6387_v47  ;;  %v6391_v16 = vld [vmem:[%s10204_s13 + $0x1b8] sm:$0xff] (%p8886_p4)  ;;  %v6393_v4 = vld [vmem:[%s10204_s13 + $0x1c0] sm:$0xff] (%p8886_p4) }
 0x38f   : > { %8709 = vtanh.f32 %v5918_v52  ;;  %v5921_v35 = vadd.f32 %v8255_v26, %v8143_v28  ;;  %v6351_v28 = vld [vmem:[%s10204_s13 + $0x118] sm:$0xff] (%p8886_p4)  ;;  %6390 = vst [vmem:[%s11333_s25 + $0x2b0] sm:$0xff] (%p8886_p4), %v6389_v42  ;;  %6392 = vst [vmem:[%s11333_s25 + $0x2b8] sm:$0xff] (%p8886_p4), %v6391_v16  ;;  %v6395_v52 = vld [vmem:[%s10204_s13 + $0x1c8] sm:$0xff] (%p8886_p4) }
 0x390   : > { %6352 = vst [vmem:[%s11333_s25 + $0x218] sm:$0xff] (%p8886_p4), %v6351_v28  ;;  %6394 = vst [vmem:[%s11333_s25 + $0x2c0] sm:$0xff] (%p8886_p4), %v6393_v4  ;;  %v6397_v26 = vld [vmem:[%s10204_s13 + $0x1d0] sm:$0xff] (%p8886_p4)  ;;  %v6439_v8 = vld [vmem:[%s10204_s13 + $0x278] sm:$0xff] (%p8886_p4) }
 0x391   : > { %v8706_v10 = vpop.eup %8705  ;;  %8711 = vtanh.f32 %v5921_v35  ;;  %v6399_v35 = vld [vmem:[%s10204_s13 + $0x1d8] sm:$0xff] (%p8886_p4)  ;;  %6396 = vst [vmem:[%s11333_s25 + $0x2c8] sm:$0xff] (%p8886_p4), %v6395_v52  ;;  %6398 = vst [vmem:[%s11333_s25 + $0x2d0] sm:$0xff] (%p8886_p4), %v6397_v26  ;;  %v6441_v43 = vld [vmem:[%s10204_s13 + $0x280] sm:$0xff] (%p8886_p4) }
 0x392   : > { %7236 = vst.msk [vmem:[%s10204_s13 + $0x3e0] sm:$0xff] %vm3688_vm14, %v8706_v10  ;;  %6400 = vst [vmem:[%s11333_s25 + $0x2d8] sm:$0xff] (%p8886_p4), %v6399_v35  ;;  %v6401_v10 = vld [vmem:[%s10204_s13 + $0x1e0] sm:$0xff] (%p8886_p4)  ;;  %v6443_v59 = vld [vmem:[%s10204_s13 + $0x288] sm:$0xff] (%p8886_p4) }
 0x393   : > { %v8708_v53 = vpop.eup %8707  ;;  %6402 = vst [vmem:[%s11333_s25 + $0x2e0] sm:$0xff] (%p8886_p4), %v6401_v10  ;;  %6416 = vst [vmem:[%s11333_s25 + $0x418] sm:$0xff] (%p8886_p4), %v6415_v33  ;;  %v6445_v45 = vld [vmem:[%s10204_s13 + $0x290] sm:$0xff] (%p8886_p4)  ;;  %v6447_v0 = vld [vmem:[%s10204_s13 + $0x298] sm:$0xff] (%p8886_p4) }
 0x394   : > { %7237 = vst.msk [vmem:[%s10204_s13 + $0x3e8] sm:$0xff] %vm3688_vm14, %v8708_v53  ;;  %v6403_v53 = vld [vmem:[%s10204_s13 + $0x1e8] sm:$0xff] (%p8886_p4)  ;;  %6418 = vst [vmem:[%s11333_s25 + $0x420] sm:$0xff] (%p8886_p4), %v6417_v50  ;;  %v6449_v44 = vld [vmem:[%s10204_s13 + $0x2a0] sm:$0xff] (%p8886_p4) }
 0x395   : > { %6404 = vst [vmem:[%s11333_s25 + $0x2e8] sm:$0xff] (%p8886_p4), %v6403_v53  ;;  %6420 = vst [vmem:[%s11333_s25 + $0x428] sm:$0xff] (%p8886_p4), %v6419_v14  ;;  %v6451_v17 = vld [vmem:[%s10204_s13 + $0x2a8] sm:$0xff] (%p8886_p4)  ;;  %v6453_v6 = vld [vmem:[%s10204_s13 + $0x2b0] sm:$0xff] (%p8886_p4) }
 0x396   : > { %5995 = sbr.rel (!%p8886_p4) target bundleno = 949 (0x3b5), region = 40  ;;  %6422 = vst [vmem:[%s11333_s25 + $0x430] sm:$0xff] (%p8886_p4), %v6421_v40  ;;  %6424 = vst [vmem:[%s11333_s25 + $0x438] sm:$0xff] (%p8886_p4), %v6423_v39  ;;  %v6455_v21 = vld [vmem:[%s10204_s13 + $0x2b8] sm:$0xff] (%p8886_p4)  ;;  %v6457_v18 = vld [vmem:[%s10204_s13 + $0x2c0] sm:$0xff] (%p8886_p4) }
 0x397   : > { %6426 = vst [vmem:[%s11333_s25 + $0x440] sm:$0xff] (%p8886_p4), %v6425_v19  ;;  %6428 = vst [vmem:[%s11333_s25 + $0x448] sm:$0xff] (%p8886_p4), %v6427_v23  ;;  %v6459_v41 = vld [vmem:[%s10204_s13 + $0x2c8] sm:$0xff] (%p8886_p4)  ;;  %v6461_v15 = vld [vmem:[%s10204_s13 + $0x2d0] sm:$0xff] (%p8886_p4) }
 0x398   : > { %6430 = vst [vmem:[%s11333_s25 + $0x450] sm:$0xff] (%p8886_p4), %v6429_v56  ;;  %6432 = vst [vmem:[%s11333_s25 + $0x458] sm:$0xff] (%p8886_p4), %v6431_v7  ;;  %v6463_v5 = vld [vmem:[%s10204_s13 + $0x2d8] sm:$0xff] (%p8886_p4)  ;;  %v6465_v55 = vld [vmem:[%s10204_s13 + $0x2e0] sm:$0xff] (%p8886_p4) }
 0x399   : > { %v8710_v58 = vpop.eup %8709  ;;  %6434 = vst [vmem:[%s11333_s25 + $0x460] sm:$0xff] (%p8886_p4), %v6433_v27  ;;  %6436 = vst [vmem:[%s11333_s25 + $0x468] sm:$0xff] (%p8886_p4), %v6435_v60  ;;  %v6467_v22 = vld [vmem:[%s10204_s13 + $0x2e8] sm:$0xff] (%p8886_p4)  ;;  %v6469_v46 = vld [vmem:[%s10204_s13 + $0x2f0] sm:$0xff] (%p8886_p4) }
 0x39a   : > { %7238 = vst.msk [vmem:[%s10204_s13 + $0x3f0] sm:$0xff] %vm3688_vm14, %v8710_v58  ;;  %v6405_v58 = vld [vmem:[%s10204_s13 + $0x1f0] sm:$0xff] (%p8886_p4)  ;;  %6438 = vst [vmem:[%s11333_s25 + $0x470] sm:$0xff] (%p8886_p4), %v6437_v54  ;;  %v6471_v12 = vld [vmem:[%s10204_s13 + $0x2f8] sm:$0xff] (%p8886_p4) }
 0x39b   : > { %v8712_v11 = vpop.eup %8711  ;;  %6406 = vst [vmem:[%s11333_s25 + $0x2f0] sm:$0xff] (%p8886_p4), %v6405_v58  ;;  %6440 = vst [vmem:[%s11333_s25 + $0x478] sm:$0xff] (%p8886_p4), %v6439_v8  ;;  %v6473_v9 = vld [vmem:[%s10204_s13 + $0x300] sm:$0xff] (%p8886_p4)  ;;  %v6475_v31 = vld [vmem:[%s10204_s13 + $0x308] sm:$0xff] (%p8886_p4) }
 0x39c   : > { %7239 = vst.msk [vmem:[%s10204_s13 + $0x3f8] sm:$0xff] %vm3688_vm14, %v8712_v11  ;;  %v6407_v11 = vld [vmem:[%s10204_s13 + $0x1f8] sm:$0xff] (%p8886_p4)  ;;  %6442 = vst [vmem:[%s11333_s25 + $0x480] sm:$0xff] (%p8886_p4), %v6441_v43  ;;  %v6477_v20 = vld [vmem:[%s10204_s13 + $0x310] sm:$0xff] (%p8886_p4) }
 0x39d   : > { %6408 = vst [vmem:[%s11333_s25 + $0x2f8] sm:$0xff] %v6407_v11  ;;  %6444 = vst [vmem:[%s11333_s25 + $0x488] sm:$0xff] %v6443_v59  ;;  %v6479_v28 = vld [vmem:[%s10204_s13 + $0x318] sm:$0xff]  ;;  %v6481_v36 = vld [vmem:[%s10204_s13 + $0x320] sm:$0xff] }
 0x39e   : > { %6446 = vst [vmem:[%s11333_s25 + $0x490] sm:$0xff] %v6445_v45  ;;  %6448 = vst [vmem:[%s11333_s25 + $0x498] sm:$0xff] %v6447_v0  ;;  %v6483_v1 = vld [vmem:[%s10204_s13 + $0x328] sm:$0xff]  ;;  %v6485_v3 = vld [vmem:[%s10204_s13 + $0x330] sm:$0xff] }
 0x39f   : > { %6450 = vst [vmem:[%s11333_s25 + $0x4a0] sm:$0xff] %v6449_v44  ;;  %6452 = vst [vmem:[%s11333_s25 + $0x4a8] sm:$0xff] %v6451_v17  ;;  %v6487_v57 = vld [vmem:[%s10204_s13 + $0x338] sm:$0xff]  ;;  %v6489_v62 = vld [vmem:[%s10204_s13 + $0x340] sm:$0xff] }
 0x3a0   : > { %6454 = vst [vmem:[%s11333_s25 + $0x4b0] sm:$0xff] %v6453_v6  ;;  %6456 = vst [vmem:[%s11333_s25 + $0x4b8] sm:$0xff] %v6455_v21  ;;  %v6491_v38 = vld [vmem:[%s10204_s13 + $0x348] sm:$0xff]  ;;  %v6493_v30 = vld [vmem:[%s10204_s13 + $0x350] sm:$0xff] }
 0x3a1   : > { %6458 = vst [vmem:[%s11333_s25 + $0x4c0] sm:$0xff] %v6457_v18  ;;  %6460 = vst [vmem:[%s11333_s25 + $0x4c8] sm:$0xff] %v6459_v41  ;;  %v6495_v34 = vld [vmem:[%s10204_s13 + $0x358] sm:$0xff]  ;;  %v6497_v37 = vld [vmem:[%s10204_s13 + $0x360] sm:$0xff] }
 0x3a2   : > { %6462 = vst [vmem:[%s11333_s25 + $0x4d0] sm:$0xff] %v6461_v15  ;;  %6464 = vst [vmem:[%s11333_s25 + $0x4d8] sm:$0xff] %v6463_v5  ;;  %v6499_v48 = vld [vmem:[%s10204_s13 + $0x368] sm:$0xff]  ;;  %v6501_v63 = vld [vmem:[%s10204_s13 + $0x370] sm:$0xff] }
 0x3a3   : > { %6466 = vst [vmem:[%s11333_s25 + $0x4e0] sm:$0xff] %v6465_v55  ;;  %6468 = vst [vmem:[%s11333_s25 + $0x4e8] sm:$0xff] %v6467_v22  ;;  %v6503_v32 = vld [vmem:[%s10204_s13 + $0x378] sm:$0xff]  ;;  %v6505_v51 = vld [vmem:[%s10204_s13 + $0x380] sm:$0xff] }
 0x3a4   : > { %6470 = vst [vmem:[%s11333_s25 + $0x4f0] sm:$0xff] %v6469_v46  ;;  %6472 = vst [vmem:[%s11333_s25 + $0x4f8] sm:$0xff] %v6471_v12  ;;  %v6507_v29 = vld [vmem:[%s10204_s13 + $0x388] sm:$0xff]  ;;  %v6509_v49 = vld [vmem:[%s10204_s13 + $0x390] sm:$0xff] }
 0x3a5   : > { %6474 = vst [vmem:[%s11333_s25 + $0x600] sm:$0xff] %v6473_v9  ;;  %6476 = vst [vmem:[%s11333_s25 + $0x608] sm:$0xff] %v6475_v31  ;;  %v6511_v13 = vld [vmem:[%s10204_s13 + $0x398] sm:$0xff]  ;;  %v6513_v2 = vld [vmem:[%s10204_s13 + $0x3a0] sm:$0xff] }
 0x3a6   : > { %6478 = vst [vmem:[%s11333_s25 + $0x610] sm:$0xff] %v6477_v20  ;;  %6480 = vst [vmem:[%s11333_s25 + $0x618] sm:$0xff] %v6479_v28  ;;  %v6515_v47 = vld [vmem:[%s10204_s13 + $0x3a8] sm:$0xff]  ;;  %v6517_v42 = vld [vmem:[%s10204_s13 + $0x3b0] sm:$0xff] }
 0x3a7   : > { %6482 = vst [vmem:[%s11333_s25 + $0x620] sm:$0xff] %v6481_v36  ;;  %6484 = vst [vmem:[%s11333_s25 + $0x628] sm:$0xff] %v6483_v1  ;;  %v6519_v16 = vld [vmem:[%s10204_s13 + $0x3b8] sm:$0xff]  ;;  %v6521_v4 = vld [vmem:[%s10204_s13 + $0x3c0] sm:$0xff] }
 0x3a8   : > { %6486 = vst [vmem:[%s11333_s25 + $0x630] sm:$0xff] %v6485_v3  ;;  %6488 = vst [vmem:[%s11333_s25 + $0x638] sm:$0xff] %v6487_v57  ;;  %v6523_v52 = vld [vmem:[%s10204_s13 + $0x3c8] sm:$0xff]  ;;  %v6525_v26 = vld [vmem:[%s10204_s13 + $0x3d0] sm:$0xff] }
 0x3a9   : > { %6490 = vst [vmem:[%s11333_s25 + $0x640] sm:$0xff] %v6489_v62  ;;  %6492 = vst [vmem:[%s11333_s25 + $0x648] sm:$0xff] %v6491_v38  ;;  %v6527_v35 = vld [vmem:[%s10204_s13 + $0x3d8] sm:$0xff]  ;;  %v6529_v10 = vld [vmem:[%s10204_s13 + $0x3e0] sm:$0xff] }
 0x3aa   : > { %6494 = vst [vmem:[%s11333_s25 + $0x650] sm:$0xff] %v6493_v30  ;;  %6496 = vst [vmem:[%s11333_s25 + $0x658] sm:$0xff] %v6495_v34  ;;  %v6531_v53 = vld [vmem:[%s10204_s13 + $0x3e8] sm:$0xff]  ;;  %v6533_v58 = vld [vmem:[%s10204_s13 + $0x3f0] sm:$0xff] }
 0x3ab   : > { %6498 = vst [vmem:[%s11333_s25 + $0x660] sm:$0xff] %v6497_v37  ;;  %6500 = vst [vmem:[%s11333_s25 + $0x668] sm:$0xff] %v6499_v48  ;;  %v6535_v11 = vld [vmem:[%s10204_s13 + $0x3f8] sm:$0xff] }
 0x3ac   : > { %6502 = vst [vmem:[%s11333_s25 + $0x670] sm:$0xff] %v6501_v63  ;;  %6504 = vst [vmem:[%s11333_s25 + $0x678] sm:$0xff] %v6503_v32 }
 0x3ad   : > { %6506 = vst [vmem:[%s11333_s25 + $0x680] sm:$0xff] %v6505_v51  ;;  %6508 = vst [vmem:[%s11333_s25 + $0x688] sm:$0xff] %v6507_v29 }
 0x3ae   : > { %6510 = vst [vmem:[%s11333_s25 + $0x690] sm:$0xff] %v6509_v49  ;;  %6512 = vst [vmem:[%s11333_s25 + $0x698] sm:$0xff] %v6511_v13 }
 0x3af   : > { %6514 = vst [vmem:[%s11333_s25 + $0x6a0] sm:$0xff] %v6513_v2  ;;  %6516 = vst [vmem:[%s11333_s25 + $0x6a8] sm:$0xff] %v6515_v47 }
 0x3b0   : > { %6518 = vst [vmem:[%s11333_s25 + $0x6b0] sm:$0xff] %v6517_v42  ;;  %6520 = vst [vmem:[%s11333_s25 + $0x6b8] sm:$0xff] %v6519_v16 }
 0x3b1   : > { %6522 = vst [vmem:[%s11333_s25 + $0x6c0] sm:$0xff] %v6521_v4  ;;  %6524 = vst [vmem:[%s11333_s25 + $0x6c8] sm:$0xff] %v6523_v52 }
 0x3b2   : > { %6526 = vst [vmem:[%s11333_s25 + $0x6d0] sm:$0xff] %v6525_v26  ;;  %6528 = vst [vmem:[%s11333_s25 + $0x6d8] sm:$0xff] %v6527_v35 }
 0x3b3   : > { %6530 = vst [vmem:[%s11333_s25 + $0x6e0] sm:$0xff] %v6529_v10  ;;  %6532 = vst [vmem:[%s11333_s25 + $0x6e8] sm:$0xff] %v6531_v53 }
 0x3b4   : > { %6534 = vst [vmem:[%s11333_s25 + $0x6f0] sm:$0xff] %v6533_v58  ;;  %6536 = vst [vmem:[%s11333_s25 + $0x6f8] sm:$0xff] %v6535_v11 }
 0x3b5 PF: > { %p11_p8 = scmp.ge.s32.totalorder %s8876_s19, 4   ;;  %s11801_s15 = smov %s8829_s16 }
 0x3b6   : > { %s11802_s16 = smov %s8884_s22  ;;  %s11803_s17 = smov %s8876_s19 }
 0x3b7   :  { %13 = sbr.rel (!%p11_p8) target bundleno = 2 (0x2), region = 112 }

</bundles_post_ra>
